<compile_context>
chip_gen: v5e
topology: v5e:2x2
jax: 0.10.0
libtpu: 0.0.40
codegen_flags: <defaults>
</compile_context>

<pallas_src>
import functools

import jax
import jax.numpy as jnp
import numpy as np
from jax import lax
from jax.experimental import pallas as pl
from jax.experimental.pallas import tpu as pltpu

N_RES_LAYERS = 3
LN_EPS = 1e-5
_LANES = 128


def _round_up(x, m):
    return (x + m - 1) // m * m


def _mxu_depth():
    """MXU contraction depth: 256 on v6e/v7x-class chips, 128 on v5e and older."""
    try:
        kind = jax.devices()[0].device_kind.lower()
    except Exception:
        return _LANES
    if any(tag in kind for tag in ("v2", "v3", "v4", "v5")):
        return _LANES
    return 256


def _choose_tm(m, tile_rows, unit):
    """Row tile (multiple of `unit`): ~tile_rows, >=2 grid steps when the problem
    allows (v7x megacore), and preferring an exact divisor of m (no pad copy)."""
    if m <= unit:
        return unit
    target = max(unit, min(_round_up(tile_rows, unit), _round_up((m + 1) // 2, unit)))
    if m % unit == 0:
        m_units = m // unit
        cap = target // unit
        for k in range(cap, 0, -1):
            if m_units % k == 0:
                if 4 * k * unit >= target:   # accept unless absurdly small
                    return k * unit
                break
    return target                            # fallback: pad to a multiple of target


def _resstack_kernel(x_ref, wc_ref, gover_ref, p_ref, o_ref, *, n_layers, precision):
    f32 = jnp.float32

    x = x_ref[...].astype(f32)              # (TMp, DD)  lane-dense packed rows
    w_c = wc_ref[...]                       # (DD, DD)   centered block-diag weight, f32
    g_over = gover_ref[...]                 # (DD, DD)   per-group mean matrix (1/D)
    b_c = p_ref[0:1, :]                     # (1, DD)    centered bias, tiled per group
    gamma = p_ref[1:2, :]                   # (1, DD)
    beta = p_ref[2:3, :]                    # (1, DD)
    # NOTE: the (1, DD) broadcasts stay implicit inside the loop body on purpose; a
    # hoisted (TMp, DD) broadcast would stay live across the 3 unrolled layers and spill.

    def body(_, x):
        # Centered Linear output in one MXU pass: d = (x @ W^T + b) - mean(...)
        d = jnp.dot(x, w_c, preferred_element_type=f32, precision=precision) + b_c
        # Biased per-group variance via a second (group-mean) matmul; stays lane-dense.
        var = jnp.dot(d * d, g_over, preferred_element_type=f32, precision=precision)
        yn = d * lax.rsqrt(var + LN_EPS) * gamma + beta     # rsqrt -> EUP (free slot)
        return x + jnp.maximum(yn, 0.0)                     # ReLU + residual add

    x = lax.fori_loop(0, n_layers, body, x, unroll=True)
    o_ref[...] = x.astype(o_ref.dtype)


def _pack_params(w, b, gamma, beta, pack):
    """Lane-dense, mean-folded parameters (built once, outside the kernel)."""
    f32 = jnp.float32
    d = w.shape[0]
    wt = w.T.astype(f32)                                    # y = x @ wt + b
    wt_c = wt - jnp.mean(wt, axis=1, keepdims=True)         # fold LN mean subtraction
    eye = jnp.eye(pack, dtype=f32)
    w_c = jnp.kron(eye, wt_c)                               # (dd, dd) block-diagonal
    g_over = jnp.kron(eye, jnp.full((d, d), 1.0 / d, f32))  # per-group mean matrix
    bf = b.astype(f32)
    params = jnp.stack([
        jnp.tile(bf - jnp.mean(bf), pack),                  # centered bias
        jnp.tile(gamma.astype(f32), pack),
        jnp.tile(beta.astype(f32), pack),
    ])                                                      # (3, dd) -> single DMA block
    return w_c, g_over, params


def residual_stack(x, w, b, gamma, beta, *, n_res_layers=N_RES_LAYERS,
                   tile_rows=8192, precision=None):
    """x: (B, S, D). Applies the shared-weight residual block n_res_layers times."""
    B, S, D = x.shape
    assert w.shape == (D, D)

    # Lane packing: place PACK rows of width D side by side so the last dim fills the
    # 128 lanes AND the full MXU contraction depth (256 on v6e/v7x, 128 on v5e).
    mxu_k = _mxu_depth()
    if D < mxu_k and mxu_k % D == 0:
        pack = mxu_k // D
    elif D < _LANES and _LANES % D == 0:
        pack = _LANES // D
    else:
        pack = 1   # D >= 128: lane-dense iff D % 128 == 0, else masked partial stores.
    dd = D * pack

    M = B * S
    unit = pack * 8                      # sublane alignment of the packed block
    tm = _choose_tm(M, tile_rows, unit)
    m_pad = _round_up(M, tm)

    x2 = x.reshape(M, D)
    if m_pad != M:
        # Fallback only; _choose_tm prefers a tile dividing M so no HBM pad copy occurs.
        x2 = jnp.pad(x2, ((0, m_pad - M), (0, 0)))
    xd = x2.reshape(m_pad // pack, dd)   # lane-dense view (layout-free reshape)

    w_c, g_over, params = _pack_params(w, b, gamma, beta, pack)

    tmp = tm // pack                     # packed rows per tile
    grid = (m_pad // tm,)

    def _call(prec):
        kernel = functools.partial(_resstack_kernel, n_layers=n_res_layers,
                                   precision=prec)
        return pl.pallas_call(
            kernel,
            out_shape=jax.ShapeDtypeStruct((m_pad // pack, dd), x.dtype),
            grid_spec=pltpu.PrefetchScalarGridSpec(
                num_scalar_prefetch=0,
                grid=grid,
                in_specs=[
                    pl.BlockSpec((tmp, dd), lambda i: (i, 0)),   # x rows (lane-dense)
                    pl.BlockSpec((dd, dd), lambda i: (0, 0)),    # centered weight
                    pl.BlockSpec((dd, dd), lambda i: (0, 0)),    # group-mean matrix
                    pl.BlockSpec((3, dd), lambda i: (0, 0)),     # b_c / gamma / beta
                ],
                out_specs=pl.BlockSpec((tmp, dd), lambda i: (i, 0)),
            ),
            compiler_params=pltpu.CompilerParams(
                dimension_semantics=("parallel",),
                vmem_limit_bytes=32 * 1024 * 1024),
        )(xd, w_c, g_over, params)

    if precision is not None:
        out = _call(precision)
    else:
        try:
            out = _call(lax.Precision.HIGH)      # bf16_3x: ~2x MXU vs HIGHEST
        except Exception:
            out = _call(lax.Precision.HIGHEST)   # fallback if HIGH can't lower

    out = out.reshape(m_pad, D)[:M]
    return out.reshape(B, S, D)


def _reference(x, w, b, gamma, beta, n_res_layers=N_RES_LAYERS):
    # Exact (float64, host) reference of the PyTorch forward pass.
    xf = np.asarray(x, np.float64)
    w64 = np.asarray(w, np.float64)
    b64 = np.asarray(b, np.float64)
    g64 = np.asarray(gamma, np.float64)
    be64 = np.asarray(beta, np.float64)
    for _ in range(n_res_layers):
        y = xf @ w64.T + b64
        mean = y.mean(axis=-1, keepdims=True)
        var = ((y - mean) ** 2).mean(axis=-1, keepdims=True)
        yn = (y - mean) / np.sqrt(var + LN_EPS) * g64 + be64
        xf = xf + np.maximum(yn, 0.0)
    return xf


if __name__ == "__main__":
    # Small shapes consistent with the module: batch=2, seq=8, hidden(in_dim)=32.
    B, S, D = 2, 8, 32
    key = jax.random.PRNGKey(0)
    kx, kw, kb, kg, kbe = jax.random.split(key, 5)

    x = jax.random.normal(kx, (B, S, D), dtype=jnp.float32)

    # nn.Linear default init bounds; LayerNorm affine params perturbed from the
    # (ones, zeros) defaults so the gamma/beta path is actually exercised.
    bound = 1.0 / np.sqrt(D)
    w = jax.random.uniform(kw, (D, D), jnp.float32, -bound, bound)   # (out, in)
    b = jax.random.uniform(kb, (D,), jnp.float32, -bound, bound)
    gamma = 1.0 + 0.1 * jax.random.normal(kg, (D,), dtype=jnp.float32)
    beta = 0.1 * jax.random.normal(kbe, (D,), dtype=jnp.float32)

    out = residual_stack(x, w, b, gamma, beta)
    out = jax.block_until_ready(out)

    ref = _reference(x, w, b, gamma, beta)
    np.testing.assert_allclose(np.asarray(out, np.float64), ref, atol=1e-4, rtol=1e-4)
    print("KERNEL_OK")
</pallas_src>

<mosaic_0001>
module attributes {stable_mosaic.version = 11 : i64} {
  func.func @_resstack_kernel(%arg0: i32, %arg1: memref<8x256xf32, #tpu.memory_space<vmem>>, %arg2: memref<256x256xf32, #tpu.memory_space<vmem>>, %arg3: memref<256x256xf32, #tpu.memory_space<vmem>>, %arg4: memref<3x256xf32, #tpu.memory_space<vmem>>, %arg5: memref<8x256xf32, #tpu.memory_space<vmem>>) attributes {dimension_semantics = [#tpu.dimension_semantics<parallel>], iteration_bounds = array<i64: 1>, scalar_prefetch = 0 : i64, scratch_operands = 0 : i64, tpu.core_type = #tpu.core_type<tc>, window_params = [{transform_indices = @transform_0, window_bounds = array<i64: 8, 256>}, {pipeline_mode = #tpu.pipeline_mode<synchronous>, transform_indices = @transform_1, window_bounds = array<i64: 256, 256>}, {pipeline_mode = #tpu.pipeline_mode<synchronous>, transform_indices = @transform_2, window_bounds = array<i64: 256, 256>}, {pipeline_mode = #tpu.pipeline_mode<synchronous>, transform_indices = @transform_3, window_bounds = array<i64: 3, 256>}, {transform_indices = @transform_4, window_bounds = array<i64: 8, 256>}]} {
    %c0 = arith.constant 0 : index
    %c0_0 = arith.constant 0 : index
    %0 = vector.load %arg1[%c0, %c0_0] : memref<8x256xf32, #tpu.memory_space<vmem>>, vector<8x256xf32>
    %c0_1 = arith.constant 0 : index
    %c0_2 = arith.constant 0 : index
    %1 = vector.load %arg2[%c0_1, %c0_2] : memref<256x256xf32, #tpu.memory_space<vmem>>, vector<256x256xf32>
    %c0_3 = arith.constant 0 : index
    %c0_4 = arith.constant 0 : index
    %2 = vector.load %arg3[%c0_3, %c0_4] : memref<256x256xf32, #tpu.memory_space<vmem>>, vector<256x256xf32>
    %c0_5 = arith.constant 0 : index
    %c0_6 = arith.constant 0 : index
    %3 = vector.load %arg4[%c0_5, %c0_6] : memref<3x256xf32, #tpu.memory_space<vmem>>, vector<1x256xf32>
    %c1 = arith.constant 1 : index
    %c0_7 = arith.constant 0 : index
    %4 = vector.load %arg4[%c1, %c0_7] : memref<3x256xf32, #tpu.memory_space<vmem>>, vector<1x256xf32>
    %c2 = arith.constant 2 : index
    %c0_8 = arith.constant 0 : index
    %5 = vector.load %arg4[%c2, %c0_8] : memref<3x256xf32, #tpu.memory_space<vmem>>, vector<1x256xf32>
    %c0_i32 = arith.constant 0 : i32
    %cst = arith.constant dense<0.000000e+00> : vector<8x256xf32>
    %6 = tpu.matmul %0, %1, %cst {dimension_numbers = #tpu.dot_dimension_numbers<[1], [0], [0], [1], [0, 0, 1, 1], [], []>, precision = #tpu.contract_precision<fp32>} : vector<8x256xf32>, vector<256x256xf32>, vector<8x256xf32> -> vector<8x256xf32>
    %7 = vector.broadcast %3 : vector<1x256xf32> to vector<8x256xf32>
    %8 = arith.addf %6, %7 : vector<8x256xf32>
    %9 = arith.mulf %8, %8 : vector<8x256xf32>
    %cst_9 = arith.constant dense<0.000000e+00> : vector<8x256xf32>
    %10 = tpu.matmul %9, %2, %cst_9 {dimension_numbers = #tpu.dot_dimension_numbers<[1], [0], [0], [1], [0, 0, 1, 1], [], []>, precision = #tpu.contract_precision<fp32>} : vector<8x256xf32>, vector<256x256xf32>, vector<8x256xf32> -> vector<8x256xf32>
    %cst_10 = arith.constant 9.99999974E-6 : f32
    %11 = vector.broadcast %cst_10 : f32 to vector<8x256xf32>
    %12 = arith.addf %10, %11 : vector<8x256xf32>
    %13 = math.rsqrt %12 : vector<8x256xf32>
    %14 = arith.mulf %8, %13 : vector<8x256xf32>
    %15 = vector.broadcast %4 : vector<1x256xf32> to vector<8x256xf32>
    %16 = arith.mulf %14, %15 : vector<8x256xf32>
    %17 = vector.broadcast %5 : vector<1x256xf32> to vector<8x256xf32>
    %18 = arith.addf %16, %17 : vector<8x256xf32>
    %cst_11 = arith.constant 0.000000e+00 : f32
    %19 = vector.broadcast %cst_11 : f32 to vector<8x256xf32>
    %20 = arith.maximumf %18, %19 : vector<8x256xf32>
    %21 = arith.addf %0, %20 : vector<8x256xf32>
    %c1_i32 = arith.constant 1 : i32
    %cst_12 = arith.constant dense<0.000000e+00> : vector<8x256xf32>
    %22 = tpu.matmul %21, %1, %cst_12 {dimension_numbers = #tpu.dot_dimension_numbers<[1], [0], [0], [1], [0, 0, 1, 1], [], []>, precision = #tpu.contract_precision<fp32>} : vector<8x256xf32>, vector<256x256xf32>, vector<8x256xf32> -> vector<8x256xf32>
    %23 = vector.broadcast %3 : vector<1x256xf32> to vector<8x256xf32>
    %24 = arith.addf %22, %23 : vector<8x256xf32>
    %25 = arith.mulf %24, %24 : vector<8x256xf32>
    %cst_13 = arith.constant dense<0.000000e+00> : vector<8x256xf32>
    %26 = tpu.matmul %25, %2, %cst_13 {dimension_numbers = #tpu.dot_dimension_numbers<[1], [0], [0], [1], [0, 0, 1, 1], [], []>, precision = #tpu.contract_precision<fp32>} : vector<8x256xf32>, vector<256x256xf32>, vector<8x256xf32> -> vector<8x256xf32>
    %cst_14 = arith.constant 9.99999974E-6 : f32
    %27 = vector.broadcast %cst_14 : f32 to vector<8x256xf32>
    %28 = arith.addf %26, %27 : vector<8x256xf32>
    %29 = math.rsqrt %28 : vector<8x256xf32>
    %30 = arith.mulf %24, %29 : vector<8x256xf32>
    %31 = vector.broadcast %4 : vector<1x256xf32> to vector<8x256xf32>
    %32 = arith.mulf %30, %31 : vector<8x256xf32>
    %33 = vector.broadcast %5 : vector<1x256xf32> to vector<8x256xf32>
    %34 = arith.addf %32, %33 : vector<8x256xf32>
    %cst_15 = arith.constant 0.000000e+00 : f32
    %35 = vector.broadcast %cst_15 : f32 to vector<8x256xf32>
    %36 = arith.maximumf %34, %35 : vector<8x256xf32>
    %37 = arith.addf %21, %36 : vector<8x256xf32>
    %c2_i32 = arith.constant 2 : i32
    %cst_16 = arith.constant dense<0.000000e+00> : vector<8x256xf32>
    %38 = tpu.matmul %37, %1, %cst_16 {dimension_numbers = #tpu.dot_dimension_numbers<[1], [0], [0], [1], [0, 0, 1, 1], [], []>, precision = #tpu.contract_precision<fp32>} : vector<8x256xf32>, vector<256x256xf32>, vector<8x256xf32> -> vector<8x256xf32>
    %39 = vector.broadcast %3 : vector<1x256xf32> to vector<8x256xf32>
    %40 = arith.addf %38, %39 : vector<8x256xf32>
    %41 = arith.mulf %40, %40 : vector<8x256xf32>
    %cst_17 = arith.constant dense<0.000000e+00> : vector<8x256xf32>
    %42 = tpu.matmul %41, %2, %cst_17 {dimension_numbers = #tpu.dot_dimension_numbers<[1], [0], [0], [1], [0, 0, 1, 1], [], []>, precision = #tpu.contract_precision<fp32>} : vector<8x256xf32>, vector<256x256xf32>, vector<8x256xf32> -> vector<8x256xf32>
    %cst_18 = arith.constant 9.99999974E-6 : f32
    %43 = vector.broadcast %cst_18 : f32 to vector<8x256xf32>
    %44 = arith.addf %42, %43 : vector<8x256xf32>
    %45 = math.rsqrt %44 : vector<8x256xf32>
    %46 = arith.mulf %40, %45 : vector<8x256xf32>
    %47 = vector.broadcast %4 : vector<1x256xf32> to vector<8x256xf32>
    %48 = arith.mulf %46, %47 : vector<8x256xf32>
    %49 = vector.broadcast %5 : vector<1x256xf32> to vector<8x256xf32>
    %50 = arith.addf %48, %49 : vector<8x256xf32>
    %cst_19 = arith.constant 0.000000e+00 : f32
    %51 = vector.broadcast %cst_19 : f32 to vector<8x256xf32>
    %52 = arith.maximumf %50, %51 : vector<8x256xf32>
    %53 = arith.addf %37, %52 : vector<8x256xf32>
    %c0_20 = arith.constant 0 : index
    %c0_21 = arith.constant 0 : index
    %54 = vector.load %arg5[%c0_20, %c0_21] : memref<8x256xf32, #tpu.memory_space<vmem>>, vector<8x256xf32>
    tpu.vector_store %arg5[%c0_20, %c0_21], %53 {strides = array<i32>} : memref<8x256xf32, #tpu.memory_space<vmem>>, vector<8x256xf32>,
    return
  }
  func.func @transform_0(%arg0: i32) -> (i32, i32) {
    %c0_i32 = arith.constant 0 : i32
    %c0_i32_0 = arith.constant 0 : i32
    return %arg0, %c0_i32 : i32, i32
  }
  func.func @transform_1(%arg0: i32) -> (i32, i32) {
    %c0_i32 = arith.constant 0 : i32
    %c0_i32_0 = arith.constant 0 : i32
    %c0_i32_1 = arith.constant 0 : i32
    return %c0_i32, %c0_i32_0 : i32, i32
  }
  func.func @transform_2(%arg0: i32) -> (i32, i32) {
    %c0_i32 = arith.constant 0 : i32
    %c0_i32_0 = arith.constant 0 : i32
    %c0_i32_1 = arith.constant 0 : i32
    return %c0_i32, %c0_i32_0 : i32, i32
  }
  func.func @transform_3(%arg0: i32) -> (i32, i32) {
    %c0_i32 = arith.constant 0 : i32
    %c0_i32_0 = arith.constant 0 : i32
    %c0_i32_1 = arith.constant 0 : i32
    return %c0_i32, %c0_i32_0 : i32, i32
  }
  func.func @transform_4(%arg0: i32) -> (i32, i32) {
    %c0_i32 = arith.constant 0 : i32
    %c0_i32_0 = arith.constant 0 : i32
    return %arg0, %c0_i32 : i32, i32
  }
}

</mosaic_0001>

<bundles_post_ra>
// kernel: tpu_custom_call.1
= control target key start
LH: loop header
LB: loop body
LE: loop exit
PB: predicated region body
PF: predicated region fallthrough
CT: control target
= control target key end

     0   :  { %9 = vsyncpa [#allocation3], 0  ;;  %s12944_s0 = inlined_call_operand.hbm [shape: f32[8,256], index: 0, kind: input, shape index: {}]   ;;  %s12945_s1 = inlined_call_operand.hbm [shape: f32[256,256], index: 1, kind: input, shape index: {}]   ;;  %s12946_s2 = inlined_call_operand.hbm [shape: f32[256,256], index: 2, kind: input, shape index: {}]   ;;  %s12947_s3 = inlined_call_operand.hbm [shape: f32[3,256], index: 3, kind: input, shape index: {}]   ;;  %s12948_s4 = inlined_call_operand.hbm [shape: f32[8,256], index: 4, kind: output, shape index: {}]  }
   0x1   :  { %10 = vsyncpa [#allocation6], 0 }
   0x2   :  { %11 = vsyncpa [#allocation9], 0  ;;  %s28_s17 = sshll.u32 %s12945_s1, 4  ;;  %s29_s17 = int_to_ptr.hbm [resolvable:$true] %s28_s17 }
   0x3   :  { %12 = vsyncpa [#allocation4], 0  ;;  %s8677_s18 = smov [#allocation5]   ;;  %s18_s22 = sshll.u32 %s12944_s0, 4  ;;  %s19_s22 = int_to_ptr.hbm [resolvable:$true] %s18_s22 }
   0x4   :  { %s30_s19 = sshll.u32 %s8677_s18, 4  ;;  %s8678_s23 = smov 256   ;;  %s31_s19 = int_to_ptr.vmem [resolvable:$true] %s30_s19 }
   0x5   :  { %s8679_s24 = smov 16   ;;  %s8680_s25 = smov [#allocation2]  }
   0x6   :  { %36 = dma.hbm_to_vmem [thread:$0]  %s29_s17, 8192, %s31_s19, [#allocation6], %s8678_s23, %s8678_s23, %s8679_s24  }
   0x7   :  { %s20_s26 = sshll.u32 %s8680_s25, 4  ;;  %s41_s29 = sshll.u32 %s12946_s2, 4  ;;  %s21_s26 = int_to_ptr.vmem [resolvable:$true] %s20_s26  ;;  %s42_s29 = int_to_ptr.hbm [resolvable:$true] %s41_s29 }
   0x8   :  { %23 = dma.hbm_to_vmem [thread:$0]  %s19_s22, 256, %s21_s26, [#allocation3]  }
   0x9   :  { %s55_s5 = sshll.u32 %s12947_s3, 4  ;;  %s8681_s6 = smov [#allocation7]   ;;  %s56_s5 = int_to_ptr.hbm [resolvable:$true] %s55_s5 }
   0xa   :  { %s43_s7 = sshll.u32 %s8681_s6, 4  ;;  %s8682_s0 = smov [#allocation8]   ;;  %s44_s7 = int_to_ptr.vmem [resolvable:$true] %s43_s7 }
   0xb   :  { %49 = dma.hbm_to_vmem [thread:$0]  %s42_s29, 8192, %s44_s7, [#allocation6], %s8678_s23, %s8678_s23, %s8679_s24  }
   0xc   :  { %s57_s8 = sshll.u32 %s8682_s0, 4  ;;  %s58_s8 = int_to_ptr.vmem [resolvable:$true] %s57_s8 }
   0xd   :  { %60 = dma.hbm_to_vmem [thread:$0]  %s56_s5, 128, %s58_s8, [#allocation9]  }
   0xe   :  { %8669 = dma.done.wait [#allocation3], 256  }
   0xf   :  { %8670 = vsyncadd [#allocation3], 4294967040 }
  0x10   :  { %8671 = dma.done.wait [#allocation6], 16384  }
  0x11   :  { %8672 = vsyncadd [#allocation6], 4294950912 }
  0x12   :  { %8673 = dma.done.wait [#allocation9], 128  }
  0x13   :  { %8674 = vsyncadd [#allocation9], 4294967168  ;;  %v109_v0 = vld [vmem:[#allocation5 + $0xf0] sm:$0xff]  ;;  %v107_v1 = vld [vmem:[#allocation5 + $0xe0] sm:$0xff]  ;;  %s8683_s2 = smov [#allocation10]   ;;  %s8516_s11 = sshll.u32 %s12948_s4, 4  ;;  %s8517_s11 = int_to_ptr.hbm [resolvable:$true] %s8516_s11 }
  0x14   :  { %v105_v2 = vld [vmem:[#allocation5 + $0xd0] sm:$0xff]  ;;  %v8721_v3 = vand.u32 4294901760, %v109_v0  ;;  %v8723_v4 = vand.u32 4294901760, %v107_v1  ;;  %v103_v6 = vld [vmem:[#allocation5 + $0xc0] sm:$0xff]  ;;  %s8514_s3 = sshll.u32 %s8683_s2, 4  ;;  %s8515_s3 = int_to_ptr.vmem [resolvable:$true] %s8514_s3 }
  0x15   :  { %v8725_v5 = vand.u32 4294901760, %v105_v2  ;;  %v101_v7 = vld [vmem:[#allocation5 + $0xb0] sm:$0xff]  ;;  %v99_v8 = vld [vmem:[#allocation5 + $0xa0] sm:$0xff]  ;;  %v8727_v9 = vand.u32 4294901760, %v103_v6 }
  0x16   :  { %14061 = vst [vmem:[#allocation15_spill] sm:$0xff] %v8721_v3  ;;  %v8729_v10 = vand.u32 4294901760, %v101_v7  ;;  %v8731_v11 = vand.u32 4294901760, %v99_v8  ;;  %v97_v12 = vld [vmem:[#allocation5 + $0x90] sm:$0xff]  ;;  %v95_v13 = vld [vmem:[#allocation5 + $0x80] sm:$0xff]  ;;  %218 = vmatpush.msra.mxu0 %v8721_v3  ;;  %v8735_v14 = vsub.f32 %v109_v0, %v8721_v3  ;;  %v8738_v15 = vsub.f32 %v107_v1, %v8723_v4  ;;  %414 = vmatpush.msra.mxu3 %v8721_v3 }
  0x17   :  { %14062 = vst [vmem:[#allocation16_spill] sm:$0xff] %v8723_v4  ;;  %v8742_v16 = vsub.f32 %v105_v2, %v8725_v5  ;;  %v8744_v17 = vand.u32 4294901760, %v97_v12  ;;  %v8747_v18 = vsub.f32 %v103_v6, %v8727_v9  ;;  %v93_v21 = vld [vmem:[#allocation5 + $0x70] sm:$0xff]  ;;  %v8766_v25 = vand.u32 4294901760, %v95_v13  ;;  %v91_v26 = vld [vmem:[#allocation5 + $0x60] sm:$0xff] }
  0x18   :  { %14063 = vst [vmem:[#allocation17_spill] sm:$0xff] %v8725_v5  ;;  %v8750_v19 = vsub.f32 %v101_v7, %v8729_v10  ;;  %v8753_v20 = vsub.f32 %v99_v8, %v8731_v11  ;;  %220 = vmatpush.msra.mxu0 %v8723_v4  ;;  %361 = vmatpush.msra.mxu2 %v8735_v14  ;;  %v8758_v22 = vand.u32 4294901760, %v8735_v14  ;;  %v8761_v23 = vand.u32 4294901760, %v8738_v15  ;;  %v89_v36 = vld [vmem:[#allocation5 + $0x50] sm:$0xff]  ;;  %v87_v42 = vld [vmem:[#allocation5 + $0x40] sm:$0xff] }
  0x19   :  { %14064 = vst [vmem:[#allocation18_spill] sm:$0xff] %v8727_v9  ;;  %v8764_v24 = vand.u32 4294901760, %v8742_v16  ;;  %416 = vmatpush.msra.mxu3 %v8723_v4  ;;  %v8770_v27 = vand.u32 4294901760, %v8747_v18  ;;  %v8776_v29 = vsub.f32 %v97_v12, %v8744_v17  ;;  %v8786_v33 = vand.u32 4294901760, %v93_v21  ;;  %v85_v47 = vld [vmem:[#allocation5 + $0x30] sm:$0xff]  ;;  %v83_v54 = vld [vmem:[#allocation5 + $0x20] sm:$0xff] }
  0x1a   :  { %14065 = vst [vmem:[#allocation19_spill] sm:$0xff] %v8729_v10  ;;  %v8773_v28 = vand.u32 4294901760, %v8750_v19  ;;  %222 = vmatpush.msra.mxu0 %v8725_v5  ;;  %364 = vmatpush.msra.mxu2 %v8738_v15  ;;  %v261_v30 = vsub.f32 %v8735_v14, %v8758_v22  ;;  %v267_v31 = vsub.f32 %v8738_v15, %v8761_v23  ;;  %v8789_v34 = vand.u32 4294901760, %v91_v26  ;;  %v141_v59 = vld [vmem:[#allocation5 + $0x1f0] sm:$0xff]  ;;  %v79_v2 = vld [vmem:[#allocation5] sm:$0xff] }
  0x1b   :  { %14066 = vst [vmem:[#allocation20_spill] sm:$0xff] %v8731_v11  ;;  %v273_v32 = vsub.f32 %v8742_v16, %v8764_v24  ;;  %418 = vmatpush.msra.mxu3 %v8725_v5  ;;  %v8792_v35 = vand.u32 4294901760, %v8753_v20  ;;  %v279_v39 = vsub.f32 %v8747_v18, %v8770_v27  ;;  %v8803_v40 = vsub.f32 %v95_v13, %v8766_v25  ;;  %v81_v61 = vld [vmem:[#allocation5 + $0x10] sm:$0xff]  ;;  %v139_v6 = vld [vmem:[#allocation5 + $0x1e0] sm:$0xff] }
  0x1c   :  { %14067 = vst [vmem:[#allocation21_spill] sm:$0xff] %v8735_v14  ;;  %224 = vmatpush.msra.mxu0 %v8727_v9  ;;  %v8795_v37 = vand.u32 4294901760, %v261_v30  ;;  %367 = vmatpush.msra.mxu2 %v8742_v16  ;;  %v8798_v38 = vand.u32 4294901760, %v267_v31  ;;  %v285_v41 = vsub.f32 %v8750_v19, %v8773_v28  ;;  %v8812_v44 = vand.u32 4294901760, %v89_v36 }
  0x1d   :  { %14068 = vst [vmem:[#allocation22_spill] sm:$0xff] %v8738_v15  ;;  %420 = vmatpush.msra.mxu3 %v8727_v9  ;;  %v8810_v43 = vand.u32 4294901760, %v273_v32  ;;  %v8815_v45 = vand.u32 4294901760, %v8776_v29  ;;  %v8818_v46 = vsub.f32 %v93_v21, %v8786_v33  ;;  %v291_v48 = vsub.f32 %v8753_v20, %v8792_v35  ;;  %v137_v32 = vld [vmem:[#allocation5 + $0x1d0] sm:$0xff] }
  0x1e   :  { %14069 = vst [vmem:[#allocation23_spill] sm:$0xff] %v8742_v16  ;;  %226 = vmatpush.msra.mxu0 %v8729_v10  ;;  %263 = vmatpush.msra.mxu1 %v8795_v37  ;;  %v8826_v49 = vand.u32 4294901760, %v279_v39  ;;  %v8828_v50 = vand.u32 4294901760, %v87_v42  ;;  %v8831_v51 = vand.u32 4294901760, %v8803_v40  ;;  %v8834_v52 = vsub.f32 %v91_v26, %v8789_v34 }
  0x1f   :  { %14070 = vst [vmem:[#allocation24_spill] sm:$0xff] %v8744_v17  ;;  %370 = vmatpush.msra.mxu2 %v8747_v18  ;;  %422 = vmatpush.msra.mxu3 %v8729_v10  ;;  %v8838_v53 = vand.u32 4294901760, %v85_v47  ;;  %v8842_v55 = vand.u32 4294901760, %v285_v41  ;;  %v297_v56 = vsub.f32 %v8776_v29, %v8815_v45  ;;  %v8847_v57 = vand.u32 4294901760, %v8818_v46 }
  0x20   :  { %14071 = vst [vmem:[#allocation25_spill] sm:$0xff] %v8747_v18  ;;  %228 = vmatpush.msra.mxu0 %v8731_v11  ;;  %269 = vmatpush.msra.mxu1 %v8798_v38  ;;  %v8850_v58 = vsub.f32 %v89_v36, %v8812_v44  ;;  %v8853_v60 = vand.u32 4294901760, %v291_v48  ;;  %v303_v62 = vsub.f32 %v8803_v40, %v8831_v51  ;;  %v8860_v63 = vand.u32 4294901760, %v83_v54 }
  0x21   :  { %14072 = vst [vmem:[#allocation26_spill] sm:$0xff] %v8750_v19  ;;  %373 = vmatpush.msra.mxu2 %v8750_v19  ;;  %424 = vmatpush.msra.mxu3 %v8731_v11  ;;  %v8863_v0 = vand.u32 4294901760, %v8834_v52  ;;  %v8866_v1 = vsub.f32 %v87_v42, %v8828_v50  ;;  %v8871_v7 = vsub.f32 %v85_v47, %v8838_v53  ;;  %v8873_v8 = vand.u32 4294901760, %v141_v59 }
  0x22   :  { %14073 = vst [vmem:[#allocation27_spill] sm:$0xff] %v8753_v20  ;;  %230 = vmatpush.msra.mxu0 %v8744_v17  ;;  %275 = vmatpush.msra.mxu1 %v8810_v43  ;;  %v8877_v12 = vand.u32 4294901760, %v297_v56  ;;  %v309_v13 = vsub.f32 %v8818_v46, %v8847_v57  ;;  %v8881_v21 = vand.u32 4294901760, %v81_v61  ;;  %v8884_v26 = vand.u32 4294901760, %v8850_v58  ;;  %v135_v56 = vld [vmem:[#allocation5 + $0x1c0] sm:$0xff] }
  0x23   :  { %14074 = vst [vmem:[#allocation28_spill] sm:$0xff] %v8758_v22  ;;  %376 = vmatpush.msra.mxu2 %v8753_v20  ;;  %426 = vmatpush.msra.mxu3 %v8744_v17  ;;  %v8888_v30 = vand.u32 4294901760, %v79_v2  ;;  %v8890_v31 = vand.u32 4294901760, %v139_v6  ;;  %v8894_v36 = vand.u32 4294901760, %v303_v62  ;;  %v315_v39 = vsub.f32 %v8834_v52, %v8863_v0 }
  0x24   :  { %14075 = vst [vmem:[#allocation29_spill] sm:$0xff] %v8761_v23  ;;  %232 = vmatpush.msra.mxu0 %v8766_v25  ;;  %281 = vmatpush.msra.mxu1 %v8826_v49  ;;  %v8899_v41 = vand.u32 4294901760, %v8866_v1  ;;  %v8902_v42 = vsub.f32 %v83_v54, %v8860_v63  ;;  %v8907_v47 = vand.u32 4294901760, %v8871_v7  ;;  %v8910_v48 = vsub.f32 %v141_v59, %v8873_v8 }
  0x25   :  { %14076 = vst [vmem:[#allocation30_spill] sm:$0xff] %v8764_v24  ;;  %379 = vmatpush.msra.mxu2 %v8776_v29  ;;  %428 = vmatpush.msra.mxu3 %v8766_v25  ;;  %v8914_v62 = vand.u32 4294901760, %v309_v13  ;;  %v321_v54 = vsub.f32 %v8850_v58, %v8884_v26  ;;  %v8926_v59 = vsub.f32 %v79_v2, %v8888_v30  ;;  %v133_v13 = vld [vmem:[#allocation5 + $0x1b0] sm:$0xff]  ;;  %v8933_v20 = vand.u32 4294901760, %v315_v39  ;;  %v131_v39 = vld [vmem:[#allocation5 + $0x1a0] sm:$0xff] }
  0x26   :  { %14077 = vst [vmem:[#allocation31_spill] sm:$0xff] %v8766_v25  ;;  %234 = vmatpush.msra.mxu0 %v8786_v33  ;;  %287 = vmatpush.msra.mxu1 %v8842_v55  ;;  %v8940_v19 = vand.u32 4294901760, %v135_v56  ;;  %v333_v2 = vsub.f32 %v8871_v7, %v8907_v47  ;;  %v8959_v15 = vand.u32 4294901760, %v133_v13 }
  0x27   :  { %14078 = vst [vmem:[#allocation32_spill] sm:$0xff] %v8770_v27  ;;  %382 = vmatpush.msra.mxu2 %v8803_v40  ;;  %430 = vmatpush.msra.mxu3 %v8786_v33  ;;  %v8951_v18 = vand.u32 4294901760, %v321_v54  ;;  %v8964_v14 = vand.u32 4294901760, %v8926_v59  ;;  %v129_v54 = vld [vmem:[#allocation5 + $0x190] sm:$0xff] }
  0x28   :  { %14079 = vst [vmem:[#allocation33_spill] sm:$0xff] %v8773_v28  ;;  %236 = vmatpush.msra.mxu0 %v8789_v34  ;;  %293 = vmatpush.msra.mxu1 %v8853_v60 }
  0x29   :  { %14080 = vst [vmem:[#allocation34_spill] sm:$0xff] %v8776_v29  ;;  %385 = vmatpush.msra.mxu2 %v8818_v46  ;;  %432 = vmatpush.msra.mxu3 %v8789_v34  ;;  %v8929_v29 = vsub.f32 %v139_v6, %v8890_v31  ;;  %v8947_v6 = vand.u32 4294901760, %v8910_v48 }
  0x2a   :  { %14081 = vst [vmem:[#allocation35_spill] sm:$0xff] %v8786_v33  ;;  %238 = vmatpush.msra.mxu0 %v8812_v44  ;;  %299 = vmatpush.msra.mxu1 %v8877_v12 }
  0x2b   :  { %14082 = vst [vmem:[#allocation36_spill] sm:$0xff] %v8789_v34  ;;  %388 = vmatpush.msra.mxu2 %v8834_v52  ;;  %434 = vmatpush.msra.mxu3 %v8812_v44 }
  0x2c   :  { %14083 = vst [vmem:[#allocation37_spill] sm:$0xff] %v8792_v35  ;;  %240 = vmatpush.msra.mxu0 %v8828_v50  ;;  %305 = vmatpush.msra.mxu1 %v8894_v36 }
  0x2d   :  { %14084 = vst [vmem:[#allocation38_spill] sm:$0xff] %v8795_v37  ;;  %391 = vmatpush.msra.mxu2 %v8850_v58  ;;  %436 = vmatpush.msra.mxu3 %v8828_v50 }
  0x2e   :  { %14085 = vst [vmem:[#allocation39_spill] sm:$0xff] %v8798_v38  ;;  %242 = vmatpush.msra.mxu0 %v8838_v53  ;;  %311 = vmatpush.msra.mxu1 %v8914_v62 }
  0x2f   :  { %14086 = vst [vmem:[#allocation40_spill] sm:$0xff] %v8803_v40  ;;  %v8921_v40 = vand.u32 4294901760, %v137_v32  ;;  %394 = vmatpush.msra.mxu2 %v8866_v1  ;;  %438 = vmatpush.msra.mxu3 %v8838_v53 }
  0x30   :  { %14087 = vst [vmem:[#allocation41_spill] sm:$0xff] %v8810_v43  ;;  %244 = vmatpush.msra.mxu0 %v8860_v63  ;;  %317 = vmatpush.msra.mxu1 %v8933_v20 }
  0x31   :  { %14088 = vst [vmem:[#allocation42_spill] sm:$0xff] %v8812_v44  ;;  %397 = vmatpush.msra.mxu2 %v8871_v7  ;;  %440 = vmatpush.msra.mxu3 %v8860_v63 }
  0x32   :  { %14089 = vst [vmem:[#allocation43_spill] sm:$0xff] %v8815_v45  ;;  %246 = vmatpush.msra.mxu0 %v8881_v21  ;;  %323 = vmatpush.msra.mxu1 %v8951_v18 }
  0x33   :  { %14090 = vst [vmem:[#allocation44_spill] sm:$0xff] %v8818_v46  ;;  %v8919_v46 = vsub.f32 %v81_v61, %v8881_v21  ;;  %v327_v61 = vsub.f32 %v8866_v1, %v8899_v41  ;;  %400 = vmatpush.msra.mxu2 %v8902_v42  ;;  %442 = vmatpush.msra.mxu3 %v8881_v21 }
  0x34   :  { %14091 = vst [vmem:[#allocation45_spill] sm:$0xff] %v8826_v49  ;;  %v8994_v49 = vsub.f32 %v133_v13, %v8959_v15  ;;  %248 = vmatpush.msra.mxu0 %v8888_v30  ;;  %v351_v13 = vsub.f32 %v8926_v59, %v8964_v14 }
  0x35   :  { %14092 = vst [vmem:[#allocation46_spill] sm:$0xff] %v8828_v50  ;;  %v8954_v16 = vand.u32 4294901760, %v8919_v46  ;;  %403 = vmatpush.msra.mxu2 %v8919_v46  ;;  %444 = vmatpush.msra.mxu3 %v8888_v30 }
  0x36   :  { %14093 = vst [vmem:[#allocation47_spill] sm:$0xff] %v8831_v51  ;;  %455 = vmatpush.msrb.mxu0 %v8758_v22 }
  0x37   :  { %14094 = vst [vmem:[#allocation48_spill] sm:$0xff] %v8834_v52  ;;  %v8938_v52 = vand.u32 4294901760, %v8902_v42  ;;  %406 = vmatpush.msra.mxu2 %v8926_v59 }
  0x38   :  { %14095 = vst [vmem:[#allocation49_spill] sm:$0xff] %v8838_v53  ;;  %459 = vmatpush.msrb.mxu0 %v8761_v23 }
  0x39   :  { %14096 = vst [vmem:[#allocation50_spill] sm:$0xff] %v8842_v55  ;;  %v8981_v55 = vand.u32 4294901760, %v333_v2  ;;  %v8996_v2 = vand.u32 4294901760, %v129_v54  ;;  %559 = vmatpush.msrb.mxu2 %v8873_v8 }
  0x3a   :  { %14097 = vst [vmem:[#allocation51_spill] sm:$0xff] %v8847_v57  ;;  %463 = vmatpush.msrb.mxu0 %v8764_v24 }
  0x3b   :  { %14098 = vst [vmem:[#allocation52_spill] sm:$0xff] %v8850_v58  ;;  %v8957_v58 = vsub.f32 %v137_v32, %v8921_v40  ;;  %v339_v32 = vsub.f32 %v8902_v42, %v8938_v52  ;;  %v9032_v22 = vsub.f32 %v129_v54, %v8996_v2  ;;  %561 = vmatpush.msrb.mxu2 %v8890_v31 }
  0x3c   :  { %14099 = vst [vmem:[#allocation53_spill] sm:$0xff] %v8853_v60  ;;  %v127_v60 = vld [vmem:[#allocation5 + $0x180] sm:$0xff]  ;;  %467 = vmatpush.msrb.mxu0 %v8770_v27  ;;  %v77_v27 = vld [vmem:[#allocation2] sm:$0xff] }
  0x3d   :  { %14100 = vst [vmem:[#allocation54_spill] sm:$0xff] %v8860_v63  ;;  %v9006_v38 = vand.u32 4294901760, %v339_v32  ;;  %563 = vmatpush.msrb.mxu2 %v8921_v40 }
  0x3e   :  { %14101 = vst [vmem:[#allocation55_spill] sm:$0xff] %v8863_v0  ;;  %471 = vmatpush.msrb.mxu0 %v8773_v28 }
  0x3f   :  { %14102 = vst [vmem:[#allocation56_spill] sm:$0xff] %v8866_v1  ;;  %v8976_v1 = vsub.f32 %v135_v56, %v8940_v19  ;;  %v345_v56 = vsub.f32 %v8919_v46, %v8954_v16  ;;  %565 = vmatpush.msrb.mxu2 %v8940_v19 }
  0x40   :  { %14103 = vst [vmem:[#allocation57_spill] sm:$0xff] %v8871_v7  ;;  %v125_v7 = vld [vmem:[#allocation5 + $0x170] sm:$0xff]  ;;  %475 = vmatpush.msrb.mxu0 %v8792_v35 }
  0x41   :  { %14104 = vst [vmem:[#allocation58_spill] sm:$0xff] %v8873_v8  ;;  %v9011_v37 = vand.u32 4294901760, %v8976_v1  ;;  %v9023_v32 = vand.u32 4294901760, %v345_v56  ;;  %567 = vmatpush.msrb.mxu2 %v8959_v15 }
  0x42   :  { %14105 = vst [vmem:[#allocation59_spill] sm:$0xff] %v8877_v12  ;;  %v8978_v12 = vand.u32 4294901760, %v131_v39  ;;  %479 = vmatpush.msrb.mxu0 %v8815_v45 }
  0x43   :  { %14106 = vst [vmem:[#allocation60_spill] sm:$0xff] %v8881_v21  ;;  %v9020_v21 = vand.u32 4294901760, %v125_v7  ;;  %v620_v54 = vsub.f32 %v8976_v1, %v9011_v37 }
  0x44   :  { %14107 = vst [vmem:[#allocation61_spill] sm:$0xff] %v8884_v26  ;;  %569 = vmatpush.msrb.mxu2 %v8978_v12  ;;  %483 = vmatpush.msrb.mxu0 %v8831_v51 }
  0x45   :  { %14108 = vst [vmem:[#allocation62_spill] sm:$0xff] %v8888_v30 }
  0x46   :  { %14109 = vst [vmem:[#allocation63_spill] sm:$0xff] %v8890_v31  ;;  %571 = vmatpush.msrb.mxu2 %v8996_v2  ;;  %487 = vmatpush.msrb.mxu0 %v8847_v57 }
  0x47   :  { %14110 = vst [vmem:[#allocation64_spill] sm:$0xff] %v8894_v36  ;;  %v8967_v36 = vand.u32 4294901760, %v8929_v29 }
  0x48   :  { %14111 = vst [vmem:[#allocation65_spill] sm:$0xff] %v8899_v41  ;;  %491 = vmatpush.msrb.mxu0 %v8863_v0 }
  0x49   :  { %14112 = vst [vmem:[#allocation66_spill] sm:$0xff] %v8902_v42  ;;  %v608_v43 = vsub.f32 %v8929_v29, %v8967_v36  ;;  %v9014_v42 = vsub.f32 %v131_v39, %v8978_v12  ;;  %v9029_v39 = vand.u32 4294901760, %v8994_v49 }
  0x4a   :  { %14113 = vst [vmem:[#allocation67_spill] sm:$0xff] %v8907_v47  ;;  %495 = vmatpush.msrb.mxu0 %v8884_v26 }
  0x4b   :  { %14114 = vst [vmem:[#allocation68_spill] sm:$0xff] %v8910_v48 }
  0x4c   :  { %14115 = vst [vmem:[#allocation69_spill] sm:$0xff] %v8914_v62  ;;  %v8971_v62 = vand.u32 4294901760, %v327_v61  ;;  %v8991_v61 = vand.u32 4294901760, %v8957_v58  ;;  %499 = vmatpush.msrb.mxu0 %v8899_v41 }
  0x4d   :  { %14116 = vst [vmem:[#allocation70_spill] sm:$0xff] %v8919_v46  ;;  %v121_v46 = vld [vmem:[#allocation5 + $0x150] sm:$0xff] }
  0x4e   :  { %14117 = vst [vmem:[#allocation71_spill] sm:$0xff] %v8921_v40  ;;  %329 = vmatpush.msra.mxu1 %v8971_v62  ;;  %503 = vmatpush.msrb.mxu0 %v8907_v47 }
  0x4f   :  { %14118 = vst [vmem:[#allocation72_spill] sm:$0xff] %v8926_v59  ;;  %v626_v59 = vsub.f32 %v8994_v49, %v9029_v39 }
  0x50   :  { %14119 = vst [vmem:[#allocation73_spill] sm:$0xff] %v8929_v29  ;;  %335 = vmatpush.msra.mxu1 %v8981_v55  ;;  %507 = vmatpush.msrb.mxu0 %v8938_v52 }
  0x51   :  { %14120 = vst [vmem:[#allocation74_spill] sm:$0xff] %v8933_v20  ;;  %v602_v20 = vsub.f32 %v8910_v48, %v8947_v6 }
  0x52   :  { %14121 = vst [vmem:[#allocation75_spill] sm:$0xff] %v8938_v52  ;;  %341 = vmatpush.msra.mxu1 %v9006_v38  ;;  %511 = vmatpush.msrb.mxu0 %v8954_v16 }
  0x53   :  { %14122 = vst [vmem:[#allocation76_spill] sm:$0xff] %v8940_v19 }
  0x54   :  { %14123 = vst [vmem:[#allocation77_spill] sm:$0xff] %v8947_v6  ;;  %v614_v6 = vsub.f32 %v8957_v58, %v8991_v61  ;;  %347 = vmatpush.msra.mxu1 %v9023_v32  ;;  %515 = vmatpush.msrb.mxu0 %v8964_v14 }
  0x55   :  { %14124 = vst [vmem:[#allocation78_spill] sm:$0xff] %v8951_v18  ;;  %v9002_v18 = vand.u32 4294901760, %v127_v60 }
  0x56   :  { %14125 = vst [vmem:[#allocation79_spill] sm:$0xff] %v8954_v16  ;;  %v140_v16 = vld [vmem:[#allocation5 + $0x1e8] sm:$0xff] }
  0x57   :  { %14126 = vst [vmem:[#allocation80_spill] sm:$0xff] %v8957_v58  ;;  %v9039_v56 = vsub.f32 %v127_v60, %v9002_v18  ;;  %v119_v60 = vld [vmem:[#allocation5 + $0x140] sm:$0xff]  ;;  %573 = vmatpush.msrb.mxu2 %v9002_v18 }
  0x58   :  { %14127 = vst [vmem:[#allocation81_spill] sm:$0xff] %v8959_v15 }
  0x59   :  { %14128 = vst [vmem:[#allocation82_spill] sm:$0xff] %v8964_v14  ;;  %575 = vmatpush.msrb.mxu2 %v9020_v21 }
  0x5a   :  { %14129 = vst [vmem:[#allocation83_spill] sm:$0xff] %v8967_v36  ;;  %v9018_v36 = vand.u32 4294901760, %v602_v20  ;;  %v9036_v20 = vand.u32 4294901760, %v608_v43  ;;  %v9055_v43 = vsub.f32 %v125_v7, %v9020_v21  ;;  %v9071_v7 = vand.u32 4294901760, %v9039_v56 }
  0x5b   :  { %14130 = vst [vmem:[#allocation84_spill] sm:$0xff] %v8971_v62  ;;  %v123_v62 = vld [vmem:[#allocation5 + $0x160] sm:$0xff] }
  0x5c   :  { %14131 = vst [vmem:[#allocation85_spill] sm:$0xff] %v8976_v1  ;;  %v9050_v23 = vand.u32 4294901760, %v123_v62  ;;  %604 = vmatpush.msrb.mxu3 %v9018_v36  ;;  %v644_v28 = vsub.f32 %v9039_v56, %v9071_v7 }
  0x5d   :  { %14132 = vst [vmem:[#allocation86_spill] sm:$0xff] %v8978_v12 }
  0x5e   :  { %14133 = vst [vmem:[#allocation87_spill] sm:$0xff] %v8981_v55  ;;  %v9043_v55 = vand.u32 4294901760, %v351_v13  ;;  %v9059_v13 = vand.u32 4294901760, %v614_v6  ;;  %610 = vmatpush.msrb.mxu3 %v9036_v20  ;;  %v9075_v6 = vand.u32 4294901760, %v620_v54  ;;  %v9091_v54 = vand.u32 4294901760, %v626_v59  ;;  %577 = vmatpush.msrb.mxu2 %v9050_v23 }
  0x5f   :  { %14134 = vst [vmem:[#allocation88_spill] sm:$0xff] %v8991_v61  ;;  %v9048_v61 = vand.u32 4294901760, %v9014_v42  ;;  %v9134_v45 = vand.u32 4294901760, %v644_v28 }
  0x60   :  { %14135 = vst [vmem:[#allocation89_spill] sm:$0xff] %v8994_v49  ;;  %353 = vmatpush.msra.mxu1 %v9043_v55  ;;  %616 = vmatpush.msrb.mxu3 %v9059_v13 }
  0x61   :  { %14136 = vst [vmem:[#allocation90_spill] sm:$0xff] %v8996_v2  ;;  %v632_v24 = vsub.f32 %v9014_v42, %v9048_v61 }
  0x62   :  { %14137 = vst [vmem:[#allocation91_spill] sm:$0xff] %v9002_v18  ;;  %522 = vmatpush.msrb.mxu1 %v8721_v3  ;;  %v115_v3 = vld [vmem:[#allocation5 + $0x120] sm:$0xff]  ;;  %622 = vmatpush.msrb.mxu3 %v9075_v6 }
  0x63   :  { %14138 = vst [vmem:[#allocation92_spill] sm:$0xff] %v9006_v38  ;;  %v9064_v38 = vand.u32 4294901760, %v9032_v22  ;;  %v9106_v59 = vand.u32 4294901760, %v632_v24 }
  0x64   :  { %14139 = vst [vmem:[#allocation93_spill] sm:$0xff] %v9011_v37  ;;  %v9066_v37 = vand.u32 4294901760, %v121_v46  ;;  %524 = vmatpush.msrb.mxu1 %v8723_v4  ;;  %v113_v4 = vld [vmem:[#allocation5 + $0x110] sm:$0xff]  ;;  %628 = vmatpush.msrb.mxu3 %v9091_v54 }
  0x65   :  { %14140 = vst [vmem:[#allocation94_spill] sm:$0xff] %v9014_v42 }
  0x66   :  { %14141 = vst [vmem:[#allocation95_spill] sm:$0xff] %v9018_v36  ;;  %v117_v36 = vld [vmem:[#allocation5 + $0x130] sm:$0xff]  ;;  %526 = vmatpush.msrb.mxu1 %v8725_v5  ;;  %v111_v5 = vld [vmem:[#allocation5 + $0x100] sm:$0xff]  ;;  %634 = vmatpush.msrb.mxu3 %v9106_v59 }
  0x67   :  { %14142 = vst [vmem:[#allocation96_spill] sm:$0xff] %v9020_v21  ;;  %579 = vmatpush.msrb.mxu2 %v9066_v37 }
  0x68   :  { %14143 = vst [vmem:[#allocation97_spill] sm:$0xff] %v9023_v32  ;;  %v9080_v32 = vsub.f32 %v123_v62, %v9050_v23  ;;  %v638_v62 = vsub.f32 %v9032_v22, %v9064_v38  ;;  %528 = vmatpush.msrb.mxu1 %v8727_v9  ;;  %v9162_v9 = vand.u32 4294901760, %v111_v5 }
  0x69   :  { %14144 = vst [vmem:[#allocation98_spill] sm:$0xff] %v9029_v39  ;;  %v9082_v39 = vand.u32 4294901760, %v119_v60 }
  0x6a   :  { %14145 = vst [vmem:[#allocation99_spill] sm:$0xff] %v9032_v22  ;;  %v9122_v24 = vand.u32 4294901760, %v638_v62  ;;  %530 = vmatpush.msrb.mxu1 %v8729_v10 }
  0x6b   :  { %14146 = vst [vmem:[#allocation100_spill] sm:$0xff] %v9036_v20  ;;  %v9087_v20 = vand.u32 4294901760, %v9055_v43  ;;  %581 = vmatpush.msrb.mxu2 %v9082_v39 }
  0x6c   :  { %14147 = vst [vmem:[#allocation101_spill] sm:$0xff] %v9039_v56  ;;  %640 = vmatpush.msrb.mxu3 %v9122_v24  ;;  %532 = vmatpush.msrb.mxu1 %v8731_v11  ;;  %v9190_v11 = vsub.f32 %v111_v5, %v9162_v9 }
  0x6d   :  { %14148 = vst [vmem:[#allocation102_spill] sm:$0xff] %v9043_v55  ;;  %v9096_v55 = vsub.f32 %v121_v46, %v9066_v37  ;;  %v9112_v46 = vsub.f32 %v119_v60, %v9082_v39  ;;  %v650_v35 = vsub.f32 %v9055_v43, %v9087_v20  ;;  %v9127_v60 = vand.u32 4294901760, %v115_v3 }
  0x6e   :  { %14149 = vst [vmem:[#allocation103_spill] sm:$0xff] %v9048_v61  ;;  %v9098_v61 = vand.u32 4294901760, %v117_v36  ;;  %646 = vmatpush.msrb.mxu3 %v9134_v45  ;;  %534 = vmatpush.msrb.mxu1 %v8744_v17 }
  0x6f   :  { %14150 = vst [vmem:[#allocation104_spill] sm:$0xff] %v9050_v23  ;;  %v9150_v28 = vand.u32 4294901760, %v650_v35 }
  0x70   :  { %14151 = vst [vmem:[#allocation105_spill] sm:$0xff] %v9055_v43  ;;  %536 = vmatpush.msrb.mxu1 %v8766_v25  ;;  %583 = vmatpush.msrb.mxu2 %v9098_v61 }
  0x71   :  { %14152 = vst [vmem:[#allocation106_spill] sm:$0xff] %v9059_v13  ;;  %v9109_v13 = vand.u32 4294901760, %v9080_v32  ;;  %652 = vmatpush.msrb.mxu3 %v9150_v28 }
  0x72   :  { %14153 = vst [vmem:[#allocation107_spill] sm:$0xff] %v9064_v38  ;;  %v9114_v38 = vand.u32 4294901760, %v77_v27  ;;  %538 = vmatpush.msrb.mxu1 %v8786_v33  ;;  %585 = vmatpush.msrb.mxu2 %v9127_v60 }
  0x73   :  { %14154 = vst [vmem:[#allocation108_spill] sm:$0xff] %v9066_v37  ;;  %v656_v62 = vsub.f32 %v9080_v32, %v9109_v13 }
  0x74   :  { %14155 = vst [vmem:[#allocation109_spill] sm:$0xff] %v9071_v7  ;;  %v9130_v7 = vsub.f32 %v117_v36, %v9098_v61  ;;  %v9144_v36 = vsub.f32 %v77_v27, %v9114_v38  ;;  %v9160_v27 = vsub.f32 %v115_v3, %v9127_v60  ;;  %540 = vmatpush.msrb.mxu1 %v8789_v34 }
  0x75   :  { %14156 = vst [vmem:[#allocation110_spill] sm:$0xff] %v9075_v6  ;;  %v9125_v6 = vand.u32 4294901760, %v9096_v55  ;;  %v9168_v35 = vand.u32 4294901760, %v656_v62  ;;  %355 = vmatmul.f32.vlgmr.msra.gmra.mxu1 %v9114_v38 }
  0x76   :  { %14157 = vst [vmem:[#allocation111_spill] sm:$0xff] %v9080_v32  ;;  %v9157_v51 = vand.u32 4294901760, %v9130_v7  ;;  %v9173_v57 = vand.u32 4294901760, %v9144_v36  ;;  %v9187_v0 = vand.u32 4294901760, %v9160_v27  ;;  %542 = vmatpush.msrb.mxu1 %v8812_v44  ;;  %409 = vmatmul.f32.vlgmr.msra.gmra.mxu2 %v9144_v36 }
  0x77   :  { %14158 = vst [vmem:[#allocation112_spill] sm:$0xff] %v9082_v39  ;;  %658 = vmatpush.msrb.mxu3 %v9168_v35 }
  0x78   :  { %14159 = vst [vmem:[#allocation113_spill] sm:$0xff] %v9087_v20  ;;  %v9146_v20 = vand.u32 4294901760, %v113_v4  ;;  %v674_v62 = vsub.f32 %v9130_v7, %v9157_v51  ;;  %544 = vmatpush.msrb.mxu1 %v8828_v50  ;;  %448 = vmatmul.f32.vlgmr.msra.gmra.mxu3 %v9173_v57  ;;  %v136_v50 = vld [vmem:[#allocation5 + $0x1c8] sm:$0xff] }
  0x79   :  { %14160 = vst [vmem:[#allocation114_spill] sm:$0xff] %v9091_v54  ;;  %v9141_v54 = vand.u32 4294901760, %v9112_v46 }
  0x7a   :  { %14161 = vst [vmem:[#allocation115_spill] sm:$0xff] %v9096_v55  ;;  %v9176_v3 = vsub.f32 %v113_v4, %v9146_v20  ;;  %v78_v4 = vld [vmem:[#allocation2 + $0x8] sm:$0xff]  ;;  %v9207_v5 = vand.u32 4294901760, %v674_v62  ;;  %587 = vmatpush.msrb.mxu2 %v9146_v20  ;;  %546 = vmatpush.msrb.mxu1 %v8838_v53  ;;  %v9526_v53 = vand.u32 4294901760, %v140_v16 }
  0x7b   :  { %14162 = vst [vmem:[#allocation116_spill] sm:$0xff] %v9098_v61  ;;  %v9214_v41 = vand.u32 4294901760, %v78_v4 }
  0x7c   :  { %14163 = vst [vmem:[#allocation117_spill] sm:$0xff] %v9106_v59  ;;  %v662_v59 = vsub.f32 %v9096_v55, %v9125_v6  ;;  %v9201_v26 = vand.u32 4294901760, %v9176_v3  ;;  %589 = vmatpush.msrb.mxu2 %v9162_v9  ;;  %548 = vmatpush.msrb.mxu1 %v8860_v63  ;;  %v138_v63 = vld [vmem:[#allocation5 + $0x1d8] sm:$0xff]  ;;  %v9561_v33 = vsub.f32 %v140_v16, %v9526_v53 }
  0x7d   :  { %14164 = vst [vmem:[#allocation118_spill] sm:$0xff] %v9109_v13  ;;  %v9545_v34 = vand.u32 4294901760, %v138_v63 }
  0x7e   :  { %14165 = vst [vmem:[#allocation119_spill] sm:$0xff] %v9112_v46  ;;  %v686_v62 = vsub.f32 %v9176_v3, %v9201_v26 }
  0x7f   :  { %14166 = vst [vmem:[#allocation120_spill] sm:$0xff] %v9114_v38 }
  0x80   :  { %14167 = vst [vmem:[#allocation121_spill] sm:$0xff] %v9122_v24  ;;  %v668_v24 = vsub.f32 %v9112_v46, %v9141_v54 }
  0x81   :  { %14168 = vst [vmem:[#allocation122_spill] sm:$0xff] %v9125_v6 }
  0x82   :  { %14169 = vst [vmem:[#allocation123_spill] sm:$0xff] %v9127_v60 }
  0x83   :  { %14170 = vst [vmem:[#allocation124_spill] sm:$0xff] %v9130_v7 }
  0x84   :  { %14171 = vst [vmem:[#allocation125_spill] sm:$0xff] %v9134_v45  ;;  %v9182_v45 = vand.u32 4294901760, %v662_v59  ;;  %v9196_v59 = vand.u32 4294901760, %v668_v24  ;;  %v680_v24 = vsub.f32 %v9160_v27, %v9187_v0 }
  0x85   :  { %14172 = vst [vmem:[#allocation126_spill] sm:$0xff] %v9141_v54 }
  0x86   :  { %14173 = vst [vmem:[#allocation127_spill] sm:$0xff] %v9146_v20  ;;  %664 = vmatpush.msrb.mxu3 %v9182_v45 }
  0x87   :  { %14174 = vst [vmem:[#allocation128_spill] sm:$0xff] %v9150_v28  ;;  %v252_v28 = vsub.f32 %v9144_v36, %v9173_v57 }
  0x88   :  { %14175 = vst [vmem:[#allocation129_spill] sm:$0xff] %v9157_v51  ;;  %670 = vmatpush.msrb.mxu3 %v9196_v59 }
  0x89   :  { %14176 = vst [vmem:[#allocation130_spill] sm:$0xff] %v9160_v27  ;;  %v9220_v47 = vand.u32 4294901760, %v252_v28  ;;  %v9239_v28 = vand.u32 4294901760, %v686_v62  ;;  %v14194_v62 = vld [vmem:[#allocation77_spill] sm:$0xff] }
  0x8a   :  { %14177 = vst [vmem:[#allocation131_spill] sm:$0xff] %v9162_v9  ;;  %676 = vmatpush.msrb.mxu3 %v9207_v5  ;;  %796 = vmatpush.msra.mxu2 %v14194_v62 }
  0x8b   :  { %14178 = vst [vmem:[#allocation132_spill] sm:$0xff] %v9168_v35  ;;  %v9212_v35 = vand.u32 4294901760, %v9190_v11  ;;  %254 = vmatmul.f32.vlgmr.msra.gmra.mxu0 %v9220_v47 }
  0x8c   :  { %14179 = vst [vmem:[#allocation133_spill] sm:$0xff] %v9173_v57  ;;  %702 = vmatpush.msra.mxu0 %v8910_v48  ;;  %v14195_v48 = vld [vmem:[#allocation60_spill] sm:$0xff] }
  0x8d   :  { %14180 = vst [vmem:[#allocation134_spill] sm:$0xff] %v9176_v3  ;;  %v692_v52 = vsub.f32 %v9190_v11, %v9212_v35  ;;  %550 = vmatpush.msrb.mxu1 %v14195_v48 }
  0x8e   :  { %14181 = vst [vmem:[#allocation135_spill] sm:$0xff] %v9182_v45  ;;  %v9228_v45 = vand.u32 4294901760, %v680_v24  ;;  %705 = vmatpush.msra.mxu0 %v8929_v29  ;;  %v14196_v29 = vld [vmem:[#allocation83_spill] sm:$0xff] }
  0x8f   :  { %14182 = vst [vmem:[#allocation136_spill] sm:$0xff] %v9187_v0  ;;  %800 = vmatpush.msra.mxu2 %v14196_v29  ;;  %552 = vmatpush.msrb.mxu1 %v8888_v30 }
  0x90   :  { %14183 = vst [vmem:[#allocation137_spill] sm:$0xff] %v9190_v11  ;;  %682 = vmatpush.msrb.mxu3 %v9228_v45  ;;  %708 = vmatpush.msra.mxu0 %v8957_v58  ;;  %v14197_v58 = vld [vmem:[#allocation88_spill] sm:$0xff] }
  0x91   :  { %14184 = vst [vmem:[#allocation138_spill] sm:$0xff] %v9196_v59  ;;  %v9233_v59 = vsub.f32 %v78_v4, %v9214_v41  ;;  %v9245_v4 = vand.u32 4294901760, %v692_v52  ;;  %804 = vmatpush.msra.mxu2 %v14197_v58  ;;  %755 = vmatpush.msra.mxu1 %v8873_v8  ;;  %v94_v58 = vld [vmem:[#allocation5 + $0x78] sm:$0xff] }
  0x92   :  { %14185 = vst [vmem:[#allocation139_spill] sm:$0xff] %v9201_v26  ;;  %688 = vmatpush.msrb.mxu3 %v9239_v28  ;;  %711 = vmatpush.msra.mxu0 %v8976_v1  ;;  %v14199_v1 = vld [vmem:[#allocation93_spill] sm:$0xff] }
  0x93   :  { %14186 = vst [vmem:[#allocation140_spill] sm:$0xff] %v9207_v5  ;;  %v9248_v24 = vand.u32 4294901760, %v9233_v59  ;;  %808 = vmatpush.msra.mxu2 %v14199_v1  ;;  %757 = vmatpush.msra.mxu1 %v8890_v31 }
  0x94   :  { %14187 = vst [vmem:[#allocation141_spill] sm:$0xff] %v9212_v35  ;;  %694 = vmatpush.msrb.mxu3 %v9245_v4  ;;  %714 = vmatpush.msra.mxu0 %v8994_v49 }
  0x95   :  { %14188 = vst [vmem:[#allocation142_spill] sm:$0xff] %v9214_v41  ;;  %v593_v52 = vsub.f32 %v9233_v59, %v9248_v24  ;;  %759 = vmatpush.msra.mxu1 %v8921_v40  ;;  %517 = vmatmul.f32.vlgmr.msrb.gmra.mxu0 %v9114_v38 }
  0x96   :  { %14189 = vst [vmem:[#allocation143_spill] sm:$0xff] %v9228_v45  ;;  %863 = vmatpush.msra.mxu3 %v8873_v8  ;;  %717 = vmatpush.msra.mxu0 %v9014_v42  ;;  %v14201_v42 = vld [vmem:[#allocation103_spill] sm:$0xff] }
  0x97   :  { %14190 = vst [vmem:[#allocation144_spill] sm:$0xff] %v9233_v59  ;;  %v9268_v62 = vand.u32 4294901760, %v593_v52  ;;  %v14200_v52 = vld [vmem:[#allocation98_spill] sm:$0xff]  ;;  %696 = vmatmul.f32.vlgmr.msrb.gmra.mxu3 %v9214_v41  ;;  %761 = vmatpush.msra.mxu1 %v8940_v19 }
  0x98   :  { %14191 = vst [vmem:[#allocation145_spill] sm:$0xff] %v9239_v28  ;;  %865 = vmatpush.msra.mxu3 %v8890_v31  ;;  %720 = vmatpush.msra.mxu0 %v9032_v22  ;;  %v14202_v22 = vld [vmem:[#allocation107_spill] sm:$0xff] }
  0x99   :  { %14192 = vst [vmem:[#allocation146_spill] sm:$0xff] %v9245_v4  ;;  %595 = vmatmul.f32.vlgmr.msrb.gmra.mxu2 %v9268_v62  ;;  %554 = vmatmul.f32.vlgmr.msrb.gmra.mxu1 %v9114_v38  ;;  %v9384_v4 = vand.u32 4294901760, %v94_v58  ;;  %v142_v31 = vld [vmem:[#allocation5 + $0x1f8] sm:$0xff] }
  0x9a   :  { %14193 = vst [vmem:[#allocation147_spill] sm:$0xff] %v9248_v24  ;;  %867 = vmatpush.msra.mxu3 %v8921_v40  ;;  %812 = vmatpush.msra.mxu2 %v14200_v52 }
  0x9b   :  { %14198 = vst [vmem:[#allocation148_spill] sm:$0xff] %v9268_v62  ;;  %723 = vmatpush.msra.mxu0 %v9039_v56  ;;  %763 = vmatpush.msra.mxu1 %v8959_v15  ;;  %v14203_v56 = vld [vmem:[#allocation109_spill] sm:$0xff] }
  0x9c   :  { %869 = vmatpush.msra.mxu3 %v8940_v19  ;;  %816 = vmatpush.msra.mxu2 %v14201_v42  ;;  %v110_v42 = vld [vmem:[#allocation5 + $0xf8] sm:$0xff]  ;;  %14223 = vst [vmem:[#allocation167_spill] sm:$0xff] %v9384_v4 }
  0x9d   :  { %726 = vmatpush.msra.mxu0 %v9055_v43  ;;  %765 = vmatpush.msra.mxu1 %v8978_v12  ;;  %v14204_v43 = vld [vmem:[#allocation113_spill] sm:$0xff]  ;;  %14259 = vst [vmem:[#allocation203_spill] sm:$0xff] %v9526_v53 }
  0x9e   :  { %871 = vmatpush.msra.mxu3 %v8959_v15  ;;  %820 = vmatpush.msra.mxu2 %v14202_v22  ;;  %14264 = vst [vmem:[#allocation208_spill] sm:$0xff] %v9545_v34 }
  0x9f   :  { %729 = vmatpush.msra.mxu0 %v9080_v32  ;;  %767 = vmatpush.msra.mxu1 %v8996_v2  ;;  %v108_v32 = vld [vmem:[#allocation5 + $0xe8] sm:$0xff]  ;;  %14268 = vst [vmem:[#allocation212_spill] sm:$0xff] %v9561_v33 }
  0xa0   :  { %873 = vmatpush.msra.mxu3 %v8978_v12  ;;  %824 = vmatpush.msra.mxu2 %v14203_v56  ;;  %v9304_v56 = vand.u32 4294901760, %v110_v42 }
  0xa1   :  { %732 = vmatpush.msra.mxu0 %v9096_v55  ;;  %769 = vmatpush.msra.mxu1 %v9002_v18  ;;  %v106_v55 = vld [vmem:[#allocation5 + $0xd8] sm:$0xff] }
  0xa2   :  { %875 = vmatpush.msra.mxu3 %v8996_v2  ;;  %828 = vmatpush.msra.mxu2 %v14204_v43  ;;  %14205 = vst [vmem:[#allocation149_spill] sm:$0xff] %v9304_v56  ;;  %v9310_v43 = vand.u32 4294901760, %v108_v32 }
  0xa3   :  { %735 = vmatpush.msra.mxu0 %v9112_v46  ;;  %771 = vmatpush.msra.mxu1 %v9020_v21  ;;  %v104_v46 = vld [vmem:[#allocation5 + $0xc8] sm:$0xff] }
  0xa4   :  { %877 = vmatpush.msra.mxu3 %v9002_v18  ;;  %832 = vmatpush.msra.mxu2 %v9109_v13  ;;  %14206 = vst [vmem:[#allocation150_spill] sm:$0xff] %v9310_v43  ;;  %v9316_v13 = vand.u32 4294901760, %v106_v55 }
  0xa5   :  { %738 = vmatpush.msra.mxu0 %v9130_v7  ;;  %773 = vmatpush.msra.mxu1 %v9050_v23  ;;  %v9319_v7 = vsub.f32 %v110_v42, %v9304_v56  ;;  %v100_v42 = vld [vmem:[#allocation5 + $0xa8] sm:$0xff] }
  0xa6   :  { %879 = vmatpush.msra.mxu3 %v9020_v21  ;;  %836 = vmatpush.msra.mxu2 %v9125_v6  ;;  %14207 = vst [vmem:[#allocation151_spill] sm:$0xff] %v9316_v13  ;;  %v102_v6 = vld [vmem:[#allocation5 + $0xb8] sm:$0xff]  ;;  %v9340_v22 = vsub.f32 %v106_v55, %v9316_v13  ;;  %v96_v55 = vld [vmem:[#allocation5 + $0x88] sm:$0xff] }
  0xa7   :  { %741 = vmatpush.msra.mxu0 %v9160_v27  ;;  %14208 = vst [vmem:[#allocation152_spill] sm:$0xff] %v9319_v7  ;;  %775 = vmatpush.msra.mxu1 %v9066_v37  ;;  %v9325_v27 = vand.u32 4294901760, %v104_v46  ;;  %v9374_v29 = vand.u32 4294901760, %v96_v55 }
  0xa8   :  { %881 = vmatpush.msra.mxu3 %v9050_v23  ;;  %840 = vmatpush.msra.mxu2 %v9141_v54  ;;  %v9328_v54 = vsub.f32 %v108_v32, %v9310_v43  ;;  %14213 = vst [vmem:[#allocation157_spill] sm:$0xff] %v9340_v22  ;;  %v98_v32 = vld [vmem:[#allocation5 + $0x98] sm:$0xff]  ;;  %v9363_v1 = vand.u32 4294901760, %v9340_v22 }
  0xa9   :  { %744 = vmatpush.msra.mxu0 %v9176_v3  ;;  %14209 = vst [vmem:[#allocation153_spill] sm:$0xff] %v9325_v27  ;;  %777 = vmatpush.msra.mxu1 %v9082_v39  ;;  %v9334_v3 = vand.u32 4294901760, %v102_v6  ;;  %v9352_v49 = vsub.f32 %v104_v46, %v9325_v27  ;;  %v9360_v52 = vand.u32 4294901760, %v98_v32 }
  0xaa   :  { %883 = vmatpush.msra.mxu3 %v9066_v37  ;;  %844 = vmatpush.msra.mxu2 %v9157_v51  ;;  %14210 = vst [vmem:[#allocation154_spill] sm:$0xff] %v9328_v54  ;;  %v9337_v51 = vand.u32 4294901760, %v9319_v7  ;;  %v90_v37 = vld [vmem:[#allocation5 + $0x58] sm:$0xff] }
  0xab   :  { %747 = vmatpush.msra.mxu0 %v9190_v11  ;;  %14211 = vst [vmem:[#allocation155_spill] sm:$0xff] %v9334_v3  ;;  %779 = vmatpush.msra.mxu1 %v9098_v61  ;;  %v9346_v11 = vand.u32 4294901760, %v100_v42  ;;  %v9366_v46 = vsub.f32 %v102_v6, %v9334_v3  ;;  %v9425_v21 = vand.u32 4294901760, %v90_v37 }
  0xac   :  { %885 = vmatpush.msra.mxu3 %v9082_v39  ;;  %848 = vmatpush.msra.mxu2 %v9187_v0  ;;  %14212 = vst [vmem:[#allocation156_spill] sm:$0xff] %v9337_v51  ;;  %v9349_v0 = vand.u32 4294901760, %v9328_v54  ;;  %v955_v39 = vsub.f32 %v9340_v22, %v9363_v1 }
  0xad   :  { %750 = vmatmul.f32.vlgmr.msra.gmra.mxu0 %v9233_v59  ;;  %14214 = vst [vmem:[#allocation158_spill] sm:$0xff] %v9346_v11  ;;  %781 = vmatpush.msra.mxu1 %v9127_v60  ;;  %v9380_v6 = vsub.f32 %v100_v42, %v9346_v11  ;;  %v9393_v28 = vand.u32 4294901760, %v9366_v46  ;;  %v9396_v42 = vsub.f32 %v98_v32, %v9360_v52 }
  0xae   :  { %887 = vmatpush.msra.mxu3 %v9098_v61  ;;  %900 = vmatpush.msrb.mxu0 %v9304_v56  ;;  %14215 = vst [vmem:[#allocation159_spill] sm:$0xff] %v9349_v0  ;;  %v92_v61 = vld [vmem:[#allocation5 + $0x68] sm:$0xff]  ;;  %v9412_v32 = vsub.f32 %v96_v55, %v9374_v29  ;;  %v9460_v15 = vsub.f32 %v90_v37, %v9425_v21 }
  0xaf   :  { %852 = vmatpush.msra.mxu2 %v9201_v26  ;;  %14216 = vst [vmem:[#allocation160_spill] sm:$0xff] %v9352_v49  ;;  %v943_v26 = vsub.f32 %v9319_v7, %v9337_v51  ;;  %783 = vmatpush.msra.mxu1 %v9146_v20  ;;  %v9409_v23 = vand.u32 4294901760, %v9380_v6  ;;  %v967_v5 = vsub.f32 %v9366_v46, %v9393_v28  ;;  %v9428_v55 = vand.u32 4294901760, %v9396_v42 }
  0xb0   :  { %889 = vmatpush.msra.mxu3 %v9127_v60  ;;  %902 = vmatpush.msrb.mxu0 %v9310_v43  ;;  %14217 = vst [vmem:[#allocation161_spill] sm:$0xff] %v9360_v52  ;;  %v9377_v60 = vand.u32 4294901760, %v9352_v49  ;;  %v9444_v2 = vand.u32 4294901760, %v9412_v32 }
  0xb1   :  { %856 = vmatpush.msra.mxu2 %v9212_v35  ;;  %14218 = vst [vmem:[#allocation162_spill] sm:$0xff] %v9363_v1  ;;  %v949_v35 = vsub.f32 %v9328_v54, %v9349_v0  ;;  %785 = vmatpush.msra.mxu1 %v9162_v9 }
  0xb2   :  { %14219 = vst [vmem:[#allocation163_spill] sm:$0xff] %v9366_v46  ;;  %891 = vmatpush.msra.mxu3 %v9146_v20  ;;  %858 = vmatmul.f32.vlgmr.msra.gmra.mxu2 %v9214_v41  ;;  %v9400_v20 = vand.u32 4294901760, %v92_v61  ;;  %v961_v45 = vsub.f32 %v9352_v49, %v9377_v60  ;;  %v985_v19 = vsub.f32 %v9412_v32, %v9444_v2 }
  0xb3   :  { %904 = vmatpush.msrb.mxu0 %v9316_v13  ;;  %1043 = vmatpush.msrb.mxu2 %v9319_v7  ;;  %14220 = vst [vmem:[#allocation164_spill] sm:$0xff] %v9374_v29  ;;  %v9388_v7 = vand.u32 4294901760, %v943_v26  ;;  %v9404_v26 = vand.u32 4294901760, %v949_v35  ;;  %v9421_v35 = vand.u32 4294901760, %v955_v39 }
  0xb4   :  { %14221 = vst [vmem:[#allocation165_spill] sm:$0xff] %v9377_v60  ;;  %893 = vmatpush.msra.mxu3 %v9162_v9  ;;  %789 = vmatmul.f32.vlgmr.msra.gmra.mxu1 %v9248_v24  ;;  %v88_v9 = vld [vmem:[#allocation5 + $0x48] sm:$0xff]  ;;  %v9437_v39 = vand.u32 4294901760, %v961_v45  ;;  %v9453_v45 = vand.u32 4294901760, %v967_v5 }
  0xb5   :  { %14222 = vst [vmem:[#allocation166_spill] sm:$0xff] %v9380_v6  ;;  %895 = vmatmul.f32.vlgmr.msra.gmra.mxu3 %v9214_v41  ;;  %906 = vmatpush.msrb.mxu0 %v9325_v27  ;;  %v9441_v18 = vand.u32 4294901760, %v88_v9 }
  0xb6   :  { %14224 = vst [vmem:[#allocation168_spill] sm:$0xff] %v9388_v7  ;;  %1046 = vmatpush.msrb.mxu2 %v9328_v54  ;;  %1096 = vmatpush.msrb.mxu3 %v9304_v56  ;;  %v9417_v54 = vsub.f32 %v94_v58, %v9384_v4  ;;  %v9433_v58 = vsub.f32 %v92_v61, %v9400_v20 }
  0xb7   :  { %14225 = vst [vmem:[#allocation169_spill] sm:$0xff] %v9393_v28  ;;  %908 = vmatpush.msrb.mxu0 %v9334_v3  ;;  %945 = vmatpush.msrb.mxu1 %v9388_v7  ;;  %v973_v7 = vsub.f32 %v9380_v6, %v9409_v23  ;;  %v9476_v37 = vsub.f32 %v88_v9, %v9441_v18  ;;  %v9489_v9 = vand.u32 4294901760, %v9460_v15 }
  0xb8   :  { %14226 = vst [vmem:[#allocation170_spill] sm:$0xff] %v9396_v42  ;;  %1049 = vmatpush.msrb.mxu2 %v9340_v22  ;;  %1098 = vmatpush.msrb.mxu3 %v9310_v43  ;;  %v86_v22 = vld [vmem:[#allocation5 + $0x38] sm:$0xff]  ;;  %v9449_v61 = vand.u32 4294901760, %v9417_v54 }
  0xb9   :  { %14227 = vst [vmem:[#allocation171_spill] sm:$0xff] %v9400_v20  ;;  %910 = vmatpush.msrb.mxu0 %v9346_v11  ;;  %951 = vmatpush.msrb.mxu1 %v9404_v26  ;;  %v9457_v12 = vand.u32 4294901760, %v86_v22  ;;  %v9469_v5 = vand.u32 4294901760, %v973_v7 }
  0xba   :  { %14228 = vst [vmem:[#allocation172_spill] sm:$0xff] %v9404_v26  ;;  %1052 = vmatpush.msrb.mxu2 %v9352_v49  ;;  %1100 = vmatpush.msrb.mxu3 %v9316_v13  ;;  %v84_v49 = vld [vmem:[#allocation5 + $0x28] sm:$0xff]  ;;  %v979_v26 = vsub.f32 %v9396_v42, %v9428_v55 }
  0xbb   :  { %14229 = vst [vmem:[#allocation173_spill] sm:$0xff] %v9409_v23  ;;  %912 = vmatpush.msrb.mxu0 %v9360_v52  ;;  %957 = vmatpush.msrb.mxu1 %v9421_v35  ;;  %v9473_v40 = vand.u32 4294901760, %v84_v49  ;;  %v9492_v14 = vsub.f32 %v86_v22, %v9457_v12  ;;  %v9507_v22 = vand.u32 4294901760, %v9476_v37 }
  0xbc   :  { %14230 = vst [vmem:[#allocation174_spill] sm:$0xff] %v9412_v32  ;;  %1055 = vmatpush.msrb.mxu2 %v9366_v46  ;;  %1102 = vmatpush.msrb.mxu3 %v9325_v27  ;;  %v9465_v46 = vand.u32 4294901760, %v9433_v58  ;;  %v9484_v7 = vand.u32 4294901760, %v979_v26  ;;  %v9502_v26 = vand.u32 4294901760, %v985_v19  ;;  %v1003_v19 = vsub.f32 %v9460_v15, %v9489_v9 }
  0xbd   :  { %14231 = vst [vmem:[#allocation175_spill] sm:$0xff] %v9417_v54  ;;  %914 = vmatpush.msrb.mxu0 %v9374_v29  ;;  %963 = vmatpush.msrb.mxu1 %v9437_v39  ;;  %v9510_v48 = vsub.f32 %v84_v49, %v9473_v40 }
  0xbe   :  { %14232 = vst [vmem:[#allocation176_spill] sm:$0xff] %v9421_v35  ;;  %1058 = vmatpush.msrb.mxu2 %v9380_v6  ;;  %v82_v35 = vld [vmem:[#allocation5 + $0x18] sm:$0xff]  ;;  %1104 = vmatpush.msrb.mxu3 %v9334_v3  ;;  %v991_v6 = vsub.f32 %v9417_v54, %v9449_v61 }
  0xbf   :  { %14233 = vst [vmem:[#allocation177_spill] sm:$0xff] %v9425_v21  ;;  %916 = vmatpush.msrb.mxu0 %v9384_v4  ;;  %969 = vmatpush.msrb.mxu1 %v9453_v45  ;;  %v9486_v8 = vand.u32 4294901760, %v82_v35 }
  0xc0   :  { %14234 = vst [vmem:[#allocation178_spill] sm:$0xff] %v9428_v55  ;;  %1061 = vmatpush.msrb.mxu2 %v9396_v42  ;;  %1106 = vmatpush.msrb.mxu3 %v9346_v11  ;;  %v997_v42 = vsub.f32 %v9433_v58, %v9465_v46 }
  0xc1   :  { %14235 = vst [vmem:[#allocation179_spill] sm:$0xff] %v9433_v58  ;;  %918 = vmatpush.msrb.mxu0 %v9400_v20  ;;  %975 = vmatpush.msrb.mxu1 %v9469_v5  ;;  %v9524_v49 = vsub.f32 %v82_v35, %v9486_v8  ;;  %v1009_v35 = vsub.f32 %v9476_v37, %v9507_v22 }
  0xc2   :  { %14236 = vst [vmem:[#allocation180_spill] sm:$0xff] %v9437_v39  ;;  %v80_v39 = vld [vmem:[#allocation5 + $0x8] sm:$0xff]  ;;  %1064 = vmatpush.msrb.mxu2 %v9412_v32  ;;  %1108 = vmatpush.msrb.mxu3 %v9360_v52  ;;  %v9514_v32 = vand.u32 4294901760, %v991_v6  ;;  %v9530_v6 = vand.u32 4294901760, %v997_v42  ;;  %v134_v42 = vld [vmem:[#allocation5 + $0x1b8] sm:$0xff] }
  0xc3   :  { %14237 = vst [vmem:[#allocation181_spill] sm:$0xff] %v9441_v18  ;;  %v9504_v30 = vand.u32 4294901760, %v80_v39  ;;  %920 = vmatpush.msrb.mxu0 %v9425_v21  ;;  %981 = vmatpush.msrb.mxu1 %v9484_v7  ;;  %v9572_v25 = vand.u32 4294901760, %v1009_v35 }
  0xc4   :  { %14238 = vst [vmem:[#allocation182_spill] sm:$0xff] %v9444_v2  ;;  %1067 = vmatpush.msrb.mxu2 %v9417_v54  ;;  %1110 = vmatpush.msrb.mxu3 %v9374_v29 }
  0xc5   :  { %14239 = vst [vmem:[#allocation183_spill] sm:$0xff] %v9449_v61  ;;  %922 = vmatpush.msrb.mxu0 %v9441_v18  ;;  %987 = vmatpush.msrb.mxu1 %v9502_v26  ;;  %v9543_v44 = vsub.f32 %v80_v39, %v9504_v30  ;;  %v9558_v39 = vand.u32 4294901760, %v9524_v49 }
  0xc6   :  { %14240 = vst [vmem:[#allocation184_spill] sm:$0xff] %v9453_v45  ;;  %v9498_v45 = vand.u32 4294901760, %v142_v31  ;;  %1070 = vmatpush.msrb.mxu2 %v9433_v58  ;;  %1112 = vmatpush.msrb.mxu3 %v9384_v4  ;;  %v9553_v58 = vand.u32 4294901760, %v1003_v19  ;;  %v132_v19 = vld [vmem:[#allocation5 + $0x1a8] sm:$0xff] }
  0xc7   :  { %14241 = vst [vmem:[#allocation185_spill] sm:$0xff] %v9457_v12  ;;  %924 = vmatpush.msrb.mxu0 %v9457_v12  ;;  %993 = vmatpush.msrb.mxu1 %v9514_v32  ;;  %v9577_v17 = vand.u32 4294901760, %v9543_v44  ;;  %v1027_v24 = vsub.f32 %v9524_v49, %v9558_v39  ;;  %v9596_v59 = vand.u32 4294901760, %v132_v19 }
  0xc8   :  { %14242 = vst [vmem:[#allocation186_spill] sm:$0xff] %v9460_v15  ;;  %v9533_v54 = vsub.f32 %v142_v31, %v9498_v45  ;;  %1073 = vmatpush.msrb.mxu2 %v9460_v15  ;;  %v9549_v31 = vand.u32 4294901760, %v136_v50  ;;  %1114 = vmatpush.msrb.mxu3 %v9400_v20 }
  0xc9   :  { %14243 = vst [vmem:[#allocation187_spill] sm:$0xff] %v9465_v46  ;;  %926 = vmatpush.msrb.mxu0 %v9473_v40  ;;  %999 = vmatpush.msrb.mxu1 %v9530_v6  ;;  %v1033_v41 = vsub.f32 %v9543_v44, %v9577_v17  ;;  %v9628_v57 = vsub.f32 %v132_v19, %v9596_v59 }
  0xca   :  { %14244 = vst [vmem:[#allocation188_spill] sm:$0xff] %v9469_v5  ;;  %v9521_v5 = vand.u32 4294901760, %v9492_v14  ;;  %1076 = vmatpush.msrb.mxu2 %v9476_v37  ;;  %v9566_v15 = vand.u32 4294901760, %v9533_v54  ;;  %1116 = vmatpush.msrb.mxu3 %v9425_v21  ;;  %v9585_v10 = vsub.f32 %v136_v50, %v9549_v31 }
  0xcb   :  { %14245 = vst [vmem:[#allocation189_spill] sm:$0xff] %v9473_v40  ;;  %928 = vmatpush.msrb.mxu0 %v9486_v8  ;;  %1005 = vmatpush.msrb.mxu1 %v9553_v58 }
  0xcc   :  { %14246 = vst [vmem:[#allocation190_spill] sm:$0xff] %v9476_v37  ;;  %v9580_v37 = vsub.f32 %v138_v63, %v9545_v34  ;;  %1079 = vmatpush.msrb.mxu2 %v9492_v14  ;;  %1118 = vmatpush.msrb.mxu3 %v9441_v18  ;;  %v9594_v63 = vand.u32 4294901760, %v9561_v33  ;;  %v1284_v50 = vsub.f32 %v9533_v54, %v9566_v15 }
  0xcd   :  { %14247 = vst [vmem:[#allocation191_spill] sm:$0xff] %v9484_v7  ;;  %v9540_v7 = vand.u32 4294901760, %v9510_v48  ;;  %930 = vmatpush.msrb.mxu0 %v9504_v30  ;;  %1011 = vmatpush.msrb.mxu1 %v9572_v25 }
  0xce   :  { %14248 = vst [vmem:[#allocation192_spill] sm:$0xff] %v9486_v8  ;;  %1082 = vmatpush.msrb.mxu2 %v9510_v48  ;;  %1120 = vmatpush.msrb.mxu3 %v9457_v12  ;;  %v9612_v62 = vand.u32 4294901760, %v9580_v37  ;;  %v1290_v38 = vsub.f32 %v9561_v33, %v9594_v63 }
  0xcf   :  { %14249 = vst [vmem:[#allocation193_spill] sm:$0xff] %v9489_v9  ;;  %v1021_v16 = vsub.f32 %v9510_v48, %v9540_v7  ;;  %1137 = vmatpush.msra.mxu0 %v9337_v51 }
  0xd0   :  { %14250 = vst [vmem:[#allocation194_spill] sm:$0xff] %v9492_v14  ;;  %1085 = vmatpush.msrb.mxu2 %v9524_v49  ;;  %1122 = vmatpush.msrb.mxu3 %v9473_v40  ;;  %v1296_v19 = vsub.f32 %v9580_v37, %v9612_v62 }
  0xd1   :  { %14251 = vst [vmem:[#allocation195_spill] sm:$0xff] %v9498_v45  ;;  %1141 = vmatpush.msra.mxu0 %v9349_v0 }
  0xd2   :  { %14252 = vst [vmem:[#allocation196_spill] sm:$0xff] %v9502_v26  ;;  %v1015_v26 = vsub.f32 %v9492_v14, %v9521_v5  ;;  %1088 = vmatpush.msrb.mxu2 %v9543_v44  ;;  %1124 = vmatpush.msrb.mxu3 %v9486_v8 }
  0xd3   :  { %14253 = vst [vmem:[#allocation197_spill] sm:$0xff] %v9504_v30  ;;  %1145 = vmatpush.msra.mxu0 %v9363_v1  ;;  %1091 = vmatmul.f32.vlgmr.msrb.gmra.mxu2 %v9144_v36  ;;  %v14337_v36 = vld [vmem:[#allocation120_spill] sm:$0xff] }
  0xd4   :  { %14254 = vst [vmem:[#allocation198_spill] sm:$0xff] %v9507_v22  ;;  %v9589_v35 = vand.u32 4294901760, %v1015_v26  ;;  %v128_v26 = vld [vmem:[#allocation5 + $0x188] sm:$0xff]  ;;  %1241 = vmatpush.msra.mxu2 %v9498_v45  ;;  %1126 = vmatpush.msrb.mxu3 %v9504_v30 }
  0xd5   :  { %14255 = vst [vmem:[#allocation199_spill] sm:$0xff] %v9510_v48  ;;  %1149 = vmatpush.msra.mxu0 %v9377_v60 }
  0xd6   :  { %14256 = vst [vmem:[#allocation200_spill] sm:$0xff] %v9514_v32  ;;  %v9568_v32 = vand.u32 4294901760, %v134_v42  ;;  %1017 = vmatpush.msrb.mxu1 %v9589_v35  ;;  %1243 = vmatpush.msra.mxu2 %v9526_v53 }
  0xd7   :  { %14257 = vst [vmem:[#allocation201_spill] sm:$0xff] %v9521_v5  ;;  %1153 = vmatpush.msra.mxu0 %v9393_v28 }
  0xd8   :  { %14258 = vst [vmem:[#allocation202_spill] sm:$0xff] %v9524_v49  ;;  %v9603_v14 = vsub.f32 %v134_v42, %v9568_v32  ;;  %v9619_v42 = vand.u32 4294901760, %v9585_v10  ;;  %v9634_v49 = vand.u32 4294901760, %v1284_v50  ;;  %1245 = vmatpush.msra.mxu2 %v9545_v34  ;;  %936 = vmatmul.f32.vlgmr.msrb.gmra.mxu0 %v9220_v47 }
  0xd9   :  { %14260 = vst [vmem:[#allocation204_spill] sm:$0xff] %v9530_v6  ;;  %v130_v6 = vld [vmem:[#allocation5 + $0x198] sm:$0xff]  ;;  %1157 = vmatpush.msra.mxu0 %v9409_v23  ;;  %v116_v23 = vld [vmem:[#allocation5 + $0x128] sm:$0xff] }
  0xda   :  { %14261 = vst [vmem:[#allocation205_spill] sm:$0xff] %v9533_v54  ;;  %v9614_v48 = vand.u32 4294901760, %v130_v6  ;;  %v9637_v51 = vand.u32 4294901760, %v9603_v14  ;;  %v1302_v50 = vsub.f32 %v9585_v10, %v9619_v42  ;;  %1286 = vmatpush.msra.mxu3 %v9634_v49  ;;  %1247 = vmatpush.msra.mxu2 %v9549_v31 }
  0xdb   :  { %14262 = vst [vmem:[#allocation206_spill] sm:$0xff] %v9540_v7  ;;  %1161 = vmatpush.msra.mxu0 %v9428_v55  ;;  %v9730_v55 = vand.u32 4294901760, %v116_v23 }
  0xdc   :  { %14263 = vst [vmem:[#allocation207_spill] sm:$0xff] %v9543_v44  ;;  %v122_v44 = vld [vmem:[#allocation5 + $0x158] sm:$0xff]  ;;  %v1308_v1 = vsub.f32 %v9603_v14, %v9637_v51  ;;  %v9684_v60 = vand.u32 4294901760, %v1302_v50  ;;  %1249 = vmatpush.msra.mxu2 %v9568_v32 }
  0xdd   :  { %14265 = vst [vmem:[#allocation209_spill] sm:$0xff] %v9549_v31  ;;  %v9680_v30 = vand.u32 4294901760, %v122_v44  ;;  %1165 = vmatpush.msra.mxu0 %v9444_v2  ;;  %v112_v2 = vld [vmem:[#allocation5 + $0x108] sm:$0xff] }
  0xde   :  { %14266 = vst [vmem:[#allocation210_spill] sm:$0xff] %v9553_v58  ;;  %v9607_v58 = vand.u32 4294901760, %v1021_v16  ;;  %v9623_v16 = vand.u32 4294901760, %v1027_v24  ;;  %v9641_v24 = vand.u32 4294901760, %v1033_v41  ;;  %v9656_v41 = vand.u32 4294901760, %v1290_v38  ;;  %1251 = vmatpush.msra.mxu2 %v9596_v59 }
  0xdf   :  { %14267 = vst [vmem:[#allocation211_spill] sm:$0xff] %v9558_v39  ;;  %v9672_v38 = vand.u32 4294901760, %v1296_v19  ;;  %v9700_v50 = vand.u32 4294901760, %v1308_v1  ;;  %1169 = vmatpush.msra.mxu0 %v9449_v61  ;;  %v9762_v61 = vand.u32 4294901760, %v112_v2 }
  0xe0   :  { %14269 = vst [vmem:[#allocation213_spill] sm:$0xff] %v9566_v15  ;;  %v9630_v15 = vand.u32 4294901760, %v128_v26  ;;  %1023 = vmatpush.msrb.mxu1 %v9607_v58  ;;  %1292 = vmatpush.msra.mxu3 %v9656_v41 }
  0xe1   :  { %14270 = vst [vmem:[#allocation214_spill] sm:$0xff] %v9568_v32  ;;  %1253 = vmatpush.msra.mxu2 %v9614_v48  ;;  %1173 = vmatpush.msra.mxu0 %v9465_v46  ;;  %v9790_v46 = vsub.f32 %v112_v2, %v9762_v61 }
  0xe2   :  { %14271 = vst [vmem:[#allocation215_spill] sm:$0xff] %v9572_v25  ;;  %v126_v25 = vld [vmem:[#allocation5 + $0x178] sm:$0xff]  ;;  %1029 = vmatpush.msrb.mxu1 %v9623_v16  ;;  %1298 = vmatpush.msra.mxu3 %v9672_v38 }
  0xe3   :  { %14272 = vst [vmem:[#allocation216_spill] sm:$0xff] %v9577_v17  ;;  %v9648_v0 = vand.u32 4294901760, %v126_v25  ;;  %1255 = vmatpush.msra.mxu2 %v9630_v15  ;;  %1177 = vmatpush.msra.mxu0 %v9489_v9 }
  0xe4   :  { %14273 = vst [vmem:[#allocation217_spill] sm:$0xff] %v9580_v37  ;;  %1035 = vmatpush.msrb.mxu1 %v9641_v24  ;;  %1304 = vmatpush.msra.mxu3 %v9684_v60 }
  0xe5   :  { %14274 = vst [vmem:[#allocation218_spill] sm:$0xff] %v9585_v10  ;;  %1257 = vmatpush.msra.mxu2 %v9648_v0  ;;  %1181 = vmatpush.msra.mxu0 %v9507_v22 }
  0xe6   :  { %14275 = vst [vmem:[#allocation219_spill] sm:$0xff] %v9589_v35  ;;  %v124_v35 = vld [vmem:[#allocation5 + $0x168] sm:$0xff]  ;;  %1204 = vmatpush.msra.mxu1 %v9304_v56  ;;  %1310 = vmatpush.msra.mxu3 %v9700_v50 }
  0xe7   :  { %14276 = vst [vmem:[#allocation220_spill] sm:$0xff] %v9594_v63  ;;  %v9646_v63 = vsub.f32 %v130_v6, %v9614_v48  ;;  %v9662_v6 = vsub.f32 %v128_v26, %v9630_v15  ;;  %v9678_v26 = vsub.f32 %v126_v25, %v9648_v0  ;;  %1185 = vmatpush.msra.mxu0 %v9521_v5  ;;  %v14333_v47 = vld [vmem:[#allocation213_spill] sm:$0xff] }
  0xe8   :  { %14277 = vst [vmem:[#allocation221_spill] sm:$0xff] %v9596_v59  ;;  %1206 = vmatpush.msra.mxu1 %v9310_v43 }
  0xe9   :  { %14278 = vst [vmem:[#allocation222_spill] sm:$0xff] %v9603_v14  ;;  %v9707_v28 = vand.u32 4294901760, %v9678_v26  ;;  %1189 = vmatpush.msra.mxu0 %v9540_v7  ;;  %1037 = vmatmul.f32.vlgmr.msrb.gmra.mxu1 %v14337_v36  ;;  %v191_v7 = vld [vmem:[#allocation7 + $0x180] sm:$0xff] }
  0xea   :  { %14279 = vst [vmem:[#allocation223_spill] sm:$0xff] %v9607_v58  ;;  %v9659_v58 = vand.u32 4294901760, %v9628_v57  ;;  %1208 = vmatpush.msra.mxu1 %v9316_v13 }
  0xeb   :  { %14280 = vst [vmem:[#allocation224_spill] sm:$0xff] %v9612_v62  ;;  %v9664_v62 = vand.u32 4294901760, %v124_v35  ;;  %1193 = vmatpush.msra.mxu0 %v9558_v39 }
  0xec   :  { %14281 = vst [vmem:[#allocation225_spill] sm:$0xff] %v9614_v48  ;;  %v1314_v19 = vsub.f32 %v9628_v57, %v9659_v58  ;;  %1210 = vmatpush.msra.mxu1 %v9325_v27 }
  0xed   :  { %14282 = vst [vmem:[#allocation226_spill] sm:$0xff] %v9619_v42  ;;  %v9675_v42 = vand.u32 4294901760, %v9646_v63  ;;  %v9694_v25 = vsub.f32 %v124_v35, %v9664_v62  ;;  %v9710_v35 = vsub.f32 %v122_v44, %v9680_v30  ;;  %1259 = vmatpush.msra.mxu2 %v9664_v62  ;;  %1197 = vmatpush.msra.mxu0 %v9577_v17  ;;  %v143_v17 = vld [vmem:[#allocation7] sm:$0xff] }
  0xee   :  { %14283 = vst [vmem:[#allocation227_spill] sm:$0xff] %v9623_v16  ;;  %v120_v16 = vld [vmem:[#allocation5 + $0x148] sm:$0xff]  ;;  %v9718_v1 = vand.u32 4294901760, %v1314_v19  ;;  %1212 = vmatpush.msra.mxu1 %v9334_v3  ;;  %1199 = vmatmul.f32.vlgmr.msra.gmra.mxu0 %v14337_v36 }
  0xef   :  { %14284 = vst [vmem:[#allocation228_spill] sm:$0xff] %v9628_v57  ;;  %v9723_v43 = vand.u32 4294901760, %v9694_v25  ;;  %v9739_v13 = vand.u32 4294901760, %v9710_v35  ;;  %1261 = vmatpush.msra.mxu2 %v9680_v30  ;;  %1384 = vmatpush.msrb.mxu0 %v9533_v54 }
  0xf0   :  { %14285 = vst [vmem:[#allocation229_spill] sm:$0xff] %v9630_v15  ;;  %1316 = vmatpush.msra.mxu3 %v9718_v1  ;;  %1214 = vmatpush.msra.mxu1 %v9346_v11 }
  0xf1   :  { %14286 = vst [vmem:[#allocation230_spill] sm:$0xff] %v9634_v49  ;;  %v9691_v49 = vand.u32 4294901760, %v9662_v6  ;;  %1387 = vmatpush.msrb.mxu0 %v9561_v33 }
  0xf2   :  { %14287 = vst [vmem:[#allocation231_spill] sm:$0xff] %v9637_v51  ;;  %v118_v51 = vld [vmem:[#allocation5 + $0x138] sm:$0xff]  ;;  %1216 = vmatpush.msra.mxu1 %v9360_v52 }
  0xf3   :  { %14288 = vst [vmem:[#allocation232_spill] sm:$0xff] %v9641_v24  ;;  %v9696_v24 = vand.u32 4294901760, %v120_v16  ;;  %v9712_v56 = vand.u32 4294901760, %v118_v51  ;;  %1390 = vmatpush.msrb.mxu0 %v9580_v37 }
  0xf4   :  { %14289 = vst [vmem:[#allocation233_spill] sm:$0xff] %v9646_v63  ;;  %1218 = vmatpush.msra.mxu1 %v9374_v29 }
  0xf5   :  { %14290 = vst [vmem:[#allocation234_spill] sm:$0xff] %v9648_v0  ;;  %v9726_v44 = vsub.f32 %v120_v16, %v9696_v24  ;;  %v9742_v16 = vsub.f32 %v118_v51, %v9712_v56  ;;  %v9760_v51 = vsub.f32 %v116_v23, %v9730_v55  ;;  %1263 = vmatpush.msra.mxu2 %v9696_v24 }
  0xf6   :  { %14291 = vst [vmem:[#allocation235_spill] sm:$0xff] %v9656_v41  ;;  %v1320_v41 = vsub.f32 %v9646_v63, %v9675_v42  ;;  %1220 = vmatpush.msra.mxu1 %v9384_v4  ;;  %1393 = vmatpush.msrb.mxu0 %v9585_v10 }
  0xf7   :  { %14292 = vst [vmem:[#allocation236_spill] sm:$0xff] %v9659_v58  ;;  %v9771_v3 = vand.u32 4294901760, %v9742_v16  ;;  %v9787_v9 = vand.u32 4294901760, %v9760_v51  ;;  %1265 = vmatpush.msra.mxu2 %v9712_v56 }
  0xf8   :  { %14293 = vst [vmem:[#allocation237_spill] sm:$0xff] %v9662_v6  ;;  %v9734_v19 = vand.u32 4294901760, %v1320_v41  ;;  %1222 = vmatpush.msra.mxu1 %v9400_v20  ;;  %1396 = vmatpush.msrb.mxu0 %v9603_v14 }
  0xf9   :  { %14294 = vst [vmem:[#allocation238_spill] sm:$0xff] %v9664_v62  ;;  %1267 = vmatpush.msra.mxu2 %v9730_v55 }
  0xfa   :  { %14295 = vst [vmem:[#allocation239_spill] sm:$0xff] %v9672_v38  ;;  %v1326_v38 = vsub.f32 %v9662_v6, %v9691_v49  ;;  %1322 = vmatpush.msra.mxu3 %v9734_v19  ;;  %1224 = vmatpush.msra.mxu1 %v9425_v21  ;;  %v148_v21 = vld [vmem:[#allocation7 + $0x28] sm:$0xff] }
  0xfb   :  { %14296 = vst [vmem:[#allocation240_spill] sm:$0xff] %v9675_v42  ;;  %v114_v42 = vld [vmem:[#allocation5 + $0x118] sm:$0xff]  ;;  %1399 = vmatpush.msrb.mxu0 %v9628_v57  ;;  %v449_v10 = vpop.f32.mrf.mxu3 }
  0xfc   :  { %14297 = vst [vmem:[#allocation241_spill] sm:$0xff] %v9678_v26  ;;  %v9746_v27 = vand.u32 4294901760, %v114_v42  ;;  %v9750_v41 = vand.u32 4294901760, %v1326_v38  ;;  %1226 = vmatpush.msra.mxu1 %v9441_v18  ;;  %v14373_v57 = vld [vmem:[#allocation147_spill] sm:$0xff] }
  0xfd   :  { %14298 = vst [vmem:[#allocation242_spill] sm:$0xff] %v9680_v30  ;;  %1402 = vmatpush.msrb.mxu0 %v9646_v63 }
  0xfe   :  { %14299 = vst [vmem:[#allocation243_spill] sm:$0xff] %v9684_v60  ;;  %v1332_v60 = vsub.f32 %v9678_v26, %v9707_v28  ;;  %v9776_v23 = vsub.f32 %v114_v42, %v9746_v27  ;;  %1328 = vmatpush.msra.mxu3 %v9750_v41  ;;  %1228 = vmatpush.msra.mxu1 %v9457_v12  ;;  %v150_v12 = vld [vmem:[#allocation7 + $0x38] sm:$0xff] }
  0xff   :  { %14300 = vst [vmem:[#allocation244_spill] sm:$0xff] %v9691_v49  ;;  %1269 = vmatpush.msra.mxu2 %v9746_v27  ;;  %1405 = vmatpush.msrb.mxu0 %v9662_v6 }
 0x100   :  { %14301 = vst [vmem:[#allocation245_spill] sm:$0xff] %v9694_v25  ;;  %v9766_v38 = vand.u32 4294901760, %v1332_v60  ;;  %1230 = vmatpush.msra.mxu1 %v9473_v40 }
 0x101   :  { %14302 = vst [vmem:[#allocation246_spill] sm:$0xff] %v9696_v24  ;;  %1271 = vmatpush.msra.mxu2 %v9762_v61  ;;  %1408 = vmatpush.msrb.mxu0 %v9678_v26 }
 0x102   :  { %14303 = vst [vmem:[#allocation247_spill] sm:$0xff] %v9700_v50  ;;  %v1338_v50 = vsub.f32 %v9694_v25, %v9723_v43  ;;  %1334 = vmatpush.msra.mxu3 %v9766_v38  ;;  %1232 = vmatpush.msra.mxu1 %v9486_v8 }
 0x103   :  { %14304 = vst [vmem:[#allocation248_spill] sm:$0xff] %v9707_v28  ;;  %v9755_v28 = vand.u32 4294901760, %v9726_v44  ;;  %1478 = vmatpush.msrb.mxu2 %v14333_v47  ;;  %v14341_v47 = vld [vmem:[#allocation231_spill] sm:$0xff]  ;;  %1411 = vmatpush.msrb.mxu0 %v9694_v25 }
 0x104   :  { %14305 = vst [vmem:[#allocation249_spill] sm:$0xff] %v9710_v35 }
 0x105   :  { %14306 = vst [vmem:[#allocation250_spill] sm:$0xff] %v9712_v56  ;;  %v1350_v60 = vsub.f32 %v9726_v44, %v9755_v28  ;;  %1414 = vmatpush.msrb.mxu0 %v9710_v35 }
 0x106   :  { %14307 = vst [vmem:[#allocation251_spill] sm:$0xff] %v9718_v1  ;;  %v1344_v1 = vsub.f32 %v9710_v35, %v9739_v13  ;;  %v163_v35 = vld [vmem:[#allocation7 + $0xa0] sm:$0xff] }
 0x107   :  { %14308 = vst [vmem:[#allocation252_spill] sm:$0xff] %v9723_v43  ;;  %v9805_v2 = vand.u32 4294901760, %v1350_v60  ;;  %1417 = vmatpush.msrb.mxu0 %v9726_v44 }
 0x108   :  { %14309 = vst [vmem:[#allocation253_spill] sm:$0xff] %v9726_v44  ;;  %v9794_v42 = vand.u32 4294901760, %v1344_v1  ;;  %v1362_v1 = vsub.f32 %v9760_v51, %v9787_v9  ;;  %v165_v44 = vld [vmem:[#allocation7 + $0xb0] sm:$0xff] }
 0x109   :  { %14310 = vst [vmem:[#allocation254_spill] sm:$0xff] %v9730_v55  ;;  %1420 = vmatpush.msrb.mxu0 %v9742_v16 }
 0x10a   :  { %14311 = vst [vmem:[#allocation255_spill] sm:$0xff] %v9734_v19  ;;  %v9780_v19 = vand.u32 4294901760, %v1338_v50  ;;  %v1356_v50 = vsub.f32 %v9742_v16, %v9771_v3 }
 0x10b   :  { %14312 = vst [vmem:[#allocation256_spill] sm:$0xff] %v9739_v13  ;;  %1423 = vmatpush.msrb.mxu0 %v9760_v51 }
 0x10c   :  { %14313 = vst [vmem:[#allocation257_spill] sm:$0xff] %v9742_v16  ;;  %1340 = vmatpush.msra.mxu3 %v9780_v19  ;;  %v9816_v5 = vand.u32 4294901760, %v1356_v50 }
 0x10d   :  { %14314 = vst [vmem:[#allocation258_spill] sm:$0xff] %v9746_v27  ;;  %1426 = vmatpush.msrb.mxu0 %v9776_v23 }
 0x10e   :  { %14315 = vst [vmem:[#allocation259_spill] sm:$0xff] %v9750_v41  ;;  %v9801_v41 = vand.u32 4294901760, %v9776_v23  ;;  %1346 = vmatpush.msra.mxu3 %v9794_v42 }
 0x10f   :  { %14316 = vst [vmem:[#allocation260_spill] sm:$0xff] %v9755_v28  ;;  %1429 = vmatpush.msrb.mxu0 %v9790_v46 }
 0x110   :  { %14317 = vst [vmem:[#allocation261_spill] sm:$0xff] %v9760_v51  ;;  %v1368_v60 = vsub.f32 %v9776_v23, %v9801_v41  ;;  %1352 = vmatpush.msra.mxu3 %v9805_v2 }
 0x111   :  { %14318 = vst [vmem:[#allocation262_spill] sm:$0xff] %v9762_v61 }
 0x112   :  { %14319 = vst [vmem:[#allocation263_spill] sm:$0xff] %v9766_v38  ;;  %v9812_v38 = vand.u32 4294901760, %v9790_v46  ;;  %1358 = vmatpush.msra.mxu3 %v9816_v5 }
 0x113   :  { %14320 = vst [vmem:[#allocation264_spill] sm:$0xff] %v9771_v3 }
 0x114   :  { %14321 = vst [vmem:[#allocation265_spill] sm:$0xff] %v9776_v23  ;;  %v1374_v50 = vsub.f32 %v9790_v46, %v9812_v38 }
 0x115   :  { %14322 = vst [vmem:[#allocation266_spill] sm:$0xff] %v9780_v19  ;;  %v9826_v19 = vand.u32 4294901760, %v1362_v1 }
 0x116   :  { %14323 = vst [vmem:[#allocation267_spill] sm:$0xff] %v9787_v9  ;;  %v9840_v1 = vand.u32 4294901760, %v1374_v50  ;;  %v14335_v50 = vld [vmem:[#allocation220_spill] sm:$0xff] }
 0x117   :  { %14324 = vst [vmem:[#allocation268_spill] sm:$0xff] %v9790_v46  ;;  %1364 = vmatpush.msra.mxu3 %v9826_v19  ;;  %1482 = vmatpush.msrb.mxu2 %v14335_v50  ;;  %v14340_v50 = vld [vmem:[#allocation148_spill] sm:$0xff] }
 0x118   :  { %14325 = vst [vmem:[#allocation269_spill] sm:$0xff] %v9794_v42  ;;  %v9834_v42 = vand.u32 4294901760, %v1368_v60  ;;  %v14334_v60 = vld [vmem:[#allocation133_spill] sm:$0xff]  ;;  %1277 = vmatmul.f32.vlgmr.msra.gmra.mxu2 %v14340_v50  ;;  %v14343_v50 = vld [vmem:[#allocation240_spill] sm:$0xff] }
 0x119   :  { %14326 = vst [vmem:[#allocation270_spill] sm:$0xff] %v9801_v41  ;;  %1130 = vmatmul.f32.vlgmr.msrb.gmra.mxu3 %v14334_v60  ;;  %v14339_v60 = vld [vmem:[#allocation226_spill] sm:$0xff] }
 0x11a   :  { %14327 = vst [vmem:[#allocation271_spill] sm:$0xff] %v9805_v2  ;;  %1370 = vmatpush.msra.mxu3 %v9834_v42  ;;  %v159_v2 = vld [vmem:[#allocation7 + $0x80] sm:$0xff] }
 0x11b   :  { %14328 = vst [vmem:[#allocation272_spill] sm:$0xff] %v9812_v38 }
 0x11c   :  { %14329 = vst [vmem:[#allocation273_spill] sm:$0xff] %v9816_v5  ;;  %1376 = vmatpush.msra.mxu3 %v9840_v1 }
 0x11d   :  { %14330 = vst [vmem:[#allocation274_spill] sm:$0xff] %v9826_v19  ;;  %v14336_v19 = vld [vmem:[#allocation197_spill] sm:$0xff] }
 0x11e   :  { %14331 = vst [vmem:[#allocation275_spill] sm:$0xff] %v9834_v42  ;;  %1545 = vmatpush.msrb.mxu3 %v9498_v45  ;;  %1234 = vmatpush.msra.mxu1 %v14336_v19  ;;  %v14338_v42 = vld [vmem:[#allocation224_spill] sm:$0xff] }
 0x11f   :  { %14332 = vst [vmem:[#allocation276_spill] sm:$0xff] %v9840_v1  ;;  %1486 = vmatpush.msrb.mxu2 %v14338_v42  ;;  %v14342_v42 = vld [vmem:[#allocation142_spill] sm:$0xff]  ;;  %1236 = vmatmul.f32.vlgmr.msra.gmra.mxu1 %v14337_v36 }
 0x120   :  { %1437 = vmatpush.msrb.mxu1 %v9498_v45  ;;  %1547 = vmatpush.msrb.mxu3 %v9526_v53 }
 0x121   :  { %1490 = vmatpush.msrb.mxu2 %v14339_v60  ;;  %1378 = vmatmul.f32.vlgmr.msra.gmra.mxu3 %v14342_v42  ;;  %v14345_v60 = vld [vmem:[#allocation248_spill] sm:$0xff] }
 0x122   :  { %1439 = vmatpush.msrb.mxu1 %v9526_v53  ;;  %1549 = vmatpush.msrb.mxu3 %v9545_v34  ;;  %v147_v53 = vld [vmem:[#allocation7 + $0x20] sm:$0xff] }
 0x123   :  { %1494 = vmatpush.msrb.mxu2 %v14341_v47  ;;  %v173_v47 = vld [vmem:[#allocation7 + $0xf0] sm:$0xff]  ;;  %v10064_v45 = vand.u32 4294901760, %v147_v53 }
 0x124   :  { %1441 = vmatpush.msrb.mxu1 %v9545_v34  ;;  %1551 = vmatpush.msrb.mxu3 %v9549_v31  ;;  %v9886_v36 = vand.u32 4294901760, %v173_v47 }
 0x125   :  { %1498 = vmatpush.msrb.mxu2 %v9659_v58  ;;  %v171_v58 = vld [vmem:[#allocation7 + $0xe0] sm:$0xff]  ;;  %14389 = vst [vmem:[#allocation313_spill] sm:$0xff] %v10064_v45 }
 0x126   :  { %1443 = vmatpush.msrb.mxu1 %v9549_v31  ;;  %1553 = vmatpush.msrb.mxu3 %v9568_v32  ;;  %14344 = vst [vmem:[#allocation133_spill] sm:$0xff] %v9886_v36  ;;  %v9892_v1 = vand.u32 4294901760, %v171_v58 }
 0x127   :  { %1502 = vmatpush.msrb.mxu2 %v14343_v50  ;;  %v169_v50 = vld [vmem:[#allocation7 + $0xd0] sm:$0xff]  ;;  %1584 = vmatpush.msra.mxu0 %v9886_v36 }
 0x128   :  { %1445 = vmatpush.msrb.mxu1 %v9568_v32  ;;  %1555 = vmatpush.msrb.mxu3 %v9596_v59  ;;  %14346 = vst [vmem:[#allocation120_spill] sm:$0xff] %v9892_v1  ;;  %v9901_v5 = vand.u32 4294901760, %v169_v50 }
 0x129   :  { %1506 = vmatpush.msrb.mxu2 %v9691_v49  ;;  %v167_v49 = vld [vmem:[#allocation7 + $0xc0] sm:$0xff]  ;;  %1586 = vmatpush.msra.mxu0 %v9892_v1 }
 0x12a   :  { %1447 = vmatpush.msrb.mxu1 %v9596_v59  ;;  %1557 = vmatpush.msrb.mxu3 %v9614_v48  ;;  %14348 = vst [vmem:[#allocation142_spill] sm:$0xff] %v9901_v5  ;;  %v9910_v16 = vand.u32 4294901760, %v167_v49  ;;  %v9922_v51 = vsub.f32 %v169_v50, %v9901_v5 }
 0x12b   :  { %1510 = vmatpush.msrb.mxu2 %v14345_v60  ;;  %v9899_v60 = vsub.f32 %v173_v47, %v9886_v36  ;;  %v9914_v47 = vld [vmem:[#allocation8] ss:$4 sm:$0x3]  ;;  %1588 = vmatpush.msra.mxu0 %v9901_v5 }
 0x12c   :  { %1449 = vmatpush.msrb.mxu1 %v9614_v48  ;;  %1559 = vmatpush.msrb.mxu3 %v9630_v15  ;;  %14350 = vst [vmem:[#allocation278_spill] sm:$0xff] %v9910_v16  ;;  %v9937_v50 = vsub.f32 %v167_v49, %v9910_v16  ;;  %v9950_v49 = vand.u32 4294901760, %v9922_v51  ;;  %v356_v48 = vpop.f32.mrf.mxu1 }
 0x12d   :  { %1514 = vmatpush.msrb.mxu2 %v9723_v43  ;;  %14347 = vst [vmem:[#allocation148_spill] sm:$0xff] %v9899_v60  ;;  %v9908_v43 = vsub.f32 %v171_v58, %v9892_v1  ;;  %v9924_v58 = vand.u32 4294901760, %v165_v44  ;;  %1590 = vmatpush.msra.mxu0 %v9910_v16 }
 0x12e   :  { %1451 = vmatpush.msrb.mxu1 %v9630_v15  ;;  %1561 = vmatpush.msrb.mxu3 %v9648_v0  ;;  %14352 = vst [vmem:[#allocation280_spill] sm:$0xff] %v9922_v51  ;;  %v157_v15 = vld [vmem:[#allocation7 + $0x70] sm:$0xff]  ;;  %v9965_v26 = vand.u32 4294901760, %v9937_v50 }
 0x12f   :  { %1518 = vmatpush.msrb.mxu2 %v9739_v13  ;;  %14349 = vst [vmem:[#allocation277_spill] sm:$0xff] %v9908_v43  ;;  %v9919_v13 = vand.u32 4294901760, %v9899_v60  ;;  %v9934_v23 = vand.u32 4294901760, %v9908_v43  ;;  %v9953_v25 = vsub.f32 %v165_v44, %v9924_v58  ;;  %v9984_v6 = vand.u32 4294901760, %v157_v15  ;;  %1592 = vmatpush.msra.mxu0 %v9924_v58 }
 0x130   :  { %1453 = vmatpush.msrb.mxu1 %v9648_v0  ;;  %1563 = vmatpush.msrb.mxu3 %v9664_v62  ;;  %14353 = vst [vmem:[#allocation281_spill] sm:$0xff] %v9924_v58  ;;  %v1645_v63 = vsub.f32 %v9937_v50, %v9965_v26 }
 0x131   :  { %1522 = vmatpush.msrb.mxu2 %v9755_v28  ;;  %14351 = vst [vmem:[#allocation279_spill] sm:$0xff] %v9919_v13  ;;  %v9931_v28 = vperm.slane %v9914_v47, 0  ;;  %v1627_v0 = vsub.f32 %v9899_v60, %v9919_v13 }
 0x132   :  { %1455 = vmatpush.msrb.mxu1 %v9664_v62  ;;  %1565 = vmatpush.msrb.mxu3 %v9680_v30  ;;  %v161_v62 = vld [vmem:[#allocation7 + $0x90] sm:$0xff]  ;;  %14355 = vst [vmem:[#allocation283_spill] sm:$0xff] %v9934_v23 }
 0x133   :  { %1526 = vmatpush.msrb.mxu2 %v9771_v3  ;;  %14354 = vst [vmem:[#allocation282_spill] sm:$0xff] %v9931_v28  ;;  %v255_v3 = vpop.f32.mrf.mxu0  ;;  %v9943_v46 = vand.u32 4294901760, %v161_v62 }
 0x134   :  { %1457 = vmatpush.msrb.mxu1 %v9680_v30  ;;  %1567 = vmatpush.msrb.mxu3 %v9696_v24  ;;  %14356 = vst [vmem:[#allocation284_spill] sm:$0xff] %v9937_v50  ;;  %v9939_v30 = vand.u32 4294901760, %v163_v35 }
 0x135   :  { %1530 = vmatpush.msrb.mxu2 %v9787_v9  ;;  %14358 = vst [vmem:[#allocation286_spill] sm:$0xff] %v9943_v46  ;;  %v9957_v9 = vand.u32 4294901760, %v159_v2 }
 0x136   :  { %1459 = vmatpush.msrb.mxu1 %v9696_v24  ;;  %14357 = vst [vmem:[#allocation285_spill] sm:$0xff] %v9939_v30  ;;  %1569 = vmatpush.msrb.mxu3 %v9712_v56  ;;  %v14359_v24 = vld [vmem:[#allocation144_spill] sm:$0xff]  ;;  %v9968_v44 = vsub.f32 %v163_v35, %v9939_v30  ;;  %v9982_v35 = vand.u32 4294901760, %v9953_v25 }
 0x137   :  { %1432 = vmatmul.f32.vlgmr.msrb.gmra.mxu0 %v14359_v24  ;;  %14360 = vst [vmem:[#allocation144_spill] sm:$0xff] %v9950_v49  ;;  %1534 = vmatpush.msrb.mxu2 %v9801_v41  ;;  %v256_v24 = vadd.f32 %v255_v3, %v9931_v28  ;;  %v155_v41 = vld [vmem:[#allocation7 + $0x60] sm:$0xff]  ;;  %v9977_v3 = vand.u32 4294901760, %v1627_v0  ;;  %v1639_v28 = vsub.f32 %v9922_v51, %v9950_v49 }
 0x138   :  { %1461 = vmatpush.msrb.mxu1 %v9712_v56  ;;  %14361 = vst [vmem:[#allocation287_spill] sm:$0xff] %v9953_v25  ;;  %1571 = vmatpush.msrb.mxu3 %v9730_v55  ;;  %v1633_v56 = vsub.f32 %v9908_v43, %v9934_v23  ;;  %v10000_v32 = vand.u32 4294901760, %v9968_v44 }
 0x139   :  { %14362 = vst [vmem:[#allocation288_spill] sm:$0xff] %v9957_v9  ;;  %1538 = vmatpush.msrb.mxu2 %v9812_v38  ;;  %v9991_v38 = vand.u32 4294901760, %v155_v41  ;;  %v357_v0 = vadd.f32 %v356_v48, %v256_v24  ;;  %v10008_v48 = vand.u32 4294901760, %v1639_v28  ;;  %v10014_v24 = vsub.f32 %v157_v15, %v9984_v6  ;;  %1594 = vmatpush.msra.mxu0 %v9939_v30 }
 0x13a   :  { %1463 = vmatpush.msrb.mxu1 %v9730_v55  ;;  %14363 = vst [vmem:[#allocation289_spill] sm:$0xff] %v9965_v26  ;;  %1573 = vmatpush.msrb.mxu3 %v9746_v27  ;;  %v9973_v55 = vsub.f32 %v161_v62, %v9943_v46  ;;  %v9989_v62 = vsub.f32 %v159_v2, %v9957_v9  ;;  %v9995_v59 = vand.u32 4294901760, %v1633_v56  ;;  %v410_v2 = vpop.f32.mrf.mxu2 }
 0x13b   :  { %14364 = vst [vmem:[#allocation290_spill] sm:$0xff] %v9968_v44  ;;  %1540 = vmatmul.f32.vlgmr.msrb.gmra.mxu2 %v14342_v42  ;;  %v1651_v56 = vsub.f32 %v9953_v25, %v9982_v35  ;;  %v10024_v28 = vsub.f32 %v155_v41, %v9991_v38  ;;  %v411_v14 = vadd.f32 %v410_v2, %v357_v0  ;;  %v10042_v0 = vand.u32 4294901760, %v10014_v24  ;;  %v518_v33 = vpop.f32.mrf.mxu0 }
 0x13c   :  { %14365 = vst [vmem:[#allocation291_spill] sm:$0xff] %v9973_v55  ;;  %1465 = vmatpush.msrb.mxu1 %v9746_v27  ;;  %1575 = vmatpush.msrb.mxu3 %v9762_v61  ;;  %v153_v27 = vld [vmem:[#allocation7 + $0x50] sm:$0xff]  ;;  %v10005_v31 = vand.u32 4294901760, %v9973_v55  ;;  %v1657_v15 = vsub.f32 %v9968_v44, %v10000_v32 }
 0x13d   :  { %14366 = vst [vmem:[#allocation292_spill] sm:$0xff] %v9977_v3  ;;  %1577 = vmatmul.f32.vlgmr.msrb.gmra.mxu3 %v14342_v42  ;;  %v151_v42 = vld [vmem:[#allocation7 + $0x40] sm:$0xff]  ;;  %1727 = vmatpush.msra.mxu2 %v9899_v60  ;;  %v10027_v60 = vand.u32 4294901760, %v1645_v63  ;;  %v10039_v63 = vand.u32 4294901760, %v1651_v56  ;;  %v10054_v37 = vand.u32 4294901760, %v10024_v28  ;;  %v145_v56 = vld [vmem:[#allocation7 + $0x10] sm:$0xff] }
 0x13e   :  { %14367 = vst [vmem:[#allocation293_spill] sm:$0xff] %v9982_v35  ;;  %1467 = vmatpush.msrb.mxu1 %v9762_v61  ;;  %v10020_v61 = vand.u32 4294901760, %v9989_v62  ;;  %1780 = vmatpush.msra.mxu3 %v9886_v36  ;;  %v10032_v34 = vand.u32 4294901760, %v151_v42  ;;  %v1663_v41 = vsub.f32 %v9973_v55, %v10005_v31 }
 0x13f   :  { %14368 = vst [vmem:[#allocation294_spill] sm:$0xff] %v9984_v6  ;;  %1471 = vmatmul.f32.vlgmr.msrb.gmra.mxu1 %v14373_v57  ;;  %v10016_v57 = vand.u32 4294901760, %v153_v27  ;;  %1730 = vmatpush.msra.mxu2 %v9908_v43 }
 0x140   :  { %14369 = vst [vmem:[#allocation295_spill] sm:$0xff] %v9989_v62  ;;  %1629 = vmatpush.msra.mxu1 %v9977_v3  ;;  %v149_v3 = vld [vmem:[#allocation7 + $0x30] sm:$0xff]  ;;  %1782 = vmatpush.msra.mxu3 %v9892_v1  ;;  %v10067_v54 = vand.u32 4294901760, %v1663_v41 }
 0x141   :  { %14370 = vst [vmem:[#allocation296_spill] sm:$0xff] %v9991_v38  ;;  %1733 = vmatpush.msra.mxu2 %v9922_v51  ;;  %v10046_v2 = vsub.f32 %v153_v27, %v10016_v57  ;;  %v10048_v43 = vand.u32 4294901760, %v149_v3  ;;  %v10058_v51 = vand.u32 4294901760, %v1657_v15  ;;  %v10062_v27 = vsub.f32 %v151_v42, %v10032_v34  ;;  %1596 = vmatpush.msra.mxu0 %v9943_v46 }
 0x142   :  { %14371 = vst [vmem:[#allocation297_spill] sm:$0xff] %v9995_v59  ;;  %1635 = vmatpush.msra.mxu1 %v9995_v59  ;;  %v1669_v59 = vsub.f32 %v9989_v62, %v10020_v61  ;;  %1784 = vmatpush.msra.mxu3 %v9901_v5  ;;  %v10080_v15 = vand.u32 4294901760, %v145_v56 }
 0x143   :  { %14372 = vst [vmem:[#allocation298_spill] sm:$0xff] %v10000_v32  ;;  %1736 = vmatpush.msra.mxu2 %v9937_v50  ;;  %v10078_v42 = vsub.f32 %v149_v3, %v10048_v43  ;;  %1598 = vmatpush.msra.mxu0 %v9957_v9  ;;  %v1681_v50 = vsub.f32 %v10024_v28, %v10054_v37 }
 0x144   :  { %14374 = vst [vmem:[#allocation147_spill] sm:$0xff] %v10005_v31  ;;  %1641 = vmatpush.msra.mxu1 %v10008_v48  ;;  %1786 = vmatpush.msra.mxu3 %v9910_v16  ;;  %v10083_v41 = vand.u32 4294901760, %v1669_v59  ;;  %v10094_v3 = vsub.f32 %v147_v53, %v10064_v45  ;;  %v555_v59 = vpop.f32.mrf.mxu1  ;;  %v10110_v53 = vsub.f32 %v145_v56, %v10080_v15 }
 0x145   :  { %14375 = vst [vmem:[#allocation299_spill] sm:$0xff] %v10008_v48  ;;  %v450_v48 = vadd.f32 %v449_v10, %v411_v14  ;;  %v1675_v10 = vsub.f32 %v10014_v24, %v10042_v0  ;;  %v10074_v14 = vand.u32 4294901760, %v10046_v2  ;;  %1739 = vmatpush.msra.mxu2 %v9953_v25  ;;  %v10096_v25 = vand.u32 4294901760, %v143_v17  ;;  %1600 = vmatpush.msra.mxu0 %v9984_v6 }
 0x146   :  { %14376 = vst [vmem:[#allocation300_spill] sm:$0xff] %v10014_v24  ;;  %1647 = vmatpush.msra.mxu1 %v10027_v60  ;;  %1788 = vmatpush.msra.mxu3 %v9924_v58  ;;  %v10120_v39 = vand.u32 4294901760, %v10094_v3 }
 0x147   :  { %14377 = vst [vmem:[#allocation301_spill] sm:$0xff] %v10016_v57  ;;  %1742 = vmatpush.msra.mxu2 %v9968_v44  ;;  %1602 = vmatpush.msra.mxu0 %v9991_v38  ;;  %v10113_v44 = vand.u32 4294901760, %v1681_v50  ;;  %v10124_v56 = vsub.f32 %v143_v17, %v10096_v25 }
 0x148   :  { %14378 = vst [vmem:[#allocation302_spill] sm:$0xff] %v10020_v61  ;;  %1653 = vmatpush.msra.mxu1 %v10039_v63  ;;  %1790 = vmatpush.msra.mxu3 %v9939_v30 }
 0x149   :  { %14379 = vst [vmem:[#allocation303_spill] sm:$0xff] %v10024_v28  ;;  %1745 = vmatpush.msra.mxu2 %v9973_v55  ;;  %v596_v55 = vpop.f32.mrf.mxu2  ;;  %1604 = vmatpush.msra.mxu0 %v10016_v57 }
 0x14a   :  { %14380 = vst [vmem:[#allocation304_spill] sm:$0xff] %v10027_v60  ;;  %1659 = vmatpush.msra.mxu1 %v10058_v51  ;;  %v10090_v60 = vand.u32 4294901760, %v10062_v27  ;;  %1792 = vmatpush.msra.mxu3 %v9943_v46 }
 0x14b   :  { %14381 = vst [vmem:[#allocation305_spill] sm:$0xff] %v10032_v34  ;;  %1748 = vmatpush.msra.mxu2 %v9989_v62  ;;  %1606 = vmatpush.msra.mxu0 %v10032_v34 }
 0x14c   :  { %14382 = vst [vmem:[#allocation306_spill] sm:$0xff] %v10039_v63  ;;  %v519_v63 = vadd.f32 %v518_v33, %v450_v48  ;;  %1665 = vmatpush.msra.mxu1 %v10067_v54  ;;  %v10101_v33 = vand.u32 4294901760, %v1675_v10  ;;  %v1687_v48 = vsub.f32 %v10046_v2, %v10074_v14  ;;  %v1693_v10 = vsub.f32 %v10062_v27, %v10090_v60 }
 0x14d   :  { %14383 = vst [vmem:[#allocation307_spill] sm:$0xff] %v10042_v0  ;;  %1794 = vmatpush.msra.mxu3 %v9957_v9  ;;  %1751 = vmatpush.msra.mxu2 %v10014_v24 }
 0x14e   :  { %14384 = vst [vmem:[#allocation308_spill] sm:$0xff] %v10046_v2  ;;  %1671 = vmatpush.msra.mxu1 %v10083_v41  ;;  %v10129_v50 = vand.u32 4294901760, %v1687_v48  ;;  %v10140_v62 = vand.u32 4294901760, %v1693_v10  ;;  %v1705_v48 = vsub.f32 %v10094_v3, %v10120_v39  ;;  %1608 = vmatpush.msra.mxu0 %v10048_v43  ;;  %v751_v10 = vpop.f32.mrf.mxu0 }
 0x14f   :  { %14385 = vst [vmem:[#allocation309_spill] sm:$0xff] %v10048_v43  ;;  %1796 = vmatpush.msra.mxu3 %v9984_v6  ;;  %1754 = vmatpush.msra.mxu2 %v10024_v28 }
 0x150   :  { %14386 = vst [vmem:[#allocation310_spill] sm:$0xff] %v10054_v37  ;;  %1677 = vmatpush.msra.mxu1 %v10101_v33  ;;  %1610 = vmatpush.msra.mxu0 %v10064_v45  ;;  %v10159_v24 = vand.u32 4294901760, %v1705_v48 }
 0x151   :  { %14387 = vst [vmem:[#allocation311_spill] sm:$0xff] %v10058_v51  ;;  %v10106_v51 = vand.u32 4294901760, %v10078_v42  ;;  %1798 = vmatpush.msra.mxu3 %v9991_v38  ;;  %1757 = vmatpush.msra.mxu2 %v10046_v2 }
 0x152   :  { %14388 = vst [vmem:[#allocation312_spill] sm:$0xff] %v10062_v27  ;;  %1683 = vmatpush.msra.mxu1 %v10113_v44  ;;  %1612 = vmatpush.msra.mxu0 %v10080_v15 }
 0x153   :  { %14390 = vst [vmem:[#allocation314_spill] sm:$0xff] %v10067_v54  ;;  %v556_v54 = vadd.f32 %v555_v59, %v519_v63  ;;  %v1699_v63 = vsub.f32 %v10078_v42, %v10106_v51  ;;  %v10134_v59 = vand.u32 4294901760, %v10110_v53  ;;  %1800 = vmatpush.msra.mxu3 %v10016_v57  ;;  %1760 = vmatpush.msra.mxu2 %v10062_v27 }
 0x154   :  { %14391 = vst [vmem:[#allocation315_spill] sm:$0xff] %v10074_v14  ;;  %1689 = vmatpush.msra.mxu1 %v10129_v50  ;;  %1614 = vmatpush.msra.mxu0 %v10096_v25 }
 0x155   :  { %14392 = vst [vmem:[#allocation316_spill] sm:$0xff] %v10078_v42  ;;  %v597_v17 = vadd.f32 %v596_v55, %v556_v54  ;;  %v10151_v54 = vand.u32 4294901760, %v1699_v63  ;;  %v1711_v55 = vsub.f32 %v10110_v53, %v10134_v59  ;;  %1802 = vmatpush.msra.mxu3 %v10032_v34  ;;  %1763 = vmatpush.msra.mxu2 %v10078_v42 }
 0x156   :  { %14393 = vst [vmem:[#allocation317_spill] sm:$0xff] %v10080_v15  ;;  %1695 = vmatpush.msra.mxu1 %v10140_v62  ;;  %1821 = vmatpush.msrb.mxu0 %v9919_v13 }
 0x157   :  { %14394 = vst [vmem:[#allocation318_spill] sm:$0xff] %v10083_v41  ;;  %v697_v41 = vpop.f32.mrf.mxu3  ;;  %v10167_v2 = vand.u32 4294901760, %v1711_v55  ;;  %1804 = vmatpush.msra.mxu3 %v10048_v43  ;;  %1766 = vmatpush.msra.mxu2 %v10094_v3 }
 0x158   :  { %14395 = vst [vmem:[#allocation319_spill] sm:$0xff] %v10090_v60  ;;  %v698_v28 = vadd.f32 %v697_v41, %v597_v17  ;;  %1701 = vmatpush.msra.mxu1 %v10151_v54  ;;  %v790_v41 = vpop.f32.mrf.mxu1  ;;  %v859_v17 = vpop.f32.mrf.mxu2  ;;  %1825 = vmatpush.msrb.mxu0 %v9934_v23 }
 0x159   :  { %14396 = vst [vmem:[#allocation320_spill] sm:$0xff] %v10094_v3  ;;  %1806 = vmatpush.msra.mxu3 %v10064_v45  ;;  %1769 = vmatpush.msra.mxu2 %v10110_v53 }
 0x15a   :  { %14397 = vst [vmem:[#allocation321_spill] sm:$0xff] %v10096_v25  ;;  %v752_v63 = vadd.f32 %v751_v10, %v698_v28  ;;  %1707 = vmatpush.msra.mxu1 %v10159_v24  ;;  %1829 = vmatpush.msrb.mxu0 %v9950_v49  ;;  %v205_v10 = vld [vmem:[#allocation7 + $0x1f0] sm:$0xff] }
 0x15b   :  { %14398 = vst [vmem:[#allocation322_spill] sm:$0xff] %v10101_v33  ;;  %v10145_v33 = vand.u32 4294901760, %v10124_v56  ;;  %1808 = vmatpush.msra.mxu3 %v10080_v15  ;;  %1772 = vmatpush.msra.mxu2 %v10124_v56  ;;  %v10188_v3 = vand.u32 4294901760, %v205_v10 }
 0x15c   :  { %14399 = vst [vmem:[#allocation323_spill] sm:$0xff] %v10106_v51  ;;  %v791_v27 = vadd.f32 %v790_v41, %v752_v63  ;;  %1713 = vmatpush.msra.mxu1 %v10167_v2  ;;  %v203_v63 = vld [vmem:[#allocation7 + $0x1e0] sm:$0xff]  ;;  %v201_v41 = vld [vmem:[#allocation7 + $0x1d0] sm:$0xff]  ;;  %1833 = vmatpush.msrb.mxu0 %v9965_v26 }
 0x15d   :  { %14400 = vst [vmem:[#allocation324_spill] sm:$0xff] %v10110_v53  ;;  %v199_v53 = vld [vmem:[#allocation7 + $0x1c0] sm:$0xff]  ;;  %1810 = vmatpush.msra.mxu3 %v10096_v25  ;;  %1925 = vmatpush.msrb.mxu2 %v10188_v3  ;;  %v197_v26 = vld [vmem:[#allocation7 + $0x1b0] sm:$0xff] }
 0x15e   :  { %14401 = vst [vmem:[#allocation325_spill] sm:$0xff] %v10113_v44  ;;  %v860_v28 = vadd.f32 %v859_v17, %v791_v27  ;;  %v10190_v27 = vand.u32 4294901760, %v203_v63  ;;  %v10192_v17 = vand.u32 4294901760, %v201_v41  ;;  %1837 = vmatpush.msrb.mxu0 %v9982_v35 }
 0x15f   :  { %14402 = vst [vmem:[#allocation326_spill] sm:$0xff] %v10120_v39  ;;  %v896_v55 = vpop.f32.mrf.mxu3 }
 0x160   :  { %14403 = vst [vmem:[#allocation327_spill] sm:$0xff] %v10124_v56  ;;  %v10205_v42 = vsub.f32 %v203_v63, %v10190_v27  ;;  %v10208_v49 = vsub.f32 %v201_v41, %v10192_v17  ;;  %1927 = vmatpush.msrb.mxu2 %v10190_v27  ;;  %1841 = vmatpush.msrb.mxu0 %v10000_v32  ;;  %v193_v32 = vld [vmem:[#allocation7 + $0x190] sm:$0xff] }
 0x161   :  { %14404 = vst [vmem:[#allocation328_spill] sm:$0xff] %v10129_v50  ;;  %v1717_v50 = vsub.f32 %v10124_v56, %v10145_v33  ;;  %v10202_v56 = vsub.f32 %v205_v10, %v10188_v3 }
 0x162   :  { %14405 = vst [vmem:[#allocation329_spill] sm:$0xff] %v10134_v59  ;;  %v10224_v63 = vand.u32 4294901760, %v10205_v42  ;;  %v10227_v41 = vand.u32 4294901760, %v10208_v49  ;;  %1929 = vmatpush.msrb.mxu2 %v10192_v17  ;;  %1845 = vmatpush.msrb.mxu0 %v10005_v31  ;;  %v10267_v31 = vand.u32 4294901760, %v193_v32 }
 0x163   :  { %14406 = vst [vmem:[#allocation330_spill] sm:$0xff] %v10140_v62  ;;  %v10174_v48 = vand.u32 4294901760, %v1717_v50  ;;  %v10184_v50 = vadd.f32 %v896_v55, %v860_v28  ;;  %v10198_v55 = vand.u32 4294901760, %v199_v53  ;;  %v10221_v10 = vand.u32 4294901760, %v10202_v56 }
 0x164   :  { %14407 = vst [vmem:[#allocation331_spill] sm:$0xff] %v10145_v33  ;;  %v1980_v44 = vsub.f32 %v10208_v49, %v10227_v41  ;;  %1849 = vmatpush.msrb.mxu0 %v10020_v61  ;;  %v189_v61 = vld [vmem:[#allocation7 + $0x170] sm:$0xff] }
 0x165   :  { %14408 = vst [vmem:[#allocation332_spill] sm:$0xff] %v10151_v54  ;;  %1719 = vmatpush.msra.mxu1 %v10174_v48  ;;  %v1581_v28 = vmul.f32 %v10184_v50, %v10184_v50  ;;  %v10215_v13 = vsub.f32 %v199_v53, %v10198_v55  ;;  %v1968_v62 = vsub.f32 %v10202_v56, %v10221_v10 }
 0x166   :  { %14409 = vst [vmem:[#allocation333_spill] sm:$0xff] %v10159_v24  ;;  %1931 = vmatpush.msrb.mxu2 %v10198_v55  ;;  %1853 = vmatpush.msrb.mxu0 %v10042_v0  ;;  %v10289_v8 = vand.u32 4294901760, %v1980_v44 }
 0x167   :  { %14410 = vst [vmem:[#allocation334_spill] sm:$0xff] %v10167_v2  ;;  %1888 = vmatpush.msrb.mxu1 %v9886_v36  ;;  %v10211_v23 = vand.u32 4294901760, %v1581_v28  ;;  %v195_v2 = vld [vmem:[#allocation7 + $0x1a0] sm:$0xff]  ;;  %v10236_v53 = vand.u32 4294901760, %v10215_v13 }
 0x168   :  { %14411 = vst [vmem:[#allocation335_spill] sm:$0xff] %v10174_v48  ;;  %v10217_v48 = vand.u32 4294901760, %v197_v26  ;;  %v10241_v54 = vand.u32 4294901760, %v195_v2  ;;  %1857 = vmatpush.msrb.mxu0 %v10054_v37 }
 0x169   :  { %14412 = vst [vmem:[#allocation336_spill] sm:$0xff] %v10184_v50  ;;  %1890 = vmatpush.msrb.mxu1 %v9892_v1  ;;  %v10231_v35 = vsub.f32 %v1581_v28, %v10211_v23  ;;  %v1974_v28 = vsub.f32 %v10205_v42, %v10224_v63  ;;  %v10263_v1 = vand.u32 4294901760, %v1968_v62 }
 0x16a   :  { %14413 = vst [vmem:[#allocation337_spill] sm:$0xff] %v10188_v3  ;;  %1721 = vmatmul.f32.vlgmr.msra.gmra.mxu1 %v10211_v23  ;;  %v10239_v24 = vsub.f32 %v197_v26, %v10217_v48  ;;  %1933 = vmatpush.msrb.mxu2 %v10217_v48 }
 0x16b   :  { %14414 = vst [vmem:[#allocation338_spill] sm:$0xff] %v10190_v27  ;;  %1892 = vmatpush.msrb.mxu1 %v9901_v5  ;;  %1775 = vmatmul.f32.vlgmr.msra.gmra.mxu2 %v10231_v35  ;;  %v10252_v26 = vand.u32 4294901760, %v10231_v35  ;;  %v10260_v5 = vsub.f32 %v195_v2, %v10241_v54  ;;  %v10265_v36 = vand.u32 4294901760, %v1974_v28  ;;  %v1986_v2 = vsub.f32 %v10215_v13, %v10236_v53 }
 0x16c   :  { %14415 = vst [vmem:[#allocation339_spill] sm:$0xff] %v10192_v17  ;;  %1970 = vmatpush.msrb.mxu3 %v10263_v1  ;;  %v10282_v28 = vsub.f32 %v193_v32, %v10267_v31  ;;  %1935 = vmatpush.msrb.mxu2 %v10241_v54 }
 0x16d   :  { %14416 = vst [vmem:[#allocation340_spill] sm:$0xff] %v10198_v55  ;;  %1894 = vmatpush.msrb.mxu1 %v9910_v16  ;;  %v10257_v16 = vand.u32 4294901760, %v10239_v24  ;;  %1814 = vmatmul.f32.vlgmr.msra.gmra.mxu3 %v10252_v26  ;;  %v1618_v22 = vsub.f32 %v10231_v35, %v10252_v26  ;;  %v10277_v62 = vand.u32 4294901760, %v10260_v5 }
 0x16e   :  { %14417 = vst [vmem:[#allocation341_spill] sm:$0xff] %v10202_v56  ;;  %1976 = vmatpush.msrb.mxu3 %v10265_v36  ;;  %v10299_v32 = vand.u32 4294901760, %v10282_v28  ;;  %1861 = vmatpush.msrb.mxu0 %v10074_v14 }
 0x16f   :  { %14418 = vst [vmem:[#allocation342_spill] sm:$0xff] %v10205_v42  ;;  %1896 = vmatpush.msrb.mxu1 %v9924_v58  ;;  %v10284_v58 = vand.u32 4294901760, %v191_v7  ;;  %v10287_v19 = vand.u32 4294901760, %v1618_v22  ;;  %v1992_v40 = vsub.f32 %v10239_v24, %v10257_v16  ;;  %v10305_v22 = vand.u32 4294901760, %v1986_v2  ;;  %1937 = vmatpush.msrb.mxu2 %v10267_v31 }
 0x170   :  { %14419 = vst [vmem:[#allocation343_spill] sm:$0xff] %v10208_v49  ;;  %v1998_v44 = vsub.f32 %v10260_v5, %v10277_v62  ;;  %1982 = vmatpush.msrb.mxu3 %v10289_v8  ;;  %v2004_v2 = vsub.f32 %v10282_v28, %v10299_v32  ;;  %1865 = vmatpush.msrb.mxu0 %v10090_v60 }
 0x171   :  { %14420 = vst [vmem:[#allocation344_spill] sm:$0xff] %v10215_v13  ;;  %1898 = vmatpush.msrb.mxu1 %v9939_v30  ;;  %v10294_v30 = vand.u32 4294901760, %v189_v61  ;;  %1620 = vmatmul.f32.vlgmr.msra.gmra.mxu0 %v10287_v19 }
 0x172   :  { %14421 = vst [vmem:[#allocation345_spill] sm:$0xff] %v10217_v48  ;;  %1988 = vmatpush.msrb.mxu3 %v10305_v22  ;;  %v10331_v37 = vand.u32 4294901760, %v1998_v44  ;;  %1939 = vmatpush.msrb.mxu2 %v10284_v58  ;;  %v10339_v14 = vand.u32 4294901760, %v2004_v2  ;;  %v185_v44 = vld [vmem:[#allocation7 + $0x150] sm:$0xff] }
 0x173   :  { %14422 = vst [vmem:[#allocation346_spill] sm:$0xff] %v10221_v10  ;;  %1900 = vmatpush.msrb.mxu1 %v9943_v46  ;;  %v10310_v0 = vsub.f32 %v189_v61, %v10294_v30  ;;  %1869 = vmatpush.msrb.mxu0 %v10106_v51  ;;  %v10354_v2 = vand.u32 4294901760, %v185_v44  ;;  %v183_v51 = vld [vmem:[#allocation7 + $0x140] sm:$0xff] }
 0x174   :  { %14423 = vst [vmem:[#allocation347_spill] sm:$0xff] %v10224_v63  ;;  %1941 = vmatpush.msrb.mxu2 %v10294_v30 }
 0x175   :  { %14424 = vst [vmem:[#allocation348_spill] sm:$0xff] %v10227_v41  ;;  %1902 = vmatpush.msrb.mxu1 %v9957_v9  ;;  %v10325_v61 = vand.u32 4294901760, %v10310_v0  ;;  %1873 = vmatpush.msrb.mxu0 %v10120_v39  ;;  %v181_v39 = vld [vmem:[#allocation7 + $0x130] sm:$0xff]  ;;  %v175_v9 = vld [vmem:[#allocation7 + $0x100] sm:$0xff] }
 0x176   :  { %14425 = vst [vmem:[#allocation349_spill] sm:$0xff] %v10231_v35  ;;  %v10427_v46 = vand.u32 4294901760, %v175_v9 }
 0x177   :  { %14426 = vst [vmem:[#allocation350_spill] sm:$0xff] %v10236_v53  ;;  %1904 = vmatpush.msrb.mxu1 %v9984_v6  ;;  %v2016_v60 = vsub.f32 %v10310_v0, %v10325_v61  ;;  %1877 = vmatpush.msrb.mxu0 %v10134_v59  ;;  %v10382_v59 = vand.u32 4294901760, %v181_v39  ;;  %v177_v6 = vld [vmem:[#allocation7 + $0x110] sm:$0xff] }
 0x178   :  { %14427 = vst [vmem:[#allocation351_spill] sm:$0xff] %v10239_v24 }
 0x179   :  { %14428 = vst [vmem:[#allocation352_spill] sm:$0xff] %v10241_v54  ;;  %1906 = vmatpush.msrb.mxu1 %v9991_v38  ;;  %1881 = vmatpush.msrb.mxu0 %v10145_v33 }
 0x17a   :  { %14429 = vst [vmem:[#allocation353_spill] sm:$0xff] %v10257_v16  ;;  %1883 = vmatmul.f32.vlgmr.msrb.gmra.mxu0 %v10211_v23 }
 0x17b   :  { %14430 = vst [vmem:[#allocation354_spill] sm:$0xff] %v10260_v5  ;;  %1908 = vmatpush.msrb.mxu1 %v10016_v57  ;;  %v10360_v57 = vand.u32 4294901760, %v2016_v60  ;;  %2068 = vmatpush.msra.mxu0 %v10202_v56 }
 0x17c   :  { %14431 = vst [vmem:[#allocation355_spill] sm:$0xff] %v10263_v1  ;;  %v10302_v1 = vsub.f32 %v191_v7, %v10284_v58  ;;  %v10320_v7 = vand.u32 4294901760, %v1992_v40 }
 0x17d   :  { %14432 = vst [vmem:[#allocation356_spill] sm:$0xff] %v10265_v36  ;;  %1910 = vmatpush.msrb.mxu1 %v10032_v34  ;;  %2071 = vmatpush.msra.mxu0 %v10205_v42 }
 0x17e   :  { %14433 = vst [vmem:[#allocation357_spill] sm:$0xff] %v10267_v31  ;;  %v10316_v36 = vand.u32 4294901760, %v10302_v1  ;;  %1994 = vmatpush.msrb.mxu3 %v10320_v7 }
 0x17f   :  { %14434 = vst [vmem:[#allocation358_spill] sm:$0xff] %v10277_v62  ;;  %1912 = vmatpush.msrb.mxu1 %v10048_v43  ;;  %v179_v43 = vld [vmem:[#allocation7 + $0x120] sm:$0xff]  ;;  %2074 = vmatpush.msra.mxu0 %v10208_v49 }
 0x180   :  { %14435 = vst [vmem:[#allocation359_spill] sm:$0xff] %v10282_v28  ;;  %v2010_v40 = vsub.f32 %v10302_v1, %v10316_v36  ;;  %2000 = vmatpush.msrb.mxu3 %v10331_v37 }
 0x181   :  { %14436 = vst [vmem:[#allocation360_spill] sm:$0xff] %v10284_v58  ;;  %1914 = vmatpush.msrb.mxu1 %v10064_v45  ;;  %v10399_v45 = vand.u32 4294901760, %v179_v43  ;;  %2077 = vmatpush.msra.mxu0 %v10215_v13 }
 0x182   :  { %14437 = vst [vmem:[#allocation361_spill] sm:$0xff] %v10289_v8  ;;  %v187_v8 = vld [vmem:[#allocation7 + $0x160] sm:$0xff]  ;;  %v10349_v38 = vand.u32 4294901760, %v2010_v40  ;;  %2006 = vmatpush.msrb.mxu3 %v10339_v14  ;;  %v10366_v40 = vsub.f32 %v185_v44, %v10354_v2 }
 0x183   :  { %14438 = vst [vmem:[#allocation362_spill] sm:$0xff] %v10294_v30  ;;  %1916 = vmatpush.msrb.mxu1 %v10080_v15  ;;  %v10415_v15 = vsub.f32 %v179_v43, %v10399_v45  ;;  %2080 = vmatpush.msra.mxu0 %v10239_v24 }
 0x184   :  { %14439 = vst [vmem:[#allocation363_spill] sm:$0xff] %v10299_v32  ;;  %2012 = vmatpush.msrb.mxu3 %v10349_v38 }
 0x185   :  { %14440 = vst [vmem:[#allocation364_spill] sm:$0xff] %v10302_v1  ;;  %1918 = vmatpush.msrb.mxu1 %v10096_v25  ;;  %v10432_v43 = vand.u32 4294901760, %v10415_v15  ;;  %v10441_v25 = vsub.f32 %v175_v9, %v10427_v46  ;;  %2083 = vmatpush.msra.mxu0 %v10260_v5 }
 0x186   :  { %14441 = vst [vmem:[#allocation365_spill] sm:$0xff] %v10305_v22  ;;  %v10343_v22 = vand.u32 4294901760, %v187_v8  ;;  %2018 = vmatpush.msrb.mxu3 %v10360_v57  ;;  %1920 = vmatmul.f32.vlgmr.msrb.gmra.mxu1 %v10211_v23 }
 0x187   :  { %14442 = vst [vmem:[#allocation366_spill] sm:$0xff] %v10310_v0  ;;  %2121 = vmatpush.msra.mxu1 %v10188_v3  ;;  %v10452_v13 = vand.u32 4294901760, %v10441_v25  ;;  %2086 = vmatpush.msra.mxu0 %v10282_v28 }
 0x188   :  { %14443 = vst [vmem:[#allocation367_spill] sm:$0xff] %v10316_v36  ;;  %1943 = vmatpush.msrb.mxu2 %v10343_v22 }
 0x189   :  { %14444 = vst [vmem:[#allocation368_spill] sm:$0xff] %v10320_v7  ;;  %v10352_v7 = vsub.f32 %v187_v8, %v10343_v22  ;;  %v10368_v8 = vand.u32 4294901760, %v183_v51  ;;  %2123 = vmatpush.msra.mxu1 %v10190_v27  ;;  %v2058_v24 = vsub.f32 %v10441_v25, %v10452_v13  ;;  %2089 = vmatpush.msra.mxu0 %v10302_v1  ;;  %v168_v1 = vld [vmem:[#allocation7 + $0xc8] sm:$0xff] }
 0x18a   :  { %14445 = vst [vmem:[#allocation369_spill] sm:$0xff] %v10325_v61  ;;  %1945 = vmatpush.msrb.mxu2 %v10354_v2 }
 0x18b   :  { %14446 = vst [vmem:[#allocation370_spill] sm:$0xff] %v10331_v37  ;;  %v10363_v37 = vand.u32 4294901760, %v10352_v7  ;;  %v10380_v44 = vsub.f32 %v183_v51, %v10368_v8  ;;  %v10396_v51 = vsub.f32 %v181_v39, %v10382_v59  ;;  %v10411_v39 = vand.u32 4294901760, %v177_v6  ;;  %2125 = vmatpush.msra.mxu1 %v10192_v17  ;;  %2092 = vmatpush.msra.mxu0 %v10310_v0 }
 0x18c   :  { %14447 = vst [vmem:[#allocation371_spill] sm:$0xff] %v10339_v14  ;;  %v10377_v14 = vand.u32 4294901760, %v10366_v40  ;;  %1947 = vmatpush.msrb.mxu2 %v10368_v8 }
 0x18d   :  { %14448 = vst [vmem:[#allocation372_spill] sm:$0xff] %v10343_v22  ;;  %v2022_v60 = vsub.f32 %v10352_v7, %v10363_v37  ;;  %v10393_v34 = vand.u32 4294901760, %v10380_v44  ;;  %2127 = vmatpush.msra.mxu1 %v10198_v55  ;;  %2095 = vmatpush.msra.mxu0 %v10352_v7 }
 0x18e   :  { %14449 = vst [vmem:[#allocation373_spill] sm:$0xff] %v10349_v38  ;;  %v2028_v33 = vsub.f32 %v10366_v40, %v10377_v14  ;;  %1949 = vmatpush.msrb.mxu2 %v10382_v59 }
 0x18f   :  { %14450 = vst [vmem:[#allocation374_spill] sm:$0xff] %v10352_v7  ;;  %v10388_v38 = vand.u32 4294901760, %v2022_v60  ;;  %v2034_v56 = vsub.f32 %v10380_v44, %v10393_v34  ;;  %2129 = vmatpush.msra.mxu1 %v10217_v48  ;;  %2098 = vmatpush.msra.mxu0 %v10366_v40  ;;  %v166_v7 = vld [vmem:[#allocation7 + $0xb8] sm:$0xff] }
 0x190   :  { %14451 = vst [vmem:[#allocation375_spill] sm:$0xff] %v10354_v2  ;;  %v10404_v60 = vand.u32 4294901760, %v2028_v33  ;;  %1951 = vmatpush.msrb.mxu2 %v10399_v45 }
 0x191   :  { %14452 = vst [vmem:[#allocation376_spill] sm:$0xff] %v10360_v57  ;;  %2024 = vmatpush.msrb.mxu3 %v10388_v38  ;;  %v10409_v57 = vand.u32 4294901760, %v10396_v51  ;;  %v10420_v33 = vand.u32 4294901760, %v2034_v56  ;;  %2131 = vmatpush.msra.mxu1 %v10241_v54 }
 0x192   :  { %14453 = vst [vmem:[#allocation377_spill] sm:$0xff] %v10363_v37  ;;  %1953 = vmatpush.msrb.mxu2 %v10411_v39  ;;  %2101 = vmatpush.msra.mxu0 %v10380_v44 }
 0x193   :  { %14454 = vst [vmem:[#allocation378_spill] sm:$0xff] %v10366_v40  ;;  %v2040_v42 = vsub.f32 %v10396_v51, %v10409_v57  ;;  %2030 = vmatpush.msrb.mxu3 %v10404_v60  ;;  %2133 = vmatpush.msra.mxu1 %v10267_v31  ;;  %v10503_v40 = vand.u32 4294901760, %v168_v1 }
 0x194   :  { %14455 = vst [vmem:[#allocation379_spill] sm:$0xff] %v10368_v8  ;;  %1955 = vmatpush.msrb.mxu2 %v10427_v46  ;;  %2104 = vmatpush.msra.mxu0 %v10396_v51 }
 0x195   :  { %14456 = vst [vmem:[#allocation380_spill] sm:$0xff] %v10377_v14  ;;  %v10435_v49 = vand.u32 4294901760, %v2040_v42  ;;  %2036 = vmatpush.msrb.mxu3 %v10420_v33  ;;  %2135 = vmatpush.msra.mxu1 %v10284_v58 }
 0x196   :  { %14457 = vst [vmem:[#allocation381_spill] sm:$0xff] %v10380_v44  ;;  %2162 = vmatpush.msra.mxu2 %v10221_v10  ;;  %v170_v10 = vld [vmem:[#allocation7 + $0xd8] sm:$0xff]  ;;  %2107 = vmatpush.msra.mxu0 %v10415_v15 }
 0x197   :  { %14458 = vst [vmem:[#allocation382_spill] sm:$0xff] %v10382_v59  ;;  %2042 = vmatpush.msrb.mxu3 %v10435_v49  ;;  %v10494_v28 = vand.u32 4294901760, %v170_v10  ;;  %2137 = vmatpush.msra.mxu1 %v10294_v30 }
 0x198   :  { %14459 = vst [vmem:[#allocation383_spill] sm:$0xff] %v10388_v38  ;;  %v10425_v38 = vsub.f32 %v177_v6, %v10411_v39  ;;  %v2046_v6 = vsub.f32 %v10415_v15, %v10432_v43  ;;  %2166 = vmatpush.msra.mxu2 %v10224_v63 }
 0x199   :  { %14460 = vst [vmem:[#allocation384_spill] sm:$0xff] %v10393_v34  ;;  %2139 = vmatpush.msra.mxu1 %v10343_v22  ;;  %v10513_v44 = vsub.f32 %v170_v10, %v10494_v28  ;;  %v160_v10 = vld [vmem:[#allocation7 + $0x88] sm:$0xff] }
 0x19a   :  { %14461 = vst [vmem:[#allocation385_spill] sm:$0xff] %v10396_v51  ;;  %v10438_v56 = vand.u32 4294901760, %v10425_v38  ;;  %v10457_v9 = vand.u32 4294901760, %v2046_v6  ;;  %v174_v6 = vld [vmem:[#allocation7 + $0xf8] sm:$0xff]  ;;  %2170 = vmatpush.msra.mxu2 %v10227_v41  ;;  %v10525_v51 = vsub.f32 %v168_v1, %v10503_v40  ;;  %2110 = vmatpush.msra.mxu0 %v10425_v38 }
 0x19b   :  { %14462 = vst [vmem:[#allocation386_spill] sm:$0xff] %v10399_v45  ;;  %2141 = vmatpush.msra.mxu1 %v10354_v2 }
 0x19c   :  { %14463 = vst [vmem:[#allocation387_spill] sm:$0xff] %v10404_v60  ;;  %v2052_v42 = vsub.f32 %v10425_v38, %v10438_v56  ;;  %2048 = vmatpush.msrb.mxu3 %v10457_v9  ;;  %v10468_v60 = vand.u32 4294901760, %v2058_v24  ;;  %v10479_v24 = vand.u32 4294901760, %v174_v6  ;;  %2174 = vmatpush.msra.mxu2 %v10236_v53 }
 0x19d   :  { %14464 = vst [vmem:[#allocation388_spill] sm:$0xff] %v10409_v57  ;;  %2143 = vmatpush.msra.mxu1 %v10368_v8  ;;  %2113 = vmatpush.msra.mxu0 %v10441_v25 }
 0x19e   :  { %14465 = vst [vmem:[#allocation389_spill] sm:$0xff] %v10411_v39  ;;  %v10492_v0 = vsub.f32 %v174_v6, %v10479_v24  ;;  %2178 = vmatpush.msra.mxu2 %v10257_v16  ;;  %v164_v6 = vld [vmem:[#allocation7 + $0xa8] sm:$0xff]  ;;  %v10515_v16 = vand.u32 4294901760, %v166_v7 }
 0x19f   :  { %14466 = vst [vmem:[#allocation390_spill] sm:$0xff] %v10415_v15  ;;  %v10527_v5 = vand.u32 4294901760, %v164_v6  ;;  %2145 = vmatpush.msra.mxu1 %v10382_v59  ;;  %2266 = vmatpush.msrb.mxu0 %v10479_v24 }
 0x1a0   :  { %14467 = vst [vmem:[#allocation391_spill] sm:$0xff] %v10420_v33  ;;  %v10460_v33 = vand.u32 4294901760, %v2052_v42  ;;  %v172_v42 = vld [vmem:[#allocation7 + $0xe8] sm:$0xff]  ;;  %2182 = vmatpush.msra.mxu2 %v10277_v62  ;;  %v10509_v41 = vand.u32 4294901760, %v10492_v0  ;;  %v10541_v1 = vsub.f32 %v166_v7, %v10515_v16 }
 0x1a1   :  { %14468 = vst [vmem:[#allocation392_spill] sm:$0xff] %v10425_v38  ;;  %v10485_v63 = vand.u32 4294901760, %v172_v42  ;;  %v10555_v7 = vsub.f32 %v164_v6, %v10527_v5  ;;  %2147 = vmatpush.msra.mxu1 %v10399_v45 }
 0x1a2   :  { %14469 = vst [vmem:[#allocation393_spill] sm:$0xff] %v10427_v46  ;;  %2054 = vmatpush.msrb.mxu3 %v10460_v33  ;;  %2186 = vmatpush.msra.mxu2 %v10299_v32  ;;  %v2309_v15 = vsub.f32 %v10492_v0, %v10509_v41  ;;  %v10537_v32 = vand.u32 4294901760, %v10513_v44  ;;  %v10570_v6 = vand.u32 4294901760, %v10541_v1 }
 0x1a3   :  { %14470 = vst [vmem:[#allocation394_spill] sm:$0xff] %v10432_v43  ;;  %v10501_v53 = vsub.f32 %v172_v42, %v10485_v63  ;;  %v162_v42 = vld [vmem:[#allocation7 + $0x98] sm:$0xff]  ;;  %2149 = vmatpush.msra.mxu1 %v10411_v39  ;;  %2268 = vmatpush.msrb.mxu0 %v10485_v63 }
 0x1a4   :  { %14471 = vst [vmem:[#allocation395_spill] sm:$0xff] %v10435_v49  ;;  %2060 = vmatpush.msrb.mxu3 %v10468_v60  ;;  %2190 = vmatpush.msra.mxu2 %v10316_v36  ;;  %v10551_v36 = vand.u32 4294901760, %v10525_v51  ;;  %v10558_v49 = vperm.slane %v9914_v47, 1 }
 0x1a5   :  { %14472 = vst [vmem:[#allocation396_spill] sm:$0xff] %v10438_v56  ;;  %v10521_v62 = vand.u32 4294901760, %v10501_v53  ;;  %2151 = vmatpush.msra.mxu1 %v10427_v46  ;;  %2270 = vmatpush.msrb.mxu0 %v10494_v28 }
 0x1a6   :  { %14473 = vst [vmem:[#allocation397_spill] sm:$0xff] %v10441_v25  ;;  %2229 = vmatpush.msra.mxu3 %v10188_v3  ;;  %2194 = vmatpush.msra.mxu2 %v10325_v61  ;;  %v156_v61 = vld [vmem:[#allocation7 + $0x68] sm:$0xff] }
 0x1a7   :  { %14474 = vst [vmem:[#allocation398_spill] sm:$0xff] %v10452_v13  ;;  %v2315_v38 = vsub.f32 %v10501_v53, %v10521_v62  ;;  %2272 = vmatpush.msrb.mxu0 %v10503_v40 }
 0x1a8   :  { %14475 = vst [vmem:[#allocation399_spill] sm:$0xff] %v10457_v9  ;;  %2231 = vmatpush.msra.mxu3 %v10190_v27  ;;  %v158_v9 = vld [vmem:[#allocation7 + $0x78] sm:$0xff]  ;;  %2198 = vmatpush.msra.mxu2 %v10363_v37  ;;  %v1038_v27 = vpop.f32.mrf.mxu1 }
 0x1a9   :  { %14476 = vst [vmem:[#allocation400_spill] sm:$0xff] %v10460_v33  ;;  %v10544_v33 = vand.u32 4294901760, %v160_v10  ;;  %v10573_v47 = vand.u32 4294901760, %v158_v9  ;;  %2274 = vmatpush.msrb.mxu0 %v10515_v16 }
 0x1aa   :  { %14477 = vst [vmem:[#allocation401_spill] sm:$0xff] %v10468_v60  ;;  %2233 = vmatpush.msra.mxu3 %v10192_v17  ;;  %v10530_v60 = vand.u32 4294901760, %v162_v42  ;;  %v10586_v17 = vand.u32 4294901760, %v10555_v7  ;;  %2202 = vmatpush.msra.mxu2 %v10377_v14 }
 0x1ab   :  { %14478 = vst [vmem:[#allocation402_spill] sm:$0xff] %v10492_v0  ;;  %2276 = vmatpush.msrb.mxu0 %v10527_v5 }
 0x1ac   :  { %2235 = vmatpush.msra.mxu3 %v10198_v55  ;;  %14479 = vst [vmem:[#allocation403_spill] sm:$0xff] %v10501_v53  ;;  %v10563_v25 = vsub.f32 %v162_v42, %v10530_v60  ;;  %v10579_v42 = vsub.f32 %v160_v10, %v10544_v33  ;;  %v2327_v55 = vsub.f32 %v10525_v51, %v10551_v36  ;;  %v152_v10 = vld [vmem:[#allocation7 + $0x48] sm:$0xff] }
 0x1ad   :  { %14480 = vst [vmem:[#allocation404_spill] sm:$0xff] %v10509_v41  ;;  %2206 = vmatpush.msra.mxu2 %v10393_v34  ;;  %2278 = vmatpush.msrb.mxu0 %v10530_v60 }
 0x1ae   :  { %2237 = vmatpush.msra.mxu3 %v10217_v48  ;;  %14481 = vst [vmem:[#allocation405_spill] sm:$0xff] %v10513_v44  ;;  %v10581_v48 = vand.u32 4294901760, %v2315_v38  ;;  %v10596_v38 = vand.u32 4294901760, %v10563_v25  ;;  %v10611_v14 = vand.u32 4294901760, %v10579_v42 }
 0x1af   :  { %14482 = vst [vmem:[#allocation406_spill] sm:$0xff] %v10521_v62  ;;  %2210 = vmatpush.msra.mxu2 %v10409_v57  ;;  %v146_v57 = vld [vmem:[#allocation7 + $0x18] sm:$0xff]  ;;  %2280 = vmatpush.msrb.mxu0 %v10544_v33 }
 0x1b0   :  { %2239 = vmatpush.msra.mxu3 %v10241_v54  ;;  %14483 = vst [vmem:[#allocation407_spill] sm:$0xff] %v10525_v51  ;;  %v10565_v54 = vand.u32 4294901760, %v2309_v15  ;;  %v154_v15 = vld [vmem:[#allocation7 + $0x58] sm:$0xff]  ;;  %v2345_v34 = vsub.f32 %v10563_v25, %v10596_v38 }
 0x1b1   :  { %14484 = vst [vmem:[#allocation408_spill] sm:$0xff] %v10537_v32  ;;  %2214 = vmatpush.msra.mxu2 %v10432_v43  ;;  %v144_v43 = vld [vmem:[#allocation7 + $0x8] sm:$0xff]  ;;  %2282 = vmatpush.msrb.mxu0 %v10573_v47 }
 0x1b2   :  { %2241 = vmatpush.msra.mxu3 %v10267_v31  ;;  %14485 = vst [vmem:[#allocation409_spill] sm:$0xff] %v10541_v1  ;;  %v937_v31 = vpop.f32.mrf.mxu0  ;;  %2311 = vmatpush.msrb.mxu1 %v10565_v54  ;;  %v10658_v4 = vand.u32 4294901760, %v2345_v34 }
 0x1b3   :  { %14486 = vst [vmem:[#allocation410_spill] sm:$0xff] %v10551_v36  ;;  %v938_v37 = vadd.f32 %v937_v31, %v10558_v49  ;;  %v10605_v31 = vsub.f32 %v158_v9, %v10573_v47  ;;  %2218 = vmatpush.msra.mxu2 %v10438_v56 }
 0x1b4   :  { %2243 = vmatpush.msra.mxu3 %v10284_v58  ;;  %14487 = vst [vmem:[#allocation411_spill] sm:$0xff] %v10555_v7  ;;  %v2321_v58 = vsub.f32 %v10513_v44, %v10537_v32  ;;  %2317 = vmatpush.msrb.mxu1 %v10581_v48 }
 0x1b5   :  { %14488 = vst [vmem:[#allocation412_spill] sm:$0xff] %v10558_v49  ;;  %v10607_v49 = vand.u32 4294901760, %v154_v15  ;;  %v1039_v18 = vadd.f32 %v1038_v27, %v938_v37  ;;  %v10639_v27 = vand.u32 4294901760, %v150_v12  ;;  %2222 = vmatpush.msra.mxu2 %v10452_v13 }
 0x1b6   :  { %14489 = vst [vmem:[#allocation413_spill] sm:$0xff] %v10563_v25  ;;  %2245 = vmatpush.msra.mxu3 %v10294_v30  ;;  %v10589_v30 = vand.u32 4294901760, %v156_v61  ;;  %v10599_v3 = vand.u32 4294901760, %v2321_v58  ;;  %v10615_v58 = vand.u32 4294901760, %v2327_v55  ;;  %v1092_v55 = vpop.f32.mrf.mxu2 }
 0x1b7   :  { %14490 = vst [vmem:[#allocation414_spill] sm:$0xff] %v10565_v54  ;;  %v2339_v54 = vsub.f32 %v10555_v7, %v10586_v17  ;;  %v10637_v37 = vsub.f32 %v154_v15, %v10607_v49  ;;  %v1093_v20 = vadd.f32 %v1092_v55, %v1039_v18  ;;  %v10669_v18 = vsub.f32 %v150_v12, %v10639_v27 }
 0x1b8   :  { %14491 = vst [vmem:[#allocation415_spill] sm:$0xff] %v10570_v6  ;;  %2247 = vmatpush.msra.mxu3 %v10343_v22  ;;  %v2333_v22 = vsub.f32 %v10541_v1, %v10570_v6  ;;  %v10621_v9 = vsub.f32 %v156_v61, %v10589_v30  ;;  %2323 = vmatpush.msrb.mxu1 %v10599_v3 }
 0x1b9   :  { %14492 = vst [vmem:[#allocation416_spill] sm:$0xff] %v10579_v42  ;;  %v2351_v61 = vsub.f32 %v10579_v42, %v10611_v14  ;;  %v10696_v29 = vand.u32 4294901760, %v10669_v18  ;;  %2284 = vmatpush.msrb.mxu0 %v10589_v30 }
 0x1ba   :  { %14493 = vst [vmem:[#allocation417_spill] sm:$0xff] %v10581_v48  ;;  %2249 = vmatpush.msra.mxu3 %v10354_v2  ;;  %v10623_v2 = vand.u32 4294901760, %v152_v10  ;;  %v10630_v48 = vand.u32 4294901760, %v2333_v22  ;;  %2329 = vmatpush.msrb.mxu1 %v10615_v58  ;;  %v10646_v22 = vand.u32 4294901760, %v2339_v54  ;;  %v1131_v54 = vpop.f32.mrf.mxu3 }
 0x1bb   :  { %14494 = vst [vmem:[#allocation418_spill] sm:$0xff] %v10586_v17  ;;  %v10674_v34 = vand.u32 4294901760, %v2351_v61  ;;  %v1200_v61 = vpop.f32.mrf.mxu0  ;;  %2286 = vmatpush.msrb.mxu0 %v10607_v49 }
 0x1bc   :  { %14495 = vst [vmem:[#allocation419_spill] sm:$0xff] %v10596_v38  ;;  %2251 = vmatpush.msra.mxu3 %v10368_v8  ;;  %v10633_v8 = vand.u32 4294901760, %v10605_v31  ;;  %v10653_v15 = vsub.f32 %v152_v10, %v10623_v2  ;;  %2335 = vmatpush.msrb.mxu1 %v10630_v48  ;;  %v10671_v10 = vand.u32 4294901760, %v146_v57 }
 0x1bd   :  { %14496 = vst [vmem:[#allocation420_spill] sm:$0xff] %v10599_v3  ;;  %v10649_v3 = vand.u32 4294901760, %v10621_v9  ;;  %2288 = vmatpush.msrb.mxu0 %v10623_v2 }
 0x1be   :  { %14497 = vst [vmem:[#allocation421_spill] sm:$0xff] %v10605_v31  ;;  %2253 = vmatpush.msra.mxu3 %v10382_v59  ;;  %v10655_v59 = vand.u32 4294901760, %v148_v21  ;;  %2341 = vmatpush.msrb.mxu1 %v10646_v22  ;;  %v10681_v56 = vand.u32 4294901760, %v10653_v15 }
 0x1bf   :  { %14498 = vst [vmem:[#allocation422_spill] sm:$0xff] %v10607_v49  ;;  %v2363_v55 = vsub.f32 %v10621_v9, %v10649_v3  ;;  %2290 = vmatpush.msrb.mxu0 %v10639_v27 }
 0x1c0   :  { %14499 = vst [vmem:[#allocation423_spill] sm:$0xff] %v10611_v14  ;;  %2255 = vmatpush.msra.mxu3 %v10399_v45  ;;  %v10665_v45 = vand.u32 4294901760, %v10637_v37  ;;  %v10685_v12 = vsub.f32 %v148_v21, %v10655_v59  ;;  %2347 = vmatpush.msrb.mxu1 %v10658_v4 }
 0x1c1   :  { %14500 = vst [vmem:[#allocation424_spill] sm:$0xff] %v10615_v58  ;;  %v2357_v58 = vsub.f32 %v10605_v31, %v10633_v8  ;;  %v10703_v21 = vand.u32 4294901760, %v2363_v55  ;;  %v2381_v55 = vsub.f32 %v10669_v18, %v10696_v29  ;;  %2292 = vmatpush.msrb.mxu0 %v10655_v59 }
 0x1c2   :  { %14501 = vst [vmem:[#allocation425_spill] sm:$0xff] %v10621_v9  ;;  %2257 = vmatpush.msra.mxu3 %v10411_v39  ;;  %v1132_v39 = vadd.f32 %v1131_v54, %v1093_v20  ;;  %2353 = vmatpush.msrb.mxu1 %v10674_v34  ;;  %v2375_v20 = vsub.f32 %v10653_v15, %v10681_v56 }
 0x1c3   :  { %14502 = vst [vmem:[#allocation426_spill] sm:$0xff] %v10623_v2  ;;  %v10691_v13 = vand.u32 4294901760, %v2357_v58  ;;  %v10708_v58 = vand.u32 4294901760, %v10685_v12  ;;  %v10733_v11 = vand.u32 4294901760, %v2381_v55  ;;  %2294 = vmatpush.msrb.mxu0 %v10671_v10 }
 0x1c4   :  { %14503 = vst [vmem:[#allocation427_spill] sm:$0xff] %v10630_v48  ;;  %2259 = vmatpush.msra.mxu3 %v10427_v46  ;;  %v10687_v48 = vand.u32 4294901760, %v144_v43  ;;  %v10699_v46 = vsub.f32 %v146_v57, %v10671_v10  ;;  %v1237_v57 = vpop.f32.mrf.mxu1 }
 0x1c5   :  { %14504 = vst [vmem:[#allocation428_spill] sm:$0xff] %v10633_v8  ;;  %2359 = vmatpush.msrb.mxu1 %v10691_v13 }
 0x1c6   :  { %14505 = vst [vmem:[#allocation429_spill] sm:$0xff] %v10637_v37  ;;  %v10711_v54 = vsub.f32 %v144_v43, %v10687_v48  ;;  %v10724_v43 = vand.u32 4294901760, %v2375_v20  ;;  %2296 = vmatpush.msrb.mxu0 %v10687_v48 }
 0x1c7   :  { %14506 = vst [vmem:[#allocation430_spill] sm:$0xff] %v10639_v27  ;;  %2365 = vmatpush.msrb.mxu1 %v10703_v21 }
 0x1c8   :  { %14507 = vst [vmem:[#allocation431_spill] sm:$0xff] %v10646_v22  ;;  %v2369_v22 = vsub.f32 %v10637_v37, %v10665_v45 }
 0x1c9   :  { %14508 = vst [vmem:[#allocation432_spill] sm:$0xff] %v10649_v3 }
 0x1ca   :  { %14509 = vst [vmem:[#allocation433_spill] sm:$0xff] %v10653_v15  ;;  %v10715_v52 = vand.u32 4294901760, %v2369_v22 }
 0x1cb   :  { %14510 = vst [vmem:[#allocation434_spill] sm:$0xff] %v10655_v59 }
 0x1cc   :  { %14511 = vst [vmem:[#allocation435_spill] sm:$0xff] %v10658_v4  ;;  %v1201_v4 = vadd.f32 %v1200_v61, %v1132_v39  ;;  %v2387_v39 = vsub.f32 %v10685_v12, %v10708_v58  ;;  %v10729_v61 = vand.u32 4294901760, %v10711_v54  ;;  %2371 = vmatpush.msrb.mxu1 %v10715_v52 }
 0x1cd   :  { %14512 = vst [vmem:[#allocation436_spill] sm:$0xff] %v10665_v45 }
 0x1ce   :  { %14513 = vst [vmem:[#allocation437_spill] sm:$0xff] %v10669_v18  ;;  %v1238_v22 = vadd.f32 %v1237_v57, %v1201_v4  ;;  %2377 = vmatpush.msrb.mxu1 %v10724_v43  ;;  %v10739_v20 = vand.u32 4294901760, %v2387_v39  ;;  %v1379_v57 = vpop.f32.mrf.mxu3 }
 0x1cf   :  { %14514 = vst [vmem:[#allocation438_spill] sm:$0xff] %v10671_v10 }
 0x1d0   :  { %14515 = vst [vmem:[#allocation439_spill] sm:$0xff] %v10674_v34  ;;  %v10720_v34 = vand.u32 4294901760, %v10699_v46  ;;  %2383 = vmatpush.msrb.mxu1 %v10733_v11 }
 0x1d1   :  { %14516 = vst [vmem:[#allocation440_spill] sm:$0xff] %v10681_v56 }
 0x1d2   :  { %14517 = vst [vmem:[#allocation441_spill] sm:$0xff] %v10685_v12  ;;  %v2393_v50 = vsub.f32 %v10699_v46, %v10720_v34  ;;  %2389 = vmatpush.msrb.mxu1 %v10739_v20 }
 0x1d3   :  { %14518 = vst [vmem:[#allocation442_spill] sm:$0xff] %v10687_v48 }
 0x1d4   :  { %14519 = vst [vmem:[#allocation443_spill] sm:$0xff] %v10691_v13  ;;  %v1278_v13 = vpop.f32.mrf.mxu2  ;;  %v10745_v55 = vand.u32 4294901760, %v2393_v50 }
 0x1d5   :  { %14520 = vst [vmem:[#allocation444_spill] sm:$0xff] %v10696_v29  ;;  %v1279_v4 = vadd.f32 %v1278_v13, %v1238_v22 }
 0x1d6   :  { %14521 = vst [vmem:[#allocation445_spill] sm:$0xff] %v10699_v46  ;;  %2395 = vmatpush.msrb.mxu1 %v10745_v55 }
 0x1d7   :  { %14522 = vst [vmem:[#allocation446_spill] sm:$0xff] %v10703_v21  ;;  %v2399_v21 = vsub.f32 %v10711_v54, %v10729_v61  ;;  %v1380_v39 = vadd.f32 %v1379_v57, %v1279_v4  ;;  %v200_v57 = vld [vmem:[#allocation7 + $0x1c8] sm:$0xff] }
 0x1d8   :  { %14523 = vst [vmem:[#allocation447_spill] sm:$0xff] %v10708_v58 }
 0x1d9   :  { %14524 = vst [vmem:[#allocation448_spill] sm:$0xff] %v10711_v54  ;;  %v10749_v35 = vand.u32 4294901760, %v2399_v21  ;;  %v1472_v54 = vpop.f32.mrf.mxu1 }
 0x1da   :  { %14525 = vst [vmem:[#allocation449_spill] sm:$0xff] %v10715_v52  ;;  %v1433_v52 = vpop.f32.mrf.mxu0 }
 0x1db   :  { %14526 = vst [vmem:[#allocation450_spill] sm:$0xff] %v10720_v34  ;;  %2401 = vmatpush.msrb.mxu1 %v10749_v35 }
 0x1dc   :  { %14527 = vst [vmem:[#allocation451_spill] sm:$0xff] %v10724_v43  ;;  %v1434_v43 = vadd.f32 %v1433_v52, %v1380_v39  ;;  %v1541_v22 = vpop.f32.mrf.mxu2 }
 0x1dd   :  { %14528 = vst [vmem:[#allocation452_spill] sm:$0xff] %v10729_v61 }
 0x1de   :  { %14529 = vst [vmem:[#allocation453_spill] sm:$0xff] %v10733_v11  ;;  %v1473_v13 = vadd.f32 %v1472_v54, %v1434_v43  ;;  %v1578_v11 = vpop.f32.mrf.mxu3  ;;  %v204_v54 = vld [vmem:[#allocation7 + $0x1e8] sm:$0xff]  ;;  %v202_v43 = vld [vmem:[#allocation7 + $0x1d8] sm:$0xff] }
 0x1df   :  { %14530 = vst [vmem:[#allocation454_spill] sm:$0xff] %v10739_v20  ;;  %v10804_v4 = vand.u32 4294901760, %v204_v54 }
 0x1e0   :  { %14531 = vst [vmem:[#allocation455_spill] sm:$0xff] %v10745_v55  ;;  %v1542_v46 = vadd.f32 %v1541_v22, %v1473_v13  ;;  %v10813_v13 = vand.u32 4294901760, %v202_v43  ;;  %v198_v22 = vld [vmem:[#allocation7 + $0x1b8] sm:$0xff] }
 0x1e1   :  { %14532 = vst [vmem:[#allocation456_spill] sm:$0xff] %v10749_v35 }
 0x1e2   :  { %v10753_v50 = vadd.f32 %v1578_v11, %v1542_v46  ;;  %14534 = vst [vmem:[#allocation458_spill] sm:$0xff] %v10804_v4 }
 0x1e3   :  { %14536 = vst [vmem:[#allocation460_spill] sm:$0xff] %v10813_v13 }
 0x1e4   :  { %v1582_v12 = vmul.f32 %v10753_v50, %v10753_v50 }
 0x1e6   :  { %v10757_v61 = vand.u32 4294901760, %v1582_v12 }
 0x1e8   :  { %v10760_v21 = vsub.f32 %v1582_v12, %v10757_v61  ;;  %2062 = vmatmul.f32.vlgmr.msrb.gmra.mxu3 %v10757_v61  ;;  %v206_v12 = vld [vmem:[#allocation7 + $0x1f8] sm:$0xff] }
 0x1e9   :  { %2462 = vmatpush.msrb.mxu3 %v10479_v24 }
 0x1ea   :  { %2116 = vmatmul.f32.vlgmr.msra.gmra.mxu0 %v10760_v21  ;;  %v10766_v52 = vand.u32 4294901760, %v10760_v21 }
 0x1eb   :  { %2464 = vmatpush.msrb.mxu3 %v10485_v63  ;;  %2503 = vmatpush.msra.mxu0 %v10509_v41  ;;  %v14566_v41 = vld [vmem:[#allocation441_spill] sm:$0xff] }
 0x1ec   :  { %2155 = vmatmul.f32.vlgmr.msra.gmra.mxu1 %v10766_v52  ;;  %v1959_v11 = vsub.f32 %v10760_v21, %v10766_v52 }
 0x1ed   :  { %2466 = vmatpush.msrb.mxu3 %v10494_v28  ;;  %2507 = vmatpush.msra.mxu0 %v10521_v62 }
 0x1ee   :  { %2570 = vmatpush.msra.mxu1 %v10479_v24  ;;  %v10776_v46 = vand.u32 4294901760, %v1959_v11  ;;  %v10820_v11 = vsub.f32 %v204_v54, %v10804_v4  ;;  %v196_v54 = vld [vmem:[#allocation7 + $0x1a8] sm:$0xff] }
 0x1ef   :  { %2468 = vmatpush.msrb.mxu3 %v10503_v40  ;;  %2511 = vmatpush.msra.mxu0 %v10537_v32 }
 0x1f0   :  { %2572 = vmatpush.msra.mxu1 %v10485_v63  ;;  %1961 = vmatmul.f32.vlgmr.msrb.gmra.mxu2 %v10776_v46  ;;  %14537 = vst [vmem:[#allocation461_spill] sm:$0xff] %v10820_v11 }
 0x1f1   :  { %2261 = vmatmul.f32.vlgmr.msra.gmra.mxu3 %v10757_v61  ;;  %2409 = vmatpush.msrb.mxu2 %v10492_v0 }
 0x1f2   :  { %2470 = vmatpush.msrb.mxu3 %v10515_v16  ;;  %2515 = vmatpush.msra.mxu0 %v10551_v36 }
 0x1f3   :  { %2574 = vmatpush.msra.mxu1 %v10494_v28  ;;  %2302 = vmatmul.f32.vlgmr.msrb.gmra.mxu0 %v10287_v19  ;;  %v10798_v19 = vand.u32 4294901760, %v206_v12 }
 0x1f4   :  { %2412 = vmatpush.msrb.mxu2 %v10501_v53  ;;  %2472 = vmatpush.msrb.mxu3 %v10527_v5 }
 0x1f5   :  { %2519 = vmatpush.msra.mxu0 %v10570_v6  ;;  %2576 = vmatpush.msra.mxu1 %v10503_v40  ;;  %14533 = vst [vmem:[#allocation457_spill] sm:$0xff] %v10798_v19  ;;  %v10811_v39 = vsub.f32 %v206_v12, %v10798_v19 }
 0x1f6   :  { %2403 = vmatmul.f32.vlgmr.msrb.gmra.mxu1 %v10211_v23  ;;  %2415 = vmatpush.msrb.mxu2 %v10513_v44 }
 0x1f7   :  { %2474 = vmatpush.msrb.mxu3 %v10530_v60  ;;  %2523 = vmatpush.msra.mxu0 %v10586_v17  ;;  %14535 = vst [vmem:[#allocation459_spill] sm:$0xff] %v10811_v39  ;;  %v10829_v12 = vand.u32 4294901760, %v10811_v39 }
 0x1f8   :  { %2578 = vmatpush.msra.mxu1 %v10515_v16  ;;  %2418 = vmatpush.msrb.mxu2 %v10525_v51 }
 0x1f9   :  { %2476 = vmatpush.msrb.mxu3 %v10544_v33  ;;  %2527 = vmatpush.msra.mxu0 %v10596_v38  ;;  %14539 = vst [vmem:[#allocation463_spill] sm:$0xff] %v10829_v12 }
 0x1fa   :  { %2580 = vmatpush.msra.mxu1 %v10527_v5  ;;  %2224 = vmatmul.f32.vlgmr.msra.gmra.mxu2 %v10757_v61 }
 0x1fb   :  { %2421 = vmatpush.msrb.mxu2 %v10541_v1  ;;  %2478 = vmatpush.msrb.mxu3 %v10573_v47 }
 0x1fc   :  { %2531 = vmatpush.msra.mxu0 %v10611_v14  ;;  %2582 = vmatpush.msra.mxu1 %v10530_v60  ;;  %v10822_v14 = vand.u32 4294901760, %v200_v57 }
 0x1fd   :  { %2424 = vmatpush.msrb.mxu2 %v10555_v7  ;;  %2480 = vmatpush.msrb.mxu3 %v10589_v30  ;;  %v10834_v7 = vand.u32 4294901760, %v198_v22 }
 0x1fe   :  { %2535 = vmatpush.msra.mxu0 %v10633_v8  ;;  %2584 = vmatpush.msra.mxu1 %v10544_v33  ;;  %14538 = vst [vmem:[#allocation462_spill] sm:$0xff] %v10822_v14  ;;  %v10832_v8 = vsub.f32 %v202_v43, %v10813_v13  ;;  %v10844_v1 = vsub.f32 %v200_v57, %v10822_v14  ;;  %v10848_v43 = vand.u32 4294901760, %v196_v54 }
 0x1ff   :  { %2427 = vmatpush.msrb.mxu2 %v10563_v25  ;;  %2482 = vmatpush.msrb.mxu3 %v10607_v49  ;;  %14541 = vst [vmem:[#allocation465_spill] sm:$0xff] %v10834_v7  ;;  %v194_v25 = vld [vmem:[#allocation7 + $0x198] sm:$0xff]  ;;  %v10858_v57 = vsub.f32 %v198_v22, %v10834_v7 }
 0x200   :  { %2539 = vmatpush.msra.mxu0 %v10649_v3  ;;  %2586 = vmatpush.msra.mxu1 %v10573_v47  ;;  %14540 = vst [vmem:[#allocation464_spill] sm:$0xff] %v10832_v8  ;;  %v10841_v3 = vand.u32 4294901760, %v10820_v11  ;;  %v10855_v38 = vand.u32 4294901760, %v10832_v8  ;;  %v10860_v51 = vand.u32 4294901760, %v194_v25  ;;  %v190_v22 = vld [vmem:[#allocation7 + $0x178] sm:$0xff] }
 0x201   :  { %2430 = vmatpush.msrb.mxu2 %v10579_v42  ;;  %2484 = vmatpush.msrb.mxu3 %v10623_v2  ;;  %14543 = vst [vmem:[#allocation467_spill] sm:$0xff] %v10844_v1  ;;  %v192_v42 = vld [vmem:[#allocation7 + $0x188] sm:$0xff]  ;;  %v10885_v6 = vand.u32 4294901760, %v10858_v57 }
 0x202   :  { %2543 = vmatpush.msra.mxu0 %v10665_v45  ;;  %2588 = vmatpush.msra.mxu1 %v10589_v30  ;;  %14542 = vst [vmem:[#allocation466_spill] sm:$0xff] %v10841_v3  ;;  %v2650_v45 = vsub.f32 %v10811_v39, %v10829_v12  ;;  %v10871_v17 = vand.u32 4294901760, %v192_v42  ;;  %v2662_v44 = vsub.f32 %v10832_v8, %v10855_v38 }
 0x203   :  { %2433 = vmatpush.msrb.mxu2 %v10605_v31  ;;  %2486 = vmatpush.msrb.mxu3 %v10639_v27  ;;  %14544 = vst [vmem:[#allocation468_spill] sm:$0xff] %v10848_v43  ;;  %v10869_v31 = vand.u32 4294901760, %v10844_v1  ;;  %v10888_v53 = vsub.f32 %v194_v25, %v10860_v51  ;;  %v186_v25 = vld [vmem:[#allocation7 + $0x158] sm:$0xff] }
 0x204   :  { %2547 = vmatpush.msra.mxu0 %v10681_v56  ;;  %2590 = vmatpush.msra.mxu1 %v10607_v49  ;;  %14545 = vst [vmem:[#allocation469_spill] sm:$0xff] %v10855_v38  ;;  %v2656_v56 = vsub.f32 %v10820_v11, %v10841_v3  ;;  %v10901_v36 = vsub.f32 %v192_v42, %v10871_v17  ;;  %v10924_v62 = vand.u32 4294901760, %v186_v25 }
 0x205   :  { %14546 = vst [vmem:[#allocation470_spill] sm:$0xff] %v10858_v57  ;;  %2436 = vmatpush.msrb.mxu2 %v10621_v9  ;;  %2488 = vmatpush.msrb.mxu3 %v10655_v59  ;;  %v10876_v9 = vsub.f32 %v196_v54, %v10848_v43  ;;  %v10892_v54 = vand.u32 4294901760, %v190_v22  ;;  %v2674_v42 = vsub.f32 %v10858_v57, %v10885_v6  ;;  %v10917_v32 = vand.u32 4294901760, %v10888_v53 }
 0x206   :  { %14547 = vst [vmem:[#allocation471_spill] sm:$0xff] %v10860_v51  ;;  %2551 = vmatpush.msra.mxu0 %v10696_v29  ;;  %2592 = vmatpush.msra.mxu1 %v10623_v2  ;;  %v10880_v29 = vand.u32 4294901760, %v2650_v45  ;;  %v10896_v45 = vand.u32 4294901760, %v2656_v56  ;;  %v14559_v56 = vld [vmem:[#allocation452_spill] sm:$0xff]  ;;  %v176_v2 = vld [vmem:[#allocation7 + $0x108] sm:$0xff] }
 0x207   :  { %14548 = vst [vmem:[#allocation472_spill] sm:$0xff] %v10869_v31  ;;  %2439 = vmatpush.msrb.mxu2 %v10637_v37  ;;  %2490 = vmatpush.msrb.mxu3 %v10671_v10  ;;  %v188_v37 = vld [vmem:[#allocation7 + $0x168] sm:$0xff] }
 0x208   :  { %14549 = vst [vmem:[#allocation473_spill] sm:$0xff] %v10871_v17  ;;  %2555 = vmatpush.msra.mxu0 %v10708_v58  ;;  %2594 = vmatpush.msra.mxu1 %v10639_v27  ;;  %v2668_v58 = vsub.f32 %v10844_v1, %v10869_v31  ;;  %v10908_v0 = vand.u32 4294901760, %v188_v37 }
 0x209   :  { %14550 = vst [vmem:[#allocation474_spill] sm:$0xff] %v10876_v9  ;;  %2442 = vmatpush.msrb.mxu2 %v10653_v15  ;;  %2492 = vmatpush.msrb.mxu3 %v10687_v48  ;;  %v10906_v15 = vand.u32 4294901760, %v10876_v9 }
 0x20a   :  { %14551 = vst [vmem:[#allocation475_spill] sm:$0xff] %v10880_v29  ;;  %2559 = vmatpush.msra.mxu0 %v10720_v34  ;;  %2596 = vmatpush.msra.mxu1 %v10655_v59  ;;  %v10912_v34 = vand.u32 4294901760, %v2662_v44  ;;  %v10928_v44 = vand.u32 4294901760, %v2668_v58  ;;  %v10944_v58 = vand.u32 4294901760, %v2674_v42 }
 0x20b   :  { %14552 = vst [vmem:[#allocation476_spill] sm:$0xff] %v10885_v6  ;;  %2496 = vmatmul.f32.vlgmr.msrb.gmra.mxu3 %v10252_v26  ;;  %2445 = vmatpush.msrb.mxu2 %v10669_v18  ;;  %v184_v26 = vld [vmem:[#allocation7 + $0x148] sm:$0xff]  ;;  %v10922_v18 = vsub.f32 %v190_v22, %v10892_v54  ;;  %v2680_v22 = vsub.f32 %v10876_v9, %v10906_v15 }
 0x20c   :  { %14553 = vst [vmem:[#allocation477_spill] sm:$0xff] %v10888_v53  ;;  %2652 = vmatpush.msra.mxu3 %v10880_v29  ;;  %2563 = vmatpush.msra.mxu0 %v14559_v56  ;;  %v10931_v56 = vand.u32 4294901760, %v10901_v36  ;;  %v182_v29 = vld [vmem:[#allocation7 + $0x138] sm:$0xff]  ;;  %v10940_v59 = vand.u32 4294901760, %v184_v26 }
 0x20d   :  { %14554 = vst [vmem:[#allocation478_spill] sm:$0xff] %v10892_v54  ;;  %2598 = vmatpush.msra.mxu1 %v10671_v10  ;;  %2565 = vmatmul.f32.vlgmr.msra.gmra.mxu0 %v10211_v23  ;;  %v10938_v10 = vsub.f32 %v188_v37, %v10908_v0  ;;  %v10954_v37 = vsub.f32 %v186_v25, %v10924_v62 }
 0x20e   :  { %14555 = vst [vmem:[#allocation479_spill] sm:$0xff] %v10896_v45  ;;  %2658 = vmatpush.msra.mxu3 %v10896_v45  ;;  %2750 = vmatpush.msrb.mxu0 %v10811_v39  ;;  %v2686_v39 = vsub.f32 %v10888_v53, %v10917_v32  ;;  %v10951_v45 = vand.u32 4294901760, %v10922_v18  ;;  %v2692_v42 = vsub.f32 %v10901_v36, %v10931_v56 }
 0x20f   :  { %14556 = vst [vmem:[#allocation480_spill] sm:$0xff] %v10901_v36  ;;  %2448 = vmatpush.msrb.mxu2 %v14566_v41  ;;  %2600 = vmatpush.msra.mxu1 %v10687_v48  ;;  %v180_v41 = vld [vmem:[#allocation7 + $0x128] sm:$0xff]  ;;  %v10956_v48 = vand.u32 4294901760, %v182_v29  ;;  %v10967_v27 = vand.u32 4294901760, %v10938_v10  ;;  %v10970_v25 = vsub.f32 %v184_v26, %v10940_v59  ;;  %v10983_v55 = vand.u32 4294901760, %v10954_v37 }
 0x210   :  { %14557 = vst [vmem:[#allocation481_spill] sm:$0xff] %v10906_v15  ;;  %2602 = vmatmul.f32.vlgmr.msra.gmra.mxu1 %v10211_v23  ;;  %2664 = vmatpush.msra.mxu3 %v10912_v34  ;;  %v14573_v23 = vld [vmem:[#allocation445_spill] sm:$0xff]  ;;  %v10972_v35 = vand.u32 4294901760, %v180_v41 }
 0x211   :  { %14558 = vst [vmem:[#allocation482_spill] sm:$0xff] %v10908_v0  ;;  %2753 = vmatpush.msrb.mxu0 %v10820_v11  ;;  %2803 = vmatpush.msrb.mxu1 %v10798_v19  ;;  %v10964_v11 = vand.u32 4294901760, %v2680_v22  ;;  %v2698_v22 = vsub.f32 %v10922_v18, %v10951_v45  ;;  %v10986_v26 = vsub.f32 %v182_v29, %v10956_v48 }
 0x212   :  { %14560 = vst [vmem:[#allocation483_spill] sm:$0xff] %v10912_v34  ;;  %2451 = vmatpush.msrb.mxu2 %v14573_v23  ;;  %2670 = vmatpush.msra.mxu3 %v10928_v44  ;;  %v178_v34 = vld [vmem:[#allocation7 + $0x118] sm:$0xff]  ;;  %v14578_v23 = vld [vmem:[#allocation448_spill] sm:$0xff]  ;;  %v11002_v29 = vsub.f32 %v180_v41, %v10972_v35 }
 0x213   :  { %14561 = vst [vmem:[#allocation484_spill] sm:$0xff] %v10917_v32  ;;  %2756 = vmatpush.msrb.mxu0 %v10832_v8  ;;  %2805 = vmatpush.msrb.mxu1 %v10804_v4  ;;  %v14580_v8 = vld [vmem:[#allocation349_spill] sm:$0xff]  ;;  %v10988_v49 = vand.u32 4294901760, %v178_v34 }
 0x214   :  { %14562 = vst [vmem:[#allocation485_spill] sm:$0xff] %v10922_v18  ;;  %2454 = vmatpush.msrb.mxu2 %v14578_v23  ;;  %2676 = vmatpush.msra.mxu3 %v10944_v58 }
 0x215   :  { %14563 = vst [vmem:[#allocation486_spill] sm:$0xff] %v10924_v62  ;;  %2457 = vmatmul.f32.vlgmr.msrb.gmra.mxu2 %v14580_v8  ;;  %2759 = vmatpush.msrb.mxu0 %v10844_v1  ;;  %v2704_v8 = vsub.f32 %v10938_v10, %v10967_v27  ;;  %v10999_v1 = vand.u32 4294901760, %v10970_v25  ;;  %v11018_v41 = vsub.f32 %v178_v34, %v10988_v49 }
 0x216   :  { %14564 = vst [vmem:[#allocation487_spill] sm:$0xff] %v10928_v44  ;;  %v10976_v44 = vand.u32 4294901760, %v2686_v39  ;;  %2607 = vmatpush.msra.mxu2 %v10798_v19  ;;  %2807 = vmatpush.msrb.mxu1 %v10813_v13  ;;  %v10992_v39 = vand.u32 4294901760, %v2692_v42  ;;  %v11010_v42 = vand.u32 4294901760, %v2698_v22 }
 0x217   :  { %14565 = vst [vmem:[#allocation488_spill] sm:$0xff] %v10931_v56  ;;  %2682 = vmatpush.msra.mxu3 %v10964_v11  ;;  %2762 = vmatpush.msrb.mxu0 %v10858_v57  ;;  %v2710_v57 = vsub.f32 %v10954_v37, %v10983_v55  ;;  %v2716_v22 = vsub.f32 %v10970_v25, %v10999_v1 }
 0x218   :  { %14567 = vst [vmem:[#allocation489_spill] sm:$0xff] %v10938_v10  ;;  %2609 = vmatpush.msra.mxu2 %v10804_v4  ;;  %2809 = vmatpush.msrb.mxu1 %v10822_v14 }
 0x219   :  { %14568 = vst [vmem:[#allocation490_spill] sm:$0xff] %v10940_v59  ;;  %2688 = vmatpush.msra.mxu3 %v10976_v44  ;;  %2765 = vmatpush.msrb.mxu0 %v10876_v9  ;;  %v11024_v9 = vand.u32 4294901760, %v2704_v8  ;;  %v11038_v34 = vand.u32 4294901760, %v2710_v57 }
 0x21a   :  { %14569 = vst [vmem:[#allocation491_spill] sm:$0xff] %v10944_v58  ;;  %v11004_v58 = vand.u32 4294901760, %v176_v2  ;;  %2611 = vmatpush.msra.mxu2 %v10813_v13  ;;  %2811 = vmatpush.msrb.mxu1 %v10834_v7 }
 0x21b   :  { %14570 = vst [vmem:[#allocation492_spill] sm:$0xff] %v10951_v45  ;;  %2694 = vmatpush.msra.mxu3 %v10992_v39  ;;  %2768 = vmatpush.msrb.mxu0 %v10888_v53  ;;  %v11043_v53 = vand.u32 4294901760, %v11018_v41 }
 0x21c   :  { %14571 = vst [vmem:[#allocation493_spill] sm:$0xff] %v10954_v37  ;;  %v11032_v23 = vsub.f32 %v176_v2, %v11004_v58  ;;  %2613 = vmatpush.msra.mxu2 %v10822_v14  ;;  %2813 = vmatpush.msrb.mxu1 %v10848_v43  ;;  %v11049_v2 = vand.u32 4294901760, %v2716_v22 }
 0x21d   :  { %14572 = vst [vmem:[#allocation494_spill] sm:$0xff] %v10956_v48  ;;  %2700 = vmatpush.msra.mxu3 %v11010_v42  ;;  %2771 = vmatpush.msrb.mxu0 %v10901_v36  ;;  %v2734_v22 = vsub.f32 %v11018_v41, %v11043_v53 }
 0x21e   :  { %14574 = vst [vmem:[#allocation495_spill] sm:$0xff] %v10964_v11  ;;  %v11015_v11 = vand.u32 4294901760, %v10986_v26  ;;  %2615 = vmatpush.msra.mxu2 %v10834_v7  ;;  %2815 = vmatpush.msrb.mxu1 %v10860_v51  ;;  %v11054_v36 = vand.u32 4294901760, %v11032_v23 }
 0x21f   :  { %14575 = vst [vmem:[#allocation496_spill] sm:$0xff] %v10967_v27  ;;  %2706 = vmatpush.msra.mxu3 %v11024_v9  ;;  %2774 = vmatpush.msrb.mxu0 %v10922_v18 }
 0x220   :  { %14576 = vst [vmem:[#allocation497_spill] sm:$0xff] %v10970_v25  ;;  %v2722_v8 = vsub.f32 %v10986_v26, %v11015_v11  ;;  %2617 = vmatpush.msra.mxu2 %v10848_v43  ;;  %2817 = vmatpush.msrb.mxu1 %v10871_v17 }
 0x221   :  { %14577 = vst [vmem:[#allocation498_spill] sm:$0xff] %v10972_v35  ;;  %2712 = vmatpush.msra.mxu3 %v11038_v34  ;;  %2777 = vmatpush.msrb.mxu0 %v10938_v10 }
 0x222   :  { %14579 = vst [vmem:[#allocation499_spill] sm:$0xff] %v10976_v44  ;;  %v11029_v44 = vand.u32 4294901760, %v11002_v29  ;;  %2619 = vmatpush.msra.mxu2 %v10860_v51  ;;  %2819 = vmatpush.msrb.mxu1 %v10892_v54 }
 0x223   :  { %14581 = vst [vmem:[#allocation349_spill] sm:$0xff] %v10983_v55  ;;  %2718 = vmatpush.msra.mxu3 %v11049_v2  ;;  %2780 = vmatpush.msrb.mxu0 %v10954_v37 }
 0x224   :  { %14582 = vst [vmem:[#allocation500_spill] sm:$0xff] %v10986_v26  ;;  %v2728_v57 = vsub.f32 %v11002_v29, %v11029_v44  ;;  %2621 = vmatpush.msra.mxu2 %v10871_v17  ;;  %2821 = vmatpush.msrb.mxu1 %v10908_v0 }
 0x225   :  { %14583 = vst [vmem:[#allocation501_spill] sm:$0xff] %v10988_v49  ;;  %2783 = vmatpush.msrb.mxu0 %v10970_v25 }
 0x226   :  { %14584 = vst [vmem:[#allocation502_spill] sm:$0xff] %v10992_v39  ;;  %v11068_v18 = vand.u32 4294901760, %v2728_v57  ;;  %2623 = vmatpush.msra.mxu2 %v10892_v54  ;;  %2823 = vmatpush.msrb.mxu1 %v10924_v62 }
 0x227   :  { %14585 = vst [vmem:[#allocation503_spill] sm:$0xff] %v10999_v1  ;;  %2786 = vmatpush.msrb.mxu0 %v10986_v26 }
 0x228   :  { %14586 = vst [vmem:[#allocation504_spill] sm:$0xff] %v11002_v29  ;;  %2625 = vmatpush.msra.mxu2 %v10908_v0  ;;  %2825 = vmatpush.msrb.mxu1 %v10940_v59 }
 0x229   :  { %14587 = vst [vmem:[#allocation505_spill] sm:$0xff] %v11004_v58  ;;  %2789 = vmatpush.msrb.mxu0 %v11002_v29 }
 0x22a   :  { %14588 = vst [vmem:[#allocation506_spill] sm:$0xff] %v11010_v42  ;;  %v11060_v42 = vand.u32 4294901760, %v2722_v8  ;;  %v11076_v8 = vand.u32 4294901760, %v2734_v22  ;;  %2627 = vmatpush.msra.mxu2 %v10924_v62  ;;  %2827 = vmatpush.msrb.mxu1 %v10956_v48  ;;  %v14603_v22 = vld [vmem:[#allocation38_spill] sm:$0xff] }
 0x22b   :  { %14589 = vst [vmem:[#allocation507_spill] sm:$0xff] %v11015_v11  ;;  %2792 = vmatpush.msrb.mxu0 %v11018_v41 }
 0x22c   :  { %14590 = vst [vmem:[#allocation508_spill] sm:$0xff] %v11018_v41  ;;  %2724 = vmatpush.msra.mxu3 %v11060_v42  ;;  %2629 = vmatpush.msra.mxu2 %v10940_v59  ;;  %v14607_v41 = vld [vmem:[#allocation17_spill] sm:$0xff] }
 0x22d   :  { %14591 = vst [vmem:[#allocation509_spill] sm:$0xff] %v11024_v9  ;;  %2829 = vmatpush.msrb.mxu1 %v10972_v35  ;;  %2795 = vmatpush.msrb.mxu0 %v11032_v23 }
 0x22e   :  { %14592 = vst [vmem:[#allocation510_spill] sm:$0xff] %v11029_v44  ;;  %2730 = vmatpush.msra.mxu3 %v11068_v18  ;;  %2631 = vmatpush.msra.mxu2 %v10956_v48 }
 0x22f   :  { %14593 = vst [vmem:[#allocation511_spill] sm:$0xff] %v11032_v23  ;;  %2831 = vmatpush.msrb.mxu1 %v10988_v49  ;;  %2798 = vmatmul.f32.vlgmr.msrb.gmra.mxu0 %v10760_v21  ;;  %v14605_v21 = vld [vmem:[#allocation39_spill] sm:$0xff] }
 0x230   :  { %14594 = vst [vmem:[#allocation512_spill] sm:$0xff] %v11038_v34  ;;  %v2740_v34 = vsub.f32 %v11032_v23, %v11054_v36  ;;  %2736 = vmatpush.msra.mxu3 %v11076_v8  ;;  %2633 = vmatpush.msra.mxu2 %v10972_v35  ;;  %v14604_v23 = vld [vmem:[#allocation16_spill] sm:$0xff] }
 0x231   :  { %14595 = vst [vmem:[#allocation513_spill] sm:$0xff] %v11043_v53  ;;  %2833 = vmatpush.msrb.mxu1 %v11004_v58 }
 0x232   :  { %14596 = vst [vmem:[#allocation514_spill] sm:$0xff] %v11049_v2  ;;  %v11082_v57 = vand.u32 4294901760, %v2740_v34  ;;  %v14602_v34 = vld [vmem:[#allocation15_spill] sm:$0xff]  ;;  %2837 = vmatmul.f32.vlgmr.msrb.gmra.mxu1 %v10766_v52  ;;  %2635 = vmatpush.msra.mxu2 %v10988_v49  ;;  %v14606_v52 = vld [vmem:[#allocation41_spill] sm:$0xff] }
 0x233   :  { %14597 = vst [vmem:[#allocation515_spill] sm:$0xff] %v11054_v36  ;;  %2988 = vmatpush.msra.mxu0 %v14602_v34  ;;  %3033 = vmatpush.msra.mxu1 %v14603_v22  ;;  %v14608_v22 = vld [vmem:[#allocation45_spill] sm:$0xff] }
 0x234   :  { %14598 = vst [vmem:[#allocation516_spill] sm:$0xff] %v11060_v42  ;;  %2742 = vmatpush.msra.mxu3 %v11082_v57  ;;  %2637 = vmatpush.msra.mxu2 %v11004_v58 }
 0x235   :  { %14599 = vst [vmem:[#allocation517_spill] sm:$0xff] %v11068_v18  ;;  %2744 = vmatmul.f32.vlgmr.msra.gmra.mxu3 %v10757_v61  ;;  %2990 = vmatpush.msra.mxu0 %v14604_v23 }
 0x236   :  { %14600 = vst [vmem:[#allocation518_spill] sm:$0xff] %v11076_v8  ;;  %2911 = vmatpush.msrb.mxu3 %v10798_v19  ;;  %3039 = vmatpush.msra.mxu1 %v14605_v21  ;;  %v11264_v21 = vld [vmem:[#allocation8 + $0x1] ss:$4 sm:$0x3] }
 0x237   :  { %14601 = vst [vmem:[#allocation519_spill] sm:$0xff] %v11082_v57  ;;  %2643 = vmatmul.f32.vlgmr.msra.gmra.mxu2 %v10776_v46  ;;  %2992 = vmatpush.msra.mxu0 %v14607_v41  ;;  %v14609_v57 = vld [vmem:[#allocation18_spill] sm:$0xff] }
 0x238   :  { %2913 = vmatpush.msrb.mxu3 %v10804_v4  ;;  %2844 = vmatpush.msrb.mxu2 %v10829_v12  ;;  %v14610_v46 = vld [vmem:[#allocation50_spill] sm:$0xff]  ;;  %v14611_v12 = vld [vmem:[#allocation19_spill] sm:$0xff] }
 0x239   :  { %3045 = vmatpush.msra.mxu1 %v14606_v52  ;;  %2994 = vmatpush.msra.mxu0 %v14609_v57  ;;  %v14612_v52 = vld [vmem:[#allocation53_spill] sm:$0xff] }
 0x23a   :  { %2915 = vmatpush.msrb.mxu3 %v10813_v13  ;;  %2848 = vmatpush.msrb.mxu2 %v10841_v3  ;;  %v14613_v3 = vld [vmem:[#allocation20_spill] sm:$0xff] }
 0x23b   :  { %3051 = vmatpush.msra.mxu1 %v14608_v22  ;;  %2996 = vmatpush.msra.mxu0 %v14611_v12  ;;  %v14614_v22 = vld [vmem:[#allocation59_spill] sm:$0xff] }
 0x23c   :  { %2917 = vmatpush.msrb.mxu3 %v10822_v14  ;;  %2852 = vmatpush.msrb.mxu2 %v10855_v38  ;;  %v14615_v38 = vld [vmem:[#allocation24_spill] sm:$0xff] }
 0x23d   :  { %3057 = vmatpush.msra.mxu1 %v14610_v46  ;;  %2998 = vmatpush.msra.mxu0 %v14613_v3  ;;  %v14616_v46 = vld [vmem:[#allocation64_spill] sm:$0xff] }
 0x23e   :  { %2919 = vmatpush.msrb.mxu3 %v10834_v7  ;;  %2856 = vmatpush.msrb.mxu2 %v10869_v31  ;;  %v14617_v31 = vld [vmem:[#allocation31_spill] sm:$0xff] }
 0x23f   :  { %3063 = vmatpush.msra.mxu1 %v14612_v52  ;;  %3000 = vmatpush.msra.mxu0 %v14615_v38  ;;  %v14618_v52 = vld [vmem:[#allocation69_spill] sm:$0xff] }
 0x240   :  { %2921 = vmatpush.msrb.mxu3 %v10848_v43  ;;  %2860 = vmatpush.msrb.mxu2 %v10885_v6  ;;  %v14619_v6 = vld [vmem:[#allocation35_spill] sm:$0xff] }
 0x241   :  { %3069 = vmatpush.msra.mxu1 %v14614_v22  ;;  %3002 = vmatpush.msra.mxu0 %v14617_v31  ;;  %v14620_v22 = vld [vmem:[#allocation74_spill] sm:$0xff] }
 0x242   :  { %2923 = vmatpush.msrb.mxu3 %v10860_v51  ;;  %2864 = vmatpush.msrb.mxu2 %v10906_v15  ;;  %v14621_v15 = vld [vmem:[#allocation36_spill] sm:$0xff] }
 0x243   :  { %3075 = vmatpush.msra.mxu1 %v14616_v46  ;;  %3004 = vmatpush.msra.mxu0 %v14619_v6  ;;  %v14622_v46 = vld [vmem:[#allocation78_spill] sm:$0xff] }
 0x244   :  { %2925 = vmatpush.msrb.mxu3 %v10871_v17  ;;  %2868 = vmatpush.msrb.mxu2 %v10917_v32  ;;  %v14623_v32 = vld [vmem:[#allocation42_spill] sm:$0xff] }
 0x245   :  { %3081 = vmatpush.msra.mxu1 %v14618_v52  ;;  %3006 = vmatpush.msra.mxu0 %v14621_v15  ;;  %v14624_v52 = vld [vmem:[#allocation84_spill] sm:$0xff] }
 0x246   :  { %2927 = vmatpush.msrb.mxu3 %v10892_v54  ;;  %2872 = vmatpush.msrb.mxu2 %v10931_v56  ;;  %v14625_v56 = vld [vmem:[#allocation46_spill] sm:$0xff] }
 0x247   :  { %3087 = vmatpush.msra.mxu1 %v14620_v22  ;;  %3008 = vmatpush.msra.mxu0 %v14623_v32  ;;  %v14626_v22 = vld [vmem:[#allocation87_spill] sm:$0xff] }
 0x248   :  { %2929 = vmatpush.msrb.mxu3 %v10908_v0  ;;  %2876 = vmatpush.msrb.mxu2 %v10951_v45  ;;  %v14627_v45 = vld [vmem:[#allocation49_spill] sm:$0xff] }
 0x249   :  { %3093 = vmatpush.msra.mxu1 %v14622_v46  ;;  %3010 = vmatpush.msra.mxu0 %v14625_v56  ;;  %v14628_v46 = vld [vmem:[#allocation92_spill] sm:$0xff] }
 0x24a   :  { %2931 = vmatpush.msrb.mxu3 %v10924_v62  ;;  %2880 = vmatpush.msrb.mxu2 %v10967_v27  ;;  %v14630_v27 = vld [vmem:[#allocation97_spill] sm:$0xff] }
 0x24b   :  { %3099 = vmatpush.msra.mxu1 %v14624_v52  ;;  %3012 = vmatpush.msra.mxu0 %v14627_v45  ;;  %v14629_v52 = vld [vmem:[#allocation54_spill] sm:$0xff] }
 0x24c   :  { %2933 = vmatpush.msrb.mxu3 %v10940_v59  ;;  %2884 = vmatpush.msrb.mxu2 %v10983_v55  ;;  %v14632_v55 = vld [vmem:[#allocation102_spill] sm:$0xff] }
 0x24d   :  { %3105 = vmatpush.msra.mxu1 %v14626_v22  ;;  %3014 = vmatpush.msra.mxu0 %v14629_v52  ;;  %v14631_v22 = vld [vmem:[#allocation60_spill] sm:$0xff] }
 0x24e   :  { %2935 = vmatpush.msrb.mxu3 %v10956_v48  ;;  %2888 = vmatpush.msrb.mxu2 %v10999_v1  ;;  %v14642_v1 = vld [vmem:[#allocation26_spill] sm:$0xff] }
 0x24f   :  { %3111 = vmatpush.msra.mxu1 %v14628_v46  ;;  %3016 = vmatpush.msra.mxu0 %v14631_v22  ;;  %v14640_v46 = vld [vmem:[#allocation25_spill] sm:$0xff] }
 0x250   :  { %2937 = vmatpush.msrb.mxu3 %v10972_v35  ;;  %2892 = vmatpush.msrb.mxu2 %v11015_v11  ;;  %v14633_v11 = vld [vmem:[#allocation62_spill] sm:$0xff] }
 0x251   :  { %3117 = vmatpush.msra.mxu1 %v14630_v27  ;;  %3018 = vmatpush.msra.mxu0 %v14633_v11  ;;  %v1621_v27 = vpop.f32.mrf.mxu0 }
 0x252   :  { %2939 = vmatpush.msrb.mxu3 %v10988_v49  ;;  %2896 = vmatpush.msrb.mxu2 %v11029_v44  ;;  %v14634_v44 = vld [vmem:[#allocation21_spill] sm:$0xff] }
 0x253   :  { %3123 = vmatpush.msra.mxu1 %v14632_v55  ;;  %v14636_v55 = vld [vmem:[#allocation22_spill] sm:$0xff] }
 0x254   :  { %2941 = vmatpush.msrb.mxu3 %v11004_v58  ;;  %2900 = vmatpush.msrb.mxu2 %v11043_v53  ;;  %v14635_v53 = vld [vmem:[#allocation28_spill] sm:$0xff] }
 0x255   :  { %2943 = vmatmul.f32.vlgmr.msrb.gmra.mxu3 %v10757_v61  ;;  %3292 = vmatpush.msrb.mxu1 %v14602_v34 }
 0x256   :  { %3184 = vmatpush.msra.mxu3 %v14602_v34  ;;  %2904 = vmatpush.msrb.mxu2 %v11054_v36  ;;  %v14637_v36 = vld [vmem:[#allocation29_spill] sm:$0xff]  ;;  %v11267_v34 = vld [vmem:[#allocation8 + $0x2] ss:$4 sm:$0x3] }
 0x257   :  { %3294 = vmatpush.msrb.mxu1 %v14604_v23  ;;  %2906 = vmatmul.f32.vlgmr.msrb.gmra.mxu2 %v10757_v61  ;;  %v14638_v61 = vld [vmem:[#allocation23_spill] sm:$0xff]  ;;  %v11275_v49 = vperm.slane %v11267_v34, 0  ;;  %v11403_v26 = vperm.slane %v11267_v34, 1 }
 0x258   :  { %3186 = vmatpush.msra.mxu3 %v14604_v23  ;;  %3131 = vmatpush.msra.mxu2 %v14634_v44  ;;  %v14639_v44 = vld [vmem:[#allocation30_spill] sm:$0xff]  ;;  %v14695_v23 = vld [vmem:[#allocation123_spill] sm:$0xff] }
 0x259   :  { %3296 = vmatpush.msrb.mxu1 %v14607_v41  ;;  %3225 = vmatpush.msrb.mxu0 %v14635_v53  ;;  %v14641_v53 = vld [vmem:[#allocation32_spill] sm:$0xff] }
 0x25a   :  { %3188 = vmatpush.msra.mxu3 %v14607_v41  ;;  %3134 = vmatpush.msra.mxu2 %v14636_v55  ;;  %v1622_v55 = vadd.f32 1e-05, %v1621_v27  ;;  %v14645_v27 = vld [vmem:[#allocation37_spill] sm:$0xff]  ;;  %v14693_v41 = vld [vmem:[#allocation146_spill] sm:$0xff] }
 0x25b   :  { %3298 = vmatpush.msrb.mxu1 %v14609_v57  ;;  %3229 = vmatpush.msrb.mxu0 %v14637_v36  ;;  %v1722_v36 = vpop.f32.mrf.mxu1 }
 0x25c   :  { %3190 = vmatpush.msra.mxu3 %v14609_v57  ;;  %3137 = vmatpush.msra.mxu2 %v14638_v61  ;;  %v14643_v61 = vld [vmem:[#allocation33_spill] sm:$0xff] }
 0x25d   :  { %3300 = vmatpush.msrb.mxu1 %v14611_v12  ;;  %3233 = vmatpush.msrb.mxu0 %v14639_v44  ;;  %v14646_v44 = vld [vmem:[#allocation34_spill] sm:$0xff] }
 0x25e   :  { %3192 = vmatpush.msra.mxu3 %v14611_v12  ;;  %3140 = vmatpush.msra.mxu2 %v14640_v46  ;;  %v14644_v12 = vld [vmem:[#allocation27_spill] sm:$0xff]  ;;  %v1723_v46 = vadd.f32 %v1722_v36, %v1622_v55  ;;  %v14650_v55 = vld [vmem:[#allocation44_spill] sm:$0xff] }
 0x25f   :  { %3302 = vmatpush.msrb.mxu1 %v14613_v3  ;;  %3237 = vmatpush.msrb.mxu0 %v14641_v53  ;;  %v1776_v53 = vpop.f32.mrf.mxu2  ;;  %v14649_v36 = vld [vmem:[#allocation47_spill] sm:$0xff] }
 0x260   :  { %3194 = vmatpush.msra.mxu3 %v14613_v3  ;;  %3143 = vmatpush.msra.mxu2 %v14642_v1  ;;  %v14647_v1 = vld [vmem:[#allocation43_spill] sm:$0xff]  ;;  %v14691_v3 = vld [vmem:[#allocation145_spill] sm:$0xff] }
 0x261   :  { %3304 = vmatpush.msrb.mxu1 %v14615_v38  ;;  %3241 = vmatpush.msrb.mxu0 %v14643_v61  ;;  %v14648_v61 = vld [vmem:[#allocation40_spill] sm:$0xff] }
 0x262   :  { %3196 = vmatpush.msra.mxu3 %v14615_v38  ;;  %3146 = vmatpush.msra.mxu2 %v14644_v12  ;;  %v1777_v12 = vadd.f32 %v1776_v53, %v1723_v46  ;;  %v14653_v53 = vld [vmem:[#allocation55_spill] sm:$0xff]  ;;  %v1884_v46 = vpop.f32.mrf.mxu0 }
 0x263   :  { %3306 = vmatpush.msrb.mxu1 %v14617_v31  ;;  %3245 = vmatpush.msrb.mxu0 %v14645_v27  ;;  %v1815_v27 = vpop.f32.mrf.mxu3 }
 0x264   :  { %3198 = vmatpush.msra.mxu3 %v14617_v31  ;;  %3149 = vmatpush.msra.mxu2 %v14646_v44  ;;  %v14651_v44 = vld [vmem:[#allocation51_spill] sm:$0xff]  ;;  %v14685_v31 = vld [vmem:[#allocation138_spill] sm:$0xff] }
 0x265   :  { %3308 = vmatpush.msrb.mxu1 %v14619_v6  ;;  %3249 = vmatpush.msrb.mxu0 %v14647_v1  ;;  %v14652_v1 = vld [vmem:[#allocation48_spill] sm:$0xff] }
 0x266   :  { %3200 = vmatpush.msra.mxu3 %v14619_v6  ;;  %3152 = vmatpush.msra.mxu2 %v14648_v61  ;;  %v1816_v61 = vadd.f32 %v1815_v27, %v1777_v12  ;;  %v14658_v12 = vld [vmem:[#allocation95_spill] sm:$0xff]  ;;  %v1921_v27 = vpop.f32.mrf.mxu1  ;;  %v14680_v6 = vld [vmem:[#allocation86_spill] sm:$0xff] }
 0x267   :  { %3310 = vmatpush.msrb.mxu1 %v14621_v15  ;;  %3253 = vmatpush.msrb.mxu0 %v14649_v36  ;;  %v14654_v36 = vld [vmem:[#allocation52_spill] sm:$0xff] }
 0x268   :  { %3202 = vmatpush.msra.mxu3 %v14621_v15  ;;  %3155 = vmatpush.msra.mxu2 %v14650_v55  ;;  %v14655_v55 = vld [vmem:[#allocation61_spill] sm:$0xff] }
 0x269   :  { %3312 = vmatpush.msrb.mxu1 %v14623_v32  ;;  %3257 = vmatpush.msrb.mxu0 %v14651_v44  ;;  %v14656_v44 = vld [vmem:[#allocation56_spill] sm:$0xff]  ;;  %v14678_v15 = vld [vmem:[#allocation81_spill] sm:$0xff] }
 0x26a   :  { %3204 = vmatpush.msra.mxu3 %v14623_v32  ;;  %3158 = vmatpush.msra.mxu2 %v14652_v1  ;;  %v1885_v1 = vadd.f32 %v1884_v46, %v1816_v61  ;;  %v14662_v32 = vld [vmem:[#allocation66_spill] sm:$0xff] }
 0x26b   :  { %3314 = vmatpush.msrb.mxu1 %v14625_v56  ;;  %3261 = vmatpush.msrb.mxu0 %v14653_v53  ;;  %v14659_v53 = vld [vmem:[#allocation57_spill] sm:$0xff]  ;;  %v14664_v61 = vld [vmem:[#allocation106_spill] sm:$0xff] }
 0x26c   :  { %3206 = vmatpush.msra.mxu3 %v14625_v56  ;;  %3161 = vmatpush.msra.mxu2 %v14654_v36  ;;  %v14657_v56 = vld [vmem:[#allocation65_spill] sm:$0xff]  ;;  %v14660_v36 = vld [vmem:[#allocation67_spill] sm:$0xff] }
 0x26d   :  { %3316 = vmatpush.msrb.mxu1 %v14627_v45  ;;  %3265 = vmatpush.msrb.mxu0 %v14655_v55  ;;  %v14663_v55 = vld [vmem:[#allocation75_spill] sm:$0xff] }
 0x26e   :  { %3208 = vmatpush.msra.mxu3 %v14627_v45  ;;  %3164 = vmatpush.msra.mxu2 %v14656_v44  ;;  %v14661_v45 = vld [vmem:[#allocation100_spill] sm:$0xff]  ;;  %v1922_v44 = vadd.f32 %v1921_v27, %v1885_v1  ;;  %v2117_v1 = vpop.f32.mrf.mxu0  ;;  %v14671_v27 = vld [vmem:[#allocation114_spill] sm:$0xff] }
 0x26f   :  { %3318 = vmatpush.msrb.mxu1 %v14629_v52  ;;  %3269 = vmatpush.msrb.mxu0 %v14657_v56 }
 0x270   :  { %3210 = vmatpush.msra.mxu3 %v14629_v52  ;;  %3167 = vmatpush.msra.mxu2 %v14659_v53  ;;  %v14666_v53 = vld [vmem:[#allocation79_spill] sm:$0xff]  ;;  %v14668_v52 = vld [vmem:[#allocation72_spill] sm:$0xff] }
 0x271   :  { %3320 = vmatpush.msrb.mxu1 %v14631_v22  ;;  %3273 = vmatpush.msrb.mxu0 %v14660_v36  ;;  %v2063_v36 = vpop.f32.mrf.mxu3 }
 0x272   :  { %3212 = vmatpush.msra.mxu3 %v14631_v22  ;;  %3170 = vmatpush.msra.mxu2 %v14662_v32  ;;  %v14667_v22 = vld [vmem:[#allocation110_spill] sm:$0xff] }
 0x273   :  { %3322 = vmatpush.msrb.mxu1 %v14633_v11  ;;  %3277 = vmatpush.msrb.mxu0 %v14663_v55  ;;  %v1962_v46 = vpop.f32.mrf.mxu2  ;;  %v14669_v32 = vld [vmem:[#allocation82_spill] sm:$0xff]  ;;  %v14672_v55 = vld [vmem:[#allocation63_spill] sm:$0xff] }
 0x274   :  { %3214 = vmatpush.msra.mxu3 %v14633_v11  ;;  %v1963_v56 = vadd.f32 %v1962_v46, %v1922_v44  ;;  %v14670_v11 = vld [vmem:[#allocation58_spill] sm:$0xff]  ;;  %v14673_v44 = vld [vmem:[#allocation117_spill] sm:$0xff] }
 0x275   :  { %3281 = vmatpush.msrb.mxu0 %v14666_v53  ;;  %v14674_v53 = vld [vmem:[#allocation71_spill] sm:$0xff] }
 0x276   :  { %3374 = vmatpush.msrb.mxu3 %v14658_v12  ;;  %v14665_v12 = vld [vmem:[#allocation70_spill] sm:$0xff] }
 0x277   :  { %3173 = vmatpush.msra.mxu2 %v14665_v12  ;;  %3285 = vmatpush.msrb.mxu0 %v14669_v32  ;;  %v2156_v12 = vpop.f32.mrf.mxu1 }
 0x278   :  { %3380 = vmatpush.msrb.mxu3 %v14661_v45  ;;  %v2064_v45 = vadd.f32 %v2063_v36, %v1963_v56  ;;  %v14677_v36 = vld [vmem:[#allocation125_spill] sm:$0xff] }
 0x279   :  { %3176 = vmatpush.msra.mxu2 %v14668_v52  ;;  %v14676_v52 = vld [vmem:[#allocation76_spill] sm:$0xff] }
 0x27a   :  { %3386 = vmatpush.msrb.mxu3 %v14664_v61  ;;  %v2118_v61 = vadd.f32 %v2117_v1, %v2064_v45  ;;  %v14679_v45 = vld [vmem:[#allocation128_spill] sm:$0xff] }
 0x27b   :  { %3329 = vmatpush.msrb.mxu2 %v14670_v11 }
 0x27c   :  { %3392 = vmatpush.msrb.mxu3 %v14667_v22  ;;  %v2157_v46 = vadd.f32 %v2156_v12, %v2118_v61  ;;  %v14675_v22 = vld [vmem:[#allocation121_spill] sm:$0xff]  ;;  %v14682_v12 = vld [vmem:[#allocation90_spill] sm:$0xff]  ;;  %v14683_v61 = vld [vmem:[#allocation135_spill] sm:$0xff] }
 0x27d   :  { %3331 = vmatpush.msrb.mxu2 %v14672_v55  ;;  %v2225_v56 = vpop.f32.mrf.mxu2 }
 0x27e   :  { %3398 = vmatpush.msrb.mxu3 %v14671_v27  ;;  %v2226_v32 = vadd.f32 %v2225_v56, %v2157_v46  ;;  %v2262_v27 = vpop.f32.mrf.mxu3  ;;  %v14686_v46 = vld [vmem:[#allocation96_spill] sm:$0xff] }
 0x27f   :  { %3333 = vmatpush.msrb.mxu2 %v14674_v53  ;;  %v14687_v56 = vld [vmem:[#allocation140_spill] sm:$0xff] }
 0x280   :  { %3404 = vmatpush.msrb.mxu3 %v14673_v44  ;;  %v2263_v1 = vadd.f32 %v2262_v27, %v2226_v32  ;;  %v14681_v44 = vld [vmem:[#allocation132_spill] sm:$0xff]  ;;  %v14689_v27 = vld [vmem:[#allocation143_spill] sm:$0xff] }
 0x281   :  { %3335 = vmatpush.msrb.mxu2 %v14676_v52 }
 0x282   :  { %3410 = vmatpush.msrb.mxu3 %v14675_v22  ;;  %8535 = vrsqrt.f32 %v2263_v1  ;;  %v14684_v22 = vld [vmem:[#allocation91_spill] sm:$0xff]  ;;  %vm2953_vm1 = vweird.f32 %v2263_v1 }
 0x283   :  { %3337 = vmatpush.msrb.mxu2 %v14678_v15 }
 0x284   :  { %3416 = vmatpush.msrb.mxu3 %v14677_v36 }
 0x285   :  { %3339 = vmatpush.msrb.mxu2 %v14680_v6 }
 0x286   :  { %3422 = vmatpush.msrb.mxu3 %v14679_v45  ;;  %v14688_v45 = vld [vmem:[#allocation104_spill] sm:$0xff] }
 0x287   :  { %3341 = vmatpush.msrb.mxu2 %v14682_v12 }
 0x288   :  { %3428 = vmatpush.msrb.mxu3 %v14681_v44  ;;  %v8536_v36 = vpop.eup %8535  ;;  %v14690_v44 = vld [vmem:[#allocation108_spill] sm:$0xff] }
 0x289   :  { %3343 = vmatpush.msrb.mxu2 %v14684_v22  ;;  %v2948_v32 = vmul.f32 %v8536_v36, %v2263_v1  ;;  %vm2954_vm0 = vweird.f32 %v8536_v36  ;;  %v8547_v1 = vld [vmem:[#allocation2] sm:$0xff] }
 0x28a   :  { %3434 = vmatpush.msrb.mxu3 %v14683_v61  ;;  %v14692_v61 = vld [vmem:[#allocation112_spill] sm:$0xff]  ;;  %vm2955_vm2 = vmor %vm2953_vm1, %vm2954_vm0 }
 0x28b   :  { %3345 = vmatpush.msrb.mxu2 %v14686_v46  ;;  %v2949_v38 = vmul.f32 %v8536_v36, %v2948_v32  ;;  %v11270_v32 = vperm.slane %v11264_v21, 0 }
 0x28c   :  { %3440 = vmatpush.msrb.mxu3 %v14685_v31  ;;  %v14694_v31 = vld [vmem:[#allocation116_spill] sm:$0xff] }
 0x28d   :  { %3347 = vmatpush.msrb.mxu2 %v14688_v45  ;;  %v2950_v57 = vmul.f32 0.5, %v2949_v38  ;;  %14696 = vst [vmem:[#allocation520_spill] sm:$0xff] %v11270_v32 }
 0x28e   :  { %3446 = vmatpush.msrb.mxu3 %v14687_v56 }
 0x28f   :  { %3349 = vmatpush.msrb.mxu2 %v14690_v44  ;;  %v2951_v56 = vsub.f32 1.5, %v2950_v57  ;;  %v14700_v57 = vld [vmem:[#allocation131_spill] sm:$0xff] }
 0x290   :  { %3452 = vmatpush.msrb.mxu3 %v14689_v27 }
 0x291   :  { %3351 = vmatpush.msrb.mxu2 %v14692_v61  ;;  %v2952_v27 = vmul.f32 %v8536_v36, %v2951_v56 }
 0x292   :  { %3458 = vmatpush.msrb.mxu3 %v14691_v3  ;;  %v14697_v3 = vld [vmem:[#allocation127_spill] sm:$0xff] }
 0x293   :  { %3353 = vmatpush.msrb.mxu2 %v14694_v31  ;;  %v2956_v38 = vsel %vm2955_vm2, %v8536_v36, %v2952_v27  ;;  %v14703_v27 = vld [vmem:[#allocation83_spill] sm:$0xff] }
 0x294   :  { %3464 = vmatpush.msrb.mxu3 %v14693_v41  ;;  %v14698_v41 = vld [vmem:[#allocation336_spill] sm:$0xff] }
 0x295   :  { %3355 = vmatpush.msrb.mxu2 %v14695_v23  ;;  %v2967_v58 = vmul.f32 %v2956_v38, %v14698_v41  ;;  %14699 = vst [vmem:[#allocation336_spill] sm:$0xff] %v11275_v49  ;;  %v14704_v38 = vld [vmem:[#allocation68_spill] sm:$0xff] }
 0x297   :  { %3357 = vmatpush.msrb.mxu2 %v14697_v3  ;;  %v2974_v35 = vmul.f32 %v11270_v32, %v2967_v58 }
 0x298   :  { %v2458_v32 = vpop.f32.mrf.mxu2 }
 0x299   :  { %3359 = vmatpush.msrb.mxu2 %v14700_v57  ;;  %v2981_v48 = vadd.f32 %v11275_v49, %v2974_v35  ;;  %v14702_v35 = vld [vmem:[#allocation77_spill] sm:$0xff]  ;;  %v2404_v49 = vpop.f32.mrf.mxu1 }
 0x29b   :  { %v2983_v56 = vmax.f32 %v2981_v48, 0.0 }
 0x29d   :  { %v11280_v29 = vadd.f32 %v8547_v1, %v2983_v56  ;;  %v14705_v56 = vld [vmem:[#allocation88_spill] sm:$0xff]  ;;  %v14706_v1 = vld [vmem:[#allocation73_spill] sm:$0xff] }
 0x29f   :  { %14701 = vst [vmem:[#allocation521_spill] sm:$0xff] %v11280_v29  ;;  %v11283_v8 = vand.u32 4294901760, %v11280_v29 }
 0x2a1   :  { %3125 = vmatmul.f32.vlgmr.msra.gmra.mxu1 %v11283_v8  ;;  %v11288_v41 = vsub.f32 %v11280_v29, %v11283_v8  ;;  %v14717_v29 = vld [vmem:[#allocation101_spill] sm:$0xff] }
 0x2a2   :  { %3525 = vmatpush.msra.mxu1 %v14670_v11 }
 0x2a3   :  { %3179 = vmatmul.f32.vlgmr.msra.gmra.mxu2 %v11288_v41  ;;  %v11293_v58 = vand.u32 4294901760, %v11288_v41 }
 0x2a4   :  { %3527 = vmatpush.msra.mxu1 %v14672_v55  ;;  %3566 = vmatpush.msra.mxu2 %v14702_v35  ;;  %v14710_v35 = vld [vmem:[#allocation85_spill] sm:$0xff] }
 0x2a5   :  { %3218 = vmatmul.f32.vlgmr.msra.gmra.mxu3 %v11293_v58  ;;  %v3022_v48 = vsub.f32 %v11288_v41, %v11293_v58 }
 0x2a6   :  { %3529 = vmatpush.msra.mxu1 %v14674_v53  ;;  %3633 = vmatpush.msra.mxu3 %v14670_v11  ;;  %v11399_v11 = vperm.slane %v11264_v21, 1 }
 0x2a7   :  { %v11302_v36 = vand.u32 4294901760, %v3022_v48  ;;  %3570 = vmatpush.msra.mxu2 %v14703_v27  ;;  %v14707_v48 = vld [vmem:[#allocation93_spill] sm:$0xff]  ;;  %v14708_v27 = vld [vmem:[#allocation80_spill] sm:$0xff] }
 0x2a8   :  { %3531 = vmatpush.msra.mxu1 %v14676_v52  ;;  %3635 = vmatpush.msra.mxu3 %v14672_v55 }
 0x2a9   :  { %3024 = vmatmul.f32.vlgmr.msra.gmra.mxu0 %v11302_v36  ;;  %3324 = vmatmul.f32.vlgmr.msrb.gmra.mxu1 %v11283_v8 }
 0x2aa   :  { %3472 = vmatpush.msra.mxu0 %v14704_v38  ;;  %3533 = vmatpush.msra.mxu1 %v14678_v15  ;;  %v14709_v38 = vld [vmem:[#allocation98_spill] sm:$0xff] }
 0x2ab   :  { %3637 = vmatpush.msra.mxu3 %v14674_v53  ;;  %3574 = vmatpush.msra.mxu2 %v14705_v56  ;;  %v14715_v56 = vld [vmem:[#allocation99_spill] sm:$0xff] }
 0x2ac   :  { %3475 = vmatpush.msra.mxu0 %v14706_v1  ;;  %3535 = vmatpush.msra.mxu1 %v14680_v6  ;;  %v14711_v1 = vld [vmem:[#allocation89_spill] sm:$0xff] }
 0x2ad   :  { %3639 = vmatpush.msra.mxu3 %v14676_v52  ;;  %3578 = vmatpush.msra.mxu2 %v14707_v48  ;;  %v14713_v48 = vld [vmem:[#allocation94_spill] sm:$0xff]  ;;  %v14758_v52 = vld [vmem:[#allocation177_spill] sm:$0xff] }
 0x2ae   :  { %3478 = vmatpush.msra.mxu0 %v14708_v27  ;;  %3537 = vmatpush.msra.mxu1 %v14682_v12  ;;  %v14712_v27 = vld [vmem:[#allocation103_spill] sm:$0xff] }
 0x2af   :  { %3641 = vmatpush.msra.mxu3 %v14678_v15  ;;  %3582 = vmatpush.msra.mxu2 %v14709_v38  ;;  %v2303_v38 = vpop.f32.mrf.mxu0  ;;  %v14756_v15 = vld [vmem:[#allocation171_spill] sm:$0xff] }
 0x2b0   :  { %3481 = vmatpush.msra.mxu0 %v14710_v35  ;;  %3539 = vmatpush.msra.mxu1 %v14684_v22  ;;  %v14714_v35 = vld [vmem:[#allocation107_spill] sm:$0xff] }
 0x2b1   :  { %3287 = vmatmul.f32.vlgmr.msrb.gmra.mxu0 %v11283_v8  ;;  %3643 = vmatpush.msra.mxu3 %v14680_v6 }
 0x2b2   :  { %3484 = vmatpush.msra.mxu0 %v14711_v1  ;;  %3541 = vmatpush.msra.mxu1 %v14686_v46  ;;  %v14716_v1 = vld [vmem:[#allocation109_spill] sm:$0xff] }
 0x2b3   :  { %3645 = vmatpush.msra.mxu3 %v14682_v12  ;;  %3586 = vmatpush.msra.mxu2 %v14712_v27  ;;  %v14718_v27 = vld [vmem:[#allocation113_spill] sm:$0xff]  ;;  %v14755_v12 = vld [vmem:[#allocation219_spill] sm:$0xff] }
 0x2b4   :  { %3487 = vmatpush.msra.mxu0 %v14713_v48  ;;  %3543 = vmatpush.msra.mxu1 %v14688_v45  ;;  %v2304_v48 = vadd.f32 1e-05, %v2303_v38  ;;  %v14722_v38 = vld [vmem:[#allocation122_spill] sm:$0xff] }
 0x2b5   :  { %3647 = vmatpush.msra.mxu3 %v14684_v22  ;;  %3590 = vmatpush.msra.mxu2 %v14714_v35  ;;  %v14719_v35 = vld [vmem:[#allocation105_spill] sm:$0xff]  ;;  %v14753_v22 = vld [vmem:[#allocation215_spill] sm:$0xff] }
 0x2b6   :  { %3490 = vmatpush.msra.mxu0 %v14715_v56  ;;  %3545 = vmatpush.msra.mxu1 %v14690_v44  ;;  %v14720_v56 = vld [vmem:[#allocation118_spill] sm:$0xff] }
 0x2b7   :  { %3649 = vmatpush.msra.mxu3 %v14686_v46  ;;  %3594 = vmatpush.msra.mxu2 %v14716_v1  ;;  %v14721_v1 = vld [vmem:[#allocation111_spill] sm:$0xff]  ;;  %v14751_v46 = vld [vmem:[#allocation210_spill] sm:$0xff] }
 0x2b8   :  { %3493 = vmatpush.msra.mxu0 %v14717_v29  ;;  %3547 = vmatpush.msra.mxu1 %v14692_v61  ;;  %v2405_v29 = vadd.f32 %v2404_v49, %v2304_v48  ;;  %v2497_v49 = vpop.f32.mrf.mxu3  ;;  %v14727_v48 = vld [vmem:[#allocation124_spill] sm:$0xff] }
 0x2b9   :  { %3651 = vmatpush.msra.mxu3 %v14688_v45  ;;  %3598 = vmatpush.msra.mxu2 %v14718_v27  ;;  %v14723_v27 = vld [vmem:[#allocation115_spill] sm:$0xff] }
 0x2ba   :  { %3496 = vmatpush.msra.mxu0 %v14719_v35  ;;  %3549 = vmatpush.msra.mxu1 %v14694_v31  ;;  %v2459_v35 = vadd.f32 %v2458_v32, %v2405_v29  ;;  %v14730_v29 = vld [vmem:[#allocation130_spill] sm:$0xff]  ;;  %v14731_v32 = vld [vmem:[#allocation136_spill] sm:$0xff]  ;;  %v14746_v45 = vld [vmem:[#allocation155_spill] sm:$0xff] }
 0x2bb   :  { %3653 = vmatpush.msra.mxu3 %v14690_v44  ;;  %3602 = vmatpush.msra.mxu2 %v14720_v56  ;;  %v14724_v44 = vld [vmem:[#allocation126_spill] sm:$0xff]  ;;  %v14725_v56 = vld [vmem:[#allocation119_spill] sm:$0xff] }
 0x2bc   :  { %3499 = vmatpush.msra.mxu0 %v14721_v1  ;;  %3551 = vmatpush.msra.mxu1 %v14695_v23  ;;  %v14726_v1 = vld [vmem:[#allocation168_spill] sm:$0xff] }
 0x2bd   :  { %3655 = vmatpush.msra.mxu3 %v14692_v61  ;;  %3606 = vmatpush.msra.mxu2 %v14722_v38  ;;  %v14728_v38 = vld [vmem:[#allocation129_spill] sm:$0xff]  ;;  %v14729_v61 = vld [vmem:[#allocation172_spill] sm:$0xff] }
 0x2be   :  { %3502 = vmatpush.msra.mxu0 %v14723_v27  ;;  %3553 = vmatpush.msra.mxu1 %v14697_v3  ;;  %v2498_v27 = vadd.f32 %v2497_v49, %v2459_v35  ;;  %v14736_v35 = vld [vmem:[#allocation137_spill] sm:$0xff] }
 0x2bf   :  { %3657 = vmatpush.msra.mxu3 %v14694_v31  ;;  %3610 = vmatpush.msra.mxu2 %v14724_v44  ;;  %v14733_v44 = vld [vmem:[#allocation134_spill] sm:$0xff]  ;;  %v14737_v49 = vld [vmem:[#allocation141_spill] sm:$0xff]  ;;  %v14741_v31 = vld [vmem:[#allocation188_spill] sm:$0xff] }
 0x2c0   :  { %3505 = vmatpush.msra.mxu0 %v14725_v56  ;;  %3555 = vmatpush.msra.mxu1 %v14700_v57  ;;  %v14732_v56 = vld [vmem:[#allocation176_spill] sm:$0xff] }
 0x2c1   :  { %3659 = vmatpush.msra.mxu3 %v14695_v23  ;;  %3614 = vmatpush.msra.mxu2 %v14728_v38  ;;  %v14734_v23 = vld [vmem:[#allocation139_spill] sm:$0xff]  ;;  %v14735_v38 = vld [vmem:[#allocation180_spill] sm:$0xff] }
 0x2c2   :  { %3715 = vmatpush.msrb.mxu1 %v14726_v1  ;;  %3508 = vmatpush.msra.mxu0 %v14727_v48  ;;  %v2566_v1 = vpop.f32.mrf.mxu0 }
 0x2c3   :  { %3661 = vmatpush.msra.mxu3 %v14697_v3  ;;  %3618 = vmatpush.msra.mxu2 %v14731_v32  ;;  %v2567_v48 = vadd.f32 %v2566_v1, %v2498_v27  ;;  %v2603_v32 = vpop.f32.mrf.mxu1  ;;  %v14743_v27 = vld [vmem:[#allocation191_spill] sm:$0xff]  ;;  %v14744_v1 = vld [vmem:[#allocation153_spill] sm:$0xff] }
 0x2c4   :  { %3721 = vmatpush.msrb.mxu1 %v14729_v61  ;;  %3511 = vmatpush.msra.mxu0 %v14730_v29  ;;  %v14738_v61 = vld [vmem:[#allocation149_spill] sm:$0xff]  ;;  %v14739_v29 = vld [vmem:[#allocation184_spill] sm:$0xff] }
 0x2c5   :  { %3663 = vmatpush.msra.mxu3 %v14700_v57  ;;  %3622 = vmatpush.msra.mxu2 %v14734_v23  ;;  %v2604_v3 = vadd.f32 %v2603_v32, %v2567_v48  ;;  %v14740_v57 = vld [vmem:[#allocation150_spill] sm:$0xff]  ;;  %v14742_v23 = vld [vmem:[#allocation151_spill] sm:$0xff]  ;;  %v14749_v32 = vld [vmem:[#allocation204_spill] sm:$0xff]  ;;  %14766 = vst [vmem:[#allocation149_spill] sm:$0xff] %v11399_v11 }
 0x2c6   :  { %3727 = vmatpush.msrb.mxu1 %v14732_v56  ;;  %3514 = vmatpush.msra.mxu0 %v14733_v44  ;;  %v2644_v56 = vpop.f32.mrf.mxu2  ;;  %v14748_v48 = vld [vmem:[#allocation158_spill] sm:$0xff]  ;;  %14767 = vst [vmem:[#allocation150_spill] sm:$0xff] %v11403_v26 }
 0x2c7   :  { %3626 = vmatpush.msra.mxu2 %v14737_v49  ;;  %v2645_v44 = vadd.f32 %v2644_v56, %v2604_v3  ;;  %v2745_v49 = vpop.f32.mrf.mxu3  ;;  %v14750_v56 = vld [vmem:[#allocation161_spill] sm:$0xff] }
 0x2c8   :  { %3733 = vmatpush.msrb.mxu1 %v14735_v38  ;;  %3517 = vmatpush.msra.mxu0 %v14736_v35  ;;  %v14745_v35 = vld [vmem:[#allocation196_spill] sm:$0xff] }
 0x2c9   :  { %v2746_v38 = vadd.f32 %v2745_v49, %v2645_v44  ;;  %v14754_v49 = vld [vmem:[#allocation167_spill] sm:$0xff] }
 0x2ca   :  { %3670 = vmatpush.msrb.mxu0 %v14738_v61  ;;  %3739 = vmatpush.msrb.mxu1 %v14739_v29  ;;  %v14747_v29 = vld [vmem:[#allocation200_spill] sm:$0xff] }
 0x2cc   :  { %3672 = vmatpush.msrb.mxu0 %v14740_v57  ;;  %3745 = vmatpush.msrb.mxu1 %v14741_v31  ;;  %v2799_v31 = vpop.f32.mrf.mxu0 }
 0x2cd   :  { %v2800_v3 = vadd.f32 %v2799_v31, %v2746_v38 }
 0x2ce   :  { %3674 = vmatpush.msrb.mxu0 %v14742_v23  ;;  %3751 = vmatpush.msrb.mxu1 %v14743_v27  ;;  %v14752_v27 = vld [vmem:[#allocation164_spill] sm:$0xff] }
 0x2d0   :  { %3676 = vmatpush.msrb.mxu0 %v14744_v1  ;;  %3757 = vmatpush.msrb.mxu1 %v14745_v35  ;;  %v2838_v35 = vpop.f32.mrf.mxu1 }
 0x2d1   :  { %v2839_v44 = vadd.f32 %v2838_v35, %v2800_v3  ;;  %v14761_v35 = vld [vmem:[#allocation232_spill] sm:$0xff]  ;;  %v14762_v3 = vld [vmem:[#allocation185_spill] sm:$0xff] }
 0x2d2   :  { %3678 = vmatpush.msrb.mxu0 %v14746_v45  ;;  %3763 = vmatpush.msrb.mxu1 %v14747_v29 }
 0x2d4   :  { %3680 = vmatpush.msrb.mxu0 %v14748_v48  ;;  %3769 = vmatpush.msrb.mxu1 %v14749_v32  ;;  %v14757_v32 = vld [vmem:[#allocation223_spill] sm:$0xff] }
 0x2d6   :  { %3682 = vmatpush.msrb.mxu0 %v14750_v56  ;;  %3775 = vmatpush.msrb.mxu1 %v14751_v46  ;;  %v14759_v46 = vld [vmem:[#allocation227_spill] sm:$0xff] }
 0x2d8   :  { %3684 = vmatpush.msrb.mxu0 %v14752_v27  ;;  %3781 = vmatpush.msrb.mxu1 %v14753_v22  ;;  %v2944_v31 = vpop.f32.mrf.mxu3  ;;  %v14760_v22 = vld [vmem:[#allocation181_spill] sm:$0xff] }
 0x2da   :  { %3686 = vmatpush.msrb.mxu0 %v14754_v49  ;;  %3787 = vmatpush.msrb.mxu1 %v14755_v12  ;;  %v2907_v29 = vpop.f32.mrf.mxu2  ;;  %v14763_v12 = vld [vmem:[#allocation189_spill] sm:$0xff] }
 0x2db   :  { %v2908_v6 = vadd.f32 %v2907_v29, %v2839_v44  ;;  %v14764_v44 = vld [vmem:[#allocation192_spill] sm:$0xff] }
 0x2dc   :  { %3688 = vmatpush.msrb.mxu0 %v14756_v15  ;;  %3793 = vmatpush.msrb.mxu1 %v14757_v32  ;;  %v14765_v32 = vld [vmem:[#allocation197_spill] sm:$0xff] }
 0x2dd   :  { %v2945_v38 = vadd.f32 %v2944_v31, %v2908_v6 }
 0x2de   :  { %3690 = vmatpush.msrb.mxu0 %v14758_v52  ;;  %3799 = vmatpush.msrb.mxu1 %v14759_v46 }
 0x2df   :  { %8537 = vrsqrt.f32 %v2945_v38  ;;  %vm2963_vm4 = vweird.f32 %v2945_v38 }
 0x2e0   :  { %3692 = vmatpush.msrb.mxu0 %v14760_v22  ;;  %3805 = vmatpush.msrb.mxu1 %v14761_v35 }
 0x2e2   :  { %3694 = vmatpush.msrb.mxu0 %v14762_v3 }
 0x2e4   :  { %3696 = vmatpush.msrb.mxu0 %v14763_v12 }
 0x2e5   :  { %v8538_v29 = vpop.eup %8537 }
 0x2e6   :  { %3698 = vmatpush.msrb.mxu0 %v14764_v44  ;;  %v2958_v53 = vmul.f32 %v8538_v29, %v2945_v38  ;;  %vm2964_vm3 = vweird.f32 %v8538_v29  ;;  %v14772_v38 = vld [vmem:[#allocation152_spill] sm:$0xff] }
 0x2e7   :  { %vm2965_vm5 = vmor %vm2963_vm4, %vm2964_vm3 }
 0x2e8   :  { %3700 = vmatpush.msrb.mxu0 %v14765_v32  ;;  %v2959_v6 = vmul.f32 %v8538_v29, %v2958_v53 }
 0x2ea   :  { %v2960_v31 = vmul.f32 0.5, %v2959_v6  ;;  %v8548_v6 = vld [vmem:[#allocation2 + $0x8] sm:$0xff] }
 0x2ec   :  { %v2961_v55 = vsub.f32 1.5, %v2960_v31 }
 0x2ee   :  { %v2962_v46 = vmul.f32 %v8538_v29, %v2961_v55 }
 0x2f0   :  { %v2966_v35 = vsel %vm2965_vm5, %v8538_v29, %v2962_v46  ;;  %v14771_v46 = vld [vmem:[#allocation162_spill] sm:$0xff] }
 0x2f1   :  { %v2968_v59 = vmul.f32 %v2966_v35, %v10753_v50  ;;  %v14770_v50 = vld [vmem:[#allocation159_spill] sm:$0xff]  ;;  %v14773_v35 = vld [vmem:[#allocation165_spill] sm:$0xff]  ;;  %v14774_v29 = vld [vmem:[#allocation154_spill] sm:$0xff] }
 0x2f3   :  { %v2975_v18 = vmul.f32 %v11399_v11, %v2968_v59  ;;  %v14835_v11 = vld [vmem:[#allocation253_spill] sm:$0xff] }
 0x2f5   :  { %v2982_v62 = vadd.f32 %v11403_v26, %v2975_v18  ;;  %v14832_v26 = vld [vmem:[#allocation249_spill] sm:$0xff] }
 0x2f7   :  { %v2984_v53 = vmax.f32 %v2982_v62, 0.0  ;;  %v14769_v62 = vld [vmem:[#allocation156_spill] sm:$0xff] }
 0x2f9   :  { %v11407_v31 = vadd.f32 %v8548_v6, %v2984_v53  ;;  %v14775_v53 = vld [vmem:[#allocation169_spill] sm:$0xff] }
 0x2fa   :  { %v14776_v6 = vld [vmem:[#allocation157_spill] sm:$0xff] }
 0x2fb   :  { %14768 = vst [vmem:[#allocation151_spill] sm:$0xff] %v11407_v31  ;;  %v11410_v55 = vand.u32 4294901760, %v11407_v31 }
 0x2fd   :  { %3466 = vmatmul.f32.vlgmr.msrb.gmra.mxu3 %v11410_v55  ;;  %v11415_v21 = vsub.f32 %v11407_v31, %v11410_v55  ;;  %v14829_v31 = vld [vmem:[#allocation245_spill] sm:$0xff] }
 0x2fe   :  { %3866 = vmatpush.msrb.mxu3 %v14738_v61 }
 0x2ff   :  { %3520 = vmatmul.f32.vlgmr.msra.gmra.mxu0 %v11415_v21  ;;  %v11420_v59 = vand.u32 4294901760, %v11415_v21 }
 0x300   :  { %3868 = vmatpush.msrb.mxu3 %v14740_v57  ;;  %3907 = vmatpush.msra.mxu0 %v14769_v62  ;;  %v14826_v62 = vld [vmem:[#allocation241_spill] sm:$0xff] }
 0x301   :  { %3559 = vmatmul.f32.vlgmr.msra.gmra.mxu1 %v11420_v59  ;;  %v3363_v18 = vsub.f32 %v11415_v21, %v11420_v59 }
 0x302   :  { %3870 = vmatpush.msrb.mxu3 %v14742_v23  ;;  %3911 = vmatpush.msra.mxu0 %v14770_v50  ;;  %v14823_v50 = vld [vmem:[#allocation237_spill] sm:$0xff] }
 0x303   :  { %3974 = vmatpush.msra.mxu1 %v14738_v61  ;;  %v11430_v34 = vand.u32 4294901760, %v3363_v18  ;;  %v14777_v18 = vld [vmem:[#allocation173_spill] sm:$0xff] }
 0x304   :  { %3872 = vmatpush.msrb.mxu3 %v14744_v1  ;;  %3915 = vmatpush.msra.mxu0 %v14771_v46  ;;  %v14807_v46 = vld [vmem:[#allocation217_spill] sm:$0xff] }
 0x305   :  { %3976 = vmatpush.msra.mxu1 %v14740_v57  ;;  %3365 = vmatmul.f32.vlgmr.msrb.gmra.mxu2 %v11430_v34 }
 0x306   :  { %3665 = vmatmul.f32.vlgmr.msra.gmra.mxu3 %v11410_v55  ;;  %3813 = vmatpush.msrb.mxu2 %v14772_v38  ;;  %v14801_v38 = vld [vmem:[#allocation199_spill] sm:$0xff] }
 0x307   :  { %3874 = vmatpush.msrb.mxu3 %v14746_v45  ;;  %3919 = vmatpush.msra.mxu0 %v14773_v35  ;;  %v14778_v35 = vld [vmem:[#allocation160_spill] sm:$0xff] }
 0x308   :  { %3978 = vmatpush.msra.mxu1 %v14742_v23  ;;  %3706 = vmatmul.f32.vlgmr.msrb.gmra.mxu0 %v11302_v36  ;;  %v14779_v36 = vld [vmem:[#allocation178_spill] sm:$0xff] }
 0x309   :  { %3816 = vmatpush.msrb.mxu2 %v14774_v29  ;;  %3876 = vmatpush.msrb.mxu3 %v14748_v48  ;;  %v14785_v29 = vld [vmem:[#allocation187_spill] sm:$0xff] }
 0x30a   :  { %3923 = vmatpush.msra.mxu0 %v14775_v53  ;;  %3980 = vmatpush.msra.mxu1 %v14744_v1  ;;  %v14780_v53 = vld [vmem:[#allocation163_spill] sm:$0xff] }
 0x30b   :  { %3807 = vmatmul.f32.vlgmr.msrb.gmra.mxu1 %v11283_v8  ;;  %3819 = vmatpush.msrb.mxu2 %v14776_v6  ;;  %v14781_v6 = vld [vmem:[#allocation182_spill] sm:$0xff] }
 0x30c   :  { %3878 = vmatpush.msrb.mxu3 %v14750_v56  ;;  %3927 = vmatpush.msra.mxu0 %v14777_v18  ;;  %v14782_v18 = vld [vmem:[#allocation166_spill] sm:$0xff] }
 0x30d   :  { %3982 = vmatpush.msra.mxu1 %v14746_v45  ;;  %3822 = vmatpush.msrb.mxu2 %v14778_v35  ;;  %v14783_v35 = vld [vmem:[#allocation183_spill] sm:$0xff] }
 0x30e   :  { %3880 = vmatpush.msrb.mxu3 %v14752_v27  ;;  %3931 = vmatpush.msra.mxu0 %v14779_v36  ;;  %v14784_v36 = vld [vmem:[#allocation170_spill] sm:$0xff] }
 0x30f   :  { %3984 = vmatpush.msra.mxu1 %v14748_v48  ;;  %3628 = vmatmul.f32.vlgmr.msra.gmra.mxu2 %v11410_v55 }
 0x310   :  { %3825 = vmatpush.msrb.mxu2 %v14780_v53  ;;  %3882 = vmatpush.msrb.mxu3 %v14754_v49  ;;  %v14786_v53 = vld [vmem:[#allocation174_spill] sm:$0xff] }
 0x311   :  { %3935 = vmatpush.msra.mxu0 %v14781_v6  ;;  %3986 = vmatpush.msra.mxu1 %v14750_v56  ;;  %v14787_v6 = vld [vmem:[#allocation193_spill] sm:$0xff] }
 0x312   :  { %3828 = vmatpush.msrb.mxu2 %v14782_v18  ;;  %3884 = vmatpush.msrb.mxu3 %v14756_v15  ;;  %v14788_v18 = vld [vmem:[#allocation175_spill] sm:$0xff] }
 0x313   :  { %3939 = vmatpush.msra.mxu0 %v14783_v35  ;;  %3988 = vmatpush.msra.mxu1 %v14752_v27  ;;  %v14789_v35 = vld [vmem:[#allocation198_spill] sm:$0xff] }
 0x314   :  { %3831 = vmatpush.msrb.mxu2 %v14784_v36  ;;  %3886 = vmatpush.msrb.mxu3 %v14758_v52  ;;  %v14790_v36 = vld [vmem:[#allocation179_spill] sm:$0xff] }
 0x315   :  { %3943 = vmatpush.msra.mxu0 %v14785_v29  ;;  %3990 = vmatpush.msra.mxu1 %v14754_v49  ;;  %v14791_v29 = vld [vmem:[#allocation201_spill] sm:$0xff] }
 0x316   :  { %3834 = vmatpush.msrb.mxu2 %v14786_v53  ;;  %3888 = vmatpush.msrb.mxu3 %v14760_v22  ;;  %v14792_v53 = vld [vmem:[#allocation186_spill] sm:$0xff] }
 0x317   :  { %3947 = vmatpush.msra.mxu0 %v14787_v6  ;;  %3992 = vmatpush.msra.mxu1 %v14756_v15  ;;  %v14793_v6 = vld [vmem:[#allocation206_spill] sm:$0xff] }
 0x318   :  { %3837 = vmatpush.msrb.mxu2 %v14788_v18  ;;  %3890 = vmatpush.msrb.mxu3 %v14762_v3  ;;  %v14794_v18 = vld [vmem:[#allocation190_spill] sm:$0xff] }
 0x319   :  { %3951 = vmatpush.msra.mxu0 %v14789_v35  ;;  %3994 = vmatpush.msra.mxu1 %v14758_v52  ;;  %v14795_v35 = vld [vmem:[#allocation211_spill] sm:$0xff] }
 0x31a   :  { %3840 = vmatpush.msrb.mxu2 %v14790_v36  ;;  %3892 = vmatpush.msrb.mxu3 %v14763_v12  ;;  %v14797_v36 = vld [vmem:[#allocation230_spill] sm:$0xff] }
 0x31b   :  { %3955 = vmatpush.msra.mxu0 %v14791_v29  ;;  %3996 = vmatpush.msra.mxu1 %v14760_v22  ;;  %v14796_v29 = vld [vmem:[#allocation194_spill] sm:$0xff] }
 0x31c   :  { %3843 = vmatpush.msrb.mxu2 %v14792_v53  ;;  %3894 = vmatpush.msrb.mxu3 %v14764_v44  ;;  %v14798_v53 = vld [vmem:[#allocation216_spill] sm:$0xff] }
 0x31d   :  { %3959 = vmatpush.msra.mxu0 %v14793_v6  ;;  %3998 = vmatpush.msra.mxu1 %v14762_v3  ;;  %v14799_v6 = vld [vmem:[#allocation235_spill] sm:$0xff] }
 0x31e   :  { %3846 = vmatpush.msrb.mxu2 %v14794_v18  ;;  %3896 = vmatpush.msrb.mxu3 %v14765_v32  ;;  %v14800_v18 = vld [vmem:[#allocation205_spill] sm:$0xff] }
 0x31f   :  { %3963 = vmatpush.msra.mxu0 %v14795_v35  ;;  %4000 = vmatpush.msra.mxu1 %v14763_v12  ;;  %v14806_v35 = vld [vmem:[#allocation243_spill] sm:$0xff]  ;;  %v14844_v12 = vld [vmem:[#allocation265_spill] sm:$0xff] }
 0x320   :  { %3900 = vmatmul.f32.vlgmr.msrb.gmra.mxu3 %v11293_v58  ;;  %3849 = vmatpush.msrb.mxu2 %v14796_v29  ;;  %v14802_v58 = vld [vmem:[#allocation239_spill] sm:$0xff]  ;;  %v14803_v29 = vld [vmem:[#allocation212_spill] sm:$0xff] }
 0x321   :  { %4056 = vmatpush.msra.mxu3 %v14797_v36  ;;  %3967 = vmatpush.msra.mxu0 %v14798_v53  ;;  %v14804_v36 = vld [vmem:[#allocation195_spill] sm:$0xff]  ;;  %v14805_v53 = vld [vmem:[#allocation202_spill] sm:$0xff] }
 0x322   :  { %4002 = vmatpush.msra.mxu1 %v14764_v44  ;;  %3969 = vmatmul.f32.vlgmr.msra.gmra.mxu0 %v11283_v8  ;;  %v14841_v44 = vld [vmem:[#allocation261_spill] sm:$0xff] }
 0x323   :  { %4062 = vmatpush.msra.mxu3 %v14799_v6  ;;  %4154 = vmatpush.msrb.mxu0 %v14800_v18  ;;  %v14808_v6 = vld [vmem:[#allocation203_spill] sm:$0xff] }
 0x324   :  { %3852 = vmatpush.msrb.mxu2 %v14801_v38  ;;  %4004 = vmatpush.msra.mxu1 %v14765_v32  ;;  %v14809_v18 = vld [vmem:[#allocation207_spill] sm:$0xff]  ;;  %v14838_v32 = vld [vmem:[#allocation257_spill] sm:$0xff] }
 0x325   :  { %4006 = vmatmul.f32.vlgmr.msra.gmra.mxu1 %v11283_v8  ;;  %4068 = vmatpush.msra.mxu3 %v14802_v58  ;;  %v14810_v38 = vld [vmem:[#allocation247_spill] sm:$0xff]  ;;  %v14811_v8 = vld [vmem:[#allocation218_spill] sm:$0xff] }
 0x326   :  { %4157 = vmatpush.msrb.mxu0 %v14803_v29  ;;  %4207 = vmatpush.msrb.mxu1 %v14804_v36  ;;  %v14812_v29 = vld [vmem:[#allocation208_spill] sm:$0xff]  ;;  %v14813_v58 = vld [vmem:[#allocation251_spill] sm:$0xff] }
 0x327   :  { %3855 = vmatpush.msrb.mxu2 %v14805_v53  ;;  %4074 = vmatpush.msra.mxu3 %v14806_v35  ;;  %v14814_v53 = vld [vmem:[#allocation222_spill] sm:$0xff]  ;;  %v14816_v35 = vld [vmem:[#allocation255_spill] sm:$0xff] }
 0x328   :  { %4160 = vmatpush.msrb.mxu0 %v14807_v46  ;;  %4209 = vmatpush.msrb.mxu1 %v14808_v6  ;;  %v14815_v46 = vld [vmem:[#allocation209_spill] sm:$0xff] }
 0x329   :  { %3858 = vmatpush.msrb.mxu2 %v14809_v18  ;;  %4080 = vmatpush.msra.mxu3 %v14810_v38  ;;  %v14817_v18 = vld [vmem:[#allocation228_spill] sm:$0xff]  ;;  %v14820_v38 = vld [vmem:[#allocation233_spill] sm:$0xff] }
 0x32a   :  { %3861 = vmatmul.f32.vlgmr.msrb.gmra.mxu2 %v11288_v41  ;;  %4163 = vmatpush.msrb.mxu0 %v14811_v8  ;;  %v14818_v41 = vld [vmem:[#allocation214_spill] sm:$0xff]  ;;  %v14819_v8 = vld [vmem:[#allocation259_spill] sm:$0xff] }
 0x32b   :  { %4011 = vmatpush.msra.mxu2 %v14804_v36  ;;  %4211 = vmatpush.msrb.mxu1 %v14812_v29 }
 0x32c   :  { %4086 = vmatpush.msra.mxu3 %v14813_v58  ;;  %4166 = vmatpush.msrb.mxu0 %v14814_v53  ;;  %v14821_v58 = vld [vmem:[#allocation221_spill] sm:$0xff]  ;;  %v14822_v53 = vld [vmem:[#allocation263_spill] sm:$0xff] }
 0x32d   :  { %4013 = vmatpush.msra.mxu2 %v14808_v6  ;;  %4213 = vmatpush.msrb.mxu1 %v14815_v46 }
 0x32e   :  { %4092 = vmatpush.msra.mxu3 %v14816_v35  ;;  %4169 = vmatpush.msrb.mxu0 %v14817_v18  ;;  %v14824_v35 = vld [vmem:[#allocation225_spill] sm:$0xff]  ;;  %v14825_v18 = vld [vmem:[#allocation266_spill] sm:$0xff] }
 0x32f   :  { %4015 = vmatpush.msra.mxu2 %v14812_v29  ;;  %4215 = vmatpush.msrb.mxu1 %v14818_v41 }
 0x330   :  { %4098 = vmatpush.msra.mxu3 %v14819_v8  ;;  %4172 = vmatpush.msrb.mxu0 %v14820_v38  ;;  %v14827_v8 = vld [vmem:[#allocation229_spill] sm:$0xff] }
 0x331   :  { %4017 = vmatpush.msra.mxu2 %v14815_v46  ;;  %4217 = vmatpush.msrb.mxu1 %v14821_v58  ;;  %v14828_v38 = vld [vmem:[#allocation269_spill] sm:$0xff] }
 0x332   :  { %4104 = vmatpush.msra.mxu3 %v14822_v53  ;;  %4175 = vmatpush.msrb.mxu0 %v14823_v50  ;;  %v14830_v53 = vld [vmem:[#allocation234_spill] sm:$0xff]  ;;  %v14831_v50 = vld [vmem:[#allocation271_spill] sm:$0xff] }
 0x333   :  { %4019 = vmatpush.msra.mxu2 %v14818_v41  ;;  %4219 = vmatpush.msrb.mxu1 %v14824_v35 }
 0x334   :  { %4110 = vmatpush.msra.mxu3 %v14825_v18  ;;  %4178 = vmatpush.msrb.mxu0 %v14826_v62  ;;  %v14833_v18 = vld [vmem:[#allocation238_spill] sm:$0xff]  ;;  %v14834_v62 = vld [vmem:[#allocation273_spill] sm:$0xff] }
 0x335   :  { %4021 = vmatpush.msra.mxu2 %v14821_v58  ;;  %4221 = vmatpush.msrb.mxu1 %v14827_v8 }
 0x336   :  { %4116 = vmatpush.msra.mxu3 %v14828_v38  ;;  %4181 = vmatpush.msrb.mxu0 %v14829_v31  ;;  %v14836_v38 = vld [vmem:[#allocation242_spill] sm:$0xff] }
 0x337   :  { %4023 = vmatpush.msra.mxu2 %v14824_v35  ;;  %4223 = vmatpush.msrb.mxu1 %v14830_v53  ;;  %v14837_v31 = vld [vmem:[#allocation274_spill] sm:$0xff] }
 0x338   :  { %4122 = vmatpush.msra.mxu3 %v14831_v50  ;;  %4184 = vmatpush.msrb.mxu0 %v14832_v26  ;;  %v14839_v50 = vld [vmem:[#allocation246_spill] sm:$0xff]  ;;  %v14840_v26 = vld [vmem:[#allocation275_spill] sm:$0xff] }
 0x339   :  { %4025 = vmatpush.msra.mxu2 %v14827_v8  ;;  %4225 = vmatpush.msrb.mxu1 %v14833_v18 }
 0x33a   :  { %4128 = vmatpush.msra.mxu3 %v14834_v62  ;;  %4187 = vmatpush.msrb.mxu0 %v14835_v11  ;;  %v14842_v62 = vld [vmem:[#allocation250_spill] sm:$0xff]  ;;  %v14843_v11 = vld [vmem:[#allocation276_spill] sm:$0xff] }
 0x33b   :  { %4027 = vmatpush.msra.mxu2 %v14830_v53  ;;  %4227 = vmatpush.msrb.mxu1 %v14836_v38 }
 0x33c   :  { %4134 = vmatpush.msra.mxu3 %v14837_v31  ;;  %4190 = vmatpush.msrb.mxu0 %v14838_v32  ;;  %v14845_v31 = vld [vmem:[#allocation254_spill] sm:$0xff]  ;;  %v14846_v32 = vld [vmem:[#allocation268_spill] sm:$0xff] }
 0x33d   :  { %4029 = vmatpush.msra.mxu2 %v14833_v18  ;;  %4229 = vmatpush.msrb.mxu1 %v14839_v50 }
 0x33e   :  { %4140 = vmatpush.msra.mxu3 %v14840_v26  ;;  %4193 = vmatpush.msrb.mxu0 %v14841_v44  ;;  %v14847_v44 = vld [vmem:[#allocation258_spill] sm:$0xff]  ;;  %v14851_v26 = vld [vmem:[#allocation120_spill] sm:$0xff] }
 0x33f   :  { %4031 = vmatpush.msra.mxu2 %v14836_v38  ;;  %4231 = vmatpush.msrb.mxu1 %v14842_v62 }
 0x340   :  { %4146 = vmatpush.msra.mxu3 %v14843_v11  ;;  %4196 = vmatpush.msrb.mxu0 %v14844_v12  ;;  %v14848_v12 = vld [vmem:[#allocation262_spill] sm:$0xff]  ;;  %v14849_v11 = vld [vmem:[#allocation133_spill] sm:$0xff] }
 0x341   :  { %4033 = vmatpush.msra.mxu2 %v14839_v50  ;;  %4233 = vmatpush.msrb.mxu1 %v14845_v31 }
 0x342   :  { %4148 = vmatmul.f32.vlgmr.msra.gmra.mxu3 %v11410_v55  ;;  %4199 = vmatpush.msrb.mxu0 %v14846_v32  ;;  %v14850_v32 = vld [vmem:[#allocation292_spill] sm:$0xff] }
 0x343   :  { %4315 = vmatpush.msrb.mxu3 %v14804_v36  ;;  %4035 = vmatpush.msra.mxu2 %v14842_v62  ;;  %v14858_v36 = vld [vmem:[#allocation278_spill] sm:$0xff] }
 0x344   :  { %4235 = vmatpush.msrb.mxu1 %v14847_v44  ;;  %4202 = vmatmul.f32.vlgmr.msrb.gmra.mxu0 %v11415_v21  ;;  %v14852_v21 = vld [vmem:[#allocation297_spill] sm:$0xff] }
 0x345   :  { %4317 = vmatpush.msrb.mxu3 %v14808_v6  ;;  %4037 = vmatpush.msra.mxu2 %v14845_v31  ;;  %v14853_v6 = vld [vmem:[#allocation213_spill] sm:$0xff] }
 0x346   :  { %4237 = vmatpush.msrb.mxu1 %v14848_v12  ;;  %4354 = vmatpush.msra.mxu0 %v14849_v11 }
 0x347   :  { %4241 = vmatmul.f32.vlgmr.msrb.gmra.mxu1 %v11420_v59  ;;  %4319 = vmatpush.msrb.mxu3 %v14812_v29  ;;  %v14854_v59 = vld [vmem:[#allocation299_spill] sm:$0xff]  ;;  %v14855_v29 = vld [vmem:[#allocation142_spill] sm:$0xff] }
 0x348   :  { %4039 = vmatpush.msra.mxu2 %v14847_v44  ;;  %4399 = vmatpush.msra.mxu1 %v14850_v32  ;;  %v14856_v32 = vld [vmem:[#allocation220_spill] sm:$0xff] }
 0x349   :  { %4321 = vmatpush.msrb.mxu3 %v14815_v46  ;;  %4356 = vmatpush.msra.mxu0 %v14851_v26  ;;  %v14857_v46 = vld [vmem:[#allocation304_spill] sm:$0xff] }
 0x34a   :  { %4041 = vmatpush.msra.mxu2 %v14848_v12  ;;  %4405 = vmatpush.msra.mxu1 %v14852_v21  ;;  %v14859_v21 = vld [vmem:[#allocation224_spill] sm:$0xff] }
 0x34b   :  { %4047 = vmatmul.f32.vlgmr.msra.gmra.mxu2 %v11430_v34  ;;  %4323 = vmatpush.msrb.mxu3 %v14818_v41  ;;  %v14860_v34 = vld [vmem:[#allocation306_spill] sm:$0xff]  ;;  %v14963_v41 = vld [vmem:[#allocation344_spill] sm:$0xff] }
 0x34c   :  { %4248 = vmatpush.msrb.mxu2 %v14853_v6  ;;  %4411 = vmatpush.msra.mxu1 %v14854_v59  ;;  %v14861_v6 = vld [vmem:[#allocation281_spill] sm:$0xff]  ;;  %v14862_v59 = vld [vmem:[#allocation226_spill] sm:$0xff] }
 0x34d   :  { %4325 = vmatpush.msrb.mxu3 %v14821_v58  ;;  %4358 = vmatpush.msra.mxu0 %v14855_v29  ;;  %v14863_v58 = vld [vmem:[#allocation311_spill] sm:$0xff] }
 0x34e   :  { %4252 = vmatpush.msrb.mxu2 %v14856_v32  ;;  %4417 = vmatpush.msra.mxu1 %v14857_v46  ;;  %v14864_v32 = vld [vmem:[#allocation285_spill] sm:$0xff]  ;;  %v14865_v46 = vld [vmem:[#allocation231_spill] sm:$0xff] }
 0x34f   :  { %4327 = vmatpush.msrb.mxu3 %v14824_v35  ;;  %4360 = vmatpush.msra.mxu0 %v14858_v36  ;;  %v14866_v35 = vld [vmem:[#allocation314_spill] sm:$0xff] }
 0x350   :  { %4256 = vmatpush.msrb.mxu2 %v14859_v21  ;;  %4423 = vmatpush.msra.mxu1 %v14860_v34  ;;  %v14867_v21 = vld [vmem:[#allocation286_spill] sm:$0xff]  ;;  %v14868_v34 = vld [vmem:[#allocation236_spill] sm:$0xff] }
 0x351   :  { %4329 = vmatpush.msrb.mxu3 %v14827_v8  ;;  %4362 = vmatpush.msra.mxu0 %v14861_v6  ;;  %v14869_v8 = vld [vmem:[#allocation318_spill] sm:$0xff] }
 0x352   :  { %4260 = vmatpush.msrb.mxu2 %v14862_v59  ;;  %4429 = vmatpush.msra.mxu1 %v14863_v58  ;;  %v14870_v59 = vld [vmem:[#allocation288_spill] sm:$0xff] }
 0x353   :  { %4331 = vmatpush.msrb.mxu3 %v14830_v53  ;;  %4364 = vmatpush.msra.mxu0 %v14864_v32  ;;  %v14871_v58 = vld [vmem:[#allocation240_spill] sm:$0xff]  ;;  %v14872_v53 = vld [vmem:[#allocation322_spill] sm:$0xff] }
 0x354   :  { %4264 = vmatpush.msrb.mxu2 %v14865_v46  ;;  %4435 = vmatpush.msra.mxu1 %v14866_v35  ;;  %v14873_v46 = vld [vmem:[#allocation294_spill] sm:$0xff]  ;;  %v14874_v35 = vld [vmem:[#allocation244_spill] sm:$0xff] }
 0x355   :  { %4333 = vmatpush.msrb.mxu3 %v14833_v18  ;;  %4366 = vmatpush.msra.mxu0 %v14867_v21  ;;  %v14875_v18 = vld [vmem:[#allocation325_spill] sm:$0xff] }
 0x356   :  { %4268 = vmatpush.msrb.mxu2 %v14868_v34  ;;  %4441 = vmatpush.msra.mxu1 %v14869_v8  ;;  %v14876_v34 = vld [vmem:[#allocation296_spill] sm:$0xff] }
 0x357   :  { %4335 = vmatpush.msrb.mxu3 %v14836_v38  ;;  %4368 = vmatpush.msra.mxu0 %v14870_v59  ;;  %v14877_v8 = vld [vmem:[#allocation248_spill] sm:$0xff] }
 0x358   :  { %4272 = vmatpush.msrb.mxu2 %v14871_v58  ;;  %4447 = vmatpush.msra.mxu1 %v14872_v53  ;;  %v14878_v38 = vld [vmem:[#allocation328_spill] sm:$0xff]  ;;  %v14879_v58 = vld [vmem:[#allocation301_spill] sm:$0xff] }
 0x359   :  { %4337 = vmatpush.msrb.mxu3 %v14839_v50  ;;  %4370 = vmatpush.msra.mxu0 %v14873_v46  ;;  %v14880_v53 = vld [vmem:[#allocation252_spill] sm:$0xff]  ;;  %v14881_v50 = vld [vmem:[#allocation330_spill] sm:$0xff] }
 0x35a   :  { %4276 = vmatpush.msrb.mxu2 %v14874_v35  ;;  %4453 = vmatpush.msra.mxu1 %v14875_v18  ;;  %v14882_v35 = vld [vmem:[#allocation305_spill] sm:$0xff]  ;;  %v14883_v18 = vld [vmem:[#allocation256_spill] sm:$0xff] }
 0x35b   :  { %4339 = vmatpush.msrb.mxu3 %v14842_v62  ;;  %4372 = vmatpush.msra.mxu0 %v14876_v34  ;;  %v14884_v62 = vld [vmem:[#allocation332_spill] sm:$0xff] }
 0x35c   :  { %4280 = vmatpush.msrb.mxu2 %v14877_v8  ;;  %4459 = vmatpush.msra.mxu1 %v14878_v38  ;;  %v14885_v8 = vld [vmem:[#allocation309_spill] sm:$0xff]  ;;  %v14886_v38 = vld [vmem:[#allocation260_spill] sm:$0xff] }
 0x35d   :  { %4341 = vmatpush.msrb.mxu3 %v14845_v31  ;;  %4374 = vmatpush.msra.mxu0 %v14879_v58  ;;  %v14887_v31 = vld [vmem:[#allocation333_spill] sm:$0xff] }
 0x35e   :  { %4284 = vmatpush.msrb.mxu2 %v14880_v53  ;;  %4465 = vmatpush.msra.mxu1 %v14881_v50  ;;  %v14888_v50 = vld [vmem:[#allocation264_spill] sm:$0xff]  ;;  %v14889_v53 = vld [vmem:[#allocation313_spill] sm:$0xff] }
 0x35f   :  { %4343 = vmatpush.msrb.mxu3 %v14847_v44  ;;  %4376 = vmatpush.msra.mxu0 %v14882_v35  ;;  %v14890_v44 = vld [vmem:[#allocation334_spill] sm:$0xff] }
 0x360   :  { %4288 = vmatpush.msrb.mxu2 %v14883_v18  ;;  %4471 = vmatpush.msra.mxu1 %v14884_v62  ;;  %v14891_v62 = vld [vmem:[#allocation267_spill] sm:$0xff]  ;;  %v14892_v18 = vld [vmem:[#allocation317_spill] sm:$0xff] }
 0x361   :  { %4345 = vmatpush.msrb.mxu3 %v14848_v12  ;;  %4378 = vmatpush.msra.mxu0 %v14885_v8  ;;  %v14893_v12 = vld [vmem:[#allocation335_spill] sm:$0xff] }
 0x362   :  { %4292 = vmatpush.msrb.mxu2 %v14886_v38  ;;  %4347 = vmatmul.f32.vlgmr.msrb.gmra.mxu3 %v11410_v55  ;;  %v14894_v38 = vld [vmem:[#allocation270_spill] sm:$0xff] }
 0x363   :  { %4477 = vmatpush.msra.mxu1 %v14887_v31  ;;  %4550 = vmatpush.msra.mxu3 %v14849_v11  ;;  %v14896_v31 = vld [vmem:[#allocation272_spill] sm:$0xff] }
 0x364   :  { %4296 = vmatpush.msrb.mxu2 %v14888_v50  ;;  %4380 = vmatpush.msra.mxu0 %v14889_v53  ;;  %v14895_v50 = vld [vmem:[#allocation321_spill] sm:$0xff] }
 0x365   :  { %4483 = vmatpush.msra.mxu1 %v14890_v44  ;;  %4552 = vmatpush.msra.mxu3 %v14851_v26  ;;  %v3025_v44 = vpop.f32.mrf.mxu0 }
 0x366   :  { %4300 = vmatpush.msrb.mxu2 %v14891_v62  ;;  %4382 = vmatpush.msra.mxu0 %v14892_v18  ;;  %v14897_v62 = vld [vmem:[#allocation148_spill] sm:$0xff] }
 0x367   :  { %4489 = vmatpush.msra.mxu1 %v14893_v12  ;;  %4554 = vmatpush.msra.mxu3 %v14855_v29  ;;  %v14899_v12 = vld [vmem:[#allocation277_spill] sm:$0xff] }
 0x368   :  { %4304 = vmatpush.msrb.mxu2 %v14894_v38  ;;  %4384 = vmatpush.msra.mxu0 %v14895_v50  ;;  %v14898_v38 = vld [vmem:[#allocation279_spill] sm:$0xff] }
 0x369   :  { %4658 = vmatpush.msrb.mxu1 %v14849_v11  ;;  %4556 = vmatpush.msra.mxu3 %v14858_v36  ;;  %v14958_v11 = vld [vmem:[#allocation401_spill] sm:$0xff] }
 0x36a   :  { %4308 = vmatpush.msrb.mxu2 %v14896_v31  ;;  %4591 = vmatpush.msrb.mxu0 %v14898_v38  ;;  %v14900_v31 = vld [vmem:[#allocation283_spill] sm:$0xff] }
 0x36b   :  { %4660 = vmatpush.msrb.mxu1 %v14851_v26  ;;  %4310 = vmatmul.f32.vlgmr.msrb.gmra.mxu2 %v11410_v55  ;;  %v14901_v55 = vld [vmem:[#allocation280_spill] sm:$0xff]  ;;  %v14957_v26 = vld [vmem:[#allocation379_spill] sm:$0xff] }
 0x36c   :  { %4558 = vmatpush.msra.mxu3 %v14861_v6  ;;  %4497 = vmatpush.msra.mxu2 %v14897_v62  ;;  %v14902_v62 = vld [vmem:[#allocation144_spill] sm:$0xff] }
 0x36d   :  { %4662 = vmatpush.msrb.mxu1 %v14855_v29  ;;  %4595 = vmatpush.msrb.mxu0 %v14900_v31  ;;  %v14903_v29 = vld [vmem:[#allocation284_spill] sm:$0xff]  ;;  %v14906_v31 = vld [vmem:[#allocation287_spill] sm:$0xff] }
 0x36e   :  { %4560 = vmatpush.msra.mxu3 %v14864_v32  ;;  %4500 = vmatpush.msra.mxu2 %v14899_v12  ;;  %v14904_v12 = vld [vmem:[#allocation282_spill] sm:$0xff] }
 0x36f   :  { %4664 = vmatpush.msrb.mxu1 %v14858_v36  ;;  %4599 = vmatpush.msrb.mxu0 %v14902_v62  ;;  %v3026_v38 = vadd.f32 %v3025_v44, %v14904_v12  ;;  %v14905_v36 = vld [vmem:[#allocation289_spill] sm:$0xff]  ;;  %v14908_v62 = vld [vmem:[#allocation290_spill] sm:$0xff]  ;;  %v14910_v12 = vld [vmem:[#allocation291_spill] sm:$0xff] }
 0x370   :  { %4562 = vmatpush.msra.mxu3 %v14867_v21  ;;  %4503 = vmatpush.msra.mxu2 %v14901_v55  ;;  %v14907_v55 = vld [vmem:[#allocation293_spill] sm:$0xff]  ;;  %v14909_v44 = vld [vmem:[#allocation298_spill] sm:$0xff] }
 0x371   :  { %4666 = vmatpush.msrb.mxu1 %v14861_v6  ;;  %4603 = vmatpush.msrb.mxu0 %v14905_v36  ;;  %v3126_v6 = vpop.f32.mrf.mxu1  ;;  %v3180_v36 = vpop.f32.mrf.mxu2 }
 0x372   :  { %4564 = vmatpush.msra.mxu3 %v14870_v59  ;;  %4506 = vmatpush.msra.mxu2 %v14903_v29  ;;  %v3127_v29 = vadd.f32 %v3126_v6, %v3026_v38  ;;  %v14913_v38 = vld [vmem:[#allocation302_spill] sm:$0xff]  ;;  %v14914_v6 = vld [vmem:[#allocation300_spill] sm:$0xff] }
 0x373   :  { %4668 = vmatpush.msrb.mxu1 %v14864_v32  ;;  %4607 = vmatpush.msrb.mxu0 %v14907_v55  ;;  %v14912_v55 = vld [vmem:[#allocation295_spill] sm:$0xff]  ;;  %v14956_v32 = vld [vmem:[#allocation341_spill] sm:$0xff] }
 0x374   :  { %4566 = vmatpush.msra.mxu3 %v14873_v46  ;;  %4509 = vmatpush.msra.mxu2 %v14906_v31  ;;  %v14911_v31 = vld [vmem:[#allocation147_spill] sm:$0xff] }
 0x375   :  { %4670 = vmatpush.msrb.mxu1 %v14867_v21  ;;  %4611 = vmatpush.msrb.mxu0 %v14909_v44  ;;  %v3219_v44 = vpop.f32.mrf.mxu3  ;;  %v14955_v21 = vld [vmem:[#allocation400_spill] sm:$0xff] }
 0x376   :  { %4568 = vmatpush.msra.mxu3 %v14876_v34  ;;  %4512 = vmatpush.msra.mxu2 %v14908_v62  ;;  %v3181_v62 = vadd.f32 %v3180_v36, %v3127_v29  ;;  %v14917_v29 = vld [vmem:[#allocation310_spill] sm:$0xff]  ;;  %v3288_v36 = vpop.f32.mrf.mxu0 }
 0x377   :  { %4672 = vmatpush.msrb.mxu1 %v14870_v59  ;;  %4615 = vmatpush.msrb.mxu0 %v14911_v31  ;;  %v14916_v31 = vld [vmem:[#allocation303_spill] sm:$0xff] }
 0x378   :  { %4570 = vmatpush.msra.mxu3 %v14879_v58  ;;  %4515 = vmatpush.msra.mxu2 %v14910_v12  ;;  %v14915_v12 = vld [vmem:[#allocation307_spill] sm:$0xff] }
 0x379   :  { %4674 = vmatpush.msrb.mxu1 %v14873_v46  ;;  %4619 = vmatpush.msrb.mxu0 %v14913_v38  ;;  %v14918_v38 = vld [vmem:[#allocation308_spill] sm:$0xff] }
 0x37a   :  { %4572 = vmatpush.msra.mxu3 %v14882_v35  ;;  %4518 = vmatpush.msra.mxu2 %v14912_v55  ;;  %v3220_v55 = vadd.f32 %v3219_v44, %v3181_v62  ;;  %v14922_v62 = vld [vmem:[#allocation355_spill] sm:$0xff]  ;;  %v14923_v44 = vld [vmem:[#allocation316_spill] sm:$0xff] }
 0x37b   :  { %4676 = vmatpush.msrb.mxu1 %v14876_v34  ;;  %4623 = vmatpush.msrb.mxu0 %v14915_v12  ;;  %v14920_v12 = vld [vmem:[#allocation312_spill] sm:$0xff]  ;;  %v14942_v34 = vld [vmem:[#allocation345_spill] sm:$0xff] }
 0x37c   :  { %4574 = vmatpush.msra.mxu3 %v14885_v8  ;;  %4521 = vmatpush.msra.mxu2 %v14914_v6  ;;  %v14919_v6 = vld [vmem:[#allocation315_spill] sm:$0xff]  ;;  %v14944_v46 = vld [vmem:[#allocation352_spill] sm:$0xff] }
 0x37d   :  { %4678 = vmatpush.msrb.mxu1 %v14879_v58  ;;  %4627 = vmatpush.msrb.mxu0 %v14917_v29  ;;  %v14925_v29 = vld [vmem:[#allocation356_spill] sm:$0xff] }
 0x37e   :  { %4576 = vmatpush.msra.mxu3 %v14889_v53  ;;  %4524 = vmatpush.msra.mxu2 %v14916_v31  ;;  %v3289_v31 = vadd.f32 %v3288_v36, %v3220_v55  ;;  %v14926_v58 = vld [vmem:[#allocation320_spill] sm:$0xff]  ;;  %v14928_v55 = vld [vmem:[#allocation361_spill] sm:$0xff] }
 0x37f   :  { %4680 = vmatpush.msrb.mxu1 %v14882_v35  ;;  %4631 = vmatpush.msrb.mxu0 %v14919_v6  ;;  %v14921_v35 = vld [vmem:[#allocation319_spill] sm:$0xff]  ;;  %v14927_v6 = vld [vmem:[#allocation326_spill] sm:$0xff] }
 0x380   :  { %4578 = vmatpush.msra.mxu3 %v14892_v18  ;;  %4527 = vmatpush.msra.mxu2 %v14918_v38  ;;  %v14924_v38 = vld [vmem:[#allocation323_spill] sm:$0xff] }
 0x381   :  { %4682 = vmatpush.msrb.mxu1 %v14885_v8  ;;  %4635 = vmatpush.msrb.mxu0 %v14921_v35  ;;  %v3325_v8 = vpop.f32.mrf.mxu1  ;;  %v14930_v35 = vld [vmem:[#allocation329_spill] sm:$0xff] }
 0x382   :  { %4580 = vmatpush.msra.mxu3 %v14895_v50  ;;  %4530 = vmatpush.msra.mxu2 %v14920_v12  ;;  %v3326_v12 = vadd.f32 %v3325_v8, %v3289_v31  ;;  %v3521_v31 = vpop.f32.mrf.mxu0  ;;  %v14935_v8 = vld [vmem:[#allocation368_spill] sm:$0xff] }
 0x383   :  { %4684 = vmatpush.msrb.mxu1 %v14889_v53  ;;  %4639 = vmatpush.msrb.mxu0 %v14924_v38  ;;  %v3467_v38 = vpop.f32.mrf.mxu3 }
 0x384   :  { %4740 = vmatpush.msrb.mxu3 %v14922_v62  ;;  %4533 = vmatpush.msra.mxu2 %v14923_v44  ;;  %v14929_v62 = vld [vmem:[#allocation324_spill] sm:$0xff] }
 0x385   :  { %4686 = vmatpush.msrb.mxu1 %v14892_v18  ;;  %4643 = vmatpush.msrb.mxu0 %v14927_v6  ;;  %v14931_v18 = vld [vmem:[#allocation365_spill] sm:$0xff]  ;;  %v14936_v6 = vld [vmem:[#allocation338_spill] sm:$0xff] }
 0x386   :  { %4746 = vmatpush.msrb.mxu3 %v14925_v29  ;;  %4536 = vmatpush.msra.mxu2 %v14926_v58  ;;  %v14932_v29 = vld [vmem:[#allocation327_spill] sm:$0xff] }
 0x387   :  { %4688 = vmatpush.msrb.mxu1 %v14895_v50  ;;  %4647 = vmatpush.msrb.mxu0 %v14930_v35  ;;  %v14933_v58 = vld [vmem:[#allocation331_spill] sm:$0xff]  ;;  %v14934_v50 = vld [vmem:[#allocation337_spill] sm:$0xff] }
 0x388   :  { %4752 = vmatpush.msrb.mxu3 %v14928_v55  ;;  %v3366_v36 = vpop.f32.mrf.mxu2  ;;  %4539 = vmatpush.msra.mxu2 %v14929_v62  ;;  %v14938_v35 = vld [vmem:[#allocation339_spill] sm:$0xff] }
 0x389   :  { %v3367_v44 = vadd.f32 %v3366_v36, %v3326_v12  ;;  %4651 = vmatpush.msrb.mxu0 %v14933_v58  ;;  %v3560_v62 = vpop.f32.mrf.mxu1  ;;  %v14937_v12 = vld [vmem:[#allocation370_spill] sm:$0xff] }
 0x38a   :  { %4758 = vmatpush.msrb.mxu3 %v14931_v18  ;;  %4542 = vmatpush.msra.mxu2 %v14932_v29  ;;  %v14939_v18 = vld [vmem:[#allocation371_spill] sm:$0xff]  ;;  %v14940_v29 = vld [vmem:[#allocation340_spill] sm:$0xff] }
 0x38b   :  { %v3468_v53 = vadd.f32 %v3467_v38, %v3367_v44  ;;  %v14941_v44 = vld [vmem:[#allocation373_spill] sm:$0xff] }
 0x38c   :  { %4695 = vmatpush.msrb.mxu2 %v14934_v50  ;;  %4764 = vmatpush.msrb.mxu3 %v14935_v8  ;;  %v3666_v8 = vpop.f32.mrf.mxu3 }
 0x38d   :  { %v3522_v55 = vadd.f32 %v3521_v31, %v3468_v53  ;;  %v14943_v53 = vld [vmem:[#allocation376_spill] sm:$0xff] }
 0x38e   :  { %4697 = vmatpush.msrb.mxu2 %v14936_v6  ;;  %4770 = vmatpush.msrb.mxu3 %v14937_v12  ;;  %v14947_v12 = vld [vmem:[#allocation387_spill] sm:$0xff] }
 0x38f   :  { %v3561_v36 = vadd.f32 %v3560_v62, %v3522_v55  ;;  %v14945_v62 = vld [vmem:[#allocation383_spill] sm:$0xff] }
 0x390   :  { %4699 = vmatpush.msrb.mxu2 %v14938_v35  ;;  %4776 = vmatpush.msrb.mxu3 %v14939_v18  ;;  %v14946_v18 = vld [vmem:[#allocation357_spill] sm:$0xff] }
 0x392   :  { %4701 = vmatpush.msrb.mxu2 %v14940_v29  ;;  %v3629_v38 = vpop.f32.mrf.mxu2  ;;  %4782 = vmatpush.msrb.mxu3 %v14941_v44 }
 0x393   :  { %v3630_v58 = vadd.f32 %v3629_v38, %v3561_v36  ;;  %v14948_v36 = vld [vmem:[#allocation360_spill] sm:$0xff]  ;;  %v14949_v38 = vld [vmem:[#allocation391_spill] sm:$0xff] }
 0x394   :  { %4703 = vmatpush.msrb.mxu2 %v14942_v34  ;;  %4788 = vmatpush.msrb.mxu3 %v14943_v53  ;;  %v14952_v53 = vld [vmem:[#allocation372_spill] sm:$0xff] }
 0x395   :  { %v11712_v31 = vadd.f32 %v3666_v8, %v3630_v58  ;;  %v14950_v8 = vld [vmem:[#allocation362_spill] sm:$0xff] }
 0x396   :  { %4705 = vmatpush.msrb.mxu2 %v14944_v46  ;;  %4794 = vmatpush.msrb.mxu3 %v14945_v62  ;;  %v14951_v62 = vld [vmem:[#allocation395_spill] sm:$0xff] }
 0x397   :  { %v4351_v55 = vmul.f32 %v11712_v31, %v11712_v31 }
 0x398   :  { %4707 = vmatpush.msrb.mxu2 %v14946_v18  ;;  %4800 = vmatpush.msrb.mxu3 %v14947_v12 }
 0x399   :  { %v11720_v44 = vand.u32 4294901760, %v4351_v55 }
 0x39a   :  { %4709 = vmatpush.msrb.mxu2 %v14948_v36  ;;  %4806 = vmatpush.msrb.mxu3 %v14949_v38  ;;  %v14953_v38 = vld [vmem:[#allocation399_spill] sm:$0xff] }
 0x39b   :  { %v11725_v58 = vsub.f32 %v4351_v55, %v11720_v44  ;;  %4491 = vmatmul.f32.vlgmr.msra.gmra.mxu1 %v11720_v44 }
 0x39c   :  { %4711 = vmatpush.msrb.mxu2 %v14950_v8  ;;  %4891 = vmatpush.msra.mxu1 %v14934_v50 }
 0x39d   :  { %4812 = vmatpush.msrb.mxu3 %v14951_v62  ;;  %4545 = vmatmul.f32.vlgmr.msra.gmra.mxu2 %v11725_v58  ;;  %v11733_v12 = vand.u32 4294901760, %v11725_v58  ;;  %v14954_v62 = vld [vmem:[#allocation375_spill] sm:$0xff] }
 0x39e   :  { %4893 = vmatpush.msra.mxu1 %v14936_v6  ;;  %4713 = vmatpush.msrb.mxu2 %v14952_v53 }
 0x39f   :  { %4584 = vmatmul.f32.vlgmr.msra.gmra.mxu3 %v11733_v12  ;;  %v4388_v55 = vsub.f32 %v11725_v58, %v11733_v12 }
 0x3a0   :  { %4895 = vmatpush.msra.mxu1 %v14938_v35  ;;  %4818 = vmatpush.msrb.mxu3 %v14953_v38  ;;  %v14960_v38 = vld [vmem:[#allocation382_spill] sm:$0xff] }
 0x3a1   :  { %v11742_v59 = vand.u32 4294901760, %v4388_v55  ;;  %4715 = vmatpush.msrb.mxu2 %v14954_v62  ;;  %v14959_v55 = vld [vmem:[#allocation342_spill] sm:$0xff] }
 0x3a2   :  { %4897 = vmatpush.msra.mxu1 %v14940_v29  ;;  %4824 = vmatpush.msrb.mxu3 %v14955_v21  ;;  %v14961_v21 = vld [vmem:[#allocation343_spill] sm:$0xff] }
 0x3a3   :  { %4390 = vmatmul.f32.vlgmr.msra.gmra.mxu0 %v11742_v59  ;;  %4690 = vmatmul.f32.vlgmr.msrb.gmra.mxu1 %v11720_v44 }
 0x3a4   :  { %4838 = vmatpush.msra.mxu0 %v14956_v32  ;;  %4899 = vmatpush.msra.mxu1 %v14942_v34  ;;  %v14962_v32 = vld [vmem:[#allocation386_spill] sm:$0xff] }
 0x3a5   :  { %4717 = vmatpush.msrb.mxu2 %v14957_v26  ;;  %4830 = vmatpush.msrb.mxu3 %v14958_v11  ;;  %v14965_v11 = vld [vmem:[#allocation389_spill] sm:$0xff] }
 0x3a6   :  { %4841 = vmatpush.msra.mxu0 %v14959_v55  ;;  %4901 = vmatpush.msra.mxu1 %v14944_v46  ;;  %v14964_v55 = vld [vmem:[#allocation351_spill] sm:$0xff] }
 0x3a7   :  { %4999 = vmatpush.msra.mxu3 %v14934_v50  ;;  %4719 = vmatpush.msrb.mxu2 %v14960_v38 }
 0x3a8   :  { %4844 = vmatpush.msra.mxu0 %v14961_v21  ;;  %4903 = vmatpush.msra.mxu1 %v14946_v18  ;;  %v14966_v21 = vld [vmem:[#allocation354_spill] sm:$0xff] }
 0x3a9   :  { %5001 = vmatpush.msra.mxu3 %v14936_v6  ;;  %4721 = vmatpush.msrb.mxu2 %v14962_v32  ;;  %v14967_v6 = vld [vmem:[#allocation393_spill] sm:$0xff] }
 0x3aa   :  { %4847 = vmatpush.msra.mxu0 %v14963_v41  ;;  %4905 = vmatpush.msra.mxu1 %v14948_v36  ;;  %v14968_v41 = vld [vmem:[#allocation359_spill] sm:$0xff] }
 0x3ab   :  { %4653 = vmatmul.f32.vlgmr.msrb.gmra.mxu0 %v11720_v44  ;;  %5003 = vmatpush.msra.mxu3 %v14938_v35  ;;  %v14969_v35 = vld [vmem:[#allocation346_spill] sm:$0xff] }
 0x3ac   :  { %4850 = vmatpush.msra.mxu0 %v14964_v55  ;;  %4907 = vmatpush.msra.mxu1 %v14950_v8  ;;  %v14970_v55 = vld [vmem:[#allocation364_spill] sm:$0xff] }
 0x3ad   :  { %4723 = vmatpush.msrb.mxu2 %v14965_v11  ;;  %5005 = vmatpush.msra.mxu3 %v14940_v29  ;;  %v14971_v29 = vld [vmem:[#allocation347_spill] sm:$0xff] }
 0x3ae   :  { %4853 = vmatpush.msra.mxu0 %v14966_v21  ;;  %4909 = vmatpush.msra.mxu1 %v14952_v53  ;;  %v14972_v21 = vld [vmem:[#allocation366_spill] sm:$0xff] }
 0x3af   :  { %4725 = vmatpush.msrb.mxu2 %v14967_v6  ;;  %5007 = vmatpush.msra.mxu3 %v14942_v34  ;;  %v14973_v34 = vld [vmem:[#allocation348_spill] sm:$0xff] }
 0x3b0   :  { %4856 = vmatpush.msra.mxu0 %v14968_v41  ;;  %4911 = vmatpush.msra.mxu1 %v14954_v62  ;;  %v14974_v41 = vld [vmem:[#allocation374_spill] sm:$0xff] }
 0x3b1   :  { %4932 = vmatpush.msra.mxu2 %v14969_v35  ;;  %5009 = vmatpush.msra.mxu3 %v14944_v46  ;;  %v14975_v35 = vld [vmem:[#allocation350_spill] sm:$0xff] }
 0x3b2   :  { %4859 = vmatpush.msra.mxu0 %v14970_v55  ;;  %4913 = vmatpush.msra.mxu1 %v14957_v26  ;;  %v14976_v55 = vld [vmem:[#allocation378_spill] sm:$0xff] }
 0x3b3   :  { %4936 = vmatpush.msra.mxu2 %v14971_v29  ;;  %5011 = vmatpush.msra.mxu3 %v14946_v18  ;;  %v14977_v29 = vld [vmem:[#allocation353_spill] sm:$0xff] }
 0x3b4   :  { %4862 = vmatpush.msra.mxu0 %v14972_v21  ;;  %4915 = vmatpush.msra.mxu1 %v14960_v38  ;;  %v14978_v21 = vld [vmem:[#allocation381_spill] sm:$0xff] }
 0x3b5   :  { %4940 = vmatpush.msra.mxu2 %v14973_v34  ;;  %5013 = vmatpush.msra.mxu3 %v14948_v36  ;;  %v14979_v34 = vld [vmem:[#allocation414_spill] sm:$0xff]  ;;  %v14981_v36 = vld [vmem:[#allocation385_spill] sm:$0xff] }
 0x3b6   :  { %4865 = vmatpush.msra.mxu0 %v14974_v41  ;;  %4917 = vmatpush.msra.mxu1 %v14962_v32  ;;  %v14980_v41 = vld [vmem:[#allocation358_spill] sm:$0xff] }
 0x3b7   :  { %4944 = vmatpush.msra.mxu2 %v14975_v35  ;;  %5015 = vmatpush.msra.mxu3 %v14950_v8  ;;  %v14982_v35 = vld [vmem:[#allocation417_spill] sm:$0xff]  ;;  %v14984_v8 = vld [vmem:[#allocation390_spill] sm:$0xff] }
 0x3b8   :  { %4868 = vmatpush.msra.mxu0 %v14976_v55  ;;  %4919 = vmatpush.msra.mxu1 %v14965_v11  ;;  %v14983_v55 = vld [vmem:[#allocation363_spill] sm:$0xff] }
 0x3b9   :  { %4948 = vmatpush.msra.mxu2 %v14977_v29  ;;  %5017 = vmatpush.msra.mxu3 %v14952_v53  ;;  %v14985_v29 = vld [vmem:[#allocation420_spill] sm:$0xff] }
 0x3ba   :  { %4871 = vmatpush.msra.mxu0 %v14978_v21  ;;  %4921 = vmatpush.msra.mxu1 %v14967_v6  ;;  %v14986_v21 = vld [vmem:[#allocation367_spill] sm:$0xff]  ;;  %v14987_v53 = vld [vmem:[#allocation392_spill] sm:$0xff] }
 0x3bb   :  { %4952 = vmatpush.msra.mxu2 %v14980_v41  ;;  %5019 = vmatpush.msra.mxu3 %v14954_v62  ;;  %v14988_v41 = vld [vmem:[#allocation424_spill] sm:$0xff] }
 0x3bc   :  { %5081 = vmatpush.msrb.mxu1 %v14979_v34  ;;  %4874 = vmatpush.msra.mxu0 %v14981_v36  ;;  %v14989_v36 = vld [vmem:[#allocation369_spill] sm:$0xff] }
 0x3bd   :  { %4956 = vmatpush.msra.mxu2 %v14983_v55  ;;  %5021 = vmatpush.msra.mxu3 %v14957_v26  ;;  %v14990_v34 = vld [vmem:[#allocation397_spill] sm:$0xff] }
 0x3be   :  { %5087 = vmatpush.msrb.mxu1 %v14982_v35  ;;  %4877 = vmatpush.msra.mxu0 %v14984_v8  ;;  %v14991_v8 = vld [vmem:[#allocation427_spill] sm:$0xff]  ;;  %v14992_v55 = vld [vmem:[#allocation377_spill] sm:$0xff] }
 0x3bf   :  { %4960 = vmatpush.msra.mxu2 %v14986_v21  ;;  %5023 = vmatpush.msra.mxu3 %v14960_v38  ;;  %v14994_v21 = vld [vmem:[#allocation380_spill] sm:$0xff] }
 0x3c0   :  { %5093 = vmatpush.msrb.mxu1 %v14985_v29  ;;  %4880 = vmatpush.msra.mxu0 %v14987_v53  ;;  %v14993_v53 = vld [vmem:[#allocation431_spill] sm:$0xff]  ;;  %v15001_v29 = vld [vmem:[#allocation412_spill] sm:$0xff] }
 0x3c1   :  { %4964 = vmatpush.msra.mxu2 %v14989_v36  ;;  %5025 = vmatpush.msra.mxu3 %v14962_v32  ;;  %v14996_v36 = vld [vmem:[#allocation384_spill] sm:$0xff] }
 0x3c2   :  { %5099 = vmatpush.msrb.mxu1 %v14988_v41  ;;  %4883 = vmatpush.msra.mxu0 %v14990_v34  ;;  %v14995_v34 = vld [vmem:[#allocation435_spill] sm:$0xff]  ;;  %v14998_v41 = vld [vmem:[#allocation388_spill] sm:$0xff] }
 0x3c3   :  { %4968 = vmatpush.msra.mxu2 %v14992_v55  ;;  %5027 = vmatpush.msra.mxu3 %v14965_v11  ;;  %v3707_v55 = vpop.f32.mrf.mxu0  ;;  %v15005_v11 = vld [vmem:[#allocation398_spill] sm:$0xff] }
 0x3c4   :  { %5036 = vmatpush.msrb.mxu0 %v10479_v24  ;;  %5105 = vmatpush.msrb.mxu1 %v14991_v8  ;;  %v14997_v8 = vld [vmem:[#allocation439_spill] sm:$0xff]  ;;  %v3708_v35 = vadd.f32 %v3707_v55, %v15001_v29  ;;  %v15007_v29 = vld [vmem:[#allocation453_spill] sm:$0xff] }
 0x3c5   :  { %4972 = vmatpush.msra.mxu2 %v14994_v21  ;;  %5029 = vmatpush.msra.mxu3 %v14967_v6  ;;  %v15000_v21 = vld [vmem:[#allocation394_spill] sm:$0xff]  ;;  %v15003_v6 = vld [vmem:[#allocation396_spill] sm:$0xff] }
 0x3c6   :  { %5038 = vmatpush.msrb.mxu0 %v10485_v63  ;;  %5111 = vmatpush.msrb.mxu1 %v14993_v53  ;;  %v14999_v53 = vld [vmem:[#allocation443_spill] sm:$0xff] }
 0x3c7   :  { %4976 = vmatpush.msra.mxu2 %v14996_v36  ;;  %v3808_v36 = vpop.f32.mrf.mxu1 }
 0x3c8   :  { %5040 = vmatpush.msrb.mxu0 %v10494_v28  ;;  %5117 = vmatpush.msrb.mxu1 %v14995_v34  ;;  %v15002_v34 = vld [vmem:[#allocation446_spill] sm:$0xff]  ;;  %v3809_v32 = vadd.f32 %v3808_v36, %v3708_v35  ;;  %v15011_v36 = vld [vmem:[#allocation456_spill] sm:$0xff] }
 0x3c9   :  { %4980 = vmatpush.msra.mxu2 %v14998_v41  ;;  %v3862_v41 = vpop.f32.mrf.mxu2  ;;  %v15010_v35 = vld [vmem:[#allocation426_spill] sm:$0xff] }
 0x3ca   :  { %5042 = vmatpush.msrb.mxu0 %v10503_v40  ;;  %5123 = vmatpush.msrb.mxu1 %v14997_v8  ;;  %v15004_v8 = vld [vmem:[#allocation449_spill] sm:$0xff]  ;;  %v3863_v55 = vadd.f32 %v3862_v41, %v3809_v32  ;;  %v15012_v41 = vld [vmem:[#allocation430_spill] sm:$0xff] }
 0x3cb   :  { %4984 = vmatpush.msra.mxu2 %v15000_v21  ;;  %v15006_v21 = vld [vmem:[#allocation451_spill] sm:$0xff] }
 0x3cc   :  { %5044 = vmatpush.msrb.mxu0 %v10515_v16  ;;  %5129 = vmatpush.msrb.mxu1 %v14999_v53  ;;  %v15009_v53 = vld [vmem:[#allocation455_spill] sm:$0xff] }
 0x3cd   :  { %4988 = vmatpush.msra.mxu2 %v15003_v6  ;;  %v3901_v6 = vpop.f32.mrf.mxu3 }
 0x3ce   :  { %5046 = vmatpush.msrb.mxu0 %v10527_v5  ;;  %5135 = vmatpush.msrb.mxu1 %v15002_v34  ;;  %v3902_v34 = vadd.f32 %v3901_v6, %v3863_v55  ;;  %v15015_v55 = vld [vmem:[#allocation442_spill] sm:$0xff] }
 0x3cf   :  { %4992 = vmatpush.msra.mxu2 %v15005_v11  ;;  %v15013_v11 = vld [vmem:[#allocation434_spill] sm:$0xff] }
 0x3d0   :  { %5048 = vmatpush.msrb.mxu0 %v10530_v60  ;;  %5141 = vmatpush.msrb.mxu1 %v15004_v8  ;;  %v15008_v8 = vld [vmem:[#allocation422_spill] sm:$0xff] }
 0x3d1   :  { %v4048_v38 = vpop.f32.mrf.mxu2 }
 0x3d2   :  { %5050 = vmatpush.msrb.mxu0 %v10544_v33  ;;  %5147 = vmatpush.msrb.mxu1 %v15006_v21  ;;  %v3970_v21 = vpop.f32.mrf.mxu0 }
 0x3d3   :  { %v3971_v32 = vadd.f32 %v3970_v21, %v3902_v34 }
 0x3d4   :  { %5052 = vmatpush.msrb.mxu0 %v10573_v47  ;;  %5153 = vmatpush.msrb.mxu1 %v15007_v29  ;;  %v4007_v29 = vpop.f32.mrf.mxu1 }
 0x3d5   :  { %v4008_v26 = vadd.f32 %v4007_v29, %v3971_v32  ;;  %v4149_v62 = vpop.f32.mrf.mxu3  ;;  %v15022_v32 = vld [vmem:[#allocation415_spill] sm:$0xff] }
 0x3d6   :  { %5054 = vmatpush.msrb.mxu0 %v10589_v30  ;;  %5159 = vmatpush.msrb.mxu1 %v10739_v20  ;;  %v15014_v20 = vld [vmem:[#allocation438_spill] sm:$0xff] }
 0x3d7   :  { %v4049_v6 = vadd.f32 %v4048_v38, %v4008_v26  ;;  %v15020_v38 = vld [vmem:[#allocation410_spill] sm:$0xff] }
 0x3d8   :  { %5056 = vmatpush.msrb.mxu0 %v15008_v8  ;;  %5165 = vmatpush.msrb.mxu1 %v15009_v53 }
 0x3d9   :  { %v4150_v53 = vadd.f32 %v4149_v62, %v4049_v6  ;;  %v15019_v62 = vld [vmem:[#allocation402_spill] sm:$0xff]  ;;  %v15023_v6 = vld [vmem:[#allocation405_spill] sm:$0xff] }
 0x3da   :  { %5058 = vmatpush.msrb.mxu0 %v15010_v35  ;;  %5171 = vmatpush.msrb.mxu1 %v15011_v36  ;;  %v4203_v18 = vpop.f32.mrf.mxu0 }
 0x3db   :  { %v4204_v46 = vadd.f32 %v4203_v18, %v4150_v53  ;;  %v15018_v53 = vld [vmem:[#allocation408_spill] sm:$0xff] }
 0x3dc   :  { %5060 = vmatpush.msrb.mxu0 %v15012_v41  ;;  %v4242_v50 = vpop.f32.mrf.mxu1 }
 0x3dd   :  { %v4243_v36 = vadd.f32 %v4242_v50, %v4204_v46 }
 0x3de   :  { %5062 = vmatpush.msrb.mxu0 %v15013_v11 }
 0x3e0   :  { %5064 = vmatpush.msrb.mxu0 %v15014_v20 }
 0x3e2   :  { %5066 = vmatpush.msrb.mxu0 %v15015_v55 }
 0x3e5   :  { %v4348_v34 = vpop.f32.mrf.mxu3 }
 0x3ee   :  { %v4311_v3 = vpop.f32.mrf.mxu2 }
 0x3ef   :  { %v4312_v21 = vadd.f32 %v4311_v3, %v4243_v36  ;;  %v15016_v3 = vld [vmem:[#allocation404_spill] sm:$0xff]  ;;  %v15021_v36 = vld [vmem:[#allocation403_spill] sm:$0xff] }
 0x3f1   :  { %v11849_v22 = vadd.f32 %v4348_v34, %v4312_v21  ;;  %v15024_v21 = vld [vmem:[#allocation418_spill] sm:$0xff]  ;;  %v15025_v34 = vld [vmem:[#allocation407_spill] sm:$0xff] }
 0x3f3   :  { %v4352_v52 = vmul.f32 %v11849_v22, %v11849_v22 }
 0x3f5   :  { %v11853_v29 = vand.u32 4294901760, %v4352_v52 }
 0x3f7   :  { %v11856_v26 = vsub.f32 %v4352_v52, %v11853_v29  ;;  %4832 = vmatmul.f32.vlgmr.msrb.gmra.mxu3 %v11853_v29  ;;  %v15017_v52 = vld [vmem:[#allocation406_spill] sm:$0xff] }
 0x3f8   :  { %5232 = vmatpush.msrb.mxu3 %v10479_v24 }
 0x3f9   :  { %4886 = vmatmul.f32.vlgmr.msra.gmra.mxu0 %v11856_v26  ;;  %v11862_v50 = vand.u32 4294901760, %v11856_v26 }
 0x3fa   :  { %5234 = vmatpush.msrb.mxu3 %v10485_v63  ;;  %5273 = vmatpush.msra.mxu0 %v15016_v3 }
 0x3fb   :  { %4925 = vmatmul.f32.vlgmr.msra.gmra.mxu1 %v11862_v50  ;;  %v4729_v46 = vsub.f32 %v11856_v26, %v11862_v50 }
 0x3fc   :  { %5236 = vmatpush.msrb.mxu3 %v10494_v28  ;;  %5277 = vmatpush.msra.mxu0 %v15017_v52 }
 0x3fd   :  { %5340 = vmatpush.msra.mxu1 %v10479_v24  ;;  %v11872_v18 = vand.u32 4294901760, %v4729_v46  ;;  %v15027_v46 = vld [vmem:[#allocation409_spill] sm:$0xff] }
 0x3fe   :  { %5238 = vmatpush.msrb.mxu3 %v10503_v40  ;;  %5281 = vmatpush.msra.mxu0 %v15018_v53 }
 0x3ff   :  { %5342 = vmatpush.msra.mxu1 %v10485_v63  ;;  %4731 = vmatmul.f32.vlgmr.msrb.gmra.mxu2 %v11872_v18 }
 0x400   :  { %5031 = vmatmul.f32.vlgmr.msra.gmra.mxu3 %v11853_v29  ;;  %5179 = vmatpush.msrb.mxu2 %v15019_v62 }
 0x401   :  { %5240 = vmatpush.msrb.mxu3 %v10515_v16  ;;  %5285 = vmatpush.msra.mxu0 %v15020_v38 }
 0x402   :  { %5344 = vmatpush.msra.mxu1 %v10494_v28  ;;  %5072 = vmatmul.f32.vlgmr.msrb.gmra.mxu0 %v11742_v59  ;;  %v15026_v59 = vld [vmem:[#allocation419_spill] sm:$0xff] }
 0x403   :  { %5182 = vmatpush.msrb.mxu2 %v15021_v36  ;;  %5242 = vmatpush.msrb.mxu3 %v10527_v5  ;;  %v15048_v36 = vld [vmem:[#allocation441_spill] sm:$0xff] }
 0x404   :  { %5289 = vmatpush.msra.mxu0 %v15022_v32  ;;  %5346 = vmatpush.msra.mxu1 %v10503_v40  ;;  %v15032_v32 = vld [vmem:[#allocation432_spill] sm:$0xff] }
 0x405   :  { %5173 = vmatmul.f32.vlgmr.msrb.gmra.mxu1 %v11720_v44  ;;  %5185 = vmatpush.msrb.mxu2 %v15023_v6  ;;  %v15028_v6 = vld [vmem:[#allocation423_spill] sm:$0xff] }
 0x406   :  { %5244 = vmatpush.msrb.mxu3 %v10530_v60  ;;  %5293 = vmatpush.msra.mxu0 %v15024_v21  ;;  %v15029_v21 = vld [vmem:[#allocation411_spill] sm:$0xff] }
 0x407   :  { %5348 = vmatpush.msra.mxu1 %v10515_v16  ;;  %5188 = vmatpush.msrb.mxu2 %v15025_v34  ;;  %v15030_v34 = vld [vmem:[#allocation428_spill] sm:$0xff] }
 0x408   :  { %5246 = vmatpush.msrb.mxu3 %v10544_v33  ;;  %5297 = vmatpush.msra.mxu0 %v15026_v59  ;;  %v15031_v59 = vld [vmem:[#allocation413_spill] sm:$0xff] }
 0x409   :  { %5350 = vmatpush.msra.mxu1 %v10527_v5  ;;  %4994 = vmatmul.f32.vlgmr.msra.gmra.mxu2 %v11853_v29 }
 0x40a   :  { %5191 = vmatpush.msrb.mxu2 %v15027_v46  ;;  %5248 = vmatpush.msrb.mxu3 %v10573_v47  ;;  %v15033_v46 = vld [vmem:[#allocation416_spill] sm:$0xff] }
 0x40b   :  { %5301 = vmatpush.msra.mxu0 %v15028_v6  ;;  %5352 = vmatpush.msra.mxu1 %v10530_v60  ;;  %v15034_v6 = vld [vmem:[#allocation436_spill] sm:$0xff] }
 0x40c   :  { %5194 = vmatpush.msrb.mxu2 %v15029_v21  ;;  %5250 = vmatpush.msrb.mxu3 %v10589_v30  ;;  %v15035_v21 = vld [vmem:[#allocation421_spill] sm:$0xff] }
 0x40d   :  { %5305 = vmatpush.msra.mxu0 %v15030_v34  ;;  %5354 = vmatpush.msra.mxu1 %v10544_v33  ;;  %v15036_v34 = vld [vmem:[#allocation440_spill] sm:$0xff] }
 0x40e   :  { %5197 = vmatpush.msrb.mxu2 %v15031_v59  ;;  %5252 = vmatpush.msrb.mxu3 %v15008_v8  ;;  %v15037_v59 = vld [vmem:[#allocation425_spill] sm:$0xff] }
 0x40f   :  { %5309 = vmatpush.msra.mxu0 %v15032_v32  ;;  %5356 = vmatpush.msra.mxu1 %v10573_v47  ;;  %v15038_v32 = vld [vmem:[#allocation444_spill] sm:$0xff] }
 0x410   :  { %5200 = vmatpush.msrb.mxu2 %v15033_v46  ;;  %5254 = vmatpush.msrb.mxu3 %v15010_v35  ;;  %v15039_v46 = vld [vmem:[#allocation429_spill] sm:$0xff] }
 0x411   :  { %5313 = vmatpush.msra.mxu0 %v15034_v6  ;;  %5358 = vmatpush.msra.mxu1 %v10589_v30  ;;  %v15040_v6 = vld [vmem:[#allocation447_spill] sm:$0xff] }
 0x412   :  { %5203 = vmatpush.msrb.mxu2 %v15035_v21  ;;  %5256 = vmatpush.msrb.mxu3 %v15012_v41  ;;  %v15041_v21 = vld [vmem:[#allocation433_spill] sm:$0xff] }
 0x413   :  { %5317 = vmatpush.msra.mxu0 %v15036_v34  ;;  %5360 = vmatpush.msra.mxu1 %v15008_v8  ;;  %v15042_v34 = vld [vmem:[#allocation450_spill] sm:$0xff] }
 0x414   :  { %5206 = vmatpush.msrb.mxu2 %v15037_v59  ;;  %5258 = vmatpush.msrb.mxu3 %v15013_v11  ;;  %v15044_v59 = vld [vmem:[#allocation475_spill] sm:$0xff] }
 0x415   :  { %5321 = vmatpush.msra.mxu0 %v15038_v32  ;;  %5362 = vmatpush.msra.mxu1 %v15010_v35  ;;  %v15043_v32 = vld [vmem:[#allocation437_spill] sm:$0xff] }
 0x416   :  { %5209 = vmatpush.msrb.mxu2 %v15039_v46  ;;  %5260 = vmatpush.msrb.mxu3 %v15014_v20  ;;  %v15045_v46 = vld [vmem:[#allocation452_spill] sm:$0xff] }
 0x417   :  { %5325 = vmatpush.msra.mxu0 %v15040_v6  ;;  %5364 = vmatpush.msra.mxu1 %v15012_v41  ;;  %v15046_v6 = vld [vmem:[#allocation479_spill] sm:$0xff] }
 0x418   :  { %5212 = vmatpush.msrb.mxu2 %v15041_v21  ;;  %5262 = vmatpush.msrb.mxu3 %v15015_v55  ;;  %v15047_v21 = vld [vmem:[#allocation459_spill] sm:$0xff] }
 0x419   :  { %5329 = vmatpush.msra.mxu0 %v15042_v34  ;;  %5366 = vmatpush.msra.mxu1 %v15013_v11  ;;  %v15053_v34 = vld [vmem:[#allocation464_spill] sm:$0xff] }
 0x41a   :  { %5266 = vmatmul.f32.vlgmr.msrb.gmra.mxu3 %v11733_v12  ;;  %5215 = vmatpush.msrb.mxu2 %v15043_v32  ;;  %v15049_v12 = vld [vmem:[#allocation483_spill] sm:$0xff]  ;;  %v15050_v32 = vld [vmem:[#allocation461_spill] sm:$0xff] }
 0x41b   :  { %5422 = vmatpush.msra.mxu3 %v15044_v59  ;;  %5333 = vmatpush.msra.mxu0 %v15045_v46  ;;  %v15051_v46 = vld [vmem:[#allocation445_spill] sm:$0xff]  ;;  %v15052_v59 = vld [vmem:[#allocation487_spill] sm:$0xff] }
 0x41c   :  { %5368 = vmatpush.msra.mxu1 %v15014_v20  ;;  %5335 = vmatmul.f32.vlgmr.msra.gmra.mxu0 %v11720_v44 }
 0x41d   :  { %5428 = vmatpush.msra.mxu3 %v15046_v6  ;;  %5520 = vmatpush.msrb.mxu0 %v15047_v21  ;;  %v15054_v21 = vld [vmem:[#allocation448_spill] sm:$0xff] }
 0x41e   :  { %5218 = vmatpush.msrb.mxu2 %v15048_v36  ;;  %5370 = vmatpush.msra.mxu1 %v15015_v55  ;;  %v15055_v36 = vld [vmem:[#allocation491_spill] sm:$0xff] }
 0x41f   :  { %5372 = vmatmul.f32.vlgmr.msra.gmra.mxu1 %v11720_v44  ;;  %5434 = vmatpush.msra.mxu3 %v15049_v12  ;;  %v15056_v44 = vld [vmem:[#allocation467_spill] sm:$0xff] }
 0x420   :  { %5523 = vmatpush.msrb.mxu0 %v15050_v32  ;;  %5573 = vmatpush.msrb.mxu1 %v10798_v19  ;;  %v15057_v32 = vld [vmem:[#allocation495_spill] sm:$0xff] }
 0x421   :  { %5221 = vmatpush.msrb.mxu2 %v15051_v46  ;;  %5440 = vmatpush.msra.mxu3 %v15052_v59  ;;  %v15058_v46 = vld [vmem:[#allocation470_spill] sm:$0xff] }
 0x422   :  { %5526 = vmatpush.msrb.mxu0 %v15053_v34  ;;  %5575 = vmatpush.msrb.mxu1 %v10804_v4  ;;  %v15059_v34 = vld [vmem:[#allocation499_spill] sm:$0xff] }
 0x423   :  { %5224 = vmatpush.msrb.mxu2 %v15054_v21  ;;  %5446 = vmatpush.msra.mxu3 %v15055_v36  ;;  %v15060_v21 = vld [vmem:[#allocation474_spill] sm:$0xff]  ;;  %v15191_v36 = vld [vmem:[#allocation520_spill] sm:$0xff] }
 0x424   :  { %5227 = vmatmul.f32.vlgmr.msrb.gmra.mxu2 %v11725_v58  ;;  %5529 = vmatpush.msrb.mxu0 %v15056_v44  ;;  %v15061_v58 = vld [vmem:[#allocation477_spill] sm:$0xff] }
 0x425   :  { %5377 = vmatpush.msra.mxu2 %v10798_v19  ;;  %5577 = vmatpush.msrb.mxu1 %v10813_v13 }
 0x426   :  { %5452 = vmatpush.msra.mxu3 %v15057_v32  ;;  %5532 = vmatpush.msrb.mxu0 %v15058_v46  ;;  %v15062_v46 = vld [vmem:[#allocation506_spill] sm:$0xff]  ;;  %v15063_v32 = vld [vmem:[#allocation480_spill] sm:$0xff] }
 0x427   :  { %5379 = vmatpush.msra.mxu2 %v10804_v4  ;;  %5579 = vmatpush.msrb.mxu1 %v10822_v14 }
 0x428   :  { %5458 = vmatpush.msra.mxu3 %v15059_v34  ;;  %5535 = vmatpush.msrb.mxu0 %v15060_v21  ;;  %v15064_v21 = vld [vmem:[#allocation485_spill] sm:$0xff] }
 0x429   :  { %5381 = vmatpush.msra.mxu2 %v10813_v13  ;;  %5581 = vmatpush.msrb.mxu1 %v10834_v7  ;;  %v15087_v34 = vld [vmem:[#allocation45_spill] sm:$0xff] }
 0x42a   :  { %5464 = vmatpush.msra.mxu3 %v10992_v39  ;;  %5538 = vmatpush.msrb.mxu0 %v15061_v58  ;;  %v15065_v58 = vld [vmem:[#allocation512_spill] sm:$0xff]  ;;  %v15085_v39 = vld [vmem:[#allocation17_spill] sm:$0xff] }
 0x42b   :  { %5383 = vmatpush.msra.mxu2 %v10822_v14  ;;  %5583 = vmatpush.msrb.mxu1 %v10848_v43 }
 0x42c   :  { %5470 = vmatpush.msra.mxu3 %v15062_v46  ;;  %5541 = vmatpush.msrb.mxu0 %v15063_v32  ;;  %v15074_v32 = vld [vmem:[#allocation508_spill] sm:$0xff]  ;;  %v15083_v46 = vld [vmem:[#allocation463_spill] sm:$0xff] }
 0x42d   :  { %5385 = vmatpush.msra.mxu2 %v10834_v7  ;;  %5585 = vmatpush.msrb.mxu1 %v10860_v51 }
 0x42e   :  { %5476 = vmatpush.msra.mxu3 %v11024_v9  ;;  %5544 = vmatpush.msrb.mxu0 %v15064_v21  ;;  %v15068_v21 = vld [vmem:[#allocation500_spill] sm:$0xff] }
 0x42f   :  { %5387 = vmatpush.msra.mxu2 %v10848_v43  ;;  %5587 = vmatpush.msrb.mxu1 %v10871_v17  ;;  %v15071_v9 = vld [vmem:[#allocation504_spill] sm:$0xff] }
 0x430   :  { %5482 = vmatpush.msra.mxu3 %v15065_v58  ;;  %5547 = vmatpush.msrb.mxu0 %v10938_v10  ;;  %v15066_v58 = vld [vmem:[#allocation486_spill] sm:$0xff]  ;;  %v15067_v10 = vld [vmem:[#allocation517_spill] sm:$0xff] }
 0x431   :  { %5389 = vmatpush.msra.mxu2 %v10860_v51  ;;  %5589 = vmatpush.msrb.mxu1 %v10892_v54 }
 0x432   :  { %5488 = vmatpush.msra.mxu3 %v11049_v2  ;;  %5550 = vmatpush.msrb.mxu0 %v10954_v37  ;;  %v15069_v2 = vld [vmem:[#allocation490_spill] sm:$0xff] }
 0x433   :  { %5391 = vmatpush.msra.mxu2 %v10871_v17  ;;  %5591 = vmatpush.msrb.mxu1 %v10908_v0  ;;  %v15070_v37 = vld [vmem:[#allocation518_spill] sm:$0xff] }
 0x434   :  { %5494 = vmatpush.msra.mxu3 %v11060_v42  ;;  %5553 = vmatpush.msrb.mxu0 %v10970_v25  ;;  %v15072_v42 = vld [vmem:[#allocation494_spill] sm:$0xff]  ;;  %v15073_v25 = vld [vmem:[#allocation519_spill] sm:$0xff] }
 0x435   :  { %5393 = vmatpush.msra.mxu2 %v10892_v54  ;;  %5593 = vmatpush.msrb.mxu1 %v15066_v58 }
 0x436   :  { %5500 = vmatpush.msra.mxu3 %v15067_v10  ;;  %5556 = vmatpush.msrb.mxu0 %v15068_v21  ;;  %v15075_v10 = vld [vmem:[#allocation498_spill] sm:$0xff]  ;;  %v15076_v21 = vld [vmem:[#allocation511_spill] sm:$0xff] }
 0x437   :  { %5395 = vmatpush.msra.mxu2 %v10908_v0  ;;  %5595 = vmatpush.msrb.mxu1 %v15069_v2 }
 0x438   :  { %5506 = vmatpush.msra.mxu3 %v15070_v37  ;;  %5559 = vmatpush.msrb.mxu0 %v15071_v9  ;;  %v15077_v9 = vld [vmem:[#allocation501_spill] sm:$0xff]  ;;  %v15081_v37 = vld [vmem:[#allocation16_spill] sm:$0xff] }
 0x439   :  { %5397 = vmatpush.msra.mxu2 %v15066_v58  ;;  %5597 = vmatpush.msrb.mxu1 %v15072_v42 }
 0x43a   :  { %5512 = vmatpush.msra.mxu3 %v15073_v25  ;;  %5562 = vmatpush.msrb.mxu0 %v15074_v32  ;;  %v15078_v32 = vld [vmem:[#allocation505_spill] sm:$0xff]  ;;  %v15079_v25 = vld [vmem:[#allocation15_spill] sm:$0xff] }
 0x43b   :  { %5399 = vmatpush.msra.mxu2 %v15069_v2  ;;  %5599 = vmatpush.msrb.mxu1 %v15075_v10 }
 0x43c   :  { %5514 = vmatmul.f32.vlgmr.msra.gmra.mxu3 %v11853_v29  ;;  %5565 = vmatpush.msrb.mxu0 %v15076_v21  ;;  %v15080_v21 = vld [vmem:[#allocation38_spill] sm:$0xff] }
 0x43d   :  { %5681 = vmatpush.msrb.mxu3 %v10798_v19  ;;  %5401 = vmatpush.msra.mxu2 %v15072_v42  ;;  %v15193_v19 = vld [vmem:[#allocation521_spill] sm:$0xff] }
 0x43e   :  { %5601 = vmatpush.msrb.mxu1 %v15077_v9  ;;  %5568 = vmatmul.f32.vlgmr.msrb.gmra.mxu0 %v11856_v26  ;;  %v15082_v26 = vld [vmem:[#allocation39_spill] sm:$0xff] }
 0x43f   :  { %5683 = vmatpush.msrb.mxu3 %v10804_v4  ;;  %5403 = vmatpush.msra.mxu2 %v15075_v10  ;;  %v15192_v4 = vld [vmem:[#allocation336_spill] sm:$0xff] }
 0x440   :  { %5603 = vmatpush.msrb.mxu1 %v15078_v32  ;;  %5748 = vmatpush.msra.mxu0 %v15079_v25 }
 0x441   :  { %5607 = vmatmul.f32.vlgmr.msrb.gmra.mxu1 %v11862_v50  ;;  %5685 = vmatpush.msrb.mxu3 %v10813_v13  ;;  %v15084_v50 = vld [vmem:[#allocation41_spill] sm:$0xff] }
 0x442   :  { %5405 = vmatpush.msra.mxu2 %v15077_v9  ;;  %5793 = vmatpush.msra.mxu1 %v15080_v21  ;;  %v15086_v21 = vld [vmem:[#allocation466_spill] sm:$0xff] }
 0x443   :  { %5687 = vmatpush.msrb.mxu3 %v10822_v14  ;;  %5750 = vmatpush.msra.mxu0 %v15081_v37  ;;  %v15088_v14 = vld [vmem:[#allocation18_spill] sm:$0xff] }
 0x444   :  { %5407 = vmatpush.msra.mxu2 %v15078_v32  ;;  %5799 = vmatpush.msra.mxu1 %v15082_v26  ;;  %v15089_v26 = vld [vmem:[#allocation469_spill] sm:$0xff] }
 0x445   :  { %5413 = vmatmul.f32.vlgmr.msra.gmra.mxu2 %v11872_v18  ;;  %5689 = vmatpush.msrb.mxu3 %v10834_v7  ;;  %v15090_v18 = vld [vmem:[#allocation50_spill] sm:$0xff] }
 0x446   :  { %5614 = vmatpush.msrb.mxu2 %v15083_v46  ;;  %5805 = vmatpush.msra.mxu1 %v15084_v50  ;;  %v15091_v46 = vld [vmem:[#allocation19_spill] sm:$0xff]  ;;  %v15092_v50 = vld [vmem:[#allocation472_spill] sm:$0xff] }
 0x447   :  { %5691 = vmatpush.msrb.mxu3 %v10848_v43  ;;  %5752 = vmatpush.msra.mxu0 %v15085_v39  ;;  %v15093_v43 = vld [vmem:[#allocation53_spill] sm:$0xff] }
 0x448   :  { %5618 = vmatpush.msrb.mxu2 %v15086_v21  ;;  %5811 = vmatpush.msra.mxu1 %v15087_v34  ;;  %v15094_v21 = vld [vmem:[#allocation20_spill] sm:$0xff] }
 0x449   :  { %5693 = vmatpush.msrb.mxu3 %v10860_v51  ;;  %5754 = vmatpush.msra.mxu0 %v15088_v14  ;;  %v15095_v34 = vld [vmem:[#allocation476_spill] sm:$0xff]  ;;  %v15096_v51 = vld [vmem:[#allocation59_spill] sm:$0xff] }
 0x44a   :  { %5622 = vmatpush.msrb.mxu2 %v15089_v26  ;;  %5817 = vmatpush.msra.mxu1 %v15090_v18  ;;  %v15097_v26 = vld [vmem:[#allocation24_spill] sm:$0xff]  ;;  %v15098_v18 = vld [vmem:[#allocation481_spill] sm:$0xff] }
 0x44b   :  { %5695 = vmatpush.msrb.mxu3 %v10871_v17  ;;  %5756 = vmatpush.msra.mxu0 %v15091_v46  ;;  %v15099_v17 = vld [vmem:[#allocation64_spill] sm:$0xff] }
 0x44c   :  { %5626 = vmatpush.msrb.mxu2 %v15092_v50  ;;  %5823 = vmatpush.msra.mxu1 %v15093_v43  ;;  %v15100_v50 = vld [vmem:[#allocation31_spill] sm:$0xff]  ;;  %v15101_v43 = vld [vmem:[#allocation484_spill] sm:$0xff] }
 0x44d   :  { %5697 = vmatpush.msrb.mxu3 %v10892_v54  ;;  %5758 = vmatpush.msra.mxu0 %v15094_v21  ;;  %v15102_v54 = vld [vmem:[#allocation69_spill] sm:$0xff] }
 0x44e   :  { %5630 = vmatpush.msrb.mxu2 %v15095_v34  ;;  %5829 = vmatpush.msra.mxu1 %v15096_v51  ;;  %v15103_v34 = vld [vmem:[#allocation35_spill] sm:$0xff]  ;;  %v15104_v51 = vld [vmem:[#allocation488_spill] sm:$0xff] }
 0x44f   :  { %5699 = vmatpush.msrb.mxu3 %v10908_v0  ;;  %5760 = vmatpush.msra.mxu0 %v15097_v26  ;;  %v15105_v0 = vld [vmem:[#allocation74_spill] sm:$0xff] }
 0x450   :  { %5634 = vmatpush.msrb.mxu2 %v15098_v18  ;;  %5835 = vmatpush.msra.mxu1 %v15099_v17  ;;  %v15106_v18 = vld [vmem:[#allocation36_spill] sm:$0xff] }
 0x451   :  { %5701 = vmatpush.msrb.mxu3 %v15066_v58  ;;  %5762 = vmatpush.msra.mxu0 %v15100_v50  ;;  %v15107_v17 = vld [vmem:[#allocation492_spill] sm:$0xff]  ;;  %v15108_v58 = vld [vmem:[#allocation78_spill] sm:$0xff] }
 0x452   :  { %5638 = vmatpush.msrb.mxu2 %v15101_v43  ;;  %5841 = vmatpush.msra.mxu1 %v15102_v54  ;;  %v15109_v43 = vld [vmem:[#allocation42_spill] sm:$0xff]  ;;  %v15110_v54 = vld [vmem:[#allocation496_spill] sm:$0xff] }
 0x453   :  { %5703 = vmatpush.msrb.mxu3 %v15069_v2  ;;  %5764 = vmatpush.msra.mxu0 %v15103_v34  ;;  %v15111_v2 = vld [vmem:[#allocation84_spill] sm:$0xff] }
 0x454   :  { %5642 = vmatpush.msrb.mxu2 %v15104_v51  ;;  %5847 = vmatpush.msra.mxu1 %v15105_v0  ;;  %v15112_v51 = vld [vmem:[#allocation46_spill] sm:$0xff]  ;;  %v15113_v0 = vld [vmem:[#allocation349_spill] sm:$0xff] }
 0x455   :  { %5705 = vmatpush.msrb.mxu3 %v15072_v42  ;;  %5766 = vmatpush.msra.mxu0 %v15106_v18  ;;  %v15114_v42 = vld [vmem:[#allocation87_spill] sm:$0xff] }
 0x456   :  { %5646 = vmatpush.msrb.mxu2 %v15107_v17  ;;  %5853 = vmatpush.msra.mxu1 %v15108_v58  ;;  %v15115_v17 = vld [vmem:[#allocation49_spill] sm:$0xff]  ;;  %v15116_v58 = vld [vmem:[#allocation503_spill] sm:$0xff] }
 0x457   :  { %5707 = vmatpush.msrb.mxu3 %v15075_v10  ;;  %5768 = vmatpush.msra.mxu0 %v15109_v43  ;;  %v15117_v10 = vld [vmem:[#allocation92_spill] sm:$0xff] }
 0x458   :  { %5650 = vmatpush.msrb.mxu2 %v15110_v54  ;;  %5859 = vmatpush.msra.mxu1 %v15111_v2  ;;  %v15118_v2 = vld [vmem:[#allocation507_spill] sm:$0xff]  ;;  %v15119_v54 = vld [vmem:[#allocation54_spill] sm:$0xff] }
 0x459   :  { %5709 = vmatpush.msrb.mxu3 %v15077_v9  ;;  %5770 = vmatpush.msra.mxu0 %v15112_v51  ;;  %v15120_v9 = vld [vmem:[#allocation97_spill] sm:$0xff] }
 0x45a   :  { %5654 = vmatpush.msrb.mxu2 %v15113_v0  ;;  %5865 = vmatpush.msra.mxu1 %v15114_v42  ;;  %v15121_v42 = vld [vmem:[#allocation510_spill] sm:$0xff]  ;;  %v15122_v0 = vld [vmem:[#allocation60_spill] sm:$0xff] }
 0x45b   :  { %5711 = vmatpush.msrb.mxu3 %v15078_v32  ;;  %5772 = vmatpush.msra.mxu0 %v15115_v17  ;;  %v15123_v32 = vld [vmem:[#allocation102_spill] sm:$0xff] }
 0x45c   :  { %5658 = vmatpush.msrb.mxu2 %v15116_v58  ;;  %5713 = vmatmul.f32.vlgmr.msrb.gmra.mxu3 %v11853_v29  ;;  %v15124_v58 = vld [vmem:[#allocation513_spill] sm:$0xff] }
 0x45d   :  { %5871 = vmatpush.msra.mxu1 %v15117_v10  ;;  %5944 = vmatpush.msra.mxu3 %v15079_v25  ;;  %v15125_v10 = vld [vmem:[#allocation62_spill] sm:$0xff] }
 0x45e   :  { %5662 = vmatpush.msrb.mxu2 %v15118_v2  ;;  %5774 = vmatpush.msra.mxu0 %v15119_v54  ;;  %v15126_v2 = vld [vmem:[#allocation515_spill] sm:$0xff] }
 0x45f   :  { %5877 = vmatpush.msra.mxu1 %v15120_v9  ;;  %5946 = vmatpush.msra.mxu3 %v15081_v37  ;;  %v15127_v9 = vld [vmem:[#allocation21_spill] sm:$0xff] }
 0x460   :  { %5666 = vmatpush.msrb.mxu2 %v15121_v42  ;;  %5776 = vmatpush.msra.mxu0 %v15122_v0  ;;  %v15186_v42 = vld [vmem:[#allocation146_spill] sm:$0xff] }
 0x461   :  { %5883 = vmatpush.msra.mxu1 %v15123_v32  ;;  %5948 = vmatpush.msra.mxu3 %v15085_v39  ;;  %v15128_v32 = vld [vmem:[#allocation28_spill] sm:$0xff] }
 0x462   :  { %5670 = vmatpush.msrb.mxu2 %v15124_v58  ;;  %5778 = vmatpush.msra.mxu0 %v15125_v10 }
 0x463   :  { %6052 = vmatpush.msrb.mxu1 %v15079_v25  ;;  %5950 = vmatpush.msra.mxu3 %v15088_v14  ;;  %v15129_v25 = vld [vmem:[#allocation22_spill] sm:$0xff] }
 0x464   :  { %5674 = vmatpush.msrb.mxu2 %v15126_v2  ;;  %5985 = vmatpush.msrb.mxu0 %v15128_v32  ;;  %v15130_v2 = vld [vmem:[#allocation29_spill] sm:$0xff] }
 0x465   :  { %6054 = vmatpush.msrb.mxu1 %v15081_v37  ;;  %5676 = vmatmul.f32.vlgmr.msrb.gmra.mxu2 %v11853_v29  ;;  %v4391_v37 = vpop.f32.mrf.mxu0  ;;  %v15131_v29 = vld [vmem:[#allocation23_spill] sm:$0xff] }
 0x466   :  { %5952 = vmatpush.msra.mxu3 %v15091_v46  ;;  %5891 = vmatpush.msra.mxu2 %v15127_v9  ;;  %v15133_v9 = vld [vmem:[#allocation25_spill] sm:$0xff]  ;;  %v4392_v32 = vadd.f32 1e-05, %v4391_v37  ;;  %v15139_v37 = vld [vmem:[#allocation34_spill] sm:$0xff] }
 0x467   :  { %6056 = vmatpush.msrb.mxu1 %v15085_v39  ;;  %5989 = vmatpush.msrb.mxu0 %v15130_v2  ;;  %v15132_v39 = vld [vmem:[#allocation30_spill] sm:$0xff]  ;;  %v4492_v2 = vpop.f32.mrf.mxu1 }
 0x468   :  { %5954 = vmatpush.msra.mxu3 %v15094_v21  ;;  %5894 = vmatpush.msra.mxu2 %v15129_v25  ;;  %v15135_v25 = vld [vmem:[#allocation26_spill] sm:$0xff] }
 0x469   :  { %6058 = vmatpush.msrb.mxu1 %v15088_v14  ;;  %5993 = vmatpush.msrb.mxu0 %v15132_v39  ;;  %v15134_v14 = vld [vmem:[#allocation32_spill] sm:$0xff]  ;;  %v4493_v39 = vadd.f32 %v4492_v2, %v4392_v32 }
 0x46a   :  { %5956 = vmatpush.msra.mxu3 %v15097_v26  ;;  %5897 = vmatpush.msra.mxu2 %v15131_v29  ;;  %v15137_v29 = vld [vmem:[#allocation27_spill] sm:$0xff]  ;;  %v15143_v32 = vld [vmem:[#allocation44_spill] sm:$0xff] }
 0x46b   :  { %6060 = vmatpush.msrb.mxu1 %v15091_v46  ;;  %5997 = vmatpush.msrb.mxu0 %v15134_v14  ;;  %v15136_v46 = vld [vmem:[#allocation33_spill] sm:$0xff]  ;;  %v15141_v14 = vld [vmem:[#allocation40_spill] sm:$0xff] }
 0x46c   :  { %5958 = vmatpush.msra.mxu3 %v15100_v50  ;;  %5900 = vmatpush.msra.mxu2 %v15133_v9  ;;  %v4546_v9 = vpop.f32.mrf.mxu2  ;;  %v15145_v2 = vld [vmem:[#allocation48_spill] sm:$0xff] }
 0x46d   :  { %6062 = vmatpush.msrb.mxu1 %v15094_v21  ;;  %6001 = vmatpush.msrb.mxu0 %v15136_v46  ;;  %v15138_v21 = vld [vmem:[#allocation37_spill] sm:$0xff]  ;;  %v4585_v46 = vpop.f32.mrf.mxu3 }
 0x46e   :  { %5960 = vmatpush.msra.mxu3 %v15103_v34  ;;  %5903 = vmatpush.msra.mxu2 %v15135_v25  ;;  %v4547_v25 = vadd.f32 %v4546_v9, %v4493_v39  ;;  %v4654_v39 = vpop.f32.mrf.mxu0  ;;  %v15151_v9 = vld [vmem:[#allocation95_spill] sm:$0xff] }
 0x46f   :  { %6064 = vmatpush.msrb.mxu1 %v15097_v26  ;;  %6005 = vmatpush.msrb.mxu0 %v15138_v21  ;;  %v15140_v26 = vld [vmem:[#allocation43_spill] sm:$0xff]  ;;  %v15147_v21 = vld [vmem:[#allocation52_spill] sm:$0xff] }
 0x470   :  { %5962 = vmatpush.msra.mxu3 %v15106_v18  ;;  %5906 = vmatpush.msra.mxu2 %v15137_v29  ;;  %v4586_v29 = vadd.f32 %v4585_v46, %v4547_v25  ;;  %v15153_v25 = vld [vmem:[#allocation67_spill] sm:$0xff]  ;;  %v15157_v46 = vld [vmem:[#allocation106_spill] sm:$0xff] }
 0x471   :  { %6066 = vmatpush.msrb.mxu1 %v15100_v50  ;;  %6009 = vmatpush.msrb.mxu0 %v15140_v26  ;;  %v15142_v50 = vld [vmem:[#allocation47_spill] sm:$0xff] }
 0x472   :  { %5964 = vmatpush.msra.mxu3 %v15109_v43  ;;  %5909 = vmatpush.msra.mxu2 %v15139_v37  ;;  %v15149_v37 = vld [vmem:[#allocation56_spill] sm:$0xff]  ;;  %v4655_v26 = vadd.f32 %v4654_v39, %v4586_v29  ;;  %v15158_v29 = vld [vmem:[#allocation70_spill] sm:$0xff]  ;;  %v15159_v39 = vld [vmem:[#allocation79_spill] sm:$0xff] }
 0x473   :  { %6068 = vmatpush.msrb.mxu1 %v15103_v34  ;;  %6013 = vmatpush.msrb.mxu0 %v15142_v50  ;;  %v15144_v34 = vld [vmem:[#allocation51_spill] sm:$0xff]  ;;  %v4691_v50 = vpop.f32.mrf.mxu1 }
 0x474   :  { %5966 = vmatpush.msra.mxu3 %v15112_v51  ;;  %5912 = vmatpush.msra.mxu2 %v15141_v14  ;;  %v15152_v14 = vld [vmem:[#allocation57_spill] sm:$0xff] }
 0x475   :  { %6070 = vmatpush.msrb.mxu1 %v15106_v18  ;;  %6017 = vmatpush.msrb.mxu0 %v15144_v34  ;;  %v15146_v18 = vld [vmem:[#allocation55_spill] sm:$0xff]  ;;  %v4692_v34 = vadd.f32 %v4691_v50, %v4655_v26  ;;  %v15166_v50 = vld [vmem:[#allocation117_spill] sm:$0xff] }
 0x476   :  { %5968 = vmatpush.msra.mxu3 %v15115_v17  ;;  %5915 = vmatpush.msra.mxu2 %v15143_v32  ;;  %v15155_v32 = vld [vmem:[#allocation66_spill] sm:$0xff]  ;;  %v4887_v26 = vpop.f32.mrf.mxu0 }
 0x477   :  { %6072 = vmatpush.msrb.mxu1 %v15109_v43  ;;  %6021 = vmatpush.msrb.mxu0 %v15146_v18  ;;  %v15148_v43 = vld [vmem:[#allocation61_spill] sm:$0xff] }
 0x478   :  { %5970 = vmatpush.msra.mxu3 %v15119_v54  ;;  %5918 = vmatpush.msra.mxu2 %v15145_v2 }
 0x479   :  { %6074 = vmatpush.msrb.mxu1 %v15112_v51  ;;  %6025 = vmatpush.msrb.mxu0 %v15148_v43  ;;  %v15150_v51 = vld [vmem:[#allocation65_spill] sm:$0xff]  ;;  %v15161_v43 = vld [vmem:[#allocation72_spill] sm:$0xff] }
 0x47a   :  { %5972 = vmatpush.msra.mxu3 %v15122_v0  ;;  %5921 = vmatpush.msra.mxu2 %v15147_v21  ;;  %v4833_v21 = vpop.f32.mrf.mxu3 }
 0x47b   :  { %6076 = vmatpush.msrb.mxu1 %v15115_v17  ;;  %6029 = vmatpush.msrb.mxu0 %v15150_v51  ;;  %v15154_v17 = vld [vmem:[#allocation100_spill] sm:$0xff]  ;;  %v15162_v51 = vld [vmem:[#allocation82_spill] sm:$0xff] }
 0x47c   :  { %5974 = vmatpush.msra.mxu3 %v15125_v10  ;;  %5924 = vmatpush.msra.mxu2 %v15149_v37 }
 0x47d   :  { %6078 = vmatpush.msrb.mxu1 %v15119_v54  ;;  %6033 = vmatpush.msrb.mxu0 %v15153_v25  ;;  %v15156_v54 = vld [vmem:[#allocation75_spill] sm:$0xff] }
 0x47e   :  { %6134 = vmatpush.msrb.mxu3 %v15151_v9  ;;  %5927 = vmatpush.msra.mxu2 %v15152_v14  ;;  %v15164_v9 = vld [vmem:[#allocation114_spill] sm:$0xff]  ;;  %v15165_v25 = vld [vmem:[#allocation63_spill] sm:$0xff] }
 0x47f   :  { %6080 = vmatpush.msrb.mxu1 %v15122_v0  ;;  %6037 = vmatpush.msrb.mxu0 %v15156_v54  ;;  %v15160_v0 = vld [vmem:[#allocation110_spill] sm:$0xff]  ;;  %v15168_v54 = vld [vmem:[#allocation121_spill] sm:$0xff] }
 0x480   :  { %6140 = vmatpush.msrb.mxu3 %v15154_v17  ;;  %5930 = vmatpush.msra.mxu2 %v15155_v32  ;;  %v4926_v17 = vpop.f32.mrf.mxu1 }
 0x481   :  { %6082 = vmatpush.msrb.mxu1 %v15125_v10  ;;  %6041 = vmatpush.msrb.mxu0 %v15159_v39  ;;  %v15163_v10 = vld [vmem:[#allocation58_spill] sm:$0xff]  ;;  %v15171_v39 = vld [vmem:[#allocation81_spill] sm:$0xff] }
 0x482   :  { %6146 = vmatpush.msrb.mxu3 %v15157_v46  ;;  %v4732_v2 = vpop.f32.mrf.mxu2  ;;  %5933 = vmatpush.msra.mxu2 %v15158_v29  ;;  %v15169_v46 = vld [vmem:[#allocation76_spill] sm:$0xff]  ;;  %v15170_v29 = vld [vmem:[#allocation125_spill] sm:$0xff] }
 0x483   :  { %v4733_v18 = vadd.f32 %v4732_v2, %v4692_v34  ;;  %6045 = vmatpush.msrb.mxu0 %v15162_v51  ;;  %v15167_v34 = vld [vmem:[#allocation71_spill] sm:$0xff]  ;;  %v15174_v51 = vld [vmem:[#allocation132_spill] sm:$0xff] }
 0x484   :  { %6152 = vmatpush.msrb.mxu3 %v15160_v0  ;;  %5936 = vmatpush.msra.mxu2 %v15161_v43  ;;  %v5032_v0 = vpop.f32.mrf.mxu3 }
 0x485   :  { %v4834_v37 = vadd.f32 %v4833_v21, %v4733_v18  ;;  %v15172_v21 = vld [vmem:[#allocation128_spill] sm:$0xff] }
 0x486   :  { %6089 = vmatpush.msrb.mxu2 %v15163_v10  ;;  %6158 = vmatpush.msrb.mxu3 %v15164_v9  ;;  %v15176_v9 = vld [vmem:[#allocation135_spill] sm:$0xff] }
 0x487   :  { %v4888_v14 = vadd.f32 %v4887_v26, %v4834_v37  ;;  %v15173_v37 = vld [vmem:[#allocation86_spill] sm:$0xff] }
 0x488   :  { %6091 = vmatpush.msrb.mxu2 %v15165_v25  ;;  %6164 = vmatpush.msrb.mxu3 %v15166_v50  ;;  %v15175_v26 = vld [vmem:[#allocation90_spill] sm:$0xff]  ;;  %v15179_v50 = vld [vmem:[#allocation96_spill] sm:$0xff] }
 0x489   :  { %v4927_v32 = vadd.f32 %v4926_v17, %v4888_v14  ;;  %v15177_v14 = vld [vmem:[#allocation91_spill] sm:$0xff]  ;;  %v15178_v17 = vld [vmem:[#allocation138_spill] sm:$0xff] }
 0x48a   :  { %6093 = vmatpush.msrb.mxu2 %v15167_v34  ;;  %6170 = vmatpush.msrb.mxu3 %v15168_v54 }
 0x48c   :  { %6095 = vmatpush.msrb.mxu2 %v15169_v46  ;;  %v4995_v2 = vpop.f32.mrf.mxu2  ;;  %6176 = vmatpush.msrb.mxu3 %v15170_v29 }
 0x48d   :  { %v4996_v18 = vadd.f32 %v4995_v2, %v4927_v32  ;;  %v15180_v32 = vld [vmem:[#allocation140_spill] sm:$0xff] }
 0x48e   :  { %6097 = vmatpush.msrb.mxu2 %v15171_v39  ;;  %6182 = vmatpush.msrb.mxu3 %v15172_v21  ;;  %v15181_v2 = vld [vmem:[#allocation104_spill] sm:$0xff] }
 0x48f   :  { %v5033_v43 = vadd.f32 %v5032_v0, %v4996_v18  ;;  %v15182_v18 = vld [vmem:[#allocation143_spill] sm:$0xff]  ;;  %v15183_v0 = vld [vmem:[#allocation108_spill] sm:$0xff] }
 0x490   :  { %6099 = vmatpush.msrb.mxu2 %v15173_v37  ;;  %6188 = vmatpush.msrb.mxu3 %v15174_v51  ;;  %v15184_v51 = vld [vmem:[#allocation145_spill] sm:$0xff] }
 0x491   :  { %8539 = vrsqrt.f32 %v5033_v43  ;;  %vm5723_vm7 = vweird.f32 %v5033_v43 }
 0x492   :  { %6101 = vmatpush.msrb.mxu2 %v15175_v26  ;;  %6194 = vmatpush.msrb.mxu3 %v15176_v9  ;;  %v15185_v9 = vld [vmem:[#allocation112_spill] sm:$0xff] }
 0x494   :  { %6103 = vmatpush.msrb.mxu2 %v15177_v14  ;;  %6200 = vmatpush.msrb.mxu3 %v15178_v17  ;;  %v15187_v17 = vld [vmem:[#allocation116_spill] sm:$0xff] }
 0x496   :  { %6105 = vmatpush.msrb.mxu2 %v15179_v50  ;;  %6206 = vmatpush.msrb.mxu3 %v15180_v32  ;;  %v15188_v32 = vld [vmem:[#allocation123_spill] sm:$0xff] }
 0x497   :  { %v8540_v54 = vpop.eup %8539 }
 0x498   :  { %6107 = vmatpush.msrb.mxu2 %v15181_v2  ;;  %v5718_v29 = vmul.f32 %v8540_v54, %v5033_v43  ;;  %6212 = vmatpush.msrb.mxu3 %v15182_v18  ;;  %vm5724_vm6 = vweird.f32 %v8540_v54  ;;  %v15189_v18 = vld [vmem:[#allocation127_spill] sm:$0xff]  ;;  %v15196_v43 = vld [vmem:[#allocation68_spill] sm:$0xff] }
 0x499   :  { %vm5725_vm8 = vmor %vm5723_vm7, %vm5724_vm6 }
 0x49a   :  { %6109 = vmatpush.msrb.mxu2 %v15183_v0  ;;  %v5719_v21 = vmul.f32 %v8540_v54, %v5718_v29  ;;  %6218 = vmatpush.msrb.mxu3 %v15184_v51  ;;  %v15190_v51 = vld [vmem:[#allocation131_spill] sm:$0xff] }
 0x49c   :  { %6111 = vmatpush.msrb.mxu2 %v15185_v9  ;;  %v5720_v58 = vmul.f32 0.5, %v5719_v21  ;;  %6224 = vmatpush.msrb.mxu3 %v15186_v42 }
 0x49e   :  { %6113 = vmatpush.msrb.mxu2 %v15187_v17  ;;  %v5721_v7 = vsub.f32 1.5, %v5720_v58 }
 0x4a0   :  { %6115 = vmatpush.msrb.mxu2 %v15188_v32  ;;  %v5722_v13 = vmul.f32 %v8540_v54, %v5721_v7 }
 0x4a2   :  { %6117 = vmatpush.msrb.mxu2 %v15189_v18  ;;  %v5726_v44 = vsel %vm5725_vm8, %v8540_v54, %v5722_v13  ;;  %v15197_v54 = vld [vmem:[#allocation88_spill] sm:$0xff] }
 0x4a3   :  { %v5737_v29 = vmul.f32 %v5726_v44, %v11712_v31  ;;  %v15195_v44 = vld [vmem:[#allocation83_spill] sm:$0xff] }
 0x4a4   :  { %6119 = vmatpush.msrb.mxu2 %v15190_v51 }
 0x4a5   :  { %v5739_v21 = vmul.f32 %v5737_v29, %v15191_v36  ;;  %v15199_v29 = vld [vmem:[#allocation93_spill] sm:$0xff] }
 0x4a7   :  { %v5741_v42 = vadd.f32 %v5739_v21, %v15192_v4  ;;  %v15201_v21 = vld [vmem:[#allocation98_spill] sm:$0xff] }
 0x4a9   :  { %v5743_v59 = vmax.f32 %v5741_v42, 0.0  ;;  %v15202_v42 = vld [vmem:[#allocation85_spill] sm:$0xff] }
 0x4ab   :  { %v12175_v58 = vadd.f32 %v5743_v59, %v15193_v19  ;;  %v15194_v19 = vld [vmem:[#allocation77_spill] sm:$0xff] }
 0x4ad   :  { %v12178_v12 = vand.u32 4294901760, %v12175_v58 }
 0x4af   :  { %5885 = vmatmul.f32.vlgmr.msra.gmra.mxu1 %v12178_v12  ;;  %v12183_v7 = vsub.f32 %v12175_v58, %v12178_v12 }
 0x4b0   :  { %6285 = vmatpush.msra.mxu1 %v15163_v10 }
 0x4b1   :  { %5939 = vmatmul.f32.vlgmr.msra.gmra.mxu2 %v12183_v7  ;;  %v12188_v13 = vand.u32 4294901760, %v12183_v7 }
 0x4b2   :  { %6287 = vmatpush.msra.mxu1 %v15165_v25  ;;  %6326 = vmatpush.msra.mxu2 %v15194_v19  ;;  %v15205_v19 = vld [vmem:[#allocation94_spill] sm:$0xff] }
 0x4b3   :  { %5978 = vmatmul.f32.vlgmr.msra.gmra.mxu3 %v12188_v13  ;;  %v5782_v31 = vsub.f32 %v12183_v7, %v12188_v13 }
 0x4b4   :  { %6289 = vmatpush.msra.mxu1 %v15167_v34  ;;  %6393 = vmatpush.msra.mxu3 %v15163_v10  ;;  %v15198_v10 = vld [vmem:[#allocation73_spill] sm:$0xff] }
 0x4b5   :  { %v12197_v59 = vand.u32 4294901760, %v5782_v31  ;;  %6330 = vmatpush.msra.mxu2 %v15195_v44  ;;  %v5073_v31 = vpop.f32.mrf.mxu0  ;;  %v15207_v44 = vld [vmem:[#allocation99_spill] sm:$0xff] }
 0x4b6   :  { %6291 = vmatpush.msra.mxu1 %v15169_v46  ;;  %6395 = vmatpush.msra.mxu3 %v15165_v25  ;;  %v15200_v25 = vld [vmem:[#allocation80_spill] sm:$0xff] }
 0x4b7   :  { %5784 = vmatmul.f32.vlgmr.msra.gmra.mxu0 %v12197_v59  ;;  %6084 = vmatmul.f32.vlgmr.msrb.gmra.mxu1 %v12178_v12 }
 0x4b8   :  { %6232 = vmatpush.msra.mxu0 %v15196_v43  ;;  %6293 = vmatpush.msra.mxu1 %v15171_v39  ;;  %v5074_v43 = vadd.f32 1e-05, %v5073_v31  ;;  %v15220_v31 = vld [vmem:[#allocation129_spill] sm:$0xff] }
 0x4b9   :  { %6397 = vmatpush.msra.mxu3 %v15167_v34  ;;  %6334 = vmatpush.msra.mxu2 %v15197_v54  ;;  %v15203_v34 = vld [vmem:[#allocation89_spill] sm:$0xff] }
 0x4ba   :  { %6235 = vmatpush.msra.mxu0 %v15198_v10  ;;  %6295 = vmatpush.msra.mxu1 %v15173_v37  ;;  %v15210_v54 = vld [vmem:[#allocation113_spill] sm:$0xff] }
 0x4bb   :  { %6399 = vmatpush.msra.mxu3 %v15169_v46  ;;  %6338 = vmatpush.msra.mxu2 %v15199_v29  ;;  %v15204_v46 = vld [vmem:[#allocation103_spill] sm:$0xff]  ;;  %v15211_v10 = vld [vmem:[#allocation105_spill] sm:$0xff]  ;;  %v15212_v29 = vld [vmem:[#allocation118_spill] sm:$0xff] }
 0x4bc   :  { %6238 = vmatpush.msra.mxu0 %v15200_v25  ;;  %6297 = vmatpush.msra.mxu1 %v15175_v26  ;;  %v15213_v25 = vld [vmem:[#allocation111_spill] sm:$0xff] }
 0x4bd   :  { %6401 = vmatpush.msra.mxu3 %v15171_v39  ;;  %6342 = vmatpush.msra.mxu2 %v15201_v21  ;;  %v15206_v39 = vld [vmem:[#allocation107_spill] sm:$0xff] }
 0x4be   :  { %6241 = vmatpush.msra.mxu0 %v15202_v42  ;;  %6299 = vmatpush.msra.mxu1 %v15177_v14  ;;  %v15215_v42 = vld [vmem:[#allocation115_spill] sm:$0xff] }
 0x4bf   :  { %6047 = vmatmul.f32.vlgmr.msrb.gmra.mxu0 %v12178_v12  ;;  %6403 = vmatpush.msra.mxu3 %v15173_v37  ;;  %v15208_v37 = vld [vmem:[#allocation109_spill] sm:$0xff] }
 0x4c0   :  { %6244 = vmatpush.msra.mxu0 %v15203_v34  ;;  %6301 = vmatpush.msra.mxu1 %v15179_v50 }
 0x4c1   :  { %6405 = vmatpush.msra.mxu3 %v15175_v26  ;;  %6346 = vmatpush.msra.mxu2 %v15204_v46  ;;  %v15209_v26 = vld [vmem:[#allocation101_spill] sm:$0xff]  ;;  %v15217_v46 = vld [vmem:[#allocation119_spill] sm:$0xff] }
 0x4c2   :  { %6247 = vmatpush.msra.mxu0 %v15205_v19  ;;  %6303 = vmatpush.msra.mxu1 %v15181_v2  ;;  %v15218_v19 = vld [vmem:[#allocation168_spill] sm:$0xff] }
 0x4c3   :  { %6407 = vmatpush.msra.mxu3 %v15177_v14  ;;  %6350 = vmatpush.msra.mxu2 %v15206_v39  ;;  %v5174_v14 = vpop.f32.mrf.mxu1  ;;  %v15219_v39 = vld [vmem:[#allocation124_spill] sm:$0xff] }
 0x4c4   :  { %6250 = vmatpush.msra.mxu0 %v15207_v44  ;;  %6305 = vmatpush.msra.mxu1 %v15183_v0  ;;  %v5175_v21 = vadd.f32 %v5174_v14, %v5074_v43  ;;  %v15224_v43 = vld [vmem:[#allocation176_spill] sm:$0xff]  ;;  %v15226_v14 = vld [vmem:[#allocation139_spill] sm:$0xff] }
 0x4c5   :  { %6409 = vmatpush.msra.mxu3 %v15179_v50  ;;  %6354 = vmatpush.msra.mxu2 %v15208_v37  ;;  %v5228_v50 = vpop.f32.mrf.mxu2  ;;  %v15221_v37 = vld [vmem:[#allocation172_spill] sm:$0xff] }
 0x4c6   :  { %6253 = vmatpush.msra.mxu0 %v15209_v26  ;;  %6307 = vmatpush.msra.mxu1 %v15185_v9  ;;  %v5229_v34 = vadd.f32 %v5228_v50, %v5175_v21  ;;  %v15223_v26 = vld [vmem:[#allocation136_spill] sm:$0xff]  ;;  %v15228_v50 = vld [vmem:[#allocation137_spill] sm:$0xff] }
 0x4c7   :  { %6411 = vmatpush.msra.mxu3 %v15181_v2  ;;  %6358 = vmatpush.msra.mxu2 %v15210_v54  ;;  %v15214_v2 = vld [vmem:[#allocation122_spill] sm:$0xff]  ;;  %v5336_v54 = vpop.f32.mrf.mxu0 }
 0x4c8   :  { %6256 = vmatpush.msra.mxu0 %v15211_v10  ;;  %6309 = vmatpush.msra.mxu1 %v15187_v17 }
 0x4c9   :  { %6413 = vmatpush.msra.mxu3 %v15183_v0  ;;  %6362 = vmatpush.msra.mxu2 %v15212_v29  ;;  %v15216_v0 = vld [vmem:[#allocation126_spill] sm:$0xff]  ;;  %v15227_v29 = vld [vmem:[#allocation180_spill] sm:$0xff] }
 0x4ca   :  { %6259 = vmatpush.msra.mxu0 %v15213_v25  ;;  %6311 = vmatpush.msra.mxu1 %v15188_v32  ;;  %v15229_v25 = vld [vmem:[#allocation141_spill] sm:$0xff] }
 0x4cb   :  { %6415 = vmatpush.msra.mxu3 %v15185_v9  ;;  %6366 = vmatpush.msra.mxu2 %v15214_v2  ;;  %v5267_v9 = vpop.f32.mrf.mxu3  ;;  %v5373_v21 = vpop.f32.mrf.mxu1 }
 0x4cc   :  { %6262 = vmatpush.msra.mxu0 %v15215_v42  ;;  %6313 = vmatpush.msra.mxu1 %v15189_v18  ;;  %v5268_v44 = vadd.f32 %v5267_v9, %v5229_v34 }
 0x4cd   :  { %6417 = vmatpush.msra.mxu3 %v15187_v17  ;;  %6370 = vmatpush.msra.mxu2 %v15216_v0  ;;  %v15222_v17 = vld [vmem:[#allocation130_spill] sm:$0xff]  ;;  %v5414_v2 = vpop.f32.mrf.mxu2  ;;  %v15232_v0 = vld [vmem:[#allocation191_spill] sm:$0xff] }
 0x4ce   :  { %6265 = vmatpush.msra.mxu0 %v15217_v46  ;;  %6315 = vmatpush.msra.mxu1 %v15190_v51  ;;  %v5337_v10 = vadd.f32 %v5336_v54, %v5268_v44  ;;  %v15233_v46 = vld [vmem:[#allocation196_spill] sm:$0xff] }
 0x4cf   :  { %6419 = vmatpush.msra.mxu3 %v15188_v32  ;;  %6374 = vmatpush.msra.mxu2 %v15220_v31  ;;  %v15225_v32 = vld [vmem:[#allocation134_spill] sm:$0xff]  ;;  %v15235_v31 = vld [vmem:[#allocation204_spill] sm:$0xff]  ;;  %v5569_v44 = vpop.f32.mrf.mxu0 }
 0x4d0   :  { %6475 = vmatpush.msrb.mxu1 %v15218_v19  ;;  %6268 = vmatpush.msra.mxu0 %v15219_v39  ;;  %v5374_v42 = vadd.f32 %v5373_v21, %v5337_v10  ;;  %v15234_v39 = vld [vmem:[#allocation200_spill] sm:$0xff]  ;;  %v15241_v21 = vld [vmem:[#allocation227_spill] sm:$0xff] }
 0x4d1   :  { %6421 = vmatpush.msra.mxu3 %v15189_v18  ;;  %6378 = vmatpush.msra.mxu2 %v15223_v26  ;;  %v15230_v18 = vld [vmem:[#allocation184_spill] sm:$0xff]  ;;  %v15237_v26 = vld [vmem:[#allocation215_spill] sm:$0xff] }
 0x4d2   :  { %6481 = vmatpush.msrb.mxu1 %v15221_v37  ;;  %6271 = vmatpush.msra.mxu0 %v15222_v17  ;;  %v5415_v34 = vadd.f32 %v5414_v2, %v5374_v42  ;;  %v15236_v17 = vld [vmem:[#allocation210_spill] sm:$0xff]  ;;  %v15242_v2 = vld [vmem:[#allocation181_spill] sm:$0xff]  ;;  %v15243_v42 = vld [vmem:[#allocation232_spill] sm:$0xff] }
 0x4d3   :  { %6423 = vmatpush.msra.mxu3 %v15190_v51  ;;  %6382 = vmatpush.msra.mxu2 %v15226_v14  ;;  %v15231_v51 = vld [vmem:[#allocation188_spill] sm:$0xff]  ;;  %v5515_v19 = vpop.f32.mrf.mxu3 }
 0x4d4   :  { %6487 = vmatpush.msrb.mxu1 %v15224_v43  ;;  %6274 = vmatpush.msra.mxu0 %v15225_v32  ;;  %v5516_v9 = vadd.f32 %v5515_v19, %v5415_v34  ;;  %v5608_v43 = vpop.f32.mrf.mxu1  ;;  %v15238_v32 = vld [vmem:[#allocation219_spill] sm:$0xff]  ;;  %v15245_v34 = vld [vmem:[#allocation189_spill] sm:$0xff] }
 0x4d5   :  { %6386 = vmatpush.msra.mxu2 %v15229_v25 }
 0x4d6   :  { %6493 = vmatpush.msrb.mxu1 %v15227_v29  ;;  %6277 = vmatpush.msra.mxu0 %v15228_v50  ;;  %v5570_v37 = vadd.f32 %v5569_v44, %v5516_v9  ;;  %v15239_v29 = vld [vmem:[#allocation223_spill] sm:$0xff]  ;;  %v15247_v9 = vld [vmem:[#allocation197_spill] sm:$0xff] }
 0x4d8   :  { %6430 = vmatpush.msrb.mxu0 %v14738_v61  ;;  %6499 = vmatpush.msrb.mxu1 %v15230_v18  ;;  %v5609_v54 = vadd.f32 %v5608_v43, %v5570_v37  ;;  %v15240_v18 = vld [vmem:[#allocation177_spill] sm:$0xff] }
 0x4d9   :  { %v15248_v43 = vld [vmem:[#allocation149_spill] sm:$0xff] }
 0x4da   :  { %6432 = vmatpush.msrb.mxu0 %v14740_v57  ;;  %6505 = vmatpush.msrb.mxu1 %v15231_v51  ;;  %v15244_v51 = vld [vmem:[#allocation185_spill] sm:$0xff] }
 0x4dc   :  { %6434 = vmatpush.msrb.mxu0 %v14742_v23  ;;  %6511 = vmatpush.msrb.mxu1 %v15232_v0 }
 0x4de   :  { %6436 = vmatpush.msrb.mxu0 %v14744_v1  ;;  %6517 = vmatpush.msrb.mxu1 %v15233_v46  ;;  %v15246_v46 = vld [vmem:[#allocation192_spill] sm:$0xff] }
 0x4df   :  { %v5714_v50 = vpop.f32.mrf.mxu3 }
 0x4e0   :  { %6438 = vmatpush.msrb.mxu0 %v14746_v45  ;;  %6523 = vmatpush.msrb.mxu1 %v15234_v39 }
 0x4e2   :  { %6440 = vmatpush.msrb.mxu0 %v14748_v48  ;;  %6529 = vmatpush.msrb.mxu1 %v15235_v31 }
 0x4e4   :  { %6442 = vmatpush.msrb.mxu0 %v14750_v56  ;;  %6535 = vmatpush.msrb.mxu1 %v15236_v17 }
 0x4e6   :  { %6444 = vmatpush.msrb.mxu0 %v14752_v27  ;;  %6541 = vmatpush.msrb.mxu1 %v15237_v26 }
 0x4e8   :  { %6446 = vmatpush.msrb.mxu0 %v14754_v49  ;;  %6547 = vmatpush.msrb.mxu1 %v15238_v32  ;;  %v5677_v14 = vpop.f32.mrf.mxu2  ;;  %v15249_v32 = vld [vmem:[#allocation150_spill] sm:$0xff] }
 0x4e9   :  { %v5678_v10 = vadd.f32 %v5677_v14, %v5609_v54 }
 0x4ea   :  { %6448 = vmatpush.msrb.mxu0 %v14756_v15  ;;  %6553 = vmatpush.msrb.mxu1 %v15239_v29  ;;  %v15250_v29 = vld [vmem:[#allocation151_spill] sm:$0xff] }
 0x4eb   :  { %v5715_v25 = vadd.f32 %v5714_v50, %v5678_v10 }
 0x4ec   :  { %6450 = vmatpush.msrb.mxu0 %v15240_v18  ;;  %6559 = vmatpush.msrb.mxu1 %v15241_v21 }
 0x4ed   :  { %8541 = vrsqrt.f32 %v5715_v25  ;;  %vm5733_vm10 = vweird.f32 %v5715_v25 }
 0x4ee   :  { %6452 = vmatpush.msrb.mxu0 %v15242_v2  ;;  %6565 = vmatpush.msrb.mxu1 %v15243_v42  ;;  %v15251_v42 = vld [vmem:[#allocation156_spill] sm:$0xff] }
 0x4f0   :  { %6454 = vmatpush.msrb.mxu0 %v15244_v51 }
 0x4f2   :  { %6456 = vmatpush.msrb.mxu0 %v15245_v34 }
 0x4f3   :  { %v8542_v0 = vpop.eup %8541 }
 0x4f4   :  { %6458 = vmatpush.msrb.mxu0 %v15246_v46  ;;  %v5728_v19 = vmul.f32 %v8542_v0, %v5715_v25  ;;  %vm5734_vm9 = vweird.f32 %v8542_v0 }
 0x4f5   :  { %vm5735_vm11 = vmor %vm5733_vm10, %vm5734_vm9 }
 0x4f6   :  { %6460 = vmatpush.msrb.mxu0 %v15247_v9  ;;  %v5729_v39 = vmul.f32 %v8542_v0, %v5728_v19  ;;  %v15252_v19 = vld [vmem:[#allocation159_spill] sm:$0xff] }
 0x4f8   :  { %v5730_v31 = vmul.f32 0.5, %v5729_v39 }
 0x4fa   :  { %v5731_v44 = vsub.f32 1.5, %v5730_v31  ;;  %v15253_v31 = vld [vmem:[#allocation162_spill] sm:$0xff] }
 0x4fc   :  { %v5732_v37 = vmul.f32 %v8542_v0, %v5731_v44  ;;  %v15254_v44 = vld [vmem:[#allocation152_spill] sm:$0xff] }
 0x4fe   :  { %v5736_v17 = vsel %vm5735_vm11, %v8542_v0, %v5732_v37  ;;  %v15255_v37 = vld [vmem:[#allocation165_spill] sm:$0xff] }
 0x4ff   :  { %v5738_v26 = vmul.f32 %v5736_v17, %v11849_v22  ;;  %v15257_v17 = vld [vmem:[#allocation169_spill] sm:$0xff] }
 0x501   :  { %v5740_v54 = vmul.f32 %v5738_v26, %v15248_v43  ;;  %v15259_v26 = vld [vmem:[#allocation173_spill] sm:$0xff] }
 0x503   :  { %v5742_v14 = vadd.f32 %v5740_v54, %v15249_v32  ;;  %v15263_v54 = vld [vmem:[#allocation182_spill] sm:$0xff] }
 0x505   :  { %v5744_v10 = vmax.f32 %v5742_v14, 0.0  ;;  %v15264_v14 = vld [vmem:[#allocation166_spill] sm:$0xff] }
 0x507   :  { %v12297_v50 = vadd.f32 %v5744_v10, %v15250_v29  ;;  %v15266_v10 = vld [vmem:[#allocation170_spill] sm:$0xff] }
 0x508   :  { %v15268_v29 = vld [vmem:[#allocation174_spill] sm:$0xff] }
 0x509   :  { %v12300_v21 = vand.u32 4294901760, %v12297_v50 }
 0x50b   :  { %6226 = vmatmul.f32.vlgmr.msrb.gmra.mxu3 %v12300_v21  ;;  %v12305_v25 = vsub.f32 %v12297_v50, %v12300_v21 }
 0x50c   :  { %6626 = vmatpush.msrb.mxu3 %v14738_v61 }
 0x50d   :  { %6280 = vmatmul.f32.vlgmr.msra.gmra.mxu0 %v12305_v25  ;;  %v12310_v22 = vand.u32 4294901760, %v12305_v25 }
 0x50e   :  { %6628 = vmatpush.msrb.mxu3 %v14740_v57  ;;  %6667 = vmatpush.msra.mxu0 %v15251_v42  ;;  %v15270_v42 = vld [vmem:[#allocation175_spill] sm:$0xff] }
 0x50f   :  { %6319 = vmatmul.f32.vlgmr.msra.gmra.mxu1 %v12310_v22  ;;  %v6123_v0 = vsub.f32 %v12305_v25, %v12310_v22 }
 0x510   :  { %6630 = vmatpush.msrb.mxu3 %v14742_v23  ;;  %6671 = vmatpush.msra.mxu0 %v15252_v19  ;;  %v15274_v19 = vld [vmem:[#allocation186_spill] sm:$0xff] }
 0x511   :  { %6734 = vmatpush.msra.mxu1 %v14738_v61  ;;  %v12320_v39 = vand.u32 4294901760, %v6123_v0  ;;  %v15256_v61 = vld [vmem:[#allocation154_spill] sm:$0xff]  ;;  %v15272_v0 = vld [vmem:[#allocation179_spill] sm:$0xff] }
 0x512   :  { %6632 = vmatpush.msrb.mxu3 %v14744_v1  ;;  %6675 = vmatpush.msra.mxu0 %v15253_v31  ;;  %v15276_v31 = vld [vmem:[#allocation190_spill] sm:$0xff] }
 0x513   :  { %6736 = vmatpush.msra.mxu1 %v14740_v57  ;;  %6125 = vmatmul.f32.vlgmr.msrb.gmra.mxu2 %v12320_v39  ;;  %v15258_v57 = vld [vmem:[#allocation157_spill] sm:$0xff] }
 0x514   :  { %6425 = vmatmul.f32.vlgmr.msra.gmra.mxu3 %v12300_v21  ;;  %6573 = vmatpush.msrb.mxu2 %v15254_v44  ;;  %v15278_v44 = vld [vmem:[#allocation194_spill] sm:$0xff] }
 0x515   :  { %6634 = vmatpush.msrb.mxu3 %v14746_v45  ;;  %6679 = vmatpush.msra.mxu0 %v15255_v37  ;;  %v15280_v37 = vld [vmem:[#allocation216_spill] sm:$0xff] }
 0x516   :  { %6738 = vmatpush.msra.mxu1 %v14742_v23  ;;  %6466 = vmatmul.f32.vlgmr.msrb.gmra.mxu0 %v12197_v59  ;;  %v15260_v23 = vld [vmem:[#allocation160_spill] sm:$0xff]  ;;  %v15261_v59 = vld [vmem:[#allocation178_spill] sm:$0xff] }
 0x517   :  { %6576 = vmatpush.msrb.mxu2 %v15256_v61  ;;  %6636 = vmatpush.msrb.mxu3 %v14748_v48  ;;  %v15282_v61 = vld [vmem:[#allocation205_spill] sm:$0xff] }
 0x518   :  { %6683 = vmatpush.msra.mxu0 %v15257_v17  ;;  %6740 = vmatpush.msra.mxu1 %v14744_v1  ;;  %v15262_v1 = vld [vmem:[#allocation163_spill] sm:$0xff] }
 0x519   :  { %6567 = vmatmul.f32.vlgmr.msrb.gmra.mxu1 %v12178_v12  ;;  %6579 = vmatpush.msrb.mxu2 %v15258_v57  ;;  %v15283_v17 = vld [vmem:[#allocation199_spill] sm:$0xff] }
 0x51a   :  { %6638 = vmatpush.msrb.mxu3 %v14750_v56  ;;  %6687 = vmatpush.msra.mxu0 %v15259_v26  ;;  %v15286_v57 = vld [vmem:[#allocation195_spill] sm:$0xff]  ;;  %v15287_v26 = vld [vmem:[#allocation202_spill] sm:$0xff] }
 0x51b   :  { %6742 = vmatpush.msra.mxu1 %v14746_v45  ;;  %6582 = vmatpush.msrb.mxu2 %v15260_v23  ;;  %v15265_v45 = vld [vmem:[#allocation183_spill] sm:$0xff]  ;;  %v15289_v23 = vld [vmem:[#allocation217_spill] sm:$0xff] }
 0x51c   :  { %6640 = vmatpush.msrb.mxu3 %v14752_v27  ;;  %6691 = vmatpush.msra.mxu0 %v15261_v59  ;;  %v15290_v59 = vld [vmem:[#allocation203_spill] sm:$0xff] }
 0x51d   :  { %6744 = vmatpush.msra.mxu1 %v14748_v48  ;;  %6388 = vmatmul.f32.vlgmr.msra.gmra.mxu2 %v12300_v21  ;;  %v15267_v48 = vld [vmem:[#allocation187_spill] sm:$0xff] }
 0x51e   :  { %6585 = vmatpush.msrb.mxu2 %v15262_v1  ;;  %6642 = vmatpush.msrb.mxu3 %v14754_v49  ;;  %v15291_v1 = vld [vmem:[#allocation207_spill] sm:$0xff] }
 0x51f   :  { %6695 = vmatpush.msra.mxu0 %v15263_v54  ;;  %6746 = vmatpush.msra.mxu1 %v14750_v56  ;;  %v15269_v56 = vld [vmem:[#allocation193_spill] sm:$0xff]  ;;  %v15292_v54 = vld [vmem:[#allocation247_spill] sm:$0xff] }
 0x520   :  { %6588 = vmatpush.msrb.mxu2 %v15264_v14  ;;  %6644 = vmatpush.msrb.mxu3 %v14756_v15  ;;  %v15295_v14 = vld [vmem:[#allocation251_spill] sm:$0xff] }
 0x521   :  { %6699 = vmatpush.msra.mxu0 %v15265_v45  ;;  %6748 = vmatpush.msra.mxu1 %v14752_v27  ;;  %v15271_v27 = vld [vmem:[#allocation198_spill] sm:$0xff] }
 0x522   :  { %6591 = vmatpush.msrb.mxu2 %v15266_v10  ;;  %6646 = vmatpush.msrb.mxu3 %v15240_v18  ;;  %v15296_v45 = vld [vmem:[#allocation222_spill] sm:$0xff]  ;;  %v15297_v10 = vld [vmem:[#allocation209_spill] sm:$0xff] }
 0x523   :  { %6703 = vmatpush.msra.mxu0 %v15267_v48  ;;  %6750 = vmatpush.msra.mxu1 %v14754_v49  ;;  %v15273_v49 = vld [vmem:[#allocation201_spill] sm:$0xff]  ;;  %v15298_v48 = vld [vmem:[#allocation255_spill] sm:$0xff] }
 0x524   :  { %6594 = vmatpush.msrb.mxu2 %v15268_v29  ;;  %6648 = vmatpush.msrb.mxu3 %v15242_v2  ;;  %v15299_v29 = vld [vmem:[#allocation228_spill] sm:$0xff] }
 0x525   :  { %6707 = vmatpush.msra.mxu0 %v15269_v56  ;;  %6752 = vmatpush.msra.mxu1 %v14756_v15  ;;  %v15275_v15 = vld [vmem:[#allocation206_spill] sm:$0xff]  ;;  %v15301_v56 = vld [vmem:[#allocation259_spill] sm:$0xff] }
 0x526   :  { %6597 = vmatpush.msrb.mxu2 %v15270_v42  ;;  %6650 = vmatpush.msrb.mxu3 %v15244_v51  ;;  %v15302_v42 = vld [vmem:[#allocation233_spill] sm:$0xff] }
 0x527   :  { %6711 = vmatpush.msra.mxu0 %v15271_v27  ;;  %6754 = vmatpush.msra.mxu1 %v15240_v18  ;;  %v15277_v18 = vld [vmem:[#allocation211_spill] sm:$0xff]  ;;  %v15303_v27 = vld [vmem:[#allocation221_spill] sm:$0xff] }
 0x528   :  { %6600 = vmatpush.msrb.mxu2 %v15272_v0  ;;  %6652 = vmatpush.msrb.mxu3 %v15245_v34  ;;  %v15304_v0 = vld [vmem:[#allocation263_spill] sm:$0xff] }
 0x529   :  { %6715 = vmatpush.msra.mxu0 %v15273_v49  ;;  %6756 = vmatpush.msra.mxu1 %v15242_v2  ;;  %v15279_v2 = vld [vmem:[#allocation230_spill] sm:$0xff]  ;;  %v15305_v49 = vld [vmem:[#allocation237_spill] sm:$0xff] }
 0x52a   :  { %6603 = vmatpush.msrb.mxu2 %v15274_v19  ;;  %6654 = vmatpush.msrb.mxu3 %v15246_v46  ;;  %v15306_v19 = vld [vmem:[#allocation225_spill] sm:$0xff] }
 0x52b   :  { %6719 = vmatpush.msra.mxu0 %v15275_v15  ;;  %6758 = vmatpush.msra.mxu1 %v15244_v51  ;;  %v15281_v51 = vld [vmem:[#allocation235_spill] sm:$0xff]  ;;  %v15307_v15 = vld [vmem:[#allocation266_spill] sm:$0xff] }
 0x52c   :  { %6606 = vmatpush.msrb.mxu2 %v15276_v31  ;;  %6656 = vmatpush.msrb.mxu3 %v15247_v9  ;;  %v15308_v31 = vld [vmem:[#allocation241_spill] sm:$0xff] }
 0x52d   :  { %6723 = vmatpush.msra.mxu0 %v15277_v18  ;;  %6760 = vmatpush.msra.mxu1 %v15245_v34  ;;  %v15285_v34 = vld [vmem:[#allocation212_spill] sm:$0xff]  ;;  %v15309_v18 = vld [vmem:[#allocation229_spill] sm:$0xff] }
 0x52e   :  { %6660 = vmatmul.f32.vlgmr.msrb.gmra.mxu3 %v12188_v13  ;;  %6609 = vmatpush.msrb.mxu2 %v15278_v44  ;;  %v15284_v13 = vld [vmem:[#allocation239_spill] sm:$0xff]  ;;  %v15310_v44 = vld [vmem:[#allocation269_spill] sm:$0xff] }
 0x52f   :  { %6816 = vmatpush.msra.mxu3 %v15279_v2  ;;  %6727 = vmatpush.msra.mxu0 %v15280_v37  ;;  %v15311_v2 = vld [vmem:[#allocation245_spill] sm:$0xff]  ;;  %v15312_v37 = vld [vmem:[#allocation234_spill] sm:$0xff] }
 0x530   :  { %6762 = vmatpush.msra.mxu1 %v15246_v46  ;;  %6729 = vmatmul.f32.vlgmr.msra.gmra.mxu0 %v12178_v12  ;;  %v15288_v46 = vld [vmem:[#allocation243_spill] sm:$0xff] }
 0x531   :  { %6822 = vmatpush.msra.mxu3 %v15281_v51  ;;  %6914 = vmatpush.msrb.mxu0 %v15282_v61  ;;  %v15313_v51 = vld [vmem:[#allocation271_spill] sm:$0xff]  ;;  %v15314_v61 = vld [vmem:[#allocation249_spill] sm:$0xff] }
 0x532   :  { %6612 = vmatpush.msrb.mxu2 %v15283_v17  ;;  %6764 = vmatpush.msra.mxu1 %v15247_v9  ;;  %v15294_v9 = vld [vmem:[#allocation208_spill] sm:$0xff]  ;;  %v15315_v17 = vld [vmem:[#allocation238_spill] sm:$0xff] }
 0x533   :  { %6766 = vmatmul.f32.vlgmr.msra.gmra.mxu1 %v12178_v12  ;;  %6828 = vmatpush.msra.mxu3 %v15284_v13  ;;  %v15293_v12 = vld [vmem:[#allocation218_spill] sm:$0xff]  ;;  %v15316_v13 = vld [vmem:[#allocation273_spill] sm:$0xff] }
 0x534   :  { %6917 = vmatpush.msrb.mxu0 %v15285_v34  ;;  %6967 = vmatpush.msrb.mxu1 %v15286_v57  ;;  %v15317_v34 = vld [vmem:[#allocation253_spill] sm:$0xff] }
 0x535   :  { %6615 = vmatpush.msrb.mxu2 %v15287_v26  ;;  %6834 = vmatpush.msra.mxu3 %v15288_v46  ;;  %v15318_v26 = vld [vmem:[#allocation242_spill] sm:$0xff] }
 0x536   :  { %6920 = vmatpush.msrb.mxu0 %v15289_v23  ;;  %6969 = vmatpush.msrb.mxu1 %v15290_v59  ;;  %v15319_v46 = vld [vmem:[#allocation274_spill] sm:$0xff]  ;;  %v15320_v23 = vld [vmem:[#allocation257_spill] sm:$0xff] }
 0x537   :  { %6618 = vmatpush.msrb.mxu2 %v15291_v1  ;;  %6840 = vmatpush.msra.mxu3 %v15292_v54  ;;  %v15321_v1 = vld [vmem:[#allocation246_spill] sm:$0xff]  ;;  %v15322_v54 = vld [vmem:[#allocation275_spill] sm:$0xff] }
 0x538   :  { %6621 = vmatmul.f32.vlgmr.msrb.gmra.mxu2 %v12183_v7  ;;  %6923 = vmatpush.msrb.mxu0 %v15293_v12  ;;  %v15300_v7 = vld [vmem:[#allocation214_spill] sm:$0xff]  ;;  %v15323_v12 = vld [vmem:[#allocation261_spill] sm:$0xff] }
 0x539   :  { %6771 = vmatpush.msra.mxu2 %v15286_v57  ;;  %6971 = vmatpush.msrb.mxu1 %v15294_v9 }
 0x53a   :  { %6846 = vmatpush.msra.mxu3 %v15295_v14  ;;  %6926 = vmatpush.msrb.mxu0 %v15296_v45  ;;  %v15324_v14 = vld [vmem:[#allocation250_spill] sm:$0xff]  ;;  %v15325_v45 = vld [vmem:[#allocation276_spill] sm:$0xff] }
 0x53b   :  { %6773 = vmatpush.msra.mxu2 %v15290_v59  ;;  %6973 = vmatpush.msrb.mxu1 %v15297_v10 }
 0x53c   :  { %6852 = vmatpush.msra.mxu3 %v15298_v48  ;;  %6929 = vmatpush.msrb.mxu0 %v15299_v29  ;;  %v15326_v48 = vld [vmem:[#allocation265_spill] sm:$0xff]  ;;  %v15327_v29 = vld [vmem:[#allocation254_spill] sm:$0xff] }
 0x53d   :  { %6775 = vmatpush.msra.mxu2 %v15294_v9  ;;  %6975 = vmatpush.msrb.mxu1 %v15300_v7 }
 0x53e   :  { %6858 = vmatpush.msra.mxu3 %v15301_v56  ;;  %6932 = vmatpush.msrb.mxu0 %v15302_v42  ;;  %v15328_v56 = vld [vmem:[#allocation268_spill] sm:$0xff]  ;;  %v15329_v42 = vld [vmem:[#allocation258_spill] sm:$0xff] }
 0x53f   :  { %6777 = vmatpush.msra.mxu2 %v15297_v10  ;;  %6977 = vmatpush.msrb.mxu1 %v15303_v27 }
 0x540   :  { %6864 = vmatpush.msra.mxu3 %v15304_v0  ;;  %6935 = vmatpush.msrb.mxu0 %v15305_v49  ;;  %v15330_v0 = vld [vmem:[#allocation262_spill] sm:$0xff]  ;;  %v15331_v49 = vld [vmem:[#allocation133_spill] sm:$0xff] }
 0x541   :  { %6779 = vmatpush.msra.mxu2 %v15300_v7  ;;  %6979 = vmatpush.msrb.mxu1 %v15306_v19 }
 0x542   :  { %6870 = vmatpush.msra.mxu3 %v15307_v15  ;;  %6938 = vmatpush.msrb.mxu0 %v15308_v31  ;;  %v15333_v15 = vld [vmem:[#allocation120_spill] sm:$0xff] }
 0x543   :  { %6781 = vmatpush.msra.mxu2 %v15303_v27  ;;  %6981 = vmatpush.msrb.mxu1 %v15309_v18  ;;  %v15338_v31 = vld [vmem:[#allocation220_spill] sm:$0xff] }
 0x544   :  { %6876 = vmatpush.msra.mxu3 %v15310_v44  ;;  %6941 = vmatpush.msrb.mxu0 %v15311_v2  ;;  %v15340_v44 = vld [vmem:[#allocation278_spill] sm:$0xff]  ;;  %v15341_v2 = vld [vmem:[#allocation224_spill] sm:$0xff] }
 0x545   :  { %6783 = vmatpush.msra.mxu2 %v15306_v19  ;;  %6983 = vmatpush.msrb.mxu1 %v15312_v37 }
 0x546   :  { %6882 = vmatpush.msra.mxu3 %v15313_v51  ;;  %6944 = vmatpush.msrb.mxu0 %v15314_v61  ;;  %v15344_v51 = vld [vmem:[#allocation226_spill] sm:$0xff]  ;;  %v15346_v61 = vld [vmem:[#allocation285_spill] sm:$0xff] }
 0x547   :  { %6785 = vmatpush.msra.mxu2 %v15309_v18  ;;  %6985 = vmatpush.msrb.mxu1 %v15315_v17 }
 0x548   :  { %6888 = vmatpush.msra.mxu3 %v15316_v13  ;;  %6947 = vmatpush.msrb.mxu0 %v15317_v34  ;;  %v15347_v13 = vld [vmem:[#allocation231_spill] sm:$0xff]  ;;  %v15349_v34 = vld [vmem:[#allocation286_spill] sm:$0xff] }
 0x549   :  { %6787 = vmatpush.msra.mxu2 %v15312_v37  ;;  %6987 = vmatpush.msrb.mxu1 %v15318_v26 }
 0x54a   :  { %6894 = vmatpush.msra.mxu3 %v15319_v46  ;;  %6950 = vmatpush.msrb.mxu0 %v15320_v23  ;;  %v15350_v46 = vld [vmem:[#allocation236_spill] sm:$0xff] }
 0x54b   :  { %6789 = vmatpush.msra.mxu2 %v15315_v17  ;;  %6989 = vmatpush.msrb.mxu1 %v15321_v1  ;;  %v15352_v23 = vld [vmem:[#allocation288_spill] sm:$0xff] }
 0x54c   :  { %6900 = vmatpush.msra.mxu3 %v15322_v54  ;;  %6953 = vmatpush.msrb.mxu0 %v15323_v12  ;;  %v15353_v54 = vld [vmem:[#allocation240_spill] sm:$0xff]  ;;  %v15355_v12 = vld [vmem:[#allocation294_spill] sm:$0xff] }
 0x54d   :  { %6791 = vmatpush.msra.mxu2 %v15318_v26  ;;  %6991 = vmatpush.msrb.mxu1 %v15324_v14 }
 0x54e   :  { %6906 = vmatpush.msra.mxu3 %v15325_v45  ;;  %6956 = vmatpush.msrb.mxu0 %v15326_v48  ;;  %v15356_v45 = vld [vmem:[#allocation244_spill] sm:$0xff] }
 0x54f   :  { %6793 = vmatpush.msra.mxu2 %v15321_v1  ;;  %6993 = vmatpush.msrb.mxu1 %v15327_v29  ;;  %v15358_v48 = vld [vmem:[#allocation296_spill] sm:$0xff] }
 0x550   :  { %6908 = vmatmul.f32.vlgmr.msra.gmra.mxu3 %v12300_v21  ;;  %6959 = vmatpush.msrb.mxu0 %v15328_v56  ;;  %v15359_v56 = vld [vmem:[#allocation248_spill] sm:$0xff] }
 0x551   :  { %7075 = vmatpush.msrb.mxu3 %v15286_v57  ;;  %6795 = vmatpush.msra.mxu2 %v15324_v14  ;;  %v15332_v57 = vld [vmem:[#allocation292_spill] sm:$0xff] }
 0x552   :  { %6995 = vmatpush.msrb.mxu1 %v15329_v42  ;;  %6962 = vmatmul.f32.vlgmr.msrb.gmra.mxu0 %v12305_v25  ;;  %v15334_v25 = vld [vmem:[#allocation297_spill] sm:$0xff] }
 0x553   :  { %7077 = vmatpush.msrb.mxu3 %v15290_v59  ;;  %6797 = vmatpush.msra.mxu2 %v15327_v29  ;;  %v15335_v59 = vld [vmem:[#allocation213_spill] sm:$0xff] }
 0x554   :  { %6997 = vmatpush.msrb.mxu1 %v15330_v0  ;;  %7114 = vmatpush.msra.mxu0 %v15331_v49 }
 0x555   :  { %7001 = vmatmul.f32.vlgmr.msrb.gmra.mxu1 %v12310_v22  ;;  %7079 = vmatpush.msrb.mxu3 %v15294_v9  ;;  %v15336_v22 = vld [vmem:[#allocation299_spill] sm:$0xff]  ;;  %v15337_v9 = vld [vmem:[#allocation142_spill] sm:$0xff] }
 0x556   :  { %6799 = vmatpush.msra.mxu2 %v15329_v42  ;;  %7159 = vmatpush.msra.mxu1 %v15332_v57  ;;  %v15361_v57 = vld [vmem:[#allocation301_spill] sm:$0xff] }
 0x557   :  { %7081 = vmatpush.msrb.mxu3 %v15297_v10  ;;  %7116 = vmatpush.msra.mxu0 %v15333_v15  ;;  %v15339_v10 = vld [vmem:[#allocation304_spill] sm:$0xff] }
 0x558   :  { %6801 = vmatpush.msra.mxu2 %v15330_v0  ;;  %7165 = vmatpush.msra.mxu1 %v15334_v25  ;;  %v15362_v25 = vld [vmem:[#allocation252_spill] sm:$0xff] }
 0x559   :  { %6807 = vmatmul.f32.vlgmr.msra.gmra.mxu2 %v12320_v39  ;;  %7083 = vmatpush.msrb.mxu3 %v15300_v7  ;;  %v15342_v39 = vld [vmem:[#allocation306_spill] sm:$0xff]  ;;  %v15343_v7 = vld [vmem:[#allocation281_spill] sm:$0xff] }
 0x55a   :  { %7008 = vmatpush.msrb.mxu2 %v15335_v59  ;;  %7171 = vmatpush.msra.mxu1 %v15336_v22  ;;  %v15364_v59 = vld [vmem:[#allocation305_spill] sm:$0xff]  ;;  %v15365_v22 = vld [vmem:[#allocation256_spill] sm:$0xff] }
 0x55b   :  { %7085 = vmatpush.msrb.mxu3 %v15303_v27  ;;  %7118 = vmatpush.msra.mxu0 %v15337_v9  ;;  %v15345_v27 = vld [vmem:[#allocation311_spill] sm:$0xff] }
 0x55c   :  { %7012 = vmatpush.msrb.mxu2 %v15338_v31  ;;  %7177 = vmatpush.msra.mxu1 %v15339_v10  ;;  %v15367_v31 = vld [vmem:[#allocation309_spill] sm:$0xff]  ;;  %v15368_v10 = vld [vmem:[#allocation260_spill] sm:$0xff] }
 0x55d   :  { %7087 = vmatpush.msrb.mxu3 %v15306_v19  ;;  %7120 = vmatpush.msra.mxu0 %v15340_v44  ;;  %v15348_v19 = vld [vmem:[#allocation314_spill] sm:$0xff] }
 0x55e   :  { %7016 = vmatpush.msrb.mxu2 %v15341_v2  ;;  %7183 = vmatpush.msra.mxu1 %v15342_v39  ;;  %v15370_v2 = vld [vmem:[#allocation264_spill] sm:$0xff]  ;;  %v15372_v39 = vld [vmem:[#allocation334_spill] sm:$0xff] }
 0x55f   :  { %7089 = vmatpush.msrb.mxu3 %v15309_v18  ;;  %7122 = vmatpush.msra.mxu0 %v15343_v7  ;;  %v15351_v18 = vld [vmem:[#allocation318_spill] sm:$0xff] }
 0x560   :  { %7020 = vmatpush.msrb.mxu2 %v15344_v51  ;;  %7189 = vmatpush.msra.mxu1 %v15345_v27  ;;  %v15373_v51 = vld [vmem:[#allocation267_spill] sm:$0xff] }
 0x561   :  { %7091 = vmatpush.msrb.mxu3 %v15312_v37  ;;  %7124 = vmatpush.msra.mxu0 %v15346_v61  ;;  %v15354_v37 = vld [vmem:[#allocation322_spill] sm:$0xff]  ;;  %v15375_v27 = vld [vmem:[#allocation335_spill] sm:$0xff] }
 0x562   :  { %7024 = vmatpush.msrb.mxu2 %v15347_v13  ;;  %7195 = vmatpush.msra.mxu1 %v15348_v19  ;;  %v15376_v13 = vld [vmem:[#allocation270_spill] sm:$0xff]  ;;  %v15377_v19 = vld [vmem:[#allocation321_spill] sm:$0xff] }
 0x563   :  { %7093 = vmatpush.msrb.mxu3 %v15315_v17  ;;  %7126 = vmatpush.msra.mxu0 %v15349_v34  ;;  %v15357_v17 = vld [vmem:[#allocation325_spill] sm:$0xff] }
 0x564   :  { %7028 = vmatpush.msrb.mxu2 %v15350_v46  ;;  %7201 = vmatpush.msra.mxu1 %v15351_v18  ;;  %v15378_v46 = vld [vmem:[#allocation272_spill] sm:$0xff] }
 0x565   :  { %7095 = vmatpush.msrb.mxu3 %v15318_v26  ;;  %7128 = vmatpush.msra.mxu0 %v15352_v23  ;;  %v15360_v26 = vld [vmem:[#allocation328_spill] sm:$0xff] }
 0x566   :  { %7032 = vmatpush.msrb.mxu2 %v15353_v54  ;;  %7207 = vmatpush.msra.mxu1 %v15354_v37  ;;  %v15379_v18 = vld [vmem:[#allocation148_spill] sm:$0xff]  ;;  %v15380_v54 = vld [vmem:[#allocation279_spill] sm:$0xff] }
 0x567   :  { %7097 = vmatpush.msrb.mxu3 %v15321_v1  ;;  %7130 = vmatpush.msra.mxu0 %v15355_v12  ;;  %v15363_v1 = vld [vmem:[#allocation330_spill] sm:$0xff]  ;;  %v15382_v37 = vld [vmem:[#allocation283_spill] sm:$0xff] }
 0x568   :  { %7036 = vmatpush.msrb.mxu2 %v15356_v45  ;;  %7213 = vmatpush.msra.mxu1 %v15357_v17  ;;  %v15385_v45 = vld [vmem:[#allocation284_spill] sm:$0xff]  ;;  %v15386_v17 = vld [vmem:[#allocation282_spill] sm:$0xff] }
 0x569   :  { %7099 = vmatpush.msrb.mxu3 %v15324_v14  ;;  %7132 = vmatpush.msra.mxu0 %v15358_v48  ;;  %v15366_v14 = vld [vmem:[#allocation332_spill] sm:$0xff] }
 0x56a   :  { %7040 = vmatpush.msrb.mxu2 %v15359_v56  ;;  %7219 = vmatpush.msra.mxu1 %v15360_v26  ;;  %v15388_v26 = vld [vmem:[#allocation287_spill] sm:$0xff] }
 0x56b   :  { %7101 = vmatpush.msrb.mxu3 %v15327_v29  ;;  %7134 = vmatpush.msra.mxu0 %v15361_v57  ;;  %v15369_v29 = vld [vmem:[#allocation333_spill] sm:$0xff] }
 0x56c   :  { %7044 = vmatpush.msrb.mxu2 %v15362_v25  ;;  %7225 = vmatpush.msra.mxu1 %v15363_v1  ;;  %v5886_v25 = vpop.f32.mrf.mxu1  ;;  %v15390_v1 = vld [vmem:[#allocation290_spill] sm:$0xff] }
 0x56d   :  { %7103 = vmatpush.msrb.mxu3 %v15329_v42  ;;  %7136 = vmatpush.msra.mxu0 %v15364_v59  ;;  %v15371_v42 = vld [vmem:[#allocation313_spill] sm:$0xff] }
 0x56e   :  { %7048 = vmatpush.msrb.mxu2 %v15365_v22  ;;  %7231 = vmatpush.msra.mxu1 %v15366_v14  ;;  %v15391_v22 = vld [vmem:[#allocation298_spill] sm:$0xff]  ;;  %v15392_v14 = vld [vmem:[#allocation291_spill] sm:$0xff] }
 0x56f   :  { %7105 = vmatpush.msrb.mxu3 %v15330_v0  ;;  %7138 = vmatpush.msra.mxu0 %v15367_v31  ;;  %v15374_v0 = vld [vmem:[#allocation317_spill] sm:$0xff] }
 0x570   :  { %7052 = vmatpush.msrb.mxu2 %v15368_v10  ;;  %7107 = vmatmul.f32.vlgmr.msrb.gmra.mxu3 %v12300_v21  ;;  %v5940_v10 = vpop.f32.mrf.mxu2 }
 0x571   :  { %7237 = vmatpush.msra.mxu1 %v15369_v29  ;;  %7310 = vmatpush.msra.mxu3 %v15331_v49  ;;  %v15394_v29 = vld [vmem:[#allocation295_spill] sm:$0xff] }
 0x572   :  { %7056 = vmatpush.msrb.mxu2 %v15370_v2  ;;  %7140 = vmatpush.msra.mxu0 %v15371_v42 }
 0x573   :  { %7243 = vmatpush.msra.mxu1 %v15372_v39  ;;  %7312 = vmatpush.msra.mxu3 %v15333_v15  ;;  %v15396_v39 = vld [vmem:[#allocation300_spill] sm:$0xff] }
 0x574   :  { %7060 = vmatpush.msrb.mxu2 %v15373_v51  ;;  %7142 = vmatpush.msra.mxu0 %v15374_v0  ;;  %v5979_v51 = vpop.f32.mrf.mxu3 }
 0x575   :  { %7249 = vmatpush.msra.mxu1 %v15375_v27  ;;  %7314 = vmatpush.msra.mxu3 %v15337_v9  ;;  %v15398_v27 = vld [vmem:[#allocation303_spill] sm:$0xff] }
 0x576   :  { %7064 = vmatpush.msrb.mxu2 %v15376_v13  ;;  %7144 = vmatpush.msra.mxu0 %v15377_v19 }
 0x577   :  { %7418 = vmatpush.msrb.mxu1 %v15331_v49  ;;  %7316 = vmatpush.msra.mxu3 %v15340_v44  ;;  %v15381_v49 = vld [vmem:[#allocation277_spill] sm:$0xff] }
 0x578   :  { %7068 = vmatpush.msrb.mxu2 %v15378_v46  ;;  %7351 = vmatpush.msrb.mxu0 %v15380_v54  ;;  %v15402_v54 = vld [vmem:[#allocation312_spill] sm:$0xff] }
 0x579   :  { %7420 = vmatpush.msrb.mxu1 %v15333_v15  ;;  %7070 = vmatmul.f32.vlgmr.msrb.gmra.mxu2 %v12300_v21  ;;  %v5785_v15 = vpop.f32.mrf.mxu0  ;;  %v15383_v21 = vld [vmem:[#allocation280_spill] sm:$0xff] }
 0x57a   :  { %7318 = vmatpush.msra.mxu3 %v15343_v7  ;;  %7257 = vmatpush.msra.mxu2 %v15379_v18  ;;  %v5786_v56 = vadd.f32 %v5785_v15, %v15386_v17  ;;  %v15400_v18 = vld [vmem:[#allocation308_spill] sm:$0xff] }
 0x57b   :  { %7422 = vmatpush.msrb.mxu1 %v15337_v9  ;;  %7355 = vmatpush.msrb.mxu0 %v15382_v37  ;;  %v15384_v9 = vld [vmem:[#allocation144_spill] sm:$0xff]  ;;  %v15404_v37 = vld [vmem:[#allocation355_spill] sm:$0xff] }
 0x57c   :  { %7320 = vmatpush.msra.mxu3 %v15346_v61  ;;  %7260 = vmatpush.msra.mxu2 %v15381_v49  ;;  %v15405_v15 = vld [vmem:[#allocation316_spill] sm:$0xff] }
 0x57d   :  { %7424 = vmatpush.msrb.mxu1 %v15340_v44  ;;  %7359 = vmatpush.msrb.mxu0 %v15384_v9  ;;  %v15387_v44 = vld [vmem:[#allocation289_spill] sm:$0xff]  ;;  %v6085_v9 = vpop.f32.mrf.mxu1 }
 0x57e   :  { %7322 = vmatpush.msra.mxu3 %v15349_v34  ;;  %7263 = vmatpush.msra.mxu2 %v15383_v21  ;;  %v15406_v21 = vld [vmem:[#allocation323_spill] sm:$0xff] }
 0x57f   :  { %7426 = vmatpush.msrb.mxu1 %v15343_v7  ;;  %7363 = vmatpush.msrb.mxu0 %v15387_v44  ;;  %v15389_v7 = vld [vmem:[#allocation293_spill] sm:$0xff] }
 0x580   :  { %7324 = vmatpush.msra.mxu3 %v15352_v23  ;;  %7266 = vmatpush.msra.mxu2 %v15385_v45  ;;  %v15408_v45 = vld [vmem:[#allocation320_spill] sm:$0xff] }
 0x581   :  { %7428 = vmatpush.msrb.mxu1 %v15346_v61  ;;  %7367 = vmatpush.msrb.mxu0 %v15389_v7  ;;  %v5887_v61 = vadd.f32 %v5886_v25, %v5786_v56  ;;  %v6048_v46 = vpop.f32.mrf.mxu0  ;;  %v15410_v56 = vld [vmem:[#allocation361_spill] sm:$0xff] }
 0x582   :  { %7326 = vmatpush.msra.mxu3 %v15355_v12  ;;  %7269 = vmatpush.msra.mxu2 %v15388_v26  ;;  %v15411_v26 = vld [vmem:[#allocation324_spill] sm:$0xff]  ;;  %v15412_v25 = vld [vmem:[#allocation329_spill] sm:$0xff] }
 0x583   :  { %7430 = vmatpush.msrb.mxu1 %v15349_v34  ;;  %7371 = vmatpush.msrb.mxu0 %v15391_v22  ;;  %v15393_v34 = vld [vmem:[#allocation147_spill] sm:$0xff]  ;;  %v5941_v2 = vadd.f32 %v5940_v10, %v5887_v61  ;;  %v15417_v10 = vld [vmem:[#allocation368_spill] sm:$0xff] }
 0x584   :  { %7328 = vmatpush.msra.mxu3 %v15358_v48  ;;  %7272 = vmatpush.msra.mxu2 %v15390_v1  ;;  %v15414_v61 = vld [vmem:[#allocation327_spill] sm:$0xff] }
 0x585   :  { %7432 = vmatpush.msrb.mxu1 %v15352_v23  ;;  %7375 = vmatpush.msrb.mxu0 %v15393_v34  ;;  %v15395_v23 = vld [vmem:[#allocation302_spill] sm:$0xff]  ;;  %v5980_v13 = vadd.f32 %v5979_v51, %v5941_v2  ;;  %v15420_v51 = vld [vmem:[#allocation339_spill] sm:$0xff] }
 0x586   :  { %7330 = vmatpush.msra.mxu3 %v15361_v57  ;;  %7275 = vmatpush.msra.mxu2 %v15392_v14  ;;  %v15415_v14 = vld [vmem:[#allocation331_spill] sm:$0xff]  ;;  %v15418_v2 = vld [vmem:[#allocation338_spill] sm:$0xff] }
 0x587   :  { %7434 = vmatpush.msrb.mxu1 %v15355_v12  ;;  %7379 = vmatpush.msrb.mxu0 %v15395_v23  ;;  %v15397_v12 = vld [vmem:[#allocation307_spill] sm:$0xff]  ;;  %v6049_v49 = vadd.f32 %v6048_v46, %v5980_v13  ;;  %v15422_v13 = vld [vmem:[#allocation340_spill] sm:$0xff]  ;;  %v15423_v46 = vld [vmem:[#allocation373_spill] sm:$0xff] }
 0x588   :  { %7332 = vmatpush.msra.mxu3 %v15364_v59  ;;  %7278 = vmatpush.msra.mxu2 %v15394_v29 }
 0x589   :  { %7436 = vmatpush.msrb.mxu1 %v15358_v48  ;;  %7383 = vmatpush.msrb.mxu0 %v15397_v12  ;;  %v15399_v48 = vld [vmem:[#allocation310_spill] sm:$0xff]  ;;  %v6086_v17 = vadd.f32 %v6085_v9, %v6049_v49  ;;  %v15425_v49 = vld [vmem:[#allocation376_spill] sm:$0xff]  ;;  %v15429_v9 = vld [vmem:[#allocation387_spill] sm:$0xff] }
 0x58a   :  { %7334 = vmatpush.msra.mxu3 %v15367_v31  ;;  %7281 = vmatpush.msra.mxu2 %v15396_v39  ;;  %v6281_v34 = vpop.f32.mrf.mxu0  ;;  %v15419_v39 = vld [vmem:[#allocation370_spill] sm:$0xff] }
 0x58b   :  { %7438 = vmatpush.msrb.mxu1 %v15361_v57  ;;  %7387 = vmatpush.msrb.mxu0 %v15399_v48  ;;  %v15401_v57 = vld [vmem:[#allocation315_spill] sm:$0xff] }
 0x58c   :  { %7336 = vmatpush.msra.mxu3 %v15371_v42  ;;  %7284 = vmatpush.msra.mxu2 %v15398_v27  ;;  %v6320_v23 = vpop.f32.mrf.mxu1  ;;  %v15421_v27 = vld [vmem:[#allocation371_spill] sm:$0xff] }
 0x58d   :  { %7440 = vmatpush.msrb.mxu1 %v15364_v59  ;;  %7391 = vmatpush.msrb.mxu0 %v15401_v57  ;;  %v15403_v59 = vld [vmem:[#allocation319_spill] sm:$0xff]  ;;  %v15424_v57 = vld [vmem:[#allocation345_spill] sm:$0xff] }
 0x58e   :  { %7338 = vmatpush.msra.mxu3 %v15374_v0  ;;  %7287 = vmatpush.msra.mxu2 %v15400_v18  ;;  %v6227_v1 = vpop.f32.mrf.mxu3 }
 0x58f   :  { %7442 = vmatpush.msrb.mxu1 %v15367_v31  ;;  %7395 = vmatpush.msrb.mxu0 %v15403_v59  ;;  %v15407_v31 = vld [vmem:[#allocation356_spill] sm:$0xff] }
 0x590   :  { %7340 = vmatpush.msra.mxu3 %v15377_v19  ;;  %7290 = vmatpush.msra.mxu2 %v15402_v54 }
 0x591   :  { %7444 = vmatpush.msrb.mxu1 %v15371_v42  ;;  %7399 = vmatpush.msrb.mxu0 %v15406_v21  ;;  %v15409_v42 = vld [vmem:[#allocation326_spill] sm:$0xff] }
 0x592   :  { %7500 = vmatpush.msrb.mxu3 %v15404_v37  ;;  %7293 = vmatpush.msra.mxu2 %v15405_v15  ;;  %v15426_v37 = vld [vmem:[#allocation352_spill] sm:$0xff]  ;;  %v15427_v15 = vld [vmem:[#allocation383_spill] sm:$0xff] }
 0x593   :  { %7446 = vmatpush.msrb.mxu1 %v15374_v0  ;;  %7403 = vmatpush.msrb.mxu0 %v15409_v42  ;;  %v15413_v0 = vld [vmem:[#allocation365_spill] sm:$0xff]  ;;  %v15431_v42 = vld [vmem:[#allocation391_spill] sm:$0xff] }
 0x594   :  { %7506 = vmatpush.msrb.mxu3 %v15407_v31  ;;  %7296 = vmatpush.msra.mxu2 %v15408_v45  ;;  %v15428_v31 = vld [vmem:[#allocation357_spill] sm:$0xff] }
 0x595   :  { %7448 = vmatpush.msrb.mxu1 %v15377_v19  ;;  %7407 = vmatpush.msrb.mxu0 %v15412_v25  ;;  %v15416_v19 = vld [vmem:[#allocation337_spill] sm:$0xff]  ;;  %v15434_v25 = vld [vmem:[#allocation372_spill] sm:$0xff] }
 0x596   :  { %7512 = vmatpush.msrb.mxu3 %v15410_v56  ;;  %v6126_v44 = vpop.f32.mrf.mxu2  ;;  %7299 = vmatpush.msra.mxu2 %v15411_v26  ;;  %v15433_v26 = vld [vmem:[#allocation395_spill] sm:$0xff] }
 0x597   :  { %v6127_v7 = vadd.f32 %v6126_v44, %v6086_v17  ;;  %7411 = vmatpush.msrb.mxu0 %v15415_v14  ;;  %v6426_v54 = vpop.f32.mrf.mxu3  ;;  %v15430_v17 = vld [vmem:[#allocation360_spill] sm:$0xff]  ;;  %v15432_v44 = vld [vmem:[#allocation362_spill] sm:$0xff] }
 0x598   :  { %7518 = vmatpush.msrb.mxu3 %v15413_v0  ;;  %7302 = vmatpush.msra.mxu2 %v15414_v61  ;;  %v15437_v14 = vld [vmem:[#allocation400_spill] sm:$0xff] }
 0x599   :  { %v6228_v22 = vadd.f32 %v6227_v1, %v6127_v7  ;;  %v15435_v1 = vld [vmem:[#allocation399_spill] sm:$0xff] }
 0x59a   :  { %7455 = vmatpush.msrb.mxu2 %v15416_v19  ;;  %7524 = vmatpush.msrb.mxu3 %v15417_v10  ;;  %v15439_v10 = vld [vmem:[#allocation379_spill] sm:$0xff] }
 0x59b   :  { %v6282_v29 = vadd.f32 %v6281_v34, %v6228_v22  ;;  %v15436_v22 = vld [vmem:[#allocation375_spill] sm:$0xff]  ;;  %v15438_v34 = vld [vmem:[#allocation341_spill] sm:$0xff] }
 0x59c   :  { %7457 = vmatpush.msrb.mxu2 %v15418_v2  ;;  %7530 = vmatpush.msrb.mxu3 %v15419_v39  ;;  %v15442_v39 = vld [vmem:[#allocation382_spill] sm:$0xff] }
 0x59d   :  { %v6321_v12 = vadd.f32 %v6320_v23, %v6282_v29  ;;  %v15440_v29 = vld [vmem:[#allocation401_spill] sm:$0xff]  ;;  %v15441_v23 = vld [vmem:[#allocation342_spill] sm:$0xff] }
 0x59e   :  { %7459 = vmatpush.msrb.mxu2 %v15420_v51  ;;  %7536 = vmatpush.msrb.mxu3 %v15421_v27  ;;  %v15444_v27 = vld [vmem:[#allocation386_spill] sm:$0xff] }
 0x5a0   :  { %7461 = vmatpush.msrb.mxu2 %v15422_v13  ;;  %v6389_v48 = vpop.f32.mrf.mxu2  ;;  %7542 = vmatpush.msrb.mxu3 %v15423_v46  ;;  %v15446_v46 = vld [vmem:[#allocation351_spill] sm:$0xff] }
 0x5a1   :  { %v6390_v18 = vadd.f32 %v6389_v48, %v6321_v12  ;;  %v15443_v12 = vld [vmem:[#allocation343_spill] sm:$0xff]  ;;  %v15445_v48 = vld [vmem:[#allocation344_spill] sm:$0xff] }
 0x5a2   :  { %7463 = vmatpush.msrb.mxu2 %v15424_v57  ;;  %7548 = vmatpush.msrb.mxu3 %v15425_v49  ;;  %v15452_v49 = vld [vmem:[#allocation364_spill] sm:$0xff] }
 0x5a3   :  { %v12602_v59 = vadd.f32 %v6426_v54, %v6390_v18  ;;  %v15448_v18 = vld [vmem:[#allocation354_spill] sm:$0xff]  ;;  %v15450_v54 = vld [vmem:[#allocation359_spill] sm:$0xff] }
 0x5a4   :  { %7465 = vmatpush.msrb.mxu2 %v15426_v37  ;;  %7554 = vmatpush.msrb.mxu3 %v15427_v15  ;;  %v15454_v15 = vld [vmem:[#allocation366_spill] sm:$0xff] }
 0x5a5   :  { %v7111_v21 = vmul.f32 %v12602_v59, %v12602_v59 }
 0x5a6   :  { %7467 = vmatpush.msrb.mxu2 %v15428_v31  ;;  %7560 = vmatpush.msrb.mxu3 %v15429_v9  ;;  %v15458_v9 = vld [vmem:[#allocation378_spill] sm:$0xff] }
 0x5a7   :  { %v12610_v45 = vand.u32 4294901760, %v7111_v21 }
 0x5a8   :  { %7469 = vmatpush.msrb.mxu2 %v15430_v17  ;;  %7566 = vmatpush.msrb.mxu3 %v15431_v42  ;;  %v15460_v42 = vld [vmem:[#allocation381_spill] sm:$0xff] }
 0x5a9   :  { %v12615_v56 = vsub.f32 %v7111_v21, %v12610_v45  ;;  %7251 = vmatmul.f32.vlgmr.msra.gmra.mxu1 %v12610_v45  ;;  %v15456_v21 = vld [vmem:[#allocation374_spill] sm:$0xff] }
 0x5aa   :  { %7471 = vmatpush.msrb.mxu2 %v15432_v44  ;;  %7651 = vmatpush.msra.mxu1 %v15416_v19 }
 0x5ab   :  { %7572 = vmatpush.msrb.mxu3 %v15433_v26  ;;  %7305 = vmatmul.f32.vlgmr.msra.gmra.mxu2 %v12615_v56  ;;  %v12623_v7 = vand.u32 4294901760, %v12615_v56  ;;  %v15462_v26 = vld [vmem:[#allocation358_spill] sm:$0xff] }
 0x5ac   :  { %7653 = vmatpush.msra.mxu1 %v15418_v2  ;;  %7473 = vmatpush.msrb.mxu2 %v15434_v25 }
 0x5ad   :  { %7344 = vmatmul.f32.vlgmr.msra.gmra.mxu3 %v12623_v7  ;;  %v7148_v0 = vsub.f32 %v12615_v56, %v12623_v7 }
 0x5ae   :  { %7655 = vmatpush.msra.mxu1 %v15420_v51  ;;  %7578 = vmatpush.msrb.mxu3 %v15435_v1  ;;  %v15465_v1 = vld [vmem:[#allocation363_spill] sm:$0xff] }
 0x5af   :  { %v12632_v61 = vand.u32 4294901760, %v7148_v0  ;;  %7475 = vmatpush.msrb.mxu2 %v15436_v22  ;;  %v15463_v0 = vld [vmem:[#allocation385_spill] sm:$0xff] }
 0x5b0   :  { %7657 = vmatpush.msra.mxu1 %v15422_v13  ;;  %7584 = vmatpush.msrb.mxu3 %v15437_v14  ;;  %v15466_v14 = vld [vmem:[#allocation390_spill] sm:$0xff] }
 0x5b1   :  { %7150 = vmatmul.f32.vlgmr.msra.gmra.mxu0 %v12632_v61  ;;  %7450 = vmatmul.f32.vlgmr.msrb.gmra.mxu1 %v12610_v45 }
 0x5b2   :  { %7598 = vmatpush.msra.mxu0 %v15438_v34  ;;  %7659 = vmatpush.msra.mxu1 %v15424_v57  ;;  %v15468_v34 = vld [vmem:[#allocation367_spill] sm:$0xff] }
 0x5b3   :  { %7477 = vmatpush.msrb.mxu2 %v15439_v10  ;;  %7590 = vmatpush.msrb.mxu3 %v15440_v29  ;;  %v15469_v29 = vld [vmem:[#allocation392_spill] sm:$0xff] }
 0x5b4   :  { %7601 = vmatpush.msra.mxu0 %v15441_v23  ;;  %7661 = vmatpush.msra.mxu1 %v15426_v37  ;;  %v15470_v23 = vld [vmem:[#allocation424_spill] sm:$0xff] }
 0x5b5   :  { %7759 = vmatpush.msra.mxu3 %v15416_v19  ;;  %7479 = vmatpush.msrb.mxu2 %v15442_v39  ;;  %v15447_v19 = vld [vmem:[#allocation389_spill] sm:$0xff] }
 0x5b6   :  { %7604 = vmatpush.msra.mxu0 %v15443_v12  ;;  %7663 = vmatpush.msra.mxu1 %v15428_v31  ;;  %v15471_v12 = vld [vmem:[#allocation369_spill] sm:$0xff] }
 0x5b7   :  { %7761 = vmatpush.msra.mxu3 %v15418_v2  ;;  %7481 = vmatpush.msrb.mxu2 %v15444_v27  ;;  %v15449_v2 = vld [vmem:[#allocation393_spill] sm:$0xff] }
 0x5b8   :  { %7607 = vmatpush.msra.mxu0 %v15445_v48  ;;  %7665 = vmatpush.msra.mxu1 %v15430_v17  ;;  %v15473_v48 = vld [vmem:[#allocation427_spill] sm:$0xff] }
 0x5b9   :  { %7413 = vmatmul.f32.vlgmr.msrb.gmra.mxu0 %v12610_v45  ;;  %7763 = vmatpush.msra.mxu3 %v15420_v51  ;;  %v15451_v51 = vld [vmem:[#allocation346_spill] sm:$0xff] }
 0x5ba   :  { %7610 = vmatpush.msra.mxu0 %v15446_v46  ;;  %7667 = vmatpush.msra.mxu1 %v15432_v44  ;;  %v15475_v46 = vld [vmem:[#allocation431_spill] sm:$0xff] }
 0x5bb   :  { %7483 = vmatpush.msrb.mxu2 %v15447_v19  ;;  %7765 = vmatpush.msra.mxu3 %v15422_v13  ;;  %v15453_v13 = vld [vmem:[#allocation347_spill] sm:$0xff] }
 0x5bc   :  { %7613 = vmatpush.msra.mxu0 %v15448_v18  ;;  %7669 = vmatpush.msra.mxu1 %v15434_v25  ;;  %v15477_v18 = vld [vmem:[#allocation435_spill] sm:$0xff] }
 0x5bd   :  { %7485 = vmatpush.msrb.mxu2 %v15449_v2  ;;  %7767 = vmatpush.msra.mxu3 %v15424_v57  ;;  %v15455_v57 = vld [vmem:[#allocation348_spill] sm:$0xff] }
 0x5be   :  { %7616 = vmatpush.msra.mxu0 %v15450_v54  ;;  %7671 = vmatpush.msra.mxu1 %v15436_v22  ;;  %v15479_v54 = vld [vmem:[#allocation439_spill] sm:$0xff] }
 0x5bf   :  { %7692 = vmatpush.msra.mxu2 %v15451_v51  ;;  %7769 = vmatpush.msra.mxu3 %v15426_v37  ;;  %v15457_v37 = vld [vmem:[#allocation350_spill] sm:$0xff]  ;;  %v6467_v51 = vpop.f32.mrf.mxu0 }
 0x5c0   :  { %7619 = vmatpush.msra.mxu0 %v15452_v49  ;;  %7673 = vmatpush.msra.mxu1 %v15439_v10  ;;  %v15481_v49 = vld [vmem:[#allocation443_spill] sm:$0xff] }
 0x5c1   :  { %7696 = vmatpush.msra.mxu2 %v15453_v13  ;;  %7771 = vmatpush.msra.mxu3 %v15428_v31  ;;  %v15459_v31 = vld [vmem:[#allocation353_spill] sm:$0xff]  ;;  %v15482_v13 = vld [vmem:[#allocation394_spill] sm:$0xff] }
 0x5c2   :  { %7622 = vmatpush.msra.mxu0 %v15454_v15  ;;  %7675 = vmatpush.msra.mxu1 %v15442_v39 }
 0x5c3   :  { %7700 = vmatpush.msra.mxu2 %v15455_v57  ;;  %7773 = vmatpush.msra.mxu3 %v15430_v17  ;;  %v15461_v17 = vld [vmem:[#allocation414_spill] sm:$0xff] }
 0x5c4   :  { %7625 = vmatpush.msra.mxu0 %v15456_v21  ;;  %7677 = vmatpush.msra.mxu1 %v15444_v27  ;;  %v15484_v57 = vld [vmem:[#allocation446_spill] sm:$0xff]  ;;  %v6568_v21 = vpop.f32.mrf.mxu1 }
 0x5c5   :  { %7704 = vmatpush.msra.mxu2 %v15457_v37  ;;  %7775 = vmatpush.msra.mxu3 %v15432_v44  ;;  %v15464_v44 = vld [vmem:[#allocation417_spill] sm:$0xff]  ;;  %v15485_v37 = vld [vmem:[#allocation396_spill] sm:$0xff] }
 0x5c6   :  { %7628 = vmatpush.msra.mxu0 %v15458_v9  ;;  %7679 = vmatpush.msra.mxu1 %v15447_v19  ;;  %v15486_v9 = vld [vmem:[#allocation449_spill] sm:$0xff] }
 0x5c7   :  { %7708 = vmatpush.msra.mxu2 %v15459_v31  ;;  %7777 = vmatpush.msra.mxu3 %v15434_v25  ;;  %v15467_v25 = vld [vmem:[#allocation420_spill] sm:$0xff]  ;;  %v6622_v31 = vpop.f32.mrf.mxu2 }
 0x5c8   :  { %7631 = vmatpush.msra.mxu0 %v15460_v42  ;;  %7681 = vmatpush.msra.mxu1 %v15449_v2  ;;  %v15487_v42 = vld [vmem:[#allocation398_spill] sm:$0xff] }
 0x5c9   :  { %7712 = vmatpush.msra.mxu2 %v15462_v26  ;;  %7779 = vmatpush.msra.mxu3 %v15436_v22  ;;  %v15472_v22 = vld [vmem:[#allocation397_spill] sm:$0xff]  ;;  %v15488_v26 = vld [vmem:[#allocation451_spill] sm:$0xff] }
 0x5ca   :  { %7841 = vmatpush.msrb.mxu1 %v15461_v17  ;;  %7634 = vmatpush.msra.mxu0 %v15463_v0 }
 0x5cb   :  { %7716 = vmatpush.msra.mxu2 %v15465_v1  ;;  %7781 = vmatpush.msra.mxu3 %v15439_v10  ;;  %v15474_v10 = vld [vmem:[#allocation377_spill] sm:$0xff]  ;;  %v15490_v1 = vld [vmem:[#allocation454_spill] sm:$0xff] }
 0x5cc   :  { %7847 = vmatpush.msrb.mxu1 %v15464_v44  ;;  %7637 = vmatpush.msra.mxu0 %v15466_v14  ;;  %v15489_v44 = vld [vmem:[#allocation453_spill] sm:$0xff]  ;;  %v6661_v14 = vpop.f32.mrf.mxu3 }
 0x5cd   :  { %7720 = vmatpush.msra.mxu2 %v15468_v34  ;;  %7783 = vmatpush.msra.mxu3 %v15442_v39  ;;  %v15476_v39 = vld [vmem:[#allocation380_spill] sm:$0xff]  ;;  %v15491_v34 = vld [vmem:[#allocation455_spill] sm:$0xff] }
 0x5ce   :  { %7853 = vmatpush.msrb.mxu1 %v15467_v25  ;;  %7640 = vmatpush.msra.mxu0 %v15469_v29  ;;  %v15492_v29 = vld [vmem:[#allocation456_spill] sm:$0xff] }
 0x5cf   :  { %7724 = vmatpush.msra.mxu2 %v15471_v12  ;;  %7785 = vmatpush.msra.mxu3 %v15444_v27  ;;  %v15478_v27 = vld [vmem:[#allocation384_spill] sm:$0xff] }
 0x5d0   :  { %7859 = vmatpush.msrb.mxu1 %v15470_v23  ;;  %7643 = vmatpush.msra.mxu0 %v15472_v22  ;;  %v6730_v23 = vpop.f32.mrf.mxu0  ;;  %v6767_v22 = vpop.f32.mrf.mxu1 }
 0x5d1   :  { %7728 = vmatpush.msra.mxu2 %v15474_v10  ;;  %7787 = vmatpush.msra.mxu3 %v15447_v19  ;;  %v15480_v19 = vld [vmem:[#allocation388_spill] sm:$0xff] }
 0x5d2   :  { %7796 = vmatpush.msrb.mxu0 %v10479_v24  ;;  %7865 = vmatpush.msrb.mxu1 %v15473_v48 }
 0x5d3   :  { %7732 = vmatpush.msra.mxu2 %v15476_v39  ;;  %7789 = vmatpush.msra.mxu3 %v15449_v2  ;;  %v15483_v2 = vld [vmem:[#allocation412_spill] sm:$0xff] }
 0x5d4   :  { %7798 = vmatpush.msrb.mxu0 %v10485_v63  ;;  %7871 = vmatpush.msrb.mxu1 %v15475_v46  ;;  %v6468_v15 = vadd.f32 %v6467_v51, %v15483_v2  ;;  %v6909_v39 = vpop.f32.mrf.mxu3 }
 0x5d5   :  { %7736 = vmatpush.msra.mxu2 %v15478_v27 }
 0x5d6   :  { %7800 = vmatpush.msrb.mxu0 %v10494_v28  ;;  %7877 = vmatpush.msrb.mxu1 %v15477_v18  ;;  %v6569_v17 = vadd.f32 %v6568_v21, %v6468_v15 }
 0x5d7   :  { %7740 = vmatpush.msra.mxu2 %v15480_v19 }
 0x5d8   :  { %7802 = vmatpush.msrb.mxu0 %v10503_v40  ;;  %7883 = vmatpush.msrb.mxu1 %v15479_v54  ;;  %v6623_v0 = vadd.f32 %v6622_v31, %v6569_v17  ;;  %v6963_v27 = vpop.f32.mrf.mxu0  ;;  %v7002_v51 = vpop.f32.mrf.mxu1  ;;  %v15505_v17 = vld [vmem:[#allocation416_spill] sm:$0xff] }
 0x5d9   :  { %7744 = vmatpush.msra.mxu2 %v15482_v13 }
 0x5da   :  { %7804 = vmatpush.msrb.mxu0 %v10515_v16  ;;  %7889 = vmatpush.msrb.mxu1 %v15481_v49  ;;  %v6662_v25 = vadd.f32 %v6661_v14, %v6623_v0  ;;  %v15509_v0 = vld [vmem:[#allocation425_spill] sm:$0xff] }
 0x5db   :  { %7748 = vmatpush.msra.mxu2 %v15485_v37  ;;  %v15515_v14 = vld [vmem:[#allocation437_spill] sm:$0xff] }
 0x5dc   :  { %7806 = vmatpush.msrb.mxu0 %v10527_v5  ;;  %7895 = vmatpush.msrb.mxu1 %v15484_v57  ;;  %v6731_v12 = vadd.f32 %v6730_v23, %v6662_v25  ;;  %v6808_v48 = vpop.f32.mrf.mxu2  ;;  %v15517_v25 = vld [vmem:[#allocation452_spill] sm:$0xff]  ;;  %v15523_v23 = vld [vmem:[#allocation445_spill] sm:$0xff] }
 0x5dd   :  { %7752 = vmatpush.msra.mxu2 %v15487_v42 }
 0x5de   :  { %7808 = vmatpush.msrb.mxu0 %v10530_v60  ;;  %7901 = vmatpush.msrb.mxu1 %v15486_v9  ;;  %v6768_v10 = vadd.f32 %v6767_v22, %v6731_v12  ;;  %v15525_v12 = vld [vmem:[#allocation464_spill] sm:$0xff] }
 0x5df   :  { %v15527_v22 = vld [vmem:[#allocation448_spill] sm:$0xff] }
 0x5e0   :  { %7810 = vmatpush.msrb.mxu0 %v10544_v33  ;;  %7907 = vmatpush.msrb.mxu1 %v15488_v26  ;;  %v6809_v46 = vadd.f32 %v6808_v48, %v6768_v10  ;;  %v15507_v26 = vld [vmem:[#allocation421_spill] sm:$0xff]  ;;  %v15528_v48 = vld [vmem:[#allocation491_spill] sm:$0xff] }
 0x5e1   :  { %v15531_v10 = vld [vmem:[#allocation495_spill] sm:$0xff] }
 0x5e2   :  { %7812 = vmatpush.msrb.mxu0 %v10573_v47  ;;  %7913 = vmatpush.msrb.mxu1 %v15489_v44  ;;  %v6910_v18 = vadd.f32 %v6909_v39, %v6809_v46  ;;  %v15511_v44 = vld [vmem:[#allocation429_spill] sm:$0xff]  ;;  %v15532_v46 = vld [vmem:[#allocation470_spill] sm:$0xff] }
 0x5e3   :  { %v15533_v39 = vld [vmem:[#allocation462_spill] sm:$0xff] }
 0x5e4   :  { %7814 = vmatpush.msrb.mxu0 %v10589_v30  ;;  %7919 = vmatpush.msrb.mxu1 %v15490_v1  ;;  %v6964_v54 = vadd.f32 %v6963_v27, %v6910_v18  ;;  %v15513_v1 = vld [vmem:[#allocation433_spill] sm:$0xff]  ;;  %v15534_v18 = vld [vmem:[#allocation499_spill] sm:$0xff]  ;;  %v15535_v27 = vld [vmem:[#allocation474_spill] sm:$0xff] }
 0x5e6   :  { %7816 = vmatpush.msrb.mxu0 %v15008_v8  ;;  %7925 = vmatpush.msrb.mxu1 %v15491_v34  ;;  %v7003_v19 = vadd.f32 %v7002_v51, %v6964_v54  ;;  %v15519_v34 = vld [vmem:[#allocation441_spill] sm:$0xff]  ;;  %v15537_v54 = vld [vmem:[#allocation502_spill] sm:$0xff] }
 0x5e7   :  { %v15538_v51 = vld [vmem:[#allocation477_spill] sm:$0xff] }
 0x5e8   :  { %7818 = vmatpush.msrb.mxu0 %v15010_v35  ;;  %7931 = vmatpush.msrb.mxu1 %v15492_v29  ;;  %v15522_v29 = vld [vmem:[#allocation457_spill] sm:$0xff] }
 0x5ea   :  { %7820 = vmatpush.msrb.mxu0 %v15012_v41 }
 0x5ec   :  { %7822 = vmatpush.msrb.mxu0 %v15013_v11 }
 0x5ee   :  { %7824 = vmatpush.msrb.mxu0 %v15014_v20 }
 0x5f0   :  { %7826 = vmatpush.msrb.mxu0 %v15015_v55 }
 0x5f3   :  { %v7108_v2 = vpop.f32.mrf.mxu3 }
 0x5fc   :  { %v7071_v49 = vpop.f32.mrf.mxu2 }
 0x5fd   :  { %v7072_v13 = vadd.f32 %v7071_v49, %v7003_v19  ;;  %v15539_v19 = vld [vmem:[#allocation468_spill] sm:$0xff]  ;;  %v15540_v49 = vld [vmem:[#allocation506_spill] sm:$0xff] }
 0x5ff   :  { %v12739_v15 = vadd.f32 %v7108_v2, %v7072_v13  ;;  %v15541_v13 = vld [vmem:[#allocation480_spill] sm:$0xff]  ;;  %v15542_v2 = vld [vmem:[#allocation471_spill] sm:$0xff] }
 0x601   :  { %v7112_v57 = vmul.f32 %v12739_v15, %v12739_v15 }
 0x603   :  { %v12743_v21 = vand.u32 4294901760, %v7112_v57 }
 0x605   :  { %v12746_v37 = vsub.f32 %v7112_v57, %v12743_v21  ;;  %7592 = vmatmul.f32.vlgmr.msrb.gmra.mxu3 %v12743_v21  ;;  %v15543_v57 = vld [vmem:[#allocation509_spill] sm:$0xff] }
 0x606   :  { %7992 = vmatpush.msrb.mxu3 %v10479_v24 }
 0x607   :  { %7646 = vmatmul.f32.vlgmr.msra.gmra.mxu0 %v12746_v37  ;;  %v12752_v9 = vand.u32 4294901760, %v12746_v37 }
 0x608   :  { %7994 = vmatpush.msrb.mxu3 %v10485_v63  ;;  %8033 = vmatpush.msra.mxu0 %v15016_v3  ;;  %v15494_v3 = vld [vmem:[#allocation415_spill] sm:$0xff] }
 0x609   :  { %7685 = vmatmul.f32.vlgmr.msra.gmra.mxu1 %v12752_v9  ;;  %v7489_v31 = vsub.f32 %v12746_v37, %v12752_v9 }
 0x60a   :  { %7996 = vmatpush.msrb.mxu3 %v10494_v28  ;;  %8037 = vmatpush.msra.mxu0 %v15017_v52  ;;  %v15496_v52 = vld [vmem:[#allocation418_spill] sm:$0xff] }
 0x60b   :  { %8100 = vmatpush.msra.mxu1 %v10479_v24  ;;  %v12762_v42 = vand.u32 4294901760, %v7489_v31  ;;  %v15493_v24 = vld [vmem:[#allocation403_spill] sm:$0xff]  ;;  %v15544_v31 = vld [vmem:[#allocation485_spill] sm:$0xff] }
 0x60c   :  { %7998 = vmatpush.msrb.mxu3 %v10503_v40  ;;  %8041 = vmatpush.msra.mxu0 %v15018_v53  ;;  %v15498_v53 = vld [vmem:[#allocation419_spill] sm:$0xff] }
 0x60d   :  { %8102 = vmatpush.msra.mxu1 %v10485_v63  ;;  %7491 = vmatmul.f32.vlgmr.msrb.gmra.mxu2 %v12762_v42  ;;  %v15495_v63 = vld [vmem:[#allocation405_spill] sm:$0xff] }
 0x60e   :  { %7791 = vmatmul.f32.vlgmr.msra.gmra.mxu3 %v12743_v21  ;;  %7939 = vmatpush.msrb.mxu2 %v15019_v62  ;;  %v15500_v62 = vld [vmem:[#allocation423_spill] sm:$0xff] }
 0x60f   :  { %8000 = vmatpush.msrb.mxu3 %v10515_v16  ;;  %8045 = vmatpush.msra.mxu0 %v15020_v38  ;;  %v15501_v38 = vld [vmem:[#allocation411_spill] sm:$0xff] }
 0x610   :  { %8104 = vmatpush.msra.mxu1 %v10494_v28  ;;  %7832 = vmatmul.f32.vlgmr.msrb.gmra.mxu0 %v12632_v61  ;;  %v15497_v28 = vld [vmem:[#allocation407_spill] sm:$0xff]  ;;  %v15503_v61 = vld [vmem:[#allocation413_spill] sm:$0xff] }
 0x611   :  { %7942 = vmatpush.msrb.mxu2 %v15493_v24  ;;  %8002 = vmatpush.msrb.mxu3 %v10527_v5  ;;  %v15545_v24 = vld [vmem:[#allocation473_spill] sm:$0xff] }
 0x612   :  { %8049 = vmatpush.msra.mxu0 %v15494_v3  ;;  %8106 = vmatpush.msra.mxu1 %v10503_v40  ;;  %v15499_v40 = vld [vmem:[#allocation409_spill] sm:$0xff]  ;;  %v15546_v3 = vld [vmem:[#allocation512_spill] sm:$0xff] }
 0x613   :  { %7933 = vmatmul.f32.vlgmr.msrb.gmra.mxu1 %v12610_v45  ;;  %7945 = vmatpush.msrb.mxu2 %v15495_v63  ;;  %v15547_v63 = vld [vmem:[#allocation489_spill] sm:$0xff] }
 0x614   :  { %8004 = vmatpush.msrb.mxu3 %v10530_v60  ;;  %8053 = vmatpush.msra.mxu0 %v15496_v52  ;;  %v15548_v52 = vld [vmem:[#allocation478_spill] sm:$0xff] }
 0x615   :  { %8108 = vmatpush.msra.mxu1 %v10515_v16  ;;  %7948 = vmatpush.msrb.mxu2 %v15497_v28  ;;  %v15502_v16 = vld [vmem:[#allocation428_spill] sm:$0xff]  ;;  %v15549_v28 = vld [vmem:[#allocation514_spill] sm:$0xff] }
 0x616   :  { %8006 = vmatpush.msrb.mxu3 %v10544_v33  ;;  %8057 = vmatpush.msra.mxu0 %v15498_v53  ;;  %v15550_v53 = vld [vmem:[#allocation493_spill] sm:$0xff] }
 0x617   :  { %8110 = vmatpush.msra.mxu1 %v10527_v5  ;;  %7754 = vmatmul.f32.vlgmr.msra.gmra.mxu2 %v12743_v21  ;;  %v15504_v5 = vld [vmem:[#allocation432_spill] sm:$0xff] }
 0x618   :  { %7951 = vmatpush.msrb.mxu2 %v15499_v40  ;;  %8008 = vmatpush.msrb.mxu3 %v10573_v47  ;;  %v15551_v40 = vld [vmem:[#allocation482_spill] sm:$0xff] }
 0x619   :  { %8061 = vmatpush.msra.mxu0 %v15500_v62  ;;  %8112 = vmatpush.msra.mxu1 %v10530_v60  ;;  %v15506_v60 = vld [vmem:[#allocation436_spill] sm:$0xff] }
 0x61a   :  { %7954 = vmatpush.msrb.mxu2 %v15501_v38  ;;  %8010 = vmatpush.msrb.mxu3 %v10589_v30  ;;  %v15552_v62 = vld [vmem:[#allocation516_spill] sm:$0xff]  ;;  %v15553_v38 = vld [vmem:[#allocation497_spill] sm:$0xff] }
 0x61b   :  { %8065 = vmatpush.msra.mxu0 %v15502_v16  ;;  %8114 = vmatpush.msra.mxu1 %v10544_v33  ;;  %v15508_v33 = vld [vmem:[#allocation440_spill] sm:$0xff]  ;;  %v15554_v16 = vld [vmem:[#allocation486_spill] sm:$0xff] }
 0x61c   :  { %7957 = vmatpush.msrb.mxu2 %v15503_v61  ;;  %8012 = vmatpush.msrb.mxu3 %v15008_v8  ;;  %v15555_v61 = vld [vmem:[#allocation517_spill] sm:$0xff] }
 0x61d   :  { %8069 = vmatpush.msra.mxu0 %v15504_v5  ;;  %8116 = vmatpush.msra.mxu1 %v10573_v47  ;;  %v15510_v47 = vld [vmem:[#allocation444_spill] sm:$0xff] }
 0x61e   :  { %7960 = vmatpush.msrb.mxu2 %v15505_v17  ;;  %8014 = vmatpush.msrb.mxu3 %v15010_v35  ;;  %v15556_v5 = vld [vmem:[#allocation500_spill] sm:$0xff]  ;;  %v15557_v17 = vld [vmem:[#allocation490_spill] sm:$0xff] }
 0x61f   :  { %8073 = vmatpush.msra.mxu0 %v15506_v60  ;;  %8118 = vmatpush.msra.mxu1 %v10589_v30  ;;  %v15512_v30 = vld [vmem:[#allocation447_spill] sm:$0xff]  ;;  %v15558_v60 = vld [vmem:[#allocation518_spill] sm:$0xff] }
 0x620   :  { %7963 = vmatpush.msrb.mxu2 %v15507_v26  ;;  %8016 = vmatpush.msrb.mxu3 %v15012_v41  ;;  %v15559_v26 = vld [vmem:[#allocation504_spill] sm:$0xff] }
 0x621   :  { %8077 = vmatpush.msra.mxu0 %v15508_v33  ;;  %8120 = vmatpush.msra.mxu1 %v15008_v8  ;;  %v15514_v8 = vld [vmem:[#allocation450_spill] sm:$0xff] }
 0x622   :  { %7966 = vmatpush.msrb.mxu2 %v15509_v0  ;;  %8018 = vmatpush.msrb.mxu3 %v15013_v11  ;;  %v15560_v33 = vld [vmem:[#allocation494_spill] sm:$0xff]  ;;  %v15561_v0 = vld [vmem:[#allocation519_spill] sm:$0xff] }
 0x623   :  { %8081 = vmatpush.msra.mxu0 %v15510_v47  ;;  %8122 = vmatpush.msra.mxu1 %v15010_v35  ;;  %v15516_v35 = vld [vmem:[#allocation475_spill] sm:$0xff]  ;;  %v15562_v47 = vld [vmem:[#allocation508_spill] sm:$0xff] }
 0x624   :  { %7969 = vmatpush.msrb.mxu2 %v15511_v44  ;;  %8020 = vmatpush.msrb.mxu3 %v15014_v20  ;;  %v15563_v44 = vld [vmem:[#allocation498_spill] sm:$0xff] }
 0x625   :  { %8085 = vmatpush.msra.mxu0 %v15512_v30  ;;  %8124 = vmatpush.msra.mxu1 %v15012_v41  ;;  %v15518_v41 = vld [vmem:[#allocation459_spill] sm:$0xff] }
 0x626   :  { %7972 = vmatpush.msrb.mxu2 %v15513_v1  ;;  %8022 = vmatpush.msrb.mxu3 %v15015_v55  ;;  %v15564_v30 = vld [vmem:[#allocation511_spill] sm:$0xff]  ;;  %v15565_v1 = vld [vmem:[#allocation501_spill] sm:$0xff] }
 0x627   :  { %8089 = vmatpush.msra.mxu0 %v15514_v8  ;;  %8126 = vmatpush.msra.mxu1 %v15013_v11  ;;  %v15520_v11 = vld [vmem:[#allocation483_spill] sm:$0xff]  ;;  %v15566_v8 = vld [vmem:[#allocation505_spill] sm:$0xff] }
 0x628   :  { %8026 = vmatmul.f32.vlgmr.msrb.gmra.mxu3 %v12623_v7  ;;  %7975 = vmatpush.msrb.mxu2 %v15515_v14  ;;  %v15521_v7 = vld [vmem:[#allocation461_spill] sm:$0xff]  ;;  %v15568_v14 = vld [vmem:[#allocation466_spill] sm:$0xff] }
 0x629   :  { %8182 = vmatpush.msra.mxu3 %v15516_v35  ;;  %8093 = vmatpush.msra.mxu0 %v15517_v25  ;;  %v15570_v35 = vld [vmem:[#allocation472_spill] sm:$0xff] }
 0x62a   :  { %8128 = vmatpush.msra.mxu1 %v15014_v20  ;;  %8095 = vmatmul.f32.vlgmr.msra.gmra.mxu0 %v12610_v45  ;;  %v15524_v20 = vld [vmem:[#allocation487_spill] sm:$0xff]  ;;  %v15571_v25 = vld [vmem:[#allocation476_spill] sm:$0xff] }
 0x62b   :  { %8188 = vmatpush.msra.mxu3 %v15046_v6  ;;  %8280 = vmatpush.msrb.mxu0 %v15518_v41  ;;  %v15526_v6 = vld [vmem:[#allocation458_spill] sm:$0xff]  ;;  %v15573_v41 = vld [vmem:[#allocation484_spill] sm:$0xff] }
 0x62c   :  { %7978 = vmatpush.msrb.mxu2 %v15519_v34  ;;  %8130 = vmatpush.msra.mxu1 %v15015_v55  ;;  %v15529_v55 = vld [vmem:[#allocation467_spill] sm:$0xff]  ;;  %v15574_v34 = vld [vmem:[#allocation488_spill] sm:$0xff] }
 0x62d   :  { %8132 = vmatmul.f32.vlgmr.msra.gmra.mxu1 %v12610_v45  ;;  %8194 = vmatpush.msra.mxu3 %v15520_v11  ;;  %v15530_v45 = vld [vmem:[#allocation460_spill] sm:$0xff] }
 0x62e   :  { %8283 = vmatpush.msrb.mxu0 %v15521_v7  ;;  %8333 = vmatpush.msrb.mxu1 %v15522_v29  ;;  %v15575_v11 = vld [vmem:[#allocation492_spill] sm:$0xff] }
 0x62f   :  { %7981 = vmatpush.msrb.mxu2 %v15523_v23  ;;  %8200 = vmatpush.msra.mxu3 %v15524_v20  ;;  %v15576_v7 = vld [vmem:[#allocation496_spill] sm:$0xff]  ;;  %v15578_v23 = vld [vmem:[#allocation503_spill] sm:$0xff] }
 0x630   :  { %8286 = vmatpush.msrb.mxu0 %v15525_v12  ;;  %8335 = vmatpush.msrb.mxu1 %v15526_v6  ;;  %v15579_v20 = vld [vmem:[#allocation507_spill] sm:$0xff]  ;;  %v15580_v12 = vld [vmem:[#allocation510_spill] sm:$0xff] }
 0x631   :  { %7984 = vmatpush.msrb.mxu2 %v15527_v22  ;;  %8206 = vmatpush.msra.mxu3 %v15528_v48  ;;  %v15582_v22 = vld [vmem:[#allocation515_spill] sm:$0xff]  ;;  %v7151_v48 = vpop.f32.mrf.mxu0 }
 0x632   :  { %7987 = vmatmul.f32.vlgmr.msrb.gmra.mxu2 %v12615_v56  ;;  %8289 = vmatpush.msrb.mxu0 %v15529_v55  ;;  %v15536_v56 = vld [vmem:[#allocation465_spill] sm:$0xff]  ;;  %v7152_v55 = vadd.f32 1e-05, %v7151_v48 }
 0x633   :  { %8137 = vmatpush.msra.mxu2 %v15522_v29  ;;  %8337 = vmatpush.msrb.mxu1 %v15530_v45 }
 0x634   :  { %8212 = vmatpush.msra.mxu3 %v15531_v10  ;;  %8292 = vmatpush.msrb.mxu0 %v15532_v46  ;;  %v7306_v46 = vpop.f32.mrf.mxu2 }
 0x635   :  { %8139 = vmatpush.msra.mxu2 %v15526_v6  ;;  %8339 = vmatpush.msrb.mxu1 %v15533_v39 }
 0x636   :  { %8218 = vmatpush.msra.mxu3 %v15534_v18  ;;  %8295 = vmatpush.msrb.mxu0 %v15535_v27  ;;  %v7345_v18 = vpop.f32.mrf.mxu3 }
 0x637   :  { %8141 = vmatpush.msra.mxu2 %v15530_v45  ;;  %8341 = vmatpush.msrb.mxu1 %v15536_v56 }
 0x638   :  { %8224 = vmatpush.msra.mxu3 %v15537_v54  ;;  %8298 = vmatpush.msrb.mxu0 %v15538_v51 }
 0x639   :  { %8143 = vmatpush.msra.mxu2 %v15533_v39  ;;  %8343 = vmatpush.msrb.mxu1 %v15539_v19 }
 0x63a   :  { %8230 = vmatpush.msra.mxu3 %v15540_v49  ;;  %8301 = vmatpush.msrb.mxu0 %v15541_v13 }
 0x63b   :  { %8145 = vmatpush.msra.mxu2 %v15536_v56  ;;  %8345 = vmatpush.msrb.mxu1 %v15542_v2 }
 0x63c   :  { %8236 = vmatpush.msra.mxu3 %v15543_v57  ;;  %8304 = vmatpush.msrb.mxu0 %v15544_v31 }
 0x63d   :  { %8147 = vmatpush.msra.mxu2 %v15539_v19  ;;  %8347 = vmatpush.msrb.mxu1 %v15545_v24 }
 0x63e   :  { %8242 = vmatpush.msra.mxu3 %v15546_v3  ;;  %8307 = vmatpush.msrb.mxu0 %v15547_v63 }
 0x63f   :  { %8149 = vmatpush.msra.mxu2 %v15542_v2  ;;  %8349 = vmatpush.msrb.mxu1 %v15548_v52 }
 0x640   :  { %8248 = vmatpush.msra.mxu3 %v15549_v28  ;;  %8310 = vmatpush.msrb.mxu0 %v15550_v53 }
 0x641   :  { %8151 = vmatpush.msra.mxu2 %v15545_v24  ;;  %8351 = vmatpush.msrb.mxu1 %v15551_v40 }
 0x642   :  { %8254 = vmatpush.msra.mxu3 %v15552_v62  ;;  %8313 = vmatpush.msrb.mxu0 %v15553_v38 }
 0x643   :  { %8153 = vmatpush.msra.mxu2 %v15548_v52  ;;  %8353 = vmatpush.msrb.mxu1 %v15554_v16 }
 0x644   :  { %8260 = vmatpush.msra.mxu3 %v15555_v61  ;;  %8316 = vmatpush.msrb.mxu0 %v15556_v5 }
 0x645   :  { %8155 = vmatpush.msra.mxu2 %v15551_v40  ;;  %8355 = vmatpush.msrb.mxu1 %v15557_v17 }
 0x646   :  { %8266 = vmatpush.msra.mxu3 %v15558_v60  ;;  %8319 = vmatpush.msrb.mxu0 %v15559_v26 }
 0x647   :  { %8157 = vmatpush.msra.mxu2 %v15554_v16  ;;  %8357 = vmatpush.msrb.mxu1 %v15560_v33 }
 0x648   :  { %8272 = vmatpush.msra.mxu3 %v15561_v0  ;;  %8322 = vmatpush.msrb.mxu0 %v15562_v47 }
 0x649   :  { %8159 = vmatpush.msra.mxu2 %v15557_v17  ;;  %8359 = vmatpush.msrb.mxu1 %v15563_v44 }
 0x64a   :  { %8274 = vmatmul.f32.vlgmr.msra.gmra.mxu3 %v12743_v21  ;;  %8325 = vmatpush.msrb.mxu0 %v15564_v30 }
 0x64b   :  { %8441 = vmatpush.msrb.mxu3 %v15522_v29  ;;  %8161 = vmatpush.msra.mxu2 %v15560_v33  ;;  %v15577_v29 = vld [vmem:[#allocation349_spill] sm:$0xff] }
 0x64c   :  { %8361 = vmatpush.msrb.mxu1 %v15565_v1  ;;  %8328 = vmatmul.f32.vlgmr.msrb.gmra.mxu0 %v12746_v37  ;;  %v15567_v37 = vld [vmem:[#allocation463_spill] sm:$0xff] }
 0x64d   :  { %8443 = vmatpush.msrb.mxu3 %v15526_v6  ;;  %8163 = vmatpush.msra.mxu2 %v15563_v44  ;;  %v15581_v6 = vld [vmem:[#allocation513_spill] sm:$0xff] }
 0x64e   :  { %8363 = vmatpush.msrb.mxu1 %v15566_v8 }
 0x64f   :  { %8367 = vmatmul.f32.vlgmr.msrb.gmra.mxu1 %v12752_v9  ;;  %8445 = vmatpush.msrb.mxu3 %v15530_v45  ;;  %v15569_v9 = vld [vmem:[#allocation469_spill] sm:$0xff]  ;;  %v7252_v45 = vpop.f32.mrf.mxu1 }
 0x650   :  { %8165 = vmatpush.msra.mxu2 %v15565_v1  ;;  %v7253_v10 = vadd.f32 %v7252_v45, %v7152_v55 }
 0x651   :  { %8447 = vmatpush.msrb.mxu3 %v15533_v39 }
 0x652   :  { %8167 = vmatpush.msra.mxu2 %v15566_v8  ;;  %v7307_v39 = vadd.f32 %v7306_v46, %v7253_v10 }
 0x653   :  { %8173 = vmatmul.f32.vlgmr.msra.gmra.mxu2 %v12762_v42  ;;  %8449 = vmatpush.msrb.mxu3 %v15536_v56  ;;  %v15572_v42 = vld [vmem:[#allocation481_spill] sm:$0xff]  ;;  %v7414_v56 = vpop.f32.mrf.mxu0 }
 0x654   :  { %8374 = vmatpush.msrb.mxu2 %v15567_v37  ;;  %v7346_v27 = vadd.f32 %v7345_v18, %v7307_v39 }
 0x655   :  { %8451 = vmatpush.msrb.mxu3 %v15539_v19 }
 0x656   :  { %8378 = vmatpush.msrb.mxu2 %v15568_v14  ;;  %v7415_v54 = vadd.f32 %v7414_v56, %v7346_v27 }
 0x657   :  { %8453 = vmatpush.msrb.mxu3 %v15542_v2  ;;  %v7451_v51 = vpop.f32.mrf.mxu1 }
 0x658   :  { %8382 = vmatpush.msrb.mxu2 %v15569_v9  ;;  %v7452_v19 = vadd.f32 %v7451_v51, %v7415_v54 }
 0x659   :  { %8455 = vmatpush.msrb.mxu3 %v15545_v24 }
 0x65a   :  { %8386 = vmatpush.msrb.mxu2 %v15570_v35 }
 0x65b   :  { %8457 = vmatpush.msrb.mxu3 %v15548_v52 }
 0x65c   :  { %8390 = vmatpush.msrb.mxu2 %v15571_v25 }
 0x65d   :  { %8459 = vmatpush.msrb.mxu3 %v15551_v40 }
 0x65e   :  { %8394 = vmatpush.msrb.mxu2 %v15572_v42 }
 0x65f   :  { %8461 = vmatpush.msrb.mxu3 %v15554_v16 }
 0x660   :  { %8398 = vmatpush.msrb.mxu2 %v15573_v41 }
 0x661   :  { %8463 = vmatpush.msrb.mxu3 %v15557_v17 }
 0x662   :  { %8402 = vmatpush.msrb.mxu2 %v15574_v34 }
 0x663   :  { %8465 = vmatpush.msrb.mxu3 %v15560_v33 }
 0x664   :  { %8406 = vmatpush.msrb.mxu2 %v15575_v11 }
 0x665   :  { %8467 = vmatpush.msrb.mxu3 %v15563_v44 }
 0x666   :  { %8410 = vmatpush.msrb.mxu2 %v15576_v7 }
 0x667   :  { %8469 = vmatpush.msrb.mxu3 %v15565_v1 }
 0x668   :  { %8414 = vmatpush.msrb.mxu2 %v15577_v29 }
 0x669   :  { %8471 = vmatpush.msrb.mxu3 %v15566_v8 }
 0x66a   :  { %8418 = vmatpush.msrb.mxu2 %v15578_v23  ;;  %8473 = vmatmul.f32.vlgmr.msrb.gmra.mxu3 %v12743_v21 }
 0x66c   :  { %8422 = vmatpush.msrb.mxu2 %v15579_v20 }
 0x66e   :  { %8426 = vmatpush.msrb.mxu2 %v15580_v12 }
 0x670   :  { %8430 = vmatpush.msrb.mxu2 %v15581_v6 }
 0x672   :  { %8434 = vmatpush.msrb.mxu2 %v15582_v22 }
 0x673   :  { %8436 = vmatmul.f32.vlgmr.msrb.gmra.mxu2 %v12743_v21 }
 0x684   :  { %v7647_v31 = vpop.f32.mrf.mxu0 }
 0x686   :  { %v7686_v3 = vpop.f32.mrf.mxu1 }
 0x688   :  { %v7593_v2 = vpop.f32.mrf.mxu3 }
 0x68d   :  { %v7833_v44 = vpop.f32.mrf.mxu0 }
 0x68e   :  { %v7834_v30 = vadd.f32 1e-05, %v7833_v44 }
 0x690   :  { %v7492_v49 = vpop.f32.mrf.mxu2  ;;  %v7934_v1 = vpop.f32.mrf.mxu1 }
 0x691   :  { %v7493_v13 = vadd.f32 %v7492_v49, %v7452_v19  ;;  %v7792_v28 = vpop.f32.mrf.mxu3  ;;  %v7935_v37 = vadd.f32 %v7934_v1, %v7834_v30 }
 0x693   :  { %v7594_v57 = vadd.f32 %v7593_v2, %v7493_v13 }
 0x695   :  { %v7648_v24 = vadd.f32 %v7647_v31, %v7594_v57 }
 0x697   :  { %v7687_v21 = vadd.f32 %v7686_v3, %v7648_v24 }
 0x69a   :  { %v7755_v63 = vpop.f32.mrf.mxu2 }
 0x69b   :  { %v7756_v52 = vadd.f32 %v7755_v63, %v7687_v21 }
 0x69d   :  { %v7793_v53 = vadd.f32 %v7792_v28, %v7756_v52 }
 0x69f   :  { %8543 = vrsqrt.f32 %v7793_v53  ;;  %vm8483_vm13 = vweird.f32 %v7793_v53 }
 0x6a5   :  { %v8544_v40 = vpop.eup %8543 }
 0x6a6   :  { %v8478_v62 = vmul.f32 %v8544_v40, %v7793_v53  ;;  %vm8484_vm12 = vweird.f32 %v8544_v40 }
 0x6a7   :  { %vm8485_vm14 = vmor %vm8483_vm13, %vm8484_vm12  ;;  %v8096_v25 = vpop.f32.mrf.mxu0 }
 0x6a8   :  { %v8479_v38 = vmul.f32 %v8544_v40, %v8478_v62 }
 0x6aa   :  { %v8480_v16 = vmul.f32 0.5, %v8479_v38  ;;  %v8133_v41 = vpop.f32.mrf.mxu1 }
 0x6ab   :  { %v8027_v9 = vpop.f32.mrf.mxu3 }
 0x6ac   :  { %v8481_v61 = vsub.f32 1.5, %v8480_v16 }
 0x6ae   :  { %v8482_v5 = vmul.f32 %v8544_v40, %v8481_v61 }
 0x6b0   :  { %v8486_v17 = vsel %vm8485_vm14, %v8544_v40, %v8482_v5 }
 0x6b1   :  { %v8497_v60 = vmul.f32 %v8486_v17, %v12602_v59 }
 0x6b3   :  { %v8499_v26 = vmul.f32 %v8497_v60, %v15191_v36 }
 0x6b5   :  { %v8501_v33 = vadd.f32 %v8499_v26, %v15192_v4  ;;  %v7988_v8 = vpop.f32.mrf.mxu2 }
 0x6b6   :  { %v7989_v14 = vadd.f32 %v7988_v8, %v7935_v37 }
 0x6b7   :  { %v8503_v0 = vmax.f32 %v8501_v33, 0.0 }
 0x6b8   :  { %v8028_v35 = vadd.f32 %v8027_v9, %v7989_v14 }
 0x6b9   :  { %v8505_v47 = vadd.f32 %v8503_v0, %v12175_v58 }
 0x6ba   :  { %v8097_v42 = vadd.f32 %v8096_v25, %v8028_v35 }
 0x6bb   :  { %8507 = vst [vmem:[#allocation10] sm:$0xff] %v8505_v47 }
 0x6bc   :  { %v8134_v34 = vadd.f32 %v8133_v41, %v8097_v42 }
 0x6c9   :  { %v8329_v7 = vpop.f32.mrf.mxu0 }
 0x6cc   :  { %v8368_v58 = vpop.f32.mrf.mxu1 }
 0x6cd   :  { %v8275_v11 = vpop.f32.mrf.mxu3 }
 0x6d6   :  { %v8174_v59 = vpop.f32.mrf.mxu2 }
 0x6d7   :  { %v8175_v36 = vadd.f32 %v8174_v59, %v8134_v34 }
 0x6d9   :  { %v8276_v4 = vadd.f32 %v8275_v11, %v8175_v36 }
 0x6db   :  { %v8330_v29 = vadd.f32 %v8329_v7, %v8276_v4 }
 0x6dd   :  { %v8369_v23 = vadd.f32 %v8368_v58, %v8330_v29 }
 0x6ed   :  { %v8474_v6 = vpop.f32.mrf.mxu3 }
 0x6f6   :  { %v8437_v20 = vpop.f32.mrf.mxu2 }
 0x6f7   :  { %v8438_v12 = vadd.f32 %v8437_v20, %v8369_v23 }
 0x6f9   :  { %v8475_v22 = vadd.f32 %v8474_v6, %v8438_v12 }
 0x6fb   :  { %8545 = vrsqrt.f32 %v8475_v22  ;;  %vm8493_vm0 = vweird.f32 %v8475_v22 }
 0x701   :  { %v8546_v48 = vpop.eup %8545 }
 0x702   :  { %v8488_v55 = vmul.f32 %v8546_v48, %v8475_v22  ;;  %vm8494_vm15 = vweird.f32 %v8546_v48 }
 0x703   :  { %vm8495_vm1 = vmor %vm8493_vm0, %vm8494_vm15 }
 0x704   :  { %v8489_v45 = vmul.f32 %v8546_v48, %v8488_v55 }
 0x706   :  { %v8490_v10 = vmul.f32 0.5, %v8489_v45 }
 0x708   :  { %v8491_v46 = vsub.f32 1.5, %v8490_v10 }
 0x70a   :  { %v8492_v39 = vmul.f32 %v8546_v48, %v8491_v46 }
 0x70c   :  { %v8496_v18 = vsel %vm8495_vm1, %v8546_v48, %v8492_v39 }
 0x70d   :  { %v8498_v27 = vmul.f32 %v8496_v18, %v12739_v15 }
 0x70f   :  { %v8500_v56 = vmul.f32 %v8498_v27, %v15248_v43 }
 0x711   :  { %v8502_v54 = vadd.f32 %v8500_v56, %v15249_v32 }
 0x713   :  { %v8504_v51 = vmax.f32 %v8502_v54, 0.0 }
 0x715   :  { %v8506_v19 = vadd.f32 %v8504_v51, %v12297_v50 }
 0x717   :  { %8508 = vst [vmem:[#allocation10 + $0x8] sm:$0xff] %v8506_v19 }
 0x718   :  { %8519 = dma.vmem_to_hbm [thread:$0]  %s8515_s3, 256, %s8517_s11, [#allocation4]  }
 0x719   :  { %8675 = dma.done.wait [#allocation4], 256  }
 0x71a   :  { %8676 = vsyncadd [#allocation4], 4294967040 }
 0x71b   :  { %8524 = vsyncpa [#allocation3], 1 }
 0x71c   :  { %8525 = vsyncpa [#allocation6], 1 }
 0x71d   :  { %8526 = vsyncpa [#allocation9], 1 }
 0x71e   :  { %8527 = vsyncpa [#allocation4], 1 }

</bundles_post_ra>
